<compile_context>
chip_gen: v5e
topology: v5e:2x2
jax: 0.10.0
libtpu: 0.0.40
codegen_flags: <defaults>
</compile_context>

<pallas_src>
import collections
import functools

import jax
import jax.numpy as jnp
from jax.experimental import pallas as pl
from jax.experimental.pallas import tpu as pltpu

# ---------------------------------------------------------------------------
# Config namedtuples (mirrors the PyTorch blocks_args / global_params)
# ---------------------------------------------------------------------------
BlockArgs = collections.namedtuple(
    "BlockArgs",
    ["fused", "input_filters", "output_filters", "expand_ratio",
     "kernel_size", "stride", "se_ratio", "num_repeat"])

GlobalParams = collections.namedtuple(
    "GlobalParams", ["width_coefficient", "dropout_rate", "num_classes"])

LANE = 128  # lane width / channel padding unit


def rup(n, m):
    return ((n + m - 1) // m) * m


def cpad(c):
    return rup(c, LANE)


# ---------------------------------------------------------------------------
# Pallas kernels
# ---------------------------------------------------------------------------
def _pw_kernel(act, has_gate, has_res, *refs):
    """Tiled (optionally gated) pointwise conv / matmul.

    o = act((a * gate) @ w + bias) [+ residual]
    grid = (B, M/tm, N/tn, K/tk); f32 accumulator scratch across the K axis.
    a: (1, tm, tk) bf16   gate: (1, 1, tk) f32   w: (tk, tn) bf16
    bias: (1, tn) f32     residual: (1, tm, tn) bf16   o: (1, tm, tn) bf16
    """
    refs = list(refs)
    a_ref = refs.pop(0)
    g_ref = refs.pop(0) if has_gate else None
    w_ref = refs.pop(0)
    b_ref = refs.pop(0)
    r_ref = refs.pop(0) if has_res else None
    o_ref, acc_ref = refs

    kk = pl.program_id(3)

    @pl.when(kk == 0)
    def _():
        acc_ref[...] = jnp.zeros_like(acc_ref)

    a = a_ref[0]
    if has_gate:
        a = (a.astype(jnp.float32) * g_ref[0]).astype(jnp.bfloat16)
    acc_ref[...] += jnp.dot(a, w_ref[...], preferred_element_type=jnp.float32)

    @pl.when(kk == pl.num_programs(3) - 1)
    def _():
        y = acc_ref[...] + b_ref[...]
        if act == "silu":
            y = y * jax.nn.sigmoid(y)
        if has_res:
            y = y + r_ref[0].astype(jnp.float32)
        o_ref[0] = y.astype(o_ref.dtype)


def _conv_kernel(k, s, th, act, x_ref, w_ref, b_ref, o_ref):
    """k x k standard conv; stride handled via phase-split input, per-tap MXU
    accumulation (no im2col in HBM).

    x_ref: (1, s*s*Hs, Ws, Cin) phase-split padded image of one batch element
           (stays resident in VMEM across row tiles).
    w_ref: (k*k, Cin, Cout) bf16 (BN scale folded)
    b_ref: (1, Cout) f32
    o_ref: (1, th, Wo, Cout) bf16
    """
    r = pl.program_id(1)
    wo, cout = o_ref.shape[2], o_ref.shape[3]
    cin = x_ref.shape[3]
    hs = x_ref.shape[1] // (s * s)
    row0 = r * th

    acc = jnp.zeros((th * wo, cout), jnp.float32)
    for dy in range(k):
        for dx in range(k):
            p = (dy % s) * s + (dx % s)
            patch = x_ref[0, pl.ds(p * hs + row0 + dy // s, th),
                          pl.ds(dx // s, wo), :]
            acc = acc + jnp.dot(patch.reshape(th * wo, cin),
                                w_ref[dy * k + dx],
                                preferred_element_type=jnp.float32)
    y = acc + b_ref[...]
    if act == "silu":
        y = y * jax.nn.sigmoid(y)
    o_ref[0] = y.reshape(th, wo, cout).astype(o_ref.dtype)


def _dw_kernel(k, s, th, act, x_ref, w_ref, b_ref, o_ref):
    """Depthwise k x k conv via unrolled per-tap VPU multiply-adds.

    x_ref: (1, s*s*Hs, Ws, C)   w_ref: (k*k, 1, C) bf16 (BN scale folded)
    b_ref: (1, 1, C) f32        o_ref: (1, th, Wo, C) bf16
    """
    r = pl.program_id(1)
    wo, c = o_ref.shape[2], o_ref.shape[3]
    hs = x_ref.shape[1] // (s * s)
    row0 = r * th

    acc = jnp.zeros((th, wo, c), jnp.float32)
    for dy in range(k):
        for dx in range(k):
            p = (dy % s) * s + (dx % s)
            patch = x_ref[0, pl.ds(p * hs + row0 + dy // s, th),
                          pl.ds(dx // s, wo), :]
            w_tap = w_ref[dy * k + dx][None]                 # (1, 1, C)
            acc = acc + patch.astype(jnp.float32) * w_tap.astype(jnp.float32)
    y = acc + b_ref[...]
    if act == "silu":
        y = y * jax.nn.sigmoid(y)
    o_ref[0] = y.astype(o_ref.dtype)


def _gap_kernel(inv_n, x_ref, o_ref):
    """Global average pool, accumulated over HW tiles. x:(B,t,C) -> o:(B,C)."""
    @pl.when(pl.program_id(0) == 0)
    def _():
        o_ref[...] = jnp.zeros_like(o_ref)

    o_ref[...] += jnp.sum(x_ref[...].astype(jnp.float32), axis=1) * inv_n


# ---------------------------------------------------------------------------
# Kernel wrappers
# ---------------------------------------------------------------------------
def pw_conv(x, wm, bias, act, gate=None, residual=None, tm_max=256):
    """1x1 conv + (folded) BN + act, optionally with SE gate and residual add
    fused into the epilogue.  x:(B,H,W,C) bf16, wm:(C,N) bf16, bias:(1,N) f32.
    """
    B, H, W, C = x.shape
    N = wm.shape[1]
    HW = H * W
    if HW <= tm_max:
        tm = rup(HW, 8)
        Mp = tm
    else:
        tm = tm_max
        Mp = rup(HW, tm)
    tk = LANE
    tn = LANE

    a = x.reshape(B, HW, C)
    if Mp > HW:
        a = jnp.pad(a, ((0, 0), (0, Mp - HW), (0, 0)))

    has_gate = gate is not None
    has_res = residual is not None

    inputs = [a]
    in_specs = [pl.BlockSpec((1, tm, tk), lambda b, i, j, k: (b, i, k))]
    if has_gate:
        inputs.append(gate.reshape(B, 1, C).astype(jnp.float32))
        in_specs.append(pl.BlockSpec((1, 1, tk), lambda b, i, j, k: (b, 0, k)))
    inputs.append(wm)
    in_specs.append(pl.BlockSpec((tk, tn), lambda b, i, j, k: (k, j)))
    inputs.append(bias)
    in_specs.append(pl.BlockSpec((1, tn), lambda b, i, j, k: (0, j)))
    if has_res:
        rr = residual.reshape(B, HW, N)
        if Mp > HW:
            rr = jnp.pad(rr, ((0, 0), (0, Mp - HW), (0, 0)))
        inputs.append(rr)
        in_specs.append(pl.BlockSpec((1, tm, tn), lambda b, i, j, k: (b, i, j)))

    out = pl.pallas_call(
        functools.partial(_pw_kernel, act, has_gate, has_res),
        out_shape=jax.ShapeDtypeStruct((B, Mp, N), jnp.bfloat16),
        grid=(B, Mp // tm, N // tn, C // tk),
        in_specs=in_specs,
        out_specs=pl.BlockSpec((1, tm, tn), lambda b, i, j, k: (b, i, j)),
        scratch_shapes=[pltpu.VMEM((tm, tn), jnp.float32)],
        compiler_params=pltpu.CompilerParams(
            dimension_semantics=("parallel", "parallel", "parallel",
                                 "arbitrary")),
    )(*inputs)
    return out[:, :HW, :].reshape(B, H, W, N)


def pad_and_phase_split(x, k, s, ho_pad, wo):
    """Symmetric (k-1)//2 padding + stride-phase decomposition (plain JAX).

    Returns (B, s*s*Hs, Ws, C): phase p = (dy%s)*s + (dx%s) occupies rows
    [p*Hs, (p+1)*Hs); tap (dy,dx) of output (ho,wo) reads row ho + dy//s,
    col wo + dx//s of that phase, so all in-kernel accesses are contiguous.
    """
    B, H, W, C = x.shape
    pad = (k - 1) // 2
    hs = ho_pad + (k - 1) // s
    ws = wo + (k - 1) // s
    bot = hs * s - H - pad
    rgt = ws * s - W - pad
    assert bot >= 0 and rgt >= 0
    xp = jnp.pad(x, ((0, 0), (pad, bot), (pad, rgt), (0, 0)))
    xp = xp.reshape(B, hs, s, ws, s, C)
    xp = jnp.transpose(xp, (0, 2, 4, 1, 3, 5))  # (B, py, px, Hs, Ws, C)
    return xp.reshape(B, s * s * hs, ws, C), hs, ws


def conv_bn_act(x, wm, bias, k, stride, act, th_max=8):
    """Standard k x k conv (symmetric auto-pad, as in the torch spec) + folded
    BN + activation.  wm: (k*k, Cin, Cout) bf16, bias: (1, Cout) f32."""
    B, H, W, C = x.shape
    cout = wm.shape[-1]
    pad = (k - 1) // 2
    s = stride
    ho = (H + 2 * pad - k) // s + 1
    wo = (W + 2 * pad - k) // s + 1
    th = min(th_max, ho)
    ho_pad = rup(ho, th)
    xph, hs, ws = pad_and_phase_split(x, k, s, ho_pad, wo)

    out = pl.pallas_call(
        functools.partial(_conv_kernel, k, s, th, act),
        out_shape=jax.ShapeDtypeStruct((B, ho_pad, wo, cout), jnp.bfloat16),
        grid=(B, ho_pad // th),
        in_specs=[
            pl.BlockSpec((1, s * s * hs, ws, C), lambda b, r: (b, 0, 0, 0)),
            pl.BlockSpec((k * k, C, cout), lambda b, r: (0, 0, 0)),
            pl.BlockSpec((1, cout), lambda b, r: (0, 0)),
        ],
        out_specs=pl.BlockSpec((1, th, wo, cout), lambda b, r: (b, r, 0, 0)),
        compiler_params=pltpu.CompilerParams(
            dimension_semantics=("parallel", "arbitrary")),
    )(xph, wm, bias)
    return out[:, :ho, :, :]


def dwconv_bn_act(x, wm, bias, k, stride, act, th_max=8):
    """Depthwise k x k conv + folded BN + activation.
    wm: (k*k, 1, C) bf16, bias: (1, 1, C) f32."""
    B, H, W, C = x.shape
    pad = (k - 1) // 2
    s = stride
    ho = (H + 2 * pad - k) // s + 1
    wo = (W + 2 * pad - k) // s + 1
    th = min(th_max, ho)
    ho_pad = rup(ho, th)
    xph, hs, ws = pad_and_phase_split(x, k, s, ho_pad, wo)

    out = pl.pallas_call(
        functools.partial(_dw_kernel, k, s, th, act),
        out_shape=jax.ShapeDtypeStruct((B, ho_pad, wo, C), jnp.bfloat16),
        grid=(B, ho_pad // th),
        in_specs=[
            pl.BlockSpec((1, s * s * hs, ws, C), lambda b, r: (b, 0, 0, 0)),
            pl.BlockSpec((k * k, 1, C), lambda b, r: (0, 0, 0)),
            pl.BlockSpec((1, 1, C), lambda b, r: (0, 0, 0)),
        ],
        out_specs=pl.BlockSpec((1, th, wo, C), lambda b, r: (b, r, 0, 0)),
        compiler_params=pltpu.CompilerParams(
            dimension_semantics=("parallel", "arbitrary")),
    )(xph, wm, bias)
    return out[:, :ho, :, :]


def global_avg_pool(x):
    """Global average pool x:(B,H,W,C) -> (B,C) f32, tiled over HW."""
    B, H, W, C = x.shape
    HW = H * W
    if HW <= 512:
        t = rup(HW, 8)
        HWp = t
    else:
        t = 512
        HWp = rup(HW, t)
    a = x.reshape(B, HW, C)
    if HWp > HW:
        a = jnp.pad(a, ((0, 0), (0, HWp - HW), (0, 0)))
    return pl.pallas_call(
        functools.partial(_gap_kernel, 1.0 / HW),
        out_shape=jax.ShapeDtypeStruct((B, C), jnp.float32),
        grid=(HWp // t,),
        in_specs=[pl.BlockSpec((B, t, C), lambda i: (0, i, 0))],
        out_specs=pl.BlockSpec((B, C), lambda i: (0, 0)),
        compiler_params=pltpu.CompilerParams(
            dimension_semantics=("arbitrary",)),
    )(a)


def se_gate(x, w1, w2):
    """SE gate = sigmoid(fc2(relu(fc1(avgpool(x))))).  Pooling is a Pallas
    kernel; the two tiny FCs run in plain JAX (launch overhead would dominate
    a Pallas call for a (B, C) x (C, hidden) matmul)."""
    pooled = global_avg_pool(x)                # (B, Cp) f32
    h = jnp.maximum(pooled @ w1, 0.0)
    return jax.nn.sigmoid(h @ w2)              # (B, Cp) f32


# ---------------------------------------------------------------------------
# Blocks
# ---------------------------------------------------------------------------
def fused_mbconv(x, ba, p):
    inp = x
    x = conv_bn_act(x, p["fused_w"], p["fused_b"],
                    ba.kernel_size, ba.stride, "silu")
    gate = se_gate(x, p["se_w1"], p["se_w2"]) if ba.se_ratio else None
    has_res = ba.input_filters == ba.output_filters and ba.stride == 1
    x = pw_conv(x, p["pw_w"], p["pw_b"], "none", gate=gate,
                residual=inp if has_res else None)
    return x


def mbconv(x, ba, p):
    inp = x
    if ba.expand_ratio != 1:
        x = pw_conv(x, p["expand_w"], p["expand_b"], "silu")
    x = dwconv_bn_act(x, p["dw_w"], p["dw_b"],
                      ba.kernel_size, ba.stride, "silu")
    gate = se_gate(x, p["se_w1"], p["se_w2"]) if ba.se_ratio else None
    has_res = ba.input_filters == ba.output_filters and ba.stride == 1
    x = pw_conv(x, p["pw_w"], p["pw_b"], "none", gate=gate,
                residual=inp if has_res else None)
    return x


# ---------------------------------------------------------------------------
# Raw (torch-shaped) parameter construction, deterministic & synthetic
# ---------------------------------------------------------------------------
def init_conv(key, outc, inc, k):
    return jax.random.normal(key, (outc, inc, k, k), jnp.float32) * 0.1


def init_bn(key, c):
    k1, k2, k3, k4 = jax.random.split(key, 4)
    return dict(
        gamma=jax.random.uniform(k1, (c,), jnp.float32, 0.5, 1.5),
        beta=jax.random.normal(k2, (c,), jnp.float32) * 0.1,
        rm=jax.random.normal(k3, (c,), jnp.float32) * 0.1,
        rv=jax.random.uniform(k4, (c,), jnp.float32, 0.5, 1.5),
    )


def expand_blocks(blocks_args):
    """Replicates the block-repeat logic of EfficientNetV2.__init__."""
    expanded = []
    last = None
    for ba in blocks_args:
        expanded.append(ba)
        if ba.num_repeat > 1:
            ba = ba._replace(input_filters=ba.output_filters, stride=1)
        for _ in range(ba.num_repeat - 1):
            expanded.append(ba)
        last = ba
    return expanded, last


def init_block_params(key, ba):
    keys = jax.random.split(key, 8)
    p = {}
    inc = ba.input_filters
    expc = inc * ba.expand_ratio
    outc = ba.output_filters
    if ba.fused:
        p["fused_w"] = init_conv(keys[0], expc, inc, ba.kernel_size)
        p["bn"] = init_bn(keys[1], expc)
    else:
        if ba.expand_ratio != 1:
            p["expand_w"] = init_conv(keys[0], expc, inc, 1)
            p["bn0"] = init_bn(keys[1], expc)
        p["dw_w"] = jax.random.normal(
            keys[2], (expc, 1, ba.kernel_size, ba.kernel_size),
            jnp.float32) * 0.1
        p["bn1"] = init_bn(keys[3], expc)
    if ba.se_ratio:
        hidden = int(expc * ba.se_ratio)
        p["se_w1"] = jax.random.normal(keys[4], (hidden, expc), jnp.float32) * 0.1
        p["se_w2"] = jax.random.normal(keys[5], (expc, hidden), jnp.float32) * 0.1
    p["pw_w"] = init_conv(keys[6], outc, expc, 1)
    p["bn2"] = init_bn(keys[7], outc)
    return p


def init_model_params(key, blocks_args, global_params):
    expanded, last_ba = expand_blocks(blocks_args)
    keys = jax.random.split(key, 4 + len(expanded))

    stem_out = blocks_args[0].input_filters
    params = {
        "stem": {
            "w": init_conv(keys[0], stem_out, 3, 3),
            "b": jax.random.normal(keys[1], (stem_out,), jnp.float32) * 0.1,
            "bn": init_bn(keys[2], stem_out),
        },
        "blocks": [init_block_params(keys[4 + i], ba)
                   for i, ba in enumerate(expanded)],
    }

    head_in = last_ba.output_filters
    head_out = int(global_params.width_coefficient * 1280)
    hkeys = jax.random.split(keys[3], 5)
    params["head"] = {
        "w": init_conv(hkeys[0], head_out, head_in, 1),
        "b": jax.random.normal(hkeys[1], (head_out,), jnp.float32) * 0.1,
        "bn": init_bn(hkeys[2], head_out),
    }
    params["fc"] = {
        "w": jax.random.normal(hkeys[3], (global_params.num_classes, head_out),
                               jnp.float32) * 0.1,
        "b": jax.random.normal(hkeys[4], (global_params.num_classes,),
                               jnp.float32) * 0.1,
    }
    return params, expanded


# ---------------------------------------------------------------------------
# Parameter preparation: fold BN (inference mode), pad channels to LANE
# multiples, cast weights to bf16.  Done once, outside the jitted forward.
# ---------------------------------------------------------------------------
def bn_scale_bias(bn, conv_b=None, eps=1e-5):
    scale = bn["gamma"] / jnp.sqrt(bn["rv"] + eps)
    bias = bn["beta"] - bn["rm"] * scale
    if conv_b is not None:
        bias = bias + conv_b * scale
    return scale, bias


def prep_conv(w, conv_b, bn):
    outc, inc, k, _ = w.shape
    scale, bias = bn_scale_bias(bn, conv_b)
    wm = jnp.transpose(w, (2, 3, 1, 0)).reshape(k * k, inc, outc)
    wm = wm * scale[None, None, :]
    wm = jnp.pad(wm, ((0, 0), (0, cpad(inc) - inc), (0, cpad(outc) - outc)))
    b = jnp.pad(bias, (0, cpad(outc) - outc)).reshape(1, cpad(outc))
    return wm.astype(jnp.bfloat16), b.astype(jnp.float32)


def prep_pw(w, conv_b, bn):
    outc, inc = w.shape[0], w.shape[1]
    scale, bias = bn_scale_bias(bn, conv_b)
    wm = w[:, :, 0, 0].T * scale[None, :]
    wm = jnp.pad(wm, ((0, cpad(inc) - inc), (0, cpad(outc) - outc)))
    b = jnp.pad(bias, (0, cpad(outc) - outc)).reshape(1, cpad(outc))
    return wm.astype(jnp.bfloat16), b.astype(jnp.float32)


def prep_dw(w, bn):
    c, _, k, _ = w.shape
    scale, bias = bn_scale_bias(bn, None)
    wm = jnp.transpose(w[:, 0], (1, 2, 0)).reshape(k * k, 1, c)
    wm = wm * scale[None, None, :]
    wm = jnp.pad(wm, ((0, 0), (0, 0), (0, cpad(c) - c)))
    b = jnp.pad(bias, (0, cpad(c) - c)).reshape(1, 1, cpad(c))
    return wm.astype(jnp.bfloat16), b.astype(jnp.float32)


def prep_se(w1, w2):
    hidden, c = w1.shape
    w1p = jnp.pad(w1.T, ((0, cpad(c) - c), (0, 0))).astype(jnp.float32)
    w2p = jnp.pad(w2.T, ((0, 0), (0, cpad(c) - c))).astype(jnp.float32)
    return w1p, w2p


def prepare_params(raw, expanded_blocks):
    prep = {}
    prep["stem_w"], prep["stem_b"] = prep_conv(
        raw["stem"]["w"], raw["stem"]["b"], raw["stem"]["bn"])
    blocks = []
    for ba, bp in zip(expanded_blocks, raw["blocks"]):
        q = {}
        if ba.fused:
            q["fused_w"], q["fused_b"] = prep_conv(bp["fused_w"], None, bp["bn"])
        else:
            if ba.expand_ratio != 1:
                q["expand_w"], q["expand_b"] = prep_pw(
                    bp["expand_w"], None, bp["bn0"])
            q["dw_w"], q["dw_b"] = prep_dw(bp["dw_w"], bp["bn1"])
        if ba.se_ratio:
            q["se_w1"], q["se_w2"] = prep_se(bp["se_w1"], bp["se_w2"])
        q["pw_w"], q["pw_b"] = prep_pw(bp["pw_w"], None, bp["bn2"])
        blocks.append(q)
    prep["blocks"] = blocks
    prep["head_w"], prep["head_b"] = prep_pw(
        raw["head"]["w"], raw["head"]["b"], raw["head"]["bn"])
    head_out = raw["head"]["w"].shape[0]
    prep["fc_w"] = jnp.pad(raw["fc"]["w"].T,
                           ((0, cpad(head_out) - head_out), (0, 0))
                           ).astype(jnp.float32)
    prep["fc_b"] = raw["fc"]["b"].astype(jnp.float32)
    return prep


# ---------------------------------------------------------------------------
# Full forward pass
# ---------------------------------------------------------------------------
def make_forward(expanded_blocks):
    def forward(params, x_nchw):
        # NCHW -> NHWC, pad 3 input channels up to the 128-lane width, bf16.
        x = jnp.transpose(x_nchw, (0, 2, 3, 1))
        x = jnp.pad(x, ((0, 0), (0, 0), (0, 0), (0, cpad(3) - 3)))
        x = x.astype(jnp.bfloat16)
        # stem: conv3x3/s2 (with bias) + BN + SiLU
        x = conv_bn_act(x, params["stem_w"], params["stem_b"], 3, 2, "silu")
        for ba, bp in zip(expanded_blocks, params["blocks"]):
            x = fused_mbconv(x, ba, bp) if ba.fused else mbconv(x, ba, bp)
        # head: conv1x1 (with bias) + BN + SiLU
        x = pw_conv(x, params["head_w"], params["head_b"], "silu")
        pooled = global_avg_pool(x)                    # (B, head_out_padded)
        # TODO(synk): nn.Dropout replicated in eval mode only (identity).
        # Classifier FC in plain JAX: (B, 128) x (128, 10) is launch-overhead
        # bound as a standalone Pallas call.
        logits = pooled @ params["fc_w"] + params["fc_b"]
        return logits
    return jax.jit(forward)


# ---------------------------------------------------------------------------
# Main
# ---------------------------------------------------------------------------
if __name__ == "__main__":
    blocks_args = [
        BlockArgs(fused=True, input_filters=8, output_filters=8,
                  expand_ratio=1, kernel_size=3, stride=1,
                  se_ratio=0.0, num_repeat=1),
        BlockArgs(fused=True, input_filters=8, output_filters=16,
                  expand_ratio=2, kernel_size=3, stride=2,
                  se_ratio=0.25, num_repeat=2),
        BlockArgs(fused=False, input_filters=16, output_filters=16,
                  expand_ratio=2, kernel_size=3, stride=1,
                  se_ratio=0.25, num_repeat=1),
    ]
    global_params = GlobalParams(width_coefficient=0.05,   # head = 64 channels
                                 dropout_rate=0.1,
                                 num_classes=10)

    key = jax.random.PRNGKey(0)
    pkey, xkey = jax.random.split(key)
    raw_params, expanded = init_model_params(pkey, blocks_args, global_params)
    params = prepare_params(raw_params, expanded)

    x = jax.random.normal(xkey, (2, 3, 16, 16), jnp.float32)  # NCHW like torch

    forward = make_forward(expanded)
    logits = jax.block_until_ready(forward(params, x))

    assert logits.shape == (2, global_params.num_classes), logits.shape
    assert bool(jnp.all(jnp.isfinite(logits)))
    print("KERNEL_OK")
</pallas_src>

<mosaic_0001>
module attributes {stable_mosaic.version = 11 : i64} {
  func.func @_conv_kernel(%arg0: i32, %arg1: i32, %arg2: memref<1x36x9x128xbf16, #tpu.memory_space<vmem>>, %arg3: memref<9x128x128xbf16, #tpu.memory_space<vmem>>, %arg4: memref<1x128xf32, #tpu.memory_space<vmem>>, %arg5: memref<1x8x8x128xbf16, #tpu.memory_space<vmem>>) attributes {dimension_semantics = [#tpu.dimension_semantics<parallel>, #tpu.dimension_semantics<arbitrary>], iteration_bounds = array<i64: 2, 1>, scalar_prefetch = 0 : i64, scratch_operands = 0 : i64, tpu.core_type = #tpu.core_type<tc>, window_params = [{transform_indices = @transform_0, window_bounds = array<i64: 1, 36, 9, 128>}, {pipeline_mode = #tpu.pipeline_mode<synchronous>, transform_indices = @transform_1, window_bounds = array<i64: 9, 128, 128>}, {pipeline_mode = #tpu.pipeline_mode<synchronous>, transform_indices = @transform_2, window_bounds = array<i64: 1, 128>}, {transform_indices = @transform_3, window_bounds = array<i64: 1, 8, 8, 128>}]} {
    %c8_i32 = arith.constant 8 : i32
    %0 = arith.muli %arg1, %c8_i32 : i32
    %cst = arith.constant 0.000000e+00 : f32
    %1 = vector.broadcast %cst : f32 to vector<64x128xf32>
    %c0_i32 = arith.constant 0 : i32
    %2 = arith.addi %c0_i32, %0 : i32
    %c0_i32_0 = arith.constant 0 : i32
    %3 = arith.addi %2, %c0_i32_0 : i32
    %c0 = arith.constant 0 : index
    %4 = arith.index_cast %3 : i32 to index
    %c0_1 = arith.constant 0 : index
    %c0_2 = arith.constant 0 : index
    %5 = vector.load %arg2[%c0, %4, %c0_1, %c0_2] : memref<1x36x9x128xbf16, #tpu.memory_space<vmem>>, vector<1x8x8x128xbf16>
    %6 = vector.shape_cast %5 : vector<1x8x8x128xbf16> to vector<8x8x128xbf16>
    %7 = vector.shape_cast %6 : vector<8x8x128xbf16> to vector<64x128xbf16>
    %c0_3 = arith.constant 0 : index
    %c0_4 = arith.constant 0 : index
    %c0_5 = arith.constant 0 : index
    %8 = vector.load %arg3[%c0_3, %c0_4, %c0_5] : memref<9x128x128xbf16, #tpu.memory_space<vmem>>, vector<1x128x128xbf16>
    %9 = vector.shape_cast %8 : vector<1x128x128xbf16> to vector<128x128xbf16>
    %cst_6 = arith.constant dense<0.000000e+00> : vector<64x128xf32>
    %10 = tpu.matmul %7, %9, %cst_6 {dimension_numbers = #tpu.dot_dimension_numbers<[1], [0], [0], [1], [0, 0, 1, 1], [], []>} : vector<64x128xbf16>, vector<128x128xbf16>, vector<64x128xf32> -> vector<64x128xf32>
    %11 = arith.addf %1, %10 : vector<64x128xf32>
    %c9_i32 = arith.constant 9 : i32
    %12 = arith.addi %c9_i32, %0 : i32
    %c0_i32_7 = arith.constant 0 : i32
    %13 = arith.addi %12, %c0_i32_7 : i32
    %c0_8 = arith.constant 0 : index
    %14 = arith.index_cast %13 : i32 to index
    %c0_9 = arith.constant 0 : index
    %c0_10 = arith.constant 0 : index
    %15 = vector.load %arg2[%c0_8, %14, %c0_9, %c0_10] : memref<1x36x9x128xbf16, #tpu.memory_space<vmem>>, vector<1x8x8x128xbf16>
    %16 = vector.shape_cast %15 : vector<1x8x8x128xbf16> to vector<8x8x128xbf16>
    %17 = vector.shape_cast %16 : vector<8x8x128xbf16> to vector<64x128xbf16>
    %c1 = arith.constant 1 : index
    %c0_11 = arith.constant 0 : index
    %c0_12 = arith.constant 0 : index
    %18 = vector.load %arg3[%c1, %c0_11, %c0_12] : memref<9x128x128xbf16, #tpu.memory_space<vmem>>, vector<1x128x128xbf16>
    %19 = vector.shape_cast %18 : vector<1x128x128xbf16> to vector<128x128xbf16>
    %cst_13 = arith.constant dense<0.000000e+00> : vector<64x128xf32>
    %20 = tpu.matmul %17, %19, %cst_13 {dimension_numbers = #tpu.dot_dimension_numbers<[1], [0], [0], [1], [0, 0, 1, 1], [], []>} : vector<64x128xbf16>, vector<128x128xbf16>, vector<64x128xf32> -> vector<64x128xf32>
    %21 = arith.addf %11, %20 : vector<64x128xf32>
    %c0_i32_14 = arith.constant 0 : i32
    %22 = arith.addi %c0_i32_14, %0 : i32
    %c0_i32_15 = arith.constant 0 : i32
    %23 = arith.addi %22, %c0_i32_15 : i32
    %c0_16 = arith.constant 0 : index
    %24 = arith.index_cast %23 : i32 to index
    %c1_17 = arith.constant 1 : index
    %c0_18 = arith.constant 0 : index
    %25 = vector.load %arg2[%c0_16, %24, %c1_17, %c0_18] : memref<1x36x9x128xbf16, #tpu.memory_space<vmem>>, vector<1x8x8x128xbf16>
    %26 = vector.shape_cast %25 : vector<1x8x8x128xbf16> to vector<8x8x128xbf16>
    %27 = vector.shape_cast %26 : vector<8x8x128xbf16> to vector<64x128xbf16>
    %c2 = arith.constant 2 : index
    %c0_19 = arith.constant 0 : index
    %c0_20 = arith.constant 0 : index
    %28 = vector.load %arg3[%c2, %c0_19, %c0_20] : memref<9x128x128xbf16, #tpu.memory_space<vmem>>, vector<1x128x128xbf16>
    %29 = vector.shape_cast %28 : vector<1x128x128xbf16> to vector<128x128xbf16>
    %cst_21 = arith.constant dense<0.000000e+00> : vector<64x128xf32>
    %30 = tpu.matmul %27, %29, %cst_21 {dimension_numbers = #tpu.dot_dimension_numbers<[1], [0], [0], [1], [0, 0, 1, 1], [], []>} : vector<64x128xbf16>, vector<128x128xbf16>, vector<64x128xf32> -> vector<64x128xf32>
    %31 = arith.addf %21, %30 : vector<64x128xf32>
    %c18_i32 = arith.constant 18 : i32
    %32 = arith.addi %c18_i32, %0 : i32
    %c0_i32_22 = arith.constant 0 : i32
    %33 = arith.addi %32, %c0_i32_22 : i32
    %c0_23 = arith.constant 0 : index
    %34 = arith.index_cast %33 : i32 to index
    %c0_24 = arith.constant 0 : index
    %c0_25 = arith.constant 0 : index
    %35 = vector.load %arg2[%c0_23, %34, %c0_24, %c0_25] : memref<1x36x9x128xbf16, #tpu.memory_space<vmem>>, vector<1x8x8x128xbf16>
    %36 = vector.shape_cast %35 : vector<1x8x8x128xbf16> to vector<8x8x128xbf16>
    %37 = vector.shape_cast %36 : vector<8x8x128xbf16> to vector<64x128xbf16>
    %c3 = arith.constant 3 : index
    %c0_26 = arith.constant 0 : index
    %c0_27 = arith.constant 0 : index
    %38 = vector.load %arg3[%c3, %c0_26, %c0_27] : memref<9x128x128xbf16, #tpu.memory_space<vmem>>, vector<1x128x128xbf16>
    %39 = vector.shape_cast %38 : vector<1x128x128xbf16> to vector<128x128xbf16>
    %cst_28 = arith.constant dense<0.000000e+00> : vector<64x128xf32>
    %40 = tpu.matmul %37, %39, %cst_28 {dimension_numbers = #tpu.dot_dimension_numbers<[1], [0], [0], [1], [0, 0, 1, 1], [], []>} : vector<64x128xbf16>, vector<128x128xbf16>, vector<64x128xf32> -> vector<64x128xf32>
    %41 = arith.addf %31, %40 : vector<64x128xf32>
    %c27_i32 = arith.constant 27 : i32
    %42 = arith.addi %c27_i32, %0 : i32
    %c0_i32_29 = arith.constant 0 : i32
    %43 = arith.addi %42, %c0_i32_29 : i32
    %c0_30 = arith.constant 0 : index
    %44 = arith.index_cast %43 : i32 to index
    %c0_31 = arith.constant 0 : index
    %c0_32 = arith.constant 0 : index
    %45 = vector.load %arg2[%c0_30, %44, %c0_31, %c0_32] : memref<1x36x9x128xbf16, #tpu.memory_space<vmem>>, vector<1x8x8x128xbf16>
    %46 = vector.shape_cast %45 : vector<1x8x8x128xbf16> to vector<8x8x128xbf16>
    %47 = vector.shape_cast %46 : vector<8x8x128xbf16> to vector<64x128xbf16>
    %c4 = arith.constant 4 : index
    %c0_33 = arith.constant 0 : index
    %c0_34 = arith.constant 0 : index
    %48 = vector.load %arg3[%c4, %c0_33, %c0_34] : memref<9x128x128xbf16, #tpu.memory_space<vmem>>, vector<1x128x128xbf16>
    %49 = vector.shape_cast %48 : vector<1x128x128xbf16> to vector<128x128xbf16>
    %cst_35 = arith.constant dense<0.000000e+00> : vector<64x128xf32>
    %50 = tpu.matmul %47, %49, %cst_35 {dimension_numbers = #tpu.dot_dimension_numbers<[1], [0], [0], [1], [0, 0, 1, 1], [], []>} : vector<64x128xbf16>, vector<128x128xbf16>, vector<64x128xf32> -> vector<64x128xf32>
    %51 = arith.addf %41, %50 : vector<64x128xf32>
    %c18_i32_36 = arith.constant 18 : i32
    %52 = arith.addi %c18_i32_36, %0 : i32
    %c0_i32_37 = arith.constant 0 : i32
    %53 = arith.addi %52, %c0_i32_37 : i32
    %c0_38 = arith.constant 0 : index
    %54 = arith.index_cast %53 : i32 to index
    %c1_39 = arith.constant 1 : index
    %c0_40 = arith.constant 0 : index
    %55 = vector.load %arg2[%c0_38, %54, %c1_39, %c0_40] : memref<1x36x9x128xbf16, #tpu.memory_space<vmem>>, vector<1x8x8x128xbf16>
    %56 = vector.shape_cast %55 : vector<1x8x8x128xbf16> to vector<8x8x128xbf16>
    %57 = vector.shape_cast %56 : vector<8x8x128xbf16> to vector<64x128xbf16>
    %c5 = arith.constant 5 : index
    %c0_41 = arith.constant 0 : index
    %c0_42 = arith.constant 0 : index
    %58 = vector.load %arg3[%c5, %c0_41, %c0_42] : memref<9x128x128xbf16, #tpu.memory_space<vmem>>, vector<1x128x128xbf16>
    %59 = vector.shape_cast %58 : vector<1x128x128xbf16> to vector<128x128xbf16>
    %cst_43 = arith.constant dense<0.000000e+00> : vector<64x128xf32>
    %60 = tpu.matmul %57, %59, %cst_43 {dimension_numbers = #tpu.dot_dimension_numbers<[1], [0], [0], [1], [0, 0, 1, 1], [], []>} : vector<64x128xbf16>, vector<128x128xbf16>, vector<64x128xf32> -> vector<64x128xf32>
    %61 = arith.addf %51, %60 : vector<64x128xf32>
    %c0_i32_44 = arith.constant 0 : i32
    %62 = arith.addi %c0_i32_44, %0 : i32
    %c1_i32 = arith.constant 1 : i32
    %63 = arith.addi %62, %c1_i32 : i32
    %c0_45 = arith.constant 0 : index
    %64 = arith.index_cast %63 : i32 to index
    %c0_46 = arith.constant 0 : index
    %c0_47 = arith.constant 0 : index
    %65 = vector.load %arg2[%c0_45, %64, %c0_46, %c0_47] : memref<1x36x9x128xbf16, #tpu.memory_space<vmem>>, vector<1x8x8x128xbf16>
    %66 = vector.shape_cast %65 : vector<1x8x8x128xbf16> to vector<8x8x128xbf16>
    %67 = vector.shape_cast %66 : vector<8x8x128xbf16> to vector<64x128xbf16>
    %c6 = arith.constant 6 : index
    %c0_48 = arith.constant 0 : index
    %c0_49 = arith.constant 0 : index
    %68 = vector.load %arg3[%c6, %c0_48, %c0_49] : memref<9x128x128xbf16, #tpu.memory_space<vmem>>, vector<1x128x128xbf16>
    %69 = vector.shape_cast %68 : vector<1x128x128xbf16> to vector<128x128xbf16>
    %cst_50 = arith.constant dense<0.000000e+00> : vector<64x128xf32>
    %70 = tpu.matmul %67, %69, %cst_50 {dimension_numbers = #tpu.dot_dimension_numbers<[1], [0], [0], [1], [0, 0, 1, 1], [], []>} : vector<64x128xbf16>, vector<128x128xbf16>, vector<64x128xf32> -> vector<64x128xf32>
    %71 = arith.addf %61, %70 : vector<64x128xf32>
    %c9_i32_51 = arith.constant 9 : i32
    %72 = arith.addi %c9_i32_51, %0 : i32
    %c1_i32_52 = arith.constant 1 : i32
    %73 = arith.addi %72, %c1_i32_52 : i32
    %c0_53 = arith.constant 0 : index
    %74 = arith.index_cast %73 : i32 to index
    %c0_54 = arith.constant 0 : index
    %c0_55 = arith.constant 0 : index
    %75 = vector.load %arg2[%c0_53, %74, %c0_54, %c0_55] : memref<1x36x9x128xbf16, #tpu.memory_space<vmem>>, vector<1x8x8x128xbf16>
    %76 = vector.shape_cast %75 : vector<1x8x8x128xbf16> to vector<8x8x128xbf16>
    %77 = vector.shape_cast %76 : vector<8x8x128xbf16> to vector<64x128xbf16>
    %c7 = arith.constant 7 : index
    %c0_56 = arith.constant 0 : index
    %c0_57 = arith.constant 0 : index
    %78 = vector.load %arg3[%c7, %c0_56, %c0_57] : memref<9x128x128xbf16, #tpu.memory_space<vmem>>, vector<1x128x128xbf16>
    %79 = vector.shape_cast %78 : vector<1x128x128xbf16> to vector<128x128xbf16>
    %cst_58 = arith.constant dense<0.000000e+00> : vector<64x128xf32>
    %80 = tpu.matmul %77, %79, %cst_58 {dimension_numbers = #tpu.dot_dimension_numbers<[1], [0], [0], [1], [0, 0, 1, 1], [], []>} : vector<64x128xbf16>, vector<128x128xbf16>, vector<64x128xf32> -> vector<64x128xf32>
    %81 = arith.addf %71, %80 : vector<64x128xf32>
    %c0_i32_59 = arith.constant 0 : i32
    %82 = arith.addi %c0_i32_59, %0 : i32
    %c1_i32_60 = arith.constant 1 : i32
    %83 = arith.addi %82, %c1_i32_60 : i32
    %c0_61 = arith.constant 0 : index
    %84 = arith.index_cast %83 : i32 to index
    %c1_62 = arith.constant 1 : index
    %c0_63 = arith.constant 0 : index
    %85 = vector.load %arg2[%c0_61, %84, %c1_62, %c0_63] : memref<1x36x9x128xbf16, #tpu.memory_space<vmem>>, vector<1x8x8x128xbf16>
    %86 = vector.shape_cast %85 : vector<1x8x8x128xbf16> to vector<8x8x128xbf16>
    %87 = vector.shape_cast %86 : vector<8x8x128xbf16> to vector<64x128xbf16>
    %c8 = arith.constant 8 : index
    %c0_64 = arith.constant 0 : index
    %c0_65 = arith.constant 0 : index
    %88 = vector.load %arg3[%c8, %c0_64, %c0_65] : memref<9x128x128xbf16, #tpu.memory_space<vmem>>, vector<1x128x128xbf16>
    %89 = vector.shape_cast %88 : vector<1x128x128xbf16> to vector<128x128xbf16>
    %cst_66 = arith.constant dense<0.000000e+00> : vector<64x128xf32>
    %90 = tpu.matmul %87, %89, %cst_66 {dimension_numbers = #tpu.dot_dimension_numbers<[1], [0], [0], [1], [0, 0, 1, 1], [], []>} : vector<64x128xbf16>, vector<128x128xbf16>, vector<64x128xf32> -> vector<64x128xf32>
    %91 = arith.addf %81, %90 : vector<64x128xf32>
    %c0_67 = arith.constant 0 : index
    %c0_68 = arith.constant 0 : index
    %92 = vector.load %arg4[%c0_67, %c0_68] : memref<1x128xf32, #tpu.memory_space<vmem>>, vector<1x128xf32>
    %93 = vector.broadcast %92 : vector<1x128xf32> to vector<64x128xf32>
    %94 = arith.addf %91, %93 : vector<64x128xf32>
    %95 = arith.negf %94 : vector<64x128xf32>
    %96 = math.exp %95 : vector<64x128xf32>
    %cst_69 = arith.constant 1.000000e+00 : f32
    %97 = vector.broadcast %cst_69 : f32 to vector<64x128xf32>
    %98 = arith.addf %97, %96 : vector<64x128xf32>
    %99 = arith.divf %97, %98 : vector<64x128xf32>
    %100 = arith.mulf %94, %99 : vector<64x128xf32>
    %101 = vector.shape_cast %100 : vector<64x128xf32> to vector<8x8x128xf32>
    %102 = arith.truncf %101 : vector<8x8x128xf32> to vector<8x8x128xbf16>
    %c0_70 = arith.constant 0 : index
    %c0_71 = arith.constant 0 : index
    %c0_72 = arith.constant 0 : index
    %c0_73 = arith.constant 0 : index
    %103 = vector.load %arg5[%c0_70, %c0_71, %c0_72, %c0_73] : memref<1x8x8x128xbf16, #tpu.memory_space<vmem>>, vector<1x8x8x128xbf16>
    %104 = vector.shape_cast %103 : vector<1x8x8x128xbf16> to vector<8x8x128xbf16>
    %105 = vector.shape_cast %102 : vector<8x8x128xbf16> to vector<1x8x8x128xbf16>
    tpu.vector_store %arg5[%c0_70, %c0_71, %c0_72, %c0_73], %105 {strides = array<i32>} : memref<1x8x8x128xbf16, #tpu.memory_space<vmem>>, vector<1x8x8x128xbf16>,
    return
  }
  func.func @transform_0(%arg0: i32, %arg1: i32) -> (i32, i32, i32, i32) {
    %c0_i32 = arith.constant 0 : i32
    %c0_i32_0 = arith.constant 0 : i32
    %c0_i32_1 = arith.constant 0 : i32
    %c0_i32_2 = arith.constant 0 : i32
    return %arg0, %c0_i32, %c0_i32_0, %c0_i32_1 : i32, i32, i32, i32
  }
  func.func @transform_1(%arg0: i32, %arg1: i32) -> (i32, i32, i32) {
    %c0_i32 = arith.constant 0 : i32
    %c0_i32_0 = arith.constant 0 : i32
    %c0_i32_1 = arith.constant 0 : i32
    %c0_i32_2 = arith.constant 0 : i32
    return %c0_i32, %c0_i32_0, %c0_i32_1 : i32, i32, i32
  }
  func.func @transform_2(%arg0: i32, %arg1: i32) -> (i32, i32) {
    %c0_i32 = arith.constant 0 : i32
    %c0_i32_0 = arith.constant 0 : i32
    %c0_i32_1 = arith.constant 0 : i32
    return %c0_i32, %c0_i32_0 : i32, i32
  }
  func.func @transform_3(%arg0: i32, %arg1: i32) -> (i32, i32, i32, i32) {
    %c0_i32 = arith.constant 0 : i32
    %c0_i32_0 = arith.constant 0 : i32
    %c0_i32_1 = arith.constant 0 : i32
    return %arg0, %arg1, %c0_i32, %c0_i32_0 : i32, i32, i32, i32
  }
}

module attributes {stable_mosaic.version = 11 : i64} {
  func.func @_conv_kernel(%arg0: i32, %arg1: i32, %arg2: memref<1x10x10x128xbf16, #tpu.memory_space<vmem>>, %arg3: memref<9x128x128xbf16, #tpu.memory_space<vmem>>, %arg4: memref<1x128xf32, #tpu.memory_space<vmem>>, %arg5: memref<1x8x8x128xbf16, #tpu.memory_space<vmem>>) attributes {dimension_semantics = [#tpu.dimension_semantics<parallel>, #tpu.dimension_semantics<arbitrary>], iteration_bounds = array<i64: 2, 1>, scalar_prefetch = 0 : i64, scratch_operands = 0 : i64, tpu.core_type = #tpu.core_type<tc>, window_params = [{transform_indices = @transform_0, window_bounds = array<i64: 1, 10, 10, 128>}, {pipeline_mode = #tpu.pipeline_mode<synchronous>, transform_indices = @transform_1, window_bounds = array<i64: 9, 128, 128>}, {pipeline_mode = #tpu.pipeline_mode<synchronous>, transform_indices = @transform_2, window_bounds = array<i64: 1, 128>}, {transform_indices = @transform_3, window_bounds = array<i64: 1, 8, 8, 128>}]} {
    %c8_i32 = arith.constant 8 : i32
    %0 = arith.muli %arg1, %c8_i32 : i32
    %cst = arith.constant 0.000000e+00 : f32
    %1 = vector.broadcast %cst : f32 to vector<64x128xf32>
    %c0_i32 = arith.constant 0 : i32
    %2 = arith.addi %c0_i32, %0 : i32
    %c0_i32_0 = arith.constant 0 : i32
    %3 = arith.addi %2, %c0_i32_0 : i32
    %c0 = arith.constant 0 : index
    %4 = arith.index_cast %3 : i32 to index
    %c0_1 = arith.constant 0 : index
    %c0_2 = arith.constant 0 : index
    %5 = vector.load %arg2[%c0, %4, %c0_1, %c0_2] : memref<1x10x10x128xbf16, #tpu.memory_space<vmem>>, vector<1x8x8x128xbf16>
    %6 = vector.shape_cast %5 : vector<1x8x8x128xbf16> to vector<8x8x128xbf16>
    %7 = vector.shape_cast %6 : vector<8x8x128xbf16> to vector<64x128xbf16>
    %c0_3 = arith.constant 0 : index
    %c0_4 = arith.constant 0 : index
    %c0_5 = arith.constant 0 : index
    %8 = vector.load %arg3[%c0_3, %c0_4, %c0_5] : memref<9x128x128xbf16, #tpu.memory_space<vmem>>, vector<1x128x128xbf16>
    %9 = vector.shape_cast %8 : vector<1x128x128xbf16> to vector<128x128xbf16>
    %cst_6 = arith.constant dense<0.000000e+00> : vector<64x128xf32>
    %10 = tpu.matmul %7, %9, %cst_6 {dimension_numbers = #tpu.dot_dimension_numbers<[1], [0], [0], [1], [0, 0, 1, 1], [], []>} : vector<64x128xbf16>, vector<128x128xbf16>, vector<64x128xf32> -> vector<64x128xf32>
    %11 = arith.addf %1, %10 : vector<64x128xf32>
    %c0_i32_7 = arith.constant 0 : i32
    %12 = arith.addi %c0_i32_7, %0 : i32
    %c0_i32_8 = arith.constant 0 : i32
    %13 = arith.addi %12, %c0_i32_8 : i32
    %c0_9 = arith.constant 0 : index
    %14 = arith.index_cast %13 : i32 to index
    %c1 = arith.constant 1 : index
    %c0_10 = arith.constant 0 : index
    %15 = vector.load %arg2[%c0_9, %14, %c1, %c0_10] : memref<1x10x10x128xbf16, #tpu.memory_space<vmem>>, vector<1x8x8x128xbf16>
    %16 = vector.shape_cast %15 : vector<1x8x8x128xbf16> to vector<8x8x128xbf16>
    %17 = vector.shape_cast %16 : vector<8x8x128xbf16> to vector<64x128xbf16>
    %c1_11 = arith.constant 1 : index
    %c0_12 = arith.constant 0 : index
    %c0_13 = arith.constant 0 : index
    %18 = vector.load %arg3[%c1_11, %c0_12, %c0_13] : memref<9x128x128xbf16, #tpu.memory_space<vmem>>, vector<1x128x128xbf16>
    %19 = vector.shape_cast %18 : vector<1x128x128xbf16> to vector<128x128xbf16>
    %cst_14 = arith.constant dense<0.000000e+00> : vector<64x128xf32>
    %20 = tpu.matmul %17, %19, %cst_14 {dimension_numbers = #tpu.dot_dimension_numbers<[1], [0], [0], [1], [0, 0, 1, 1], [], []>} : vector<64x128xbf16>, vector<128x128xbf16>, vector<64x128xf32> -> vector<64x128xf32>
    %21 = arith.addf %11, %20 : vector<64x128xf32>
    %c0_i32_15 = arith.constant 0 : i32
    %22 = arith.addi %c0_i32_15, %0 : i32
    %c0_i32_16 = arith.constant 0 : i32
    %23 = arith.addi %22, %c0_i32_16 : i32
    %c0_17 = arith.constant 0 : index
    %24 = arith.index_cast %23 : i32 to index
    %c2 = arith.constant 2 : index
    %c0_18 = arith.constant 0 : index
    %25 = vector.load %arg2[%c0_17, %24, %c2, %c0_18] : memref<1x10x10x128xbf16, #tpu.memory_space<vmem>>, vector<1x8x8x128xbf16>
    %26 = vector.shape_cast %25 : vector<1x8x8x128xbf16> to vector<8x8x128xbf16>
    %27 = vector.shape_cast %26 : vector<8x8x128xbf16> to vector<64x128xbf16>
    %c2_19 = arith.constant 2 : index
    %c0_20 = arith.constant 0 : index
    %c0_21 = arith.constant 0 : index
    %28 = vector.load %arg3[%c2_19, %c0_20, %c0_21] : memref<9x128x128xbf16, #tpu.memory_space<vmem>>, vector<1x128x128xbf16>
    %29 = vector.shape_cast %28 : vector<1x128x128xbf16> to vector<128x128xbf16>
    %cst_22 = arith.constant dense<0.000000e+00> : vector<64x128xf32>
    %30 = tpu.matmul %27, %29, %cst_22 {dimension_numbers = #tpu.dot_dimension_numbers<[1], [0], [0], [1], [0, 0, 1, 1], [], []>} : vector<64x128xbf16>, vector<128x128xbf16>, vector<64x128xf32> -> vector<64x128xf32>
    %31 = arith.addf %21, %30 : vector<64x128xf32>
    %c0_i32_23 = arith.constant 0 : i32
    %32 = arith.addi %c0_i32_23, %0 : i32
    %c1_i32 = arith.constant 1 : i32
    %33 = arith.addi %32, %c1_i32 : i32
    %c0_24 = arith.constant 0 : index
    %34 = arith.index_cast %33 : i32 to index
    %c0_25 = arith.constant 0 : index
    %c0_26 = arith.constant 0 : index
    %35 = vector.load %arg2[%c0_24, %34, %c0_25, %c0_26] : memref<1x10x10x128xbf16, #tpu.memory_space<vmem>>, vector<1x8x8x128xbf16>
    %36 = vector.shape_cast %35 : vector<1x8x8x128xbf16> to vector<8x8x128xbf16>
    %37 = vector.shape_cast %36 : vector<8x8x128xbf16> to vector<64x128xbf16>
    %c3 = arith.constant 3 : index
    %c0_27 = arith.constant 0 : index
    %c0_28 = arith.constant 0 : index
    %38 = vector.load %arg3[%c3, %c0_27, %c0_28] : memref<9x128x128xbf16, #tpu.memory_space<vmem>>, vector<1x128x128xbf16>
    %39 = vector.shape_cast %38 : vector<1x128x128xbf16> to vector<128x128xbf16>
    %cst_29 = arith.constant dense<0.000000e+00> : vector<64x128xf32>
    %40 = tpu.matmul %37, %39, %cst_29 {dimension_numbers = #tpu.dot_dimension_numbers<[1], [0], [0], [1], [0, 0, 1, 1], [], []>} : vector<64x128xbf16>, vector<128x128xbf16>, vector<64x128xf32> -> vector<64x128xf32>
    %41 = arith.addf %31, %40 : vector<64x128xf32>
    %c0_i32_30 = arith.constant 0 : i32
    %42 = arith.addi %c0_i32_30, %0 : i32
    %c1_i32_31 = arith.constant 1 : i32
    %43 = arith.addi %42, %c1_i32_31 : i32
    %c0_32 = arith.constant 0 : index
    %44 = arith.index_cast %43 : i32 to index
    %c1_33 = arith.constant 1 : index
    %c0_34 = arith.constant 0 : index
    %45 = vector.load %arg2[%c0_32, %44, %c1_33, %c0_34] : memref<1x10x10x128xbf16, #tpu.memory_space<vmem>>, vector<1x8x8x128xbf16>
    %46 = vector.shape_cast %45 : vector<1x8x8x128xbf16> to vector<8x8x128xbf16>
    %47 = vector.shape_cast %46 : vector<8x8x128xbf16> to vector<64x128xbf16>
    %c4 = arith.constant 4 : index
    %c0_35 = arith.constant 0 : index
    %c0_36 = arith.constant 0 : index
    %48 = vector.load %arg3[%c4, %c0_35, %c0_36] : memref<9x128x128xbf16, #tpu.memory_space<vmem>>, vector<1x128x128xbf16>
    %49 = vector.shape_cast %48 : vector<1x128x128xbf16> to vector<128x128xbf16>
    %cst_37 = arith.constant dense<0.000000e+00> : vector<64x128xf32>
    %50 = tpu.matmul %47, %49, %cst_37 {dimension_numbers = #tpu.dot_dimension_numbers<[1], [0], [0], [1], [0, 0, 1, 1], [], []>} : vector<64x128xbf16>, vector<128x128xbf16>, vector<64x128xf32> -> vector<64x128xf32>
    %51 = arith.addf %41, %50 : vector<64x128xf32>
    %c0_i32_38 = arith.constant 0 : i32
    %52 = arith.addi %c0_i32_38, %0 : i32
    %c1_i32_39 = arith.constant 1 : i32
    %53 = arith.addi %52, %c1_i32_39 : i32
    %c0_40 = arith.constant 0 : index
    %54 = arith.index_cast %53 : i32 to index
    %c2_41 = arith.constant 2 : index
    %c0_42 = arith.constant 0 : index
    %55 = vector.load %arg2[%c0_40, %54, %c2_41, %c0_42] : memref<1x10x10x128xbf16, #tpu.memory_space<vmem>>, vector<1x8x8x128xbf16>
    %56 = vector.shape_cast %55 : vector<1x8x8x128xbf16> to vector<8x8x128xbf16>
    %57 = vector.shape_cast %56 : vector<8x8x128xbf16> to vector<64x128xbf16>
    %c5 = arith.constant 5 : index
    %c0_43 = arith.constant 0 : index
    %c0_44 = arith.constant 0 : index
    %58 = vector.load %arg3[%c5, %c0_43, %c0_44] : memref<9x128x128xbf16, #tpu.memory_space<vmem>>, vector<1x128x128xbf16>
    %59 = vector.shape_cast %58 : vector<1x128x128xbf16> to vector<128x128xbf16>
    %cst_45 = arith.constant dense<0.000000e+00> : vector<64x128xf32>
    %60 = tpu.matmul %57, %59, %cst_45 {dimension_numbers = #tpu.dot_dimension_numbers<[1], [0], [0], [1], [0, 0, 1, 1], [], []>} : vector<64x128xbf16>, vector<128x128xbf16>, vector<64x128xf32> -> vector<64x128xf32>
    %61 = arith.addf %51, %60 : vector<64x128xf32>
    %c0_i32_46 = arith.constant 0 : i32
    %62 = arith.addi %c0_i32_46, %0 : i32
    %c2_i32 = arith.constant 2 : i32
    %63 = arith.addi %62, %c2_i32 : i32
    %c0_47 = arith.constant 0 : index
    %64 = arith.index_cast %63 : i32 to index
    %c0_48 = arith.constant 0 : index
    %c0_49 = arith.constant 0 : index
    %65 = vector.load %arg2[%c0_47, %64, %c0_48, %c0_49] : memref<1x10x10x128xbf16, #tpu.memory_space<vmem>>, vector<1x8x8x128xbf16>
    %66 = vector.shape_cast %65 : vector<1x8x8x128xbf16> to vector<8x8x128xbf16>
    %67 = vector.shape_cast %66 : vector<8x8x128xbf16> to vector<64x128xbf16>
    %c6 = arith.constant 6 : index
    %c0_50 = arith.constant 0 : index
    %c0_51 = arith.constant 0 : index
    %68 = vector.load %arg3[%c6, %c0_50, %c0_51] : memref<9x128x128xbf16, #tpu.memory_space<vmem>>, vector<1x128x128xbf16>
    %69 = vector.shape_cast %68 : vector<1x128x128xbf16> to vector<128x128xbf16>
    %cst_52 = arith.constant dense<0.000000e+00> : vector<64x128xf32>
    %70 = tpu.matmul %67, %69, %cst_52 {dimension_numbers = #tpu.dot_dimension_numbers<[1], [0], [0], [1], [0, 0, 1, 1], [], []>} : vector<64x128xbf16>, vector<128x128xbf16>, vector<64x128xf32> -> vector<64x128xf32>
    %71 = arith.addf %61, %70 : vector<64x128xf32>
    %c0_i32_53 = arith.constant 0 : i32
    %72 = arith.addi %c0_i32_53, %0 : i32
    %c2_i32_54 = arith.constant 2 : i32
    %73 = arith.addi %72, %c2_i32_54 : i32
    %c0_55 = arith.constant 0 : index
    %74 = arith.index_cast %73 : i32 to index
    %c1_56 = arith.constant 1 : index
    %c0_57 = arith.constant 0 : index
    %75 = vector.load %arg2[%c0_55, %74, %c1_56, %c0_57] : memref<1x10x10x128xbf16, #tpu.memory_space<vmem>>, vector<1x8x8x128xbf16>
    %76 = vector.shape_cast %75 : vector<1x8x8x128xbf16> to vector<8x8x128xbf16>
    %77 = vector.shape_cast %76 : vector<8x8x128xbf16> to vector<64x128xbf16>
    %c7 = arith.constant 7 : index
    %c0_58 = arith.constant 0 : index
    %c0_59 = arith.constant 0 : index
    %78 = vector.load %arg3[%c7, %c0_58, %c0_59] : memref<9x128x128xbf16, #tpu.memory_space<vmem>>, vector<1x128x128xbf16>
    %79 = vector.shape_cast %78 : vector<1x128x128xbf16> to vector<128x128xbf16>
    %cst_60 = arith.constant dense<0.000000e+00> : vector<64x128xf32>
    %80 = tpu.matmul %77, %79, %cst_60 {dimension_numbers = #tpu.dot_dimension_numbers<[1], [0], [0], [1], [0, 0, 1, 1], [], []>} : vector<64x128xbf16>, vector<128x128xbf16>, vector<64x128xf32> -> vector<64x128xf32>
    %81 = arith.addf %71, %80 : vector<64x128xf32>
    %c0_i32_61 = arith.constant 0 : i32
    %82 = arith.addi %c0_i32_61, %0 : i32
    %c2_i32_62 = arith.constant 2 : i32
    %83 = arith.addi %82, %c2_i32_62 : i32
    %c0_63 = arith.constant 0 : index
    %84 = arith.index_cast %83 : i32 to index
    %c2_64 = arith.constant 2 : index
    %c0_65 = arith.constant 0 : index
    %85 = vector.load %arg2[%c0_63, %84, %c2_64, %c0_65] : memref<1x10x10x128xbf16, #tpu.memory_space<vmem>>, vector<1x8x8x128xbf16>
    %86 = vector.shape_cast %85 : vector<1x8x8x128xbf16> to vector<8x8x128xbf16>
    %87 = vector.shape_cast %86 : vector<8x8x128xbf16> to vector<64x128xbf16>
    %c8 = arith.constant 8 : index
    %c0_66 = arith.constant 0 : index
    %c0_67 = arith.constant 0 : index
    %88 = vector.load %arg3[%c8, %c0_66, %c0_67] : memref<9x128x128xbf16, #tpu.memory_space<vmem>>, vector<1x128x128xbf16>
    %89 = vector.shape_cast %88 : vector<1x128x128xbf16> to vector<128x128xbf16>
    %cst_68 = arith.constant dense<0.000000e+00> : vector<64x128xf32>
    %90 = tpu.matmul %87, %89, %cst_68 {dimension_numbers = #tpu.dot_dimension_numbers<[1], [0], [0], [1], [0, 0, 1, 1], [], []>} : vector<64x128xbf16>, vector<128x128xbf16>, vector<64x128xf32> -> vector<64x128xf32>
    %91 = arith.addf %81, %90 : vector<64x128xf32>
    %c0_69 = arith.constant 0 : index
    %c0_70 = arith.constant 0 : index
    %92 = vector.load %arg4[%c0_69, %c0_70] : memref<1x128xf32, #tpu.memory_space<vmem>>, vector<1x128xf32>
    %93 = vector.broadcast %92 : vector<1x128xf32> to vector<64x128xf32>
    %94 = arith.addf %91, %93 : vector<64x128xf32>
    %95 = arith.negf %94 : vector<64x128xf32>
    %96 = math.exp %95 : vector<64x128xf32>
    %cst_71 = arith.constant 1.000000e+00 : f32
    %97 = vector.broadcast %cst_71 : f32 to vector<64x128xf32>
    %98 = arith.addf %97, %96 : vector<64x128xf32>
    %99 = arith.divf %97, %98 : vector<64x128xf32>
    %100 = arith.mulf %94, %99 : vector<64x128xf32>
    %101 = vector.shape_cast %100 : vector<64x128xf32> to vector<8x8x128xf32>
    %102 = arith.truncf %101 : vector<8x8x128xf32> to vector<8x8x128xbf16>
    %c0_72 = arith.constant 0 : index
    %c0_73 = arith.constant 0 : index
    %c0_74 = arith.constant 0 : index
    %c0_75 = arith.constant 0 : index
    %103 = vector.load %arg5[%c0_72, %c0_73, %c0_74, %c0_75] : memref<1x8x8x128xbf16, #tpu.memory_space<vmem>>, vector<1x8x8x128xbf16>
    %104 = vector.shape_cast %103 : vector<1x8x8x128xbf16> to vector<8x8x128xbf16>
    %105 = vector.shape_cast %102 : vector<8x8x128xbf16> to vector<1x8x8x128xbf16>
    tpu.vector_store %arg5[%c0_72, %c0_73, %c0_74, %c0_75], %105 {strides = array<i32>} : memref<1x8x8x128xbf16, #tpu.memory_space<vmem>>, vector<1x8x8x128xbf16>,
    return
  }
  func.func @transform_0(%arg0: i32, %arg1: i32) -> (i32, i32, i32, i32) {
    %c0_i32 = arith.constant 0 : i32
    %c0_i32_0 = arith.constant 0 : i32
    %c0_i32_1 = arith.constant 0 : i32
    %c0_i32_2 = arith.constant 0 : i32
    return %arg0, %c0_i32, %c0_i32_0, %c0_i32_1 : i32, i32, i32, i32
  }
  func.func @transform_1(%arg0: i32, %arg1: i32) -> (i32, i32, i32) {
    %c0_i32 = arith.constant 0 : i32
    %c0_i32_0 = arith.constant 0 : i32
    %c0_i32_1 = arith.constant 0 : i32
    %c0_i32_2 = arith.constant 0 : i32
    return %c0_i32, %c0_i32_0, %c0_i32_1 : i32, i32, i32
  }
  func.func @transform_2(%arg0: i32, %arg1: i32) -> (i32, i32) {
    %c0_i32 = arith.constant 0 : i32
    %c0_i32_0 = arith.constant 0 : i32
    %c0_i32_1 = arith.constant 0 : i32
    return %c0_i32, %c0_i32_0 : i32, i32
  }
  func.func @transform_3(%arg0: i32, %arg1: i32) -> (i32, i32, i32, i32) {
    %c0_i32 = arith.constant 0 : i32
    %c0_i32_0 = arith.constant 0 : i32
    %c0_i32_1 = arith.constant 0 : i32
    return %arg0, %arg1, %c0_i32, %c0_i32_0 : i32, i32, i32, i32
  }
}

module attributes {stable_mosaic.version = 11 : i64} {
  func.func @_pw_kernel(%arg0: i32, %arg1: i32, %arg2: i32, %arg3: i32, %arg4: memref<1x64x128xbf16, #tpu.memory_space<vmem>>, %arg5: memref<128x128xbf16, #tpu.memory_space<vmem>>, %arg6: memref<1x128xf32, #tpu.memory_space<vmem>>, %arg7: memref<1x64x128xbf16, #tpu.memory_space<vmem>>, %arg8: memref<1x64x128xbf16, #tpu.memory_space<vmem>>, %arg9: memref<64x128xf32, #tpu.memory_space<vmem>>) attributes {dimension_semantics = [#tpu.dimension_semantics<parallel>, #tpu.dimension_semantics<parallel>, #tpu.dimension_semantics<parallel>, #tpu.dimension_semantics<arbitrary>], iteration_bounds = array<i64: 2, 1, 1, 1>, scalar_prefetch = 0 : i64, scratch_operands = 1 : i64, tpu.core_type = #tpu.core_type<tc>, window_params = [{transform_indices = @transform_0, window_bounds = array<i64: 1, 64, 128>}, {transform_indices = @transform_1, window_bounds = array<i64: 128, 128>}, {transform_indices = @transform_2, window_bounds = array<i64: 1, 128>}, {transform_indices = @transform_3, window_bounds = array<i64: 1, 64, 128>}, {transform_indices = @transform_4, window_bounds = array<i64: 1, 64, 128>}]} {
    %c0_i32 = arith.constant 0 : i32
    %0 = arith.cmpi eq, %arg3, %c0_i32 : i32
    %1 = arith.extui %0 : i1 to i32
    %c0_i32_0 = arith.constant 0 : i32
    %2 = arith.cmpi ne, %1, %c0_i32_0 : i32
    scf.if %2 {
      %cst_11 = arith.constant 0.000000e+00 : f32
      %13 = vector.broadcast %cst_11 : f32 to vector<64x128xf32>
      %c0_12 = arith.constant 0 : index
      %c0_13 = arith.constant 0 : index
      %14 = vector.load %arg9[%c0_12, %c0_13] : memref<64x128xf32, #tpu.memory_space<vmem>>, vector<64x128xf32>
      tpu.vector_store %arg9[%c0_12, %c0_13], %13 {strides = array<i32>} : memref<64x128xf32, #tpu.memory_space<vmem>>, vector<64x128xf32>,
    } else {
    }
    %c0 = arith.constant 0 : index
    %c0_1 = arith.constant 0 : index
    %c0_2 = arith.constant 0 : index
    %3 = vector.load %arg4[%c0, %c0_1, %c0_2] : memref<1x64x128xbf16, #tpu.memory_space<vmem>>, vector<1x64x128xbf16>
    %4 = vector.shape_cast %3 : vector<1x64x128xbf16> to vector<64x128xbf16>
    %c0_3 = arith.constant 0 : index
    %c0_4 = arith.constant 0 : index
    %5 = vector.load %arg9[%c0_3, %c0_4] : memref<64x128xf32, #tpu.memory_space<vmem>>, vector<64x128xf32>
    %c0_5 = arith.constant 0 : index
    %c0_6 = arith.constant 0 : index
    %6 = vector.load %arg5[%c0_5, %c0_6] : memref<128x128xbf16, #tpu.memory_space<vmem>>, vector<128x128xbf16>
    %cst = arith.constant dense<0.000000e+00> : vector<64x128xf32>
    %7 = tpu.matmul %4, %6, %cst {dimension_numbers = #tpu.dot_dimension_numbers<[1], [0], [0], [1], [0, 0, 1, 1], [], []>} : vector<64x128xbf16>, vector<128x128xbf16>, vector<64x128xf32> -> vector<64x128xf32>
    %8 = arith.addf %5, %7 : vector<64x128xf32>
    %c0_7 = arith.constant 0 : index
    %c0_8 = arith.constant 0 : index
    %9 = vector.load %arg9[%c0_7, %c0_8] : memref<64x128xf32, #tpu.memory_space<vmem>>, vector<64x128xf32>
    tpu.vector_store %arg9[%c0_7, %c0_8], %8 {strides = array<i32>} : memref<64x128xf32, #tpu.memory_space<vmem>>, vector<64x128xf32>,
    %c0_i32_9 = arith.constant 0 : i32
    %10 = arith.cmpi eq, %arg3, %c0_i32_9 : i32
    %11 = arith.extui %10 : i1 to i32
    %c0_i32_10 = arith.constant 0 : i32
    %12 = arith.cmpi ne, %11, %c0_i32_10 : i32
    scf.if %12 {
      %c0_11 = arith.constant 0 : index
      %c0_12 = arith.constant 0 : index
      %13 = vector.load %arg9[%c0_11, %c0_12] : memref<64x128xf32, #tpu.memory_space<vmem>>, vector<64x128xf32>
      %c0_13 = arith.constant 0 : index
      %c0_14 = arith.constant 0 : index
      %14 = vector.load %arg6[%c0_13, %c0_14] : memref<1x128xf32, #tpu.memory_space<vmem>>, vector<1x128xf32>
      %15 = vector.broadcast %14 : vector<1x128xf32> to vector<64x128xf32>
      %16 = arith.addf %13, %15 : vector<64x128xf32>
      %c0_15 = arith.constant 0 : index
      %c0_16 = arith.constant 0 : index
      %c0_17 = arith.constant 0 : index
      %17 = vector.load %arg7[%c0_15, %c0_16, %c0_17] : memref<1x64x128xbf16, #tpu.memory_space<vmem>>, vector<1x64x128xbf16>
      %18 = vector.shape_cast %17 : vector<1x64x128xbf16> to vector<64x128xbf16>
      %19 = arith.extf %18 : vector<64x128xbf16> to vector<64x128xf32>
      %20 = arith.addf %16, %19 : vector<64x128xf32>
      %21 = arith.truncf %20 : vector<64x128xf32> to vector<64x128xbf16>
      %c0_18 = arith.constant 0 : index
      %c0_19 = arith.constant 0 : index
      %c0_20 = arith.constant 0 : index
      %22 = vector.load %arg8[%c0_18, %c0_19, %c0_20] : memref<1x64x128xbf16, #tpu.memory_space<vmem>>, vector<1x64x128xbf16>
      %23 = vector.shape_cast %22 : vector<1x64x128xbf16> to vector<64x128xbf16>
      %24 = vector.shape_cast %21 : vector<64x128xbf16> to vector<1x64x128xbf16>
      tpu.vector_store %arg8[%c0_18, %c0_19, %c0_20], %24 {strides = array<i32>} : memref<1x64x128xbf16, #tpu.memory_space<vmem>>, vector<1x64x128xbf16>,
    } else {
    }
    return
  }
  func.func @transform_0(%arg0: i32, %arg1: i32, %arg2: i32, %arg3: i32) -> (i32, i32, i32) {
    %c0_i32 = arith.constant 0 : i32
    return %arg0, %arg1, %arg3 : i32, i32, i32
  }
  func.func @transform_1(%arg0: i32, %arg1: i32, %arg2: i32, %arg3: i32) -> (i32, i32) {
    %c0_i32 = arith.constant 0 : i32
    return %arg3, %arg2 : i32, i32
  }
  func.func @transform_2(%arg0: i32, %arg1: i32, %arg2: i32, %arg3: i32) -> (i32, i32) {
    %c0_i32 = arith.constant 0 : i32
    %c0_i32_0 = arith.constant 0 : i32
    return %c0_i32, %arg2 : i32, i32
  }
  func.func @transform_3(%arg0: i32, %arg1: i32, %arg2: i32, %arg3: i32) -> (i32, i32, i32) {
    %c0_i32 = arith.constant 0 : i32
    return %arg0, %arg1, %arg2 : i32, i32, i32
  }
  func.func @transform_4(%arg0: i32, %arg1: i32, %arg2: i32, %arg3: i32) -> (i32, i32, i32) {
    %c0_i32 = arith.constant 0 : i32
    return %arg0, %arg1, %arg2 : i32, i32, i32
  }
}

module attributes {stable_mosaic.version = 11 : i64} {
  func.func @_conv_kernel(%arg0: i32, %arg1: i32, %arg2: memref<1x20x5x128xbf16, #tpu.memory_space<vmem>>, %arg3: memref<9x128x128xbf16, #tpu.memory_space<vmem>>, %arg4: memref<1x128xf32, #tpu.memory_space<vmem>>, %arg5: memref<1x4x4x128xbf16, #tpu.memory_space<vmem>>) attributes {dimension_semantics = [#tpu.dimension_semantics<parallel>, #tpu.dimension_semantics<arbitrary>], iteration_bounds = array<i64: 2, 1>, scalar_prefetch = 0 : i64, scratch_operands = 0 : i64, tpu.core_type = #tpu.core_type<tc>, window_params = [{transform_indices = @transform_0, window_bounds = array<i64: 1, 20, 5, 128>}, {pipeline_mode = #tpu.pipeline_mode<synchronous>, transform_indices = @transform_1, window_bounds = array<i64: 9, 128, 128>}, {pipeline_mode = #tpu.pipeline_mode<synchronous>, transform_indices = @transform_2, window_bounds = array<i64: 1, 128>}, {transform_indices = @transform_3, window_bounds = array<i64: 1, 4, 4, 128>}]} {
    %c4_i32 = arith.constant 4 : i32
    %0 = arith.muli %arg1, %c4_i32 : i32
    %cst = arith.constant 0.000000e+00 : f32
    %1 = vector.broadcast %cst : f32 to vector<16x128xf32>
    %c0_i32 = arith.constant 0 : i32
    %2 = arith.addi %c0_i32, %0 : i32
    %c0_i32_0 = arith.constant 0 : i32
    %3 = arith.addi %2, %c0_i32_0 : i32
    %c0 = arith.constant 0 : index
    %4 = arith.index_cast %3 : i32 to index
    %c0_1 = arith.constant 0 : index
    %c0_2 = arith.constant 0 : index
    %5 = vector.load %arg2[%c0, %4, %c0_1, %c0_2] : memref<1x20x5x128xbf16, #tpu.memory_space<vmem>>, vector<1x4x4x128xbf16>
    %6 = vector.shape_cast %5 : vector<1x4x4x128xbf16> to vector<4x4x128xbf16>
    %7 = vector.shape_cast %6 : vector<4x4x128xbf16> to vector<16x128xbf16>
    %c0_3 = arith.constant 0 : index
    %c0_4 = arith.constant 0 : index
    %c0_5 = arith.constant 0 : index
    %8 = vector.load %arg3[%c0_3, %c0_4, %c0_5] : memref<9x128x128xbf16, #tpu.memory_space<vmem>>, vector<1x128x128xbf16>
    %9 = vector.shape_cast %8 : vector<1x128x128xbf16> to vector<128x128xbf16>
    %cst_6 = arith.constant dense<0.000000e+00> : vector<16x128xf32>
    %10 = tpu.matmul %7, %9, %cst_6 {dimension_numbers = #tpu.dot_dimension_numbers<[1], [0], [0], [1], [0, 0, 1, 1], [], []>} : vector<16x128xbf16>, vector<128x128xbf16>, vector<16x128xf32> -> vector<16x128xf32>
    %11 = arith.addf %1, %10 : vector<16x128xf32>
    %c5_i32 = arith.constant 5 : i32
    %12 = arith.addi %c5_i32, %0 : i32
    %c0_i32_7 = arith.constant 0 : i32
    %13 = arith.addi %12, %c0_i32_7 : i32
    %c0_8 = arith.constant 0 : index
    %14 = arith.index_cast %13 : i32 to index
    %c0_9 = arith.constant 0 : index
    %c0_10 = arith.constant 0 : index
    %15 = vector.load %arg2[%c0_8, %14, %c0_9, %c0_10] : memref<1x20x5x128xbf16, #tpu.memory_space<vmem>>, vector<1x4x4x128xbf16>
    %16 = vector.shape_cast %15 : vector<1x4x4x128xbf16> to vector<4x4x128xbf16>
    %17 = vector.shape_cast %16 : vector<4x4x128xbf16> to vector<16x128xbf16>
    %c1 = arith.constant 1 : index
    %c0_11 = arith.constant 0 : index
    %c0_12 = arith.constant 0 : index
    %18 = vector.load %arg3[%c1, %c0_11, %c0_12] : memref<9x128x128xbf16, #tpu.memory_space<vmem>>, vector<1x128x128xbf16>
    %19 = vector.shape_cast %18 : vector<1x128x128xbf16> to vector<128x128xbf16>
    %cst_13 = arith.constant dense<0.000000e+00> : vector<16x128xf32>
    %20 = tpu.matmul %17, %19, %cst_13 {dimension_numbers = #tpu.dot_dimension_numbers<[1], [0], [0], [1], [0, 0, 1, 1], [], []>} : vector<16x128xbf16>, vector<128x128xbf16>, vector<16x128xf32> -> vector<16x128xf32>
    %21 = arith.addf %11, %20 : vector<16x128xf32>
    %c0_i32_14 = arith.constant 0 : i32
    %22 = arith.addi %c0_i32_14, %0 : i32
    %c0_i32_15 = arith.constant 0 : i32
    %23 = arith.addi %22, %c0_i32_15 : i32
    %c0_16 = arith.constant 0 : index
    %24 = arith.index_cast %23 : i32 to index
    %c1_17 = arith.constant 1 : index
    %c0_18 = arith.constant 0 : index
    %25 = vector.load %arg2[%c0_16, %24, %c1_17, %c0_18] : memref<1x20x5x128xbf16, #tpu.memory_space<vmem>>, vector<1x4x4x128xbf16>
    %26 = vector.shape_cast %25 : vector<1x4x4x128xbf16> to vector<4x4x128xbf16>
    %27 = vector.shape_cast %26 : vector<4x4x128xbf16> to vector<16x128xbf16>
    %c2 = arith.constant 2 : index
    %c0_19 = arith.constant 0 : index
    %c0_20 = arith.constant 0 : index
    %28 = vector.load %arg3[%c2, %c0_19, %c0_20] : memref<9x128x128xbf16, #tpu.memory_space<vmem>>, vector<1x128x128xbf16>
    %29 = vector.shape_cast %28 : vector<1x128x128xbf16> to vector<128x128xbf16>
    %cst_21 = arith.constant dense<0.000000e+00> : vector<16x128xf32>
    %30 = tpu.matmul %27, %29, %cst_21 {dimension_numbers = #tpu.dot_dimension_numbers<[1], [0], [0], [1], [0, 0, 1, 1], [], []>} : vector<16x128xbf16>, vector<128x128xbf16>, vector<16x128xf32> -> vector<16x128xf32>
    %31 = arith.addf %21, %30 : vector<16x128xf32>
    %c10_i32 = arith.constant 10 : i32
    %32 = arith.addi %c10_i32, %0 : i32
    %c0_i32_22 = arith.constant 0 : i32
    %33 = arith.addi %32, %c0_i32_22 : i32
    %c0_23 = arith.constant 0 : index
    %34 = arith.index_cast %33 : i32 to index
    %c0_24 = arith.constant 0 : index
    %c0_25 = arith.constant 0 : index
    %35 = vector.load %arg2[%c0_23, %34, %c0_24, %c0_25] : memref<1x20x5x128xbf16, #tpu.memory_space<vmem>>, vector<1x4x4x128xbf16>
    %36 = vector.shape_cast %35 : vector<1x4x4x128xbf16> to vector<4x4x128xbf16>
    %37 = vector.shape_cast %36 : vector<4x4x128xbf16> to vector<16x128xbf16>
    %c3 = arith.constant 3 : index
    %c0_26 = arith.constant 0 : index
    %c0_27 = arith.constant 0 : index
    %38 = vector.load %arg3[%c3, %c0_26, %c0_27] : memref<9x128x128xbf16, #tpu.memory_space<vmem>>, vector<1x128x128xbf16>
    %39 = vector.shape_cast %38 : vector<1x128x128xbf16> to vector<128x128xbf16>
    %cst_28 = arith.constant dense<0.000000e+00> : vector<16x128xf32>
    %40 = tpu.matmul %37, %39, %cst_28 {dimension_numbers = #tpu.dot_dimension_numbers<[1], [0], [0], [1], [0, 0, 1, 1], [], []>} : vector<16x128xbf16>, vector<128x128xbf16>, vector<16x128xf32> -> vector<16x128xf32>
    %41 = arith.addf %31, %40 : vector<16x128xf32>
    %c15_i32 = arith.constant 15 : i32
    %42 = arith.addi %c15_i32, %0 : i32
    %c0_i32_29 = arith.constant 0 : i32
    %43 = arith.addi %42, %c0_i32_29 : i32
    %c0_30 = arith.constant 0 : index
    %44 = arith.index_cast %43 : i32 to index
    %c0_31 = arith.constant 0 : index
    %c0_32 = arith.constant 0 : index
    %45 = vector.load %arg2[%c0_30, %44, %c0_31, %c0_32] : memref<1x20x5x128xbf16, #tpu.memory_space<vmem>>, vector<1x4x4x128xbf16>
    %46 = vector.shape_cast %45 : vector<1x4x4x128xbf16> to vector<4x4x128xbf16>
    %47 = vector.shape_cast %46 : vector<4x4x128xbf16> to vector<16x128xbf16>
    %c4 = arith.constant 4 : index
    %c0_33 = arith.constant 0 : index
    %c0_34 = arith.constant 0 : index
    %48 = vector.load %arg3[%c4, %c0_33, %c0_34] : memref<9x128x128xbf16, #tpu.memory_space<vmem>>, vector<1x128x128xbf16>
    %49 = vector.shape_cast %48 : vector<1x128x128xbf16> to vector<128x128xbf16>
    %cst_35 = arith.constant dense<0.000000e+00> : vector<16x128xf32>
    %50 = tpu.matmul %47, %49, %cst_35 {dimension_numbers = #tpu.dot_dimension_numbers<[1], [0], [0], [1], [0, 0, 1, 1], [], []>} : vector<16x128xbf16>, vector<128x128xbf16>, vector<16x128xf32> -> vector<16x128xf32>
    %51 = arith.addf %41, %50 : vector<16x128xf32>
    %c10_i32_36 = arith.constant 10 : i32
    %52 = arith.addi %c10_i32_36, %0 : i32
    %c0_i32_37 = arith.constant 0 : i32
    %53 = arith.addi %52, %c0_i32_37 : i32
    %c0_38 = arith.constant 0 : index
    %54 = arith.index_cast %53 : i32 to index
    %c1_39 = arith.constant 1 : index
    %c0_40 = arith.constant 0 : index
    %55 = vector.load %arg2[%c0_38, %54, %c1_39, %c0_40] : memref<1x20x5x128xbf16, #tpu.memory_space<vmem>>, vector<1x4x4x128xbf16>
    %56 = vector.shape_cast %55 : vector<1x4x4x128xbf16> to vector<4x4x128xbf16>
    %57 = vector.shape_cast %56 : vector<4x4x128xbf16> to vector<16x128xbf16>
    %c5 = arith.constant 5 : index
    %c0_41 = arith.constant 0 : index
    %c0_42 = arith.constant 0 : index
    %58 = vector.load %arg3[%c5, %c0_41, %c0_42] : memref<9x128x128xbf16, #tpu.memory_space<vmem>>, vector<1x128x128xbf16>
    %59 = vector.shape_cast %58 : vector<1x128x128xbf16> to vector<128x128xbf16>
    %cst_43 = arith.constant dense<0.000000e+00> : vector<16x128xf32>
    %60 = tpu.matmul %57, %59, %cst_43 {dimension_numbers = #tpu.dot_dimension_numbers<[1], [0], [0], [1], [0, 0, 1, 1], [], []>} : vector<16x128xbf16>, vector<128x128xbf16>, vector<16x128xf32> -> vector<16x128xf32>
    %61 = arith.addf %51, %60 : vector<16x128xf32>
    %c0_i32_44 = arith.constant 0 : i32
    %62 = arith.addi %c0_i32_44, %0 : i32
    %c1_i32 = arith.constant 1 : i32
    %63 = arith.addi %62, %c1_i32 : i32
    %c0_45 = arith.constant 0 : index
    %64 = arith.index_cast %63 : i32 to index
    %c0_46 = arith.constant 0 : index
    %c0_47 = arith.constant 0 : index
    %65 = vector.load %arg2[%c0_45, %64, %c0_46, %c0_47] : memref<1x20x5x128xbf16, #tpu.memory_space<vmem>>, vector<1x4x4x128xbf16>
    %66 = vector.shape_cast %65 : vector<1x4x4x128xbf16> to vector<4x4x128xbf16>
    %67 = vector.shape_cast %66 : vector<4x4x128xbf16> to vector<16x128xbf16>
    %c6 = arith.constant 6 : index
    %c0_48 = arith.constant 0 : index
    %c0_49 = arith.constant 0 : index
    %68 = vector.load %arg3[%c6, %c0_48, %c0_49] : memref<9x128x128xbf16, #tpu.memory_space<vmem>>, vector<1x128x128xbf16>
    %69 = vector.shape_cast %68 : vector<1x128x128xbf16> to vector<128x128xbf16>
    %cst_50 = arith.constant dense<0.000000e+00> : vector<16x128xf32>
    %70 = tpu.matmul %67, %69, %cst_50 {dimension_numbers = #tpu.dot_dimension_numbers<[1], [0], [0], [1], [0, 0, 1, 1], [], []>} : vector<16x128xbf16>, vector<128x128xbf16>, vector<16x128xf32> -> vector<16x128xf32>
    %71 = arith.addf %61, %70 : vector<16x128xf32>
    %c5_i32_51 = arith.constant 5 : i32
    %72 = arith.addi %c5_i32_51, %0 : i32
    %c1_i32_52 = arith.constant 1 : i32
    %73 = arith.addi %72, %c1_i32_52 : i32
    %c0_53 = arith.constant 0 : index
    %74 = arith.index_cast %73 : i32 to index
    %c0_54 = arith.constant 0 : index
    %c0_55 = arith.constant 0 : index
    %75 = vector.load %arg2[%c0_53, %74, %c0_54, %c0_55] : memref<1x20x5x128xbf16, #tpu.memory_space<vmem>>, vector<1x4x4x128xbf16>
    %76 = vector.shape_cast %75 : vector<1x4x4x128xbf16> to vector<4x4x128xbf16>
    %77 = vector.shape_cast %76 : vector<4x4x128xbf16> to vector<16x128xbf16>
    %c7 = arith.constant 7 : index
    %c0_56 = arith.constant 0 : index
    %c0_57 = arith.constant 0 : index
    %78 = vector.load %arg3[%c7, %c0_56, %c0_57] : memref<9x128x128xbf16, #tpu.memory_space<vmem>>, vector<1x128x128xbf16>
    %79 = vector.shape_cast %78 : vector<1x128x128xbf16> to vector<128x128xbf16>
    %cst_58 = arith.constant dense<0.000000e+00> : vector<16x128xf32>
    %80 = tpu.matmul %77, %79, %cst_58 {dimension_numbers = #tpu.dot_dimension_numbers<[1], [0], [0], [1], [0, 0, 1, 1], [], []>} : vector<16x128xbf16>, vector<128x128xbf16>, vector<16x128xf32> -> vector<16x128xf32>
    %81 = arith.addf %71, %80 : vector<16x128xf32>
    %c0_i32_59 = arith.constant 0 : i32
    %82 = arith.addi %c0_i32_59, %0 : i32
    %c1_i32_60 = arith.constant 1 : i32
    %83 = arith.addi %82, %c1_i32_60 : i32
    %c0_61 = arith.constant 0 : index
    %84 = arith.index_cast %83 : i32 to index
    %c1_62 = arith.constant 1 : index
    %c0_63 = arith.constant 0 : index
    %85 = vector.load %arg2[%c0_61, %84, %c1_62, %c0_63] : memref<1x20x5x128xbf16, #tpu.memory_space<vmem>>, vector<1x4x4x128xbf16>
    %86 = vector.shape_cast %85 : vector<1x4x4x128xbf16> to vector<4x4x128xbf16>
    %87 = vector.shape_cast %86 : vector<4x4x128xbf16> to vector<16x128xbf16>
    %c8 = arith.constant 8 : index
    %c0_64 = arith.constant 0 : index
    %c0_65 = arith.constant 0 : index
    %88 = vector.load %arg3[%c8, %c0_64, %c0_65] : memref<9x128x128xbf16, #tpu.memory_space<vmem>>, vector<1x128x128xbf16>
    %89 = vector.shape_cast %88 : vector<1x128x128xbf16> to vector<128x128xbf16>
    %cst_66 = arith.constant dense<0.000000e+00> : vector<16x128xf32>
    %90 = tpu.matmul %87, %89, %cst_66 {dimension_numbers = #tpu.dot_dimension_numbers<[1], [0], [0], [1], [0, 0, 1, 1], [], []>} : vector<16x128xbf16>, vector<128x128xbf16>, vector<16x128xf32> -> vector<16x128xf32>
    %91 = arith.addf %81, %90 : vector<16x128xf32>
    %c0_67 = arith.constant 0 : index
    %c0_68 = arith.constant 0 : index
    %92 = vector.load %arg4[%c0_67, %c0_68] : memref<1x128xf32, #tpu.memory_space<vmem>>, vector<1x128xf32>
    %93 = vector.broadcast %92 : vector<1x128xf32> to vector<16x128xf32>
    %94 = arith.addf %91, %93 : vector<16x128xf32>
    %95 = arith.negf %94 : vector<16x128xf32>
    %96 = math.exp %95 : vector<16x128xf32>
    %cst_69 = arith.constant 1.000000e+00 : f32
    %97 = vector.broadcast %cst_69 : f32 to vector<16x128xf32>
    %98 = arith.addf %97, %96 : vector<16x128xf32>
    %99 = arith.divf %97, %98 : vector<16x128xf32>
    %100 = arith.mulf %94, %99 : vector<16x128xf32>
    %101 = vector.shape_cast %100 : vector<16x128xf32> to vector<4x4x128xf32>
    %102 = arith.truncf %101 : vector<4x4x128xf32> to vector<4x4x128xbf16>
    %c0_70 = arith.constant 0 : index
    %c0_71 = arith.constant 0 : index
    %c0_72 = arith.constant 0 : index
    %c0_73 = arith.constant 0 : index
    %103 = vector.load %arg5[%c0_70, %c0_71, %c0_72, %c0_73] : memref<1x4x4x128xbf16, #tpu.memory_space<vmem>>, vector<1x4x4x128xbf16>
    %104 = vector.shape_cast %103 : vector<1x4x4x128xbf16> to vector<4x4x128xbf16>
    %105 = vector.shape_cast %102 : vector<4x4x128xbf16> to vector<1x4x4x128xbf16>
    tpu.vector_store %arg5[%c0_70, %c0_71, %c0_72, %c0_73], %105 {strides = array<i32>} : memref<1x4x4x128xbf16, #tpu.memory_space<vmem>>, vector<1x4x4x128xbf16>,
    return
  }
  func.func @transform_0(%arg0: i32, %arg1: i32) -> (i32, i32, i32, i32) {
    %c0_i32 = arith.constant 0 : i32
    %c0_i32_0 = arith.constant 0 : i32
    %c0_i32_1 = arith.constant 0 : i32
    %c0_i32_2 = arith.constant 0 : i32
    return %arg0, %c0_i32, %c0_i32_0, %c0_i32_1 : i32, i32, i32, i32
  }
  func.func @transform_1(%arg0: i32, %arg1: i32) -> (i32, i32, i32) {
    %c0_i32 = arith.constant 0 : i32
    %c0_i32_0 = arith.constant 0 : i32
    %c0_i32_1 = arith.constant 0 : i32
    %c0_i32_2 = arith.constant 0 : i32
    return %c0_i32, %c0_i32_0, %c0_i32_1 : i32, i32, i32
  }
  func.func @transform_2(%arg0: i32, %arg1: i32) -> (i32, i32) {
    %c0_i32 = arith.constant 0 : i32
    %c0_i32_0 = arith.constant 0 : i32
    %c0_i32_1 = arith.constant 0 : i32
    return %c0_i32, %c0_i32_0 : i32, i32
  }
  func.func @transform_3(%arg0: i32, %arg1: i32) -> (i32, i32, i32, i32) {
    %c0_i32 = arith.constant 0 : i32
    %c0_i32_0 = arith.constant 0 : i32
    %c0_i32_1 = arith.constant 0 : i32
    return %arg0, %arg1, %c0_i32, %c0_i32_0 : i32, i32, i32, i32
  }
}

module attributes {stable_mosaic.version = 11 : i64} {
  func.func @_gap_kernel(%arg0: i32, %arg1: memref<2x16x128xbf16, #tpu.memory_space<vmem>>, %arg2: memref<2x128xf32, #tpu.memory_space<vmem>>) attributes {dimension_semantics = [#tpu.dimension_semantics<arbitrary>], iteration_bounds = array<i64: 1>, scalar_prefetch = 0 : i64, scratch_operands = 0 : i64, tpu.core_type = #tpu.core_type<tc>, window_params = [{transform_indices = @transform_0, window_bounds = array<i64: 2, 16, 128>}, {pipeline_mode = #tpu.pipeline_mode<synchronous>, transform_indices = @transform_1, window_bounds = array<i64: 2, 128>}]} {
    %c0_i32 = arith.constant 0 : i32
    %0 = arith.cmpi eq, %arg0, %c0_i32 : i32
    %1 = arith.extui %0 : i1 to i32
    %c0_i32_0 = arith.constant 0 : i32
    %2 = arith.cmpi ne, %1, %c0_i32_0 : i32
    scf.if %2 {
      %cst_8 = arith.constant 0.000000e+00 : f32
      %11 = vector.broadcast %cst_8 : f32 to vector<2x128xf32>
      %c0_9 = arith.constant 0 : index
      %c0_10 = arith.constant 0 : index
      %12 = vector.load %arg2[%c0_9, %c0_10] : memref<2x128xf32, #tpu.memory_space<vmem>>, vector<2x128xf32>
      tpu.vector_store %arg2[%c0_9, %c0_10], %11 {strides = array<i32>} : memref<2x128xf32, #tpu.memory_space<vmem>>, vector<2x128xf32>,
    } else {
    }
    %c0 = arith.constant 0 : index
    %c0_1 = arith.constant 0 : index
    %3 = vector.load %arg2[%c0, %c0_1] : memref<2x128xf32, #tpu.memory_space<vmem>>, vector<2x128xf32>
    %c0_2 = arith.constant 0 : index
    %c0_3 = arith.constant 0 : index
    %c0_4 = arith.constant 0 : index
    %4 = vector.load %arg1[%c0_2, %c0_3, %c0_4] : memref<2x16x128xbf16, #tpu.memory_space<vmem>>, vector<2x16x128xbf16>
    %5 = arith.extf %4 : vector<2x16x128xbf16> to vector<2x16x128xf32>
    %cst = arith.constant dense<0.000000e+00> : vector<2x128xf32>
    %6 = vector.multi_reduction <add>, %5, %cst [1] : vector<2x16x128xf32> to vector<2x128xf32>
    %cst_5 = arith.constant 6.250000e-02 : f32
    %7 = vector.broadcast %cst_5 : f32 to vector<2x128xf32>
    %8 = arith.mulf %6, %7 : vector<2x128xf32>
    %9 = arith.addf %3, %8 : vector<2x128xf32>
    %c0_6 = arith.constant 0 : index
    %c0_7 = arith.constant 0 : index
    %10 = vector.load %arg2[%c0_6, %c0_7] : memref<2x128xf32, #tpu.memory_space<vmem>>, vector<2x128xf32>
    tpu.vector_store %arg2[%c0_6, %c0_7], %9 {strides = array<i32>} : memref<2x128xf32, #tpu.memory_space<vmem>>, vector<2x128xf32>,
    return
  }
  func.func @transform_0(%arg0: i32) -> (i32, i32, i32) {
    %c0_i32 = arith.constant 0 : i32
    %c0_i32_0 = arith.constant 0 : i32
    %c0_i32_1 = arith.constant 0 : i32
    return %c0_i32, %arg0, %c0_i32_0 : i32, i32, i32
  }
  func.func @transform_1(%arg0: i32) -> (i32, i32) {
    %c0_i32 = arith.constant 0 : i32
    %c0_i32_0 = arith.constant 0 : i32
    %c0_i32_1 = arith.constant 0 : i32
    return %c0_i32, %c0_i32_0 : i32, i32
  }
}

module attributes {stable_mosaic.version = 11 : i64} {
  func.func @_pw_kernel(%arg0: i32, %arg1: i32, %arg2: i32, %arg3: i32, %arg4: memref<1x16x128xbf16, #tpu.memory_space<vmem>>, %arg5: memref<1x1x128xf32, #tpu.memory_space<vmem>>, %arg6: memref<128x128xbf16, #tpu.memory_space<vmem>>, %arg7: memref<1x128xf32, #tpu.memory_space<vmem>>, %arg8: memref<1x16x128xbf16, #tpu.memory_space<vmem>>, %arg9: memref<16x128xf32, #tpu.memory_space<vmem>>) attributes {dimension_semantics = [#tpu.dimension_semantics<parallel>, #tpu.dimension_semantics<parallel>, #tpu.dimension_semantics<parallel>, #tpu.dimension_semantics<arbitrary>], iteration_bounds = array<i64: 2, 1, 1, 1>, scalar_prefetch = 0 : i64, scratch_operands = 1 : i64, tpu.core_type = #tpu.core_type<tc>, window_params = [{transform_indices = @transform_0, window_bounds = array<i64: 1, 16, 128>}, {transform_indices = @transform_1, window_bounds = array<i64: 1, 1, 128>}, {transform_indices = @transform_2, window_bounds = array<i64: 128, 128>}, {transform_indices = @transform_3, window_bounds = array<i64: 1, 128>}, {transform_indices = @transform_4, window_bounds = array<i64: 1, 16, 128>}]} {
    %c0_i32 = arith.constant 0 : i32
    %0 = arith.cmpi eq, %arg3, %c0_i32 : i32
    %1 = arith.extui %0 : i1 to i32
    %c0_i32_0 = arith.constant 0 : i32
    %2 = arith.cmpi ne, %1, %c0_i32_0 : i32
    scf.if %2 {
      %cst_14 = arith.constant 0.000000e+00 : f32
      %19 = vector.broadcast %cst_14 : f32 to vector<16x128xf32>
      %c0_15 = arith.constant 0 : index
      %c0_16 = arith.constant 0 : index
      %20 = vector.load %arg9[%c0_15, %c0_16] : memref<16x128xf32, #tpu.memory_space<vmem>>, vector<16x128xf32>
      tpu.vector_store %arg9[%c0_15, %c0_16], %19 {strides = array<i32>} : memref<16x128xf32, #tpu.memory_space<vmem>>, vector<16x128xf32>,
    } else {
    }
    %c0 = arith.constant 0 : index
    %c0_1 = arith.constant 0 : index
    %c0_2 = arith.constant 0 : index
    %3 = vector.load %arg4[%c0, %c0_1, %c0_2] : memref<1x16x128xbf16, #tpu.memory_space<vmem>>, vector<1x16x128xbf16>
    %4 = vector.shape_cast %3 : vector<1x16x128xbf16> to vector<16x128xbf16>
    %5 = arith.extf %4 : vector<16x128xbf16> to vector<16x128xf32>
    %c0_3 = arith.constant 0 : index
    %c0_4 = arith.constant 0 : index
    %c0_5 = arith.constant 0 : index
    %6 = vector.load %arg5[%c0_3, %c0_4, %c0_5] : memref<1x1x128xf32, #tpu.memory_space<vmem>>, vector<1x1x128xf32>
    %7 = vector.shape_cast %6 : vector<1x1x128xf32> to vector<1x128xf32>
    %8 = vector.broadcast %7 : vector<1x128xf32> to vector<16x128xf32>
    %9 = arith.mulf %5, %8 : vector<16x128xf32>
    %10 = arith.truncf %9 : vector<16x128xf32> to vector<16x128xbf16>
    %c0_6 = arith.constant 0 : index
    %c0_7 = arith.constant 0 : index
    %11 = vector.load %arg9[%c0_6, %c0_7] : memref<16x128xf32, #tpu.memory_space<vmem>>, vector<16x128xf32>
    %c0_8 = arith.constant 0 : index
    %c0_9 = arith.constant 0 : index
    %12 = vector.load %arg6[%c0_8, %c0_9] : memref<128x128xbf16, #tpu.memory_space<vmem>>, vector<128x128xbf16>
    %cst = arith.constant dense<0.000000e+00> : vector<16x128xf32>
    %13 = tpu.matmul %10, %12, %cst {dimension_numbers = #tpu.dot_dimension_numbers<[1], [0], [0], [1], [0, 0, 1, 1], [], []>} : vector<16x128xbf16>, vector<128x128xbf16>, vector<16x128xf32> -> vector<16x128xf32>
    %14 = arith.addf %11, %13 : vector<16x128xf32>
    %c0_10 = arith.constant 0 : index
    %c0_11 = arith.constant 0 : index
    %15 = vector.load %arg9[%c0_10, %c0_11] : memref<16x128xf32, #tpu.memory_space<vmem>>, vector<16x128xf32>
    tpu.vector_store %arg9[%c0_10, %c0_11], %14 {strides = array<i32>} : memref<16x128xf32, #tpu.memory_space<vmem>>, vector<16x128xf32>,
    %c0_i32_12 = arith.constant 0 : i32
    %16 = arith.cmpi eq, %arg3, %c0_i32_12 : i32
    %17 = arith.extui %16 : i1 to i32
    %c0_i32_13 = arith.constant 0 : i32
    %18 = arith.cmpi ne, %17, %c0_i32_13 : i32
    scf.if %18 {
      %c0_14 = arith.constant 0 : index
      %c0_15 = arith.constant 0 : index
      %19 = vector.load %arg9[%c0_14, %c0_15] : memref<16x128xf32, #tpu.memory_space<vmem>>, vector<16x128xf32>
      %c0_16 = arith.constant 0 : index
      %c0_17 = arith.constant 0 : index
      %20 = vector.load %arg7[%c0_16, %c0_17] : memref<1x128xf32, #tpu.memory_space<vmem>>, vector<1x128xf32>
      %21 = vector.broadcast %20 : vector<1x128xf32> to vector<16x128xf32>
      %22 = arith.addf %19, %21 : vector<16x128xf32>
      %23 = arith.truncf %22 : vector<16x128xf32> to vector<16x128xbf16>
      %c0_18 = arith.constant 0 : index
      %c0_19 = arith.constant 0 : index
      %c0_20 = arith.constant 0 : index
      %24 = vector.load %arg8[%c0_18, %c0_19, %c0_20] : memref<1x16x128xbf16, #tpu.memory_space<vmem>>, vector<1x16x128xbf16>
      %25 = vector.shape_cast %24 : vector<1x16x128xbf16> to vector<16x128xbf16>
      %26 = vector.shape_cast %23 : vector<16x128xbf16> to vector<1x16x128xbf16>
      tpu.vector_store %arg8[%c0_18, %c0_19, %c0_20], %26 {strides = array<i32>} : memref<1x16x128xbf16, #tpu.memory_space<vmem>>, vector<1x16x128xbf16>,
    } else {
    }
    return
  }
  func.func @transform_0(%arg0: i32, %arg1: i32, %arg2: i32, %arg3: i32) -> (i32, i32, i32) {
    %c0_i32 = arith.constant 0 : i32
    return %arg0, %arg1, %arg3 : i32, i32, i32
  }
  func.func @transform_1(%arg0: i32, %arg1: i32, %arg2: i32, %arg3: i32) -> (i32, i32, i32) {
    %c0_i32 = arith.constant 0 : i32
    %c0_i32_0 = arith.constant 0 : i32
    return %arg0, %c0_i32, %arg3 : i32, i32, i32
  }
  func.func @transform_2(%arg0: i32, %arg1: i32, %arg2: i32, %arg3: i32) -> (i32, i32) {
    %c0_i32 = arith.constant 0 : i32
    return %arg3, %arg2 : i32, i32
  }
  func.func @transform_3(%arg0: i32, %arg1: i32, %arg2: i32, %arg3: i32) -> (i32, i32) {
    %c0_i32 = arith.constant 0 : i32
    %c0_i32_0 = arith.constant 0 : i32
    return %c0_i32, %arg2 : i32, i32
  }
  func.func @transform_4(%arg0: i32, %arg1: i32, %arg2: i32, %arg3: i32) -> (i32, i32, i32) {
    %c0_i32 = arith.constant 0 : i32
    return %arg0, %arg1, %arg2 : i32, i32, i32
  }
}

module attributes {stable_mosaic.version = 11 : i64} {
  func.func @_conv_kernel(%arg0: i32, %arg1: i32, %arg2: memref<1x6x6x128xbf16, #tpu.memory_space<vmem>>, %arg3: memref<9x128x128xbf16, #tpu.memory_space<vmem>>, %arg4: memref<1x128xf32, #tpu.memory_space<vmem>>, %arg5: memref<1x4x4x128xbf16, #tpu.memory_space<vmem>>) attributes {dimension_semantics = [#tpu.dimension_semantics<parallel>, #tpu.dimension_semantics<arbitrary>], iteration_bounds = array<i64: 2, 1>, scalar_prefetch = 0 : i64, scratch_operands = 0 : i64, tpu.core_type = #tpu.core_type<tc>, window_params = [{transform_indices = @transform_0, window_bounds = array<i64: 1, 6, 6, 128>}, {pipeline_mode = #tpu.pipeline_mode<synchronous>, transform_indices = @transform_1, window_bounds = array<i64: 9, 128, 128>}, {pipeline_mode = #tpu.pipeline_mode<synchronous>, transform_indices = @transform_2, window_bounds = array<i64: 1, 128>}, {transform_indices = @transform_3, window_bounds = array<i64: 1, 4, 4, 128>}]} {
    %c4_i32 = arith.constant 4 : i32
    %0 = arith.muli %arg1, %c4_i32 : i32
    %cst = arith.constant 0.000000e+00 : f32
    %1 = vector.broadcast %cst : f32 to vector<16x128xf32>
    %c0_i32 = arith.constant 0 : i32
    %2 = arith.addi %c0_i32, %0 : i32
    %c0_i32_0 = arith.constant 0 : i32
    %3 = arith.addi %2, %c0_i32_0 : i32
    %c0 = arith.constant 0 : index
    %4 = arith.index_cast %3 : i32 to index
    %c0_1 = arith.constant 0 : index
    %c0_2 = arith.constant 0 : index
    %5 = vector.load %arg2[%c0, %4, %c0_1, %c0_2] : memref<1x6x6x128xbf16, #tpu.memory_space<vmem>>, vector<1x4x4x128xbf16>
    %6 = vector.shape_cast %5 : vector<1x4x4x128xbf16> to vector<4x4x128xbf16>
    %7 = vector.shape_cast %6 : vector<4x4x128xbf16> to vector<16x128xbf16>
    %c0_3 = arith.constant 0 : index
    %c0_4 = arith.constant 0 : index
    %c0_5 = arith.constant 0 : index
    %8 = vector.load %arg3[%c0_3, %c0_4, %c0_5] : memref<9x128x128xbf16, #tpu.memory_space<vmem>>, vector<1x128x128xbf16>
    %9 = vector.shape_cast %8 : vector<1x128x128xbf16> to vector<128x128xbf16>
    %cst_6 = arith.constant dense<0.000000e+00> : vector<16x128xf32>
    %10 = tpu.matmul %7, %9, %cst_6 {dimension_numbers = #tpu.dot_dimension_numbers<[1], [0], [0], [1], [0, 0, 1, 1], [], []>} : vector<16x128xbf16>, vector<128x128xbf16>, vector<16x128xf32> -> vector<16x128xf32>
    %11 = arith.addf %1, %10 : vector<16x128xf32>
    %c0_i32_7 = arith.constant 0 : i32
    %12 = arith.addi %c0_i32_7, %0 : i32
    %c0_i32_8 = arith.constant 0 : i32
    %13 = arith.addi %12, %c0_i32_8 : i32
    %c0_9 = arith.constant 0 : index
    %14 = arith.index_cast %13 : i32 to index
    %c1 = arith.constant 1 : index
    %c0_10 = arith.constant 0 : index
    %15 = vector.load %arg2[%c0_9, %14, %c1, %c0_10] : memref<1x6x6x128xbf16, #tpu.memory_space<vmem>>, vector<1x4x4x128xbf16>
    %16 = vector.shape_cast %15 : vector<1x4x4x128xbf16> to vector<4x4x128xbf16>
    %17 = vector.shape_cast %16 : vector<4x4x128xbf16> to vector<16x128xbf16>
    %c1_11 = arith.constant 1 : index
    %c0_12 = arith.constant 0 : index
    %c0_13 = arith.constant 0 : index
    %18 = vector.load %arg3[%c1_11, %c0_12, %c0_13] : memref<9x128x128xbf16, #tpu.memory_space<vmem>>, vector<1x128x128xbf16>
    %19 = vector.shape_cast %18 : vector<1x128x128xbf16> to vector<128x128xbf16>
    %cst_14 = arith.constant dense<0.000000e+00> : vector<16x128xf32>
    %20 = tpu.matmul %17, %19, %cst_14 {dimension_numbers = #tpu.dot_dimension_numbers<[1], [0], [0], [1], [0, 0, 1, 1], [], []>} : vector<16x128xbf16>, vector<128x128xbf16>, vector<16x128xf32> -> vector<16x128xf32>
    %21 = arith.addf %11, %20 : vector<16x128xf32>
    %c0_i32_15 = arith.constant 0 : i32
    %22 = arith.addi %c0_i32_15, %0 : i32
    %c0_i32_16 = arith.constant 0 : i32
    %23 = arith.addi %22, %c0_i32_16 : i32
    %c0_17 = arith.constant 0 : index
    %24 = arith.index_cast %23 : i32 to index
    %c2 = arith.constant 2 : index
    %c0_18 = arith.constant 0 : index
    %25 = vector.load %arg2[%c0_17, %24, %c2, %c0_18] : memref<1x6x6x128xbf16, #tpu.memory_space<vmem>>, vector<1x4x4x128xbf16>
    %26 = vector.shape_cast %25 : vector<1x4x4x128xbf16> to vector<4x4x128xbf16>
    %27 = vector.shape_cast %26 : vector<4x4x128xbf16> to vector<16x128xbf16>
    %c2_19 = arith.constant 2 : index
    %c0_20 = arith.constant 0 : index
    %c0_21 = arith.constant 0 : index
    %28 = vector.load %arg3[%c2_19, %c0_20, %c0_21] : memref<9x128x128xbf16, #tpu.memory_space<vmem>>, vector<1x128x128xbf16>
    %29 = vector.shape_cast %28 : vector<1x128x128xbf16> to vector<128x128xbf16>
    %cst_22 = arith.constant dense<0.000000e+00> : vector<16x128xf32>
    %30 = tpu.matmul %27, %29, %cst_22 {dimension_numbers = #tpu.dot_dimension_numbers<[1], [0], [0], [1], [0, 0, 1, 1], [], []>} : vector<16x128xbf16>, vector<128x128xbf16>, vector<16x128xf32> -> vector<16x128xf32>
    %31 = arith.addf %21, %30 : vector<16x128xf32>
    %c0_i32_23 = arith.constant 0 : i32
    %32 = arith.addi %c0_i32_23, %0 : i32
    %c1_i32 = arith.constant 1 : i32
    %33 = arith.addi %32, %c1_i32 : i32
    %c0_24 = arith.constant 0 : index
    %34 = arith.index_cast %33 : i32 to index
    %c0_25 = arith.constant 0 : index
    %c0_26 = arith.constant 0 : index
    %35 = vector.load %arg2[%c0_24, %34, %c0_25, %c0_26] : memref<1x6x6x128xbf16, #tpu.memory_space<vmem>>, vector<1x4x4x128xbf16>
    %36 = vector.shape_cast %35 : vector<1x4x4x128xbf16> to vector<4x4x128xbf16>
    %37 = vector.shape_cast %36 : vector<4x4x128xbf16> to vector<16x128xbf16>
    %c3 = arith.constant 3 : index
    %c0_27 = arith.constant 0 : index
    %c0_28 = arith.constant 0 : index
    %38 = vector.load %arg3[%c3, %c0_27, %c0_28] : memref<9x128x128xbf16, #tpu.memory_space<vmem>>, vector<1x128x128xbf16>
    %39 = vector.shape_cast %38 : vector<1x128x128xbf16> to vector<128x128xbf16>
    %cst_29 = arith.constant dense<0.000000e+00> : vector<16x128xf32>
    %40 = tpu.matmul %37, %39, %cst_29 {dimension_numbers = #tpu.dot_dimension_numbers<[1], [0], [0], [1], [0, 0, 1, 1], [], []>} : vector<16x128xbf16>, vector<128x128xbf16>, vector<16x128xf32> -> vector<16x128xf32>
    %41 = arith.addf %31, %40 : vector<16x128xf32>
    %c0_i32_30 = arith.constant 0 : i32
    %42 = arith.addi %c0_i32_30, %0 : i32
    %c1_i32_31 = arith.constant 1 : i32
    %43 = arith.addi %42, %c1_i32_31 : i32
    %c0_32 = arith.constant 0 : index
    %44 = arith.index_cast %43 : i32 to index
    %c1_33 = arith.constant 1 : index
    %c0_34 = arith.constant 0 : index
    %45 = vector.load %arg2[%c0_32, %44, %c1_33, %c0_34] : memref<1x6x6x128xbf16, #tpu.memory_space<vmem>>, vector<1x4x4x128xbf16>
    %46 = vector.shape_cast %45 : vector<1x4x4x128xbf16> to vector<4x4x128xbf16>
    %47 = vector.shape_cast %46 : vector<4x4x128xbf16> to vector<16x128xbf16>
    %c4 = arith.constant 4 : index
    %c0_35 = arith.constant 0 : index
    %c0_36 = arith.constant 0 : index
    %48 = vector.load %arg3[%c4, %c0_35, %c0_36] : memref<9x128x128xbf16, #tpu.memory_space<vmem>>, vector<1x128x128xbf16>
    %49 = vector.shape_cast %48 : vector<1x128x128xbf16> to vector<128x128xbf16>
    %cst_37 = arith.constant dense<0.000000e+00> : vector<16x128xf32>
    %50 = tpu.matmul %47, %49, %cst_37 {dimension_numbers = #tpu.dot_dimension_numbers<[1], [0], [0], [1], [0, 0, 1, 1], [], []>} : vector<16x128xbf16>, vector<128x128xbf16>, vector<16x128xf32> -> vector<16x128xf32>
    %51 = arith.addf %41, %50 : vector<16x128xf32>
    %c0_i32_38 = arith.constant 0 : i32
    %52 = arith.addi %c0_i32_38, %0 : i32
    %c1_i32_39 = arith.constant 1 : i32
    %53 = arith.addi %52, %c1_i32_39 : i32
    %c0_40 = arith.constant 0 : index
    %54 = arith.index_cast %53 : i32 to index
    %c2_41 = arith.constant 2 : index
    %c0_42 = arith.constant 0 : index
    %55 = vector.load %arg2[%c0_40, %54, %c2_41, %c0_42] : memref<1x6x6x128xbf16, #tpu.memory_space<vmem>>, vector<1x4x4x128xbf16>
    %56 = vector.shape_cast %55 : vector<1x4x4x128xbf16> to vector<4x4x128xbf16>
    %57 = vector.shape_cast %56 : vector<4x4x128xbf16> to vector<16x128xbf16>
    %c5 = arith.constant 5 : index
    %c0_43 = arith.constant 0 : index
    %c0_44 = arith.constant 0 : index
    %58 = vector.load %arg3[%c5, %c0_43, %c0_44] : memref<9x128x128xbf16, #tpu.memory_space<vmem>>, vector<1x128x128xbf16>
    %59 = vector.shape_cast %58 : vector<1x128x128xbf16> to vector<128x128xbf16>
    %cst_45 = arith.constant dense<0.000000e+00> : vector<16x128xf32>
    %60 = tpu.matmul %57, %59, %cst_45 {dimension_numbers = #tpu.dot_dimension_numbers<[1], [0], [0], [1], [0, 0, 1, 1], [], []>} : vector<16x128xbf16>, vector<128x128xbf16>, vector<16x128xf32> -> vector<16x128xf32>
    %61 = arith.addf %51, %60 : vector<16x128xf32>
    %c0_i32_46 = arith.constant 0 : i32
    %62 = arith.addi %c0_i32_46, %0 : i32
    %c2_i32 = arith.constant 2 : i32
    %63 = arith.addi %62, %c2_i32 : i32
    %c0_47 = arith.constant 0 : index
    %64 = arith.index_cast %63 : i32 to index
    %c0_48 = arith.constant 0 : index
    %c0_49 = arith.constant 0 : index
    %65 = vector.load %arg2[%c0_47, %64, %c0_48, %c0_49] : memref<1x6x6x128xbf16, #tpu.memory_space<vmem>>, vector<1x4x4x128xbf16>
    %66 = vector.shape_cast %65 : vector<1x4x4x128xbf16> to vector<4x4x128xbf16>
    %67 = vector.shape_cast %66 : vector<4x4x128xbf16> to vector<16x128xbf16>
    %c6 = arith.constant 6 : index
    %c0_50 = arith.constant 0 : index
    %c0_51 = arith.constant 0 : index
    %68 = vector.load %arg3[%c6, %c0_50, %c0_51] : memref<9x128x128xbf16, #tpu.memory_space<vmem>>, vector<1x128x128xbf16>
    %69 = vector.shape_cast %68 : vector<1x128x128xbf16> to vector<128x128xbf16>
    %cst_52 = arith.constant dense<0.000000e+00> : vector<16x128xf32>
    %70 = tpu.matmul %67, %69, %cst_52 {dimension_numbers = #tpu.dot_dimension_numbers<[1], [0], [0], [1], [0, 0, 1, 1], [], []>} : vector<16x128xbf16>, vector<128x128xbf16>, vector<16x128xf32> -> vector<16x128xf32>
    %71 = arith.addf %61, %70 : vector<16x128xf32>
    %c0_i32_53 = arith.constant 0 : i32
    %72 = arith.addi %c0_i32_53, %0 : i32
    %c2_i32_54 = arith.constant 2 : i32
    %73 = arith.addi %72, %c2_i32_54 : i32
    %c0_55 = arith.constant 0 : index
    %74 = arith.index_cast %73 : i32 to index
    %c1_56 = arith.constant 1 : index
    %c0_57 = arith.constant 0 : index
    %75 = vector.load %arg2[%c0_55, %74, %c1_56, %c0_57] : memref<1x6x6x128xbf16, #tpu.memory_space<vmem>>, vector<1x4x4x128xbf16>
    %76 = vector.shape_cast %75 : vector<1x4x4x128xbf16> to vector<4x4x128xbf16>
    %77 = vector.shape_cast %76 : vector<4x4x128xbf16> to vector<16x128xbf16>
    %c7 = arith.constant 7 : index
    %c0_58 = arith.constant 0 : index
    %c0_59 = arith.constant 0 : index
    %78 = vector.load %arg3[%c7, %c0_58, %c0_59] : memref<9x128x128xbf16, #tpu.memory_space<vmem>>, vector<1x128x128xbf16>
    %79 = vector.shape_cast %78 : vector<1x128x128xbf16> to vector<128x128xbf16>
    %cst_60 = arith.constant dense<0.000000e+00> : vector<16x128xf32>
    %80 = tpu.matmul %77, %79, %cst_60 {dimension_numbers = #tpu.dot_dimension_numbers<[1], [0], [0], [1], [0, 0, 1, 1], [], []>} : vector<16x128xbf16>, vector<128x128xbf16>, vector<16x128xf32> -> vector<16x128xf32>
    %81 = arith.addf %71, %80 : vector<16x128xf32>
    %c0_i32_61 = arith.constant 0 : i32
    %82 = arith.addi %c0_i32_61, %0 : i32
    %c2_i32_62 = arith.constant 2 : i32
    %83 = arith.addi %82, %c2_i32_62 : i32
    %c0_63 = arith.constant 0 : index
    %84 = arith.index_cast %83 : i32 to index
    %c2_64 = arith.constant 2 : index
    %c0_65 = arith.constant 0 : index
    %85 = vector.load %arg2[%c0_63, %84, %c2_64, %c0_65] : memref<1x6x6x128xbf16, #tpu.memory_space<vmem>>, vector<1x4x4x128xbf16>
    %86 = vector.shape_cast %85 : vector<1x4x4x128xbf16> to vector<4x4x128xbf16>
    %87 = vector.shape_cast %86 : vector<4x4x128xbf16> to vector<16x128xbf16>
    %c8 = arith.constant 8 : index
    %c0_66 = arith.constant 0 : index
    %c0_67 = arith.constant 0 : index
    %88 = vector.load %arg3[%c8, %c0_66, %c0_67] : memref<9x128x128xbf16, #tpu.memory_space<vmem>>, vector<1x128x128xbf16>
    %89 = vector.shape_cast %88 : vector<1x128x128xbf16> to vector<128x128xbf16>
    %cst_68 = arith.constant dense<0.000000e+00> : vector<16x128xf32>
    %90 = tpu.matmul %87, %89, %cst_68 {dimension_numbers = #tpu.dot_dimension_numbers<[1], [0], [0], [1], [0, 0, 1, 1], [], []>} : vector<16x128xbf16>, vector<128x128xbf16>, vector<16x128xf32> -> vector<16x128xf32>
    %91 = arith.addf %81, %90 : vector<16x128xf32>
    %c0_69 = arith.constant 0 : index
    %c0_70 = arith.constant 0 : index
    %92 = vector.load %arg4[%c0_69, %c0_70] : memref<1x128xf32, #tpu.memory_space<vmem>>, vector<1x128xf32>
    %93 = vector.broadcast %92 : vector<1x128xf32> to vector<16x128xf32>
    %94 = arith.addf %91, %93 : vector<16x128xf32>
    %95 = arith.negf %94 : vector<16x128xf32>
    %96 = math.exp %95 : vector<16x128xf32>
    %cst_71 = arith.constant 1.000000e+00 : f32
    %97 = vector.broadcast %cst_71 : f32 to vector<16x128xf32>
    %98 = arith.addf %97, %96 : vector<16x128xf32>
    %99 = arith.divf %97, %98 : vector<16x128xf32>
    %100 = arith.mulf %94, %99 : vector<16x128xf32>
    %101 = vector.shape_cast %100 : vector<16x128xf32> to vector<4x4x128xf32>
    %102 = arith.truncf %101 : vector<4x4x128xf32> to vector<4x4x128xbf16>
    %c0_72 = arith.constant 0 : index
    %c0_73 = arith.constant 0 : index
    %c0_74 = arith.constant 0 : index
    %c0_75 = arith.constant 0 : index
    %103 = vector.load %arg5[%c0_72, %c0_73, %c0_74, %c0_75] : memref<1x4x4x128xbf16, #tpu.memory_space<vmem>>, vector<1x4x4x128xbf16>
    %104 = vector.shape_cast %103 : vector<1x4x4x128xbf16> to vector<4x4x128xbf16>
    %105 = vector.shape_cast %102 : vector<4x4x128xbf16> to vector<1x4x4x128xbf16>
    tpu.vector_store %arg5[%c0_72, %c0_73, %c0_74, %c0_75], %105 {strides = array<i32>} : memref<1x4x4x128xbf16, #tpu.memory_space<vmem>>, vector<1x4x4x128xbf16>,
    return
  }
  func.func @transform_0(%arg0: i32, %arg1: i32) -> (i32, i32, i32, i32) {
    %c0_i32 = arith.constant 0 : i32
    %c0_i32_0 = arith.constant 0 : i32
    %c0_i32_1 = arith.constant 0 : i32
    %c0_i32_2 = arith.constant 0 : i32
    return %arg0, %c0_i32, %c0_i32_0, %c0_i32_1 : i32, i32, i32, i32
  }
  func.func @transform_1(%arg0: i32, %arg1: i32) -> (i32, i32, i32) {
    %c0_i32 = arith.constant 0 : i32
    %c0_i32_0 = arith.constant 0 : i32
    %c0_i32_1 = arith.constant 0 : i32
    %c0_i32_2 = arith.constant 0 : i32
    return %c0_i32, %c0_i32_0, %c0_i32_1 : i32, i32, i32
  }
  func.func @transform_2(%arg0: i32, %arg1: i32) -> (i32, i32) {
    %c0_i32 = arith.constant 0 : i32
    %c0_i32_0 = arith.constant 0 : i32
    %c0_i32_1 = arith.constant 0 : i32
    return %c0_i32, %c0_i32_0 : i32, i32
  }
  func.func @transform_3(%arg0: i32, %arg1: i32) -> (i32, i32, i32, i32) {
    %c0_i32 = arith.constant 0 : i32
    %c0_i32_0 = arith.constant 0 : i32
    %c0_i32_1 = arith.constant 0 : i32
    return %arg0, %arg1, %c0_i32, %c0_i32_0 : i32, i32, i32, i32
  }
}

module attributes {stable_mosaic.version = 11 : i64} {
  func.func @_pw_kernel(%arg0: i32, %arg1: i32, %arg2: i32, %arg3: i32, %arg4: memref<1x16x128xbf16, #tpu.memory_space<vmem>>, %arg5: memref<1x1x128xf32, #tpu.memory_space<vmem>>, %arg6: memref<128x128xbf16, #tpu.memory_space<vmem>>, %arg7: memref<1x128xf32, #tpu.memory_space<vmem>>, %arg8: memref<1x16x128xbf16, #tpu.memory_space<vmem>>, %arg9: memref<1x16x128xbf16, #tpu.memory_space<vmem>>, %arg10: memref<16x128xf32, #tpu.memory_space<vmem>>) attributes {dimension_semantics = [#tpu.dimension_semantics<parallel>, #tpu.dimension_semantics<parallel>, #tpu.dimension_semantics<parallel>, #tpu.dimension_semantics<arbitrary>], iteration_bounds = array<i64: 2, 1, 1, 1>, scalar_prefetch = 0 : i64, scratch_operands = 1 : i64, tpu.core_type = #tpu.core_type<tc>, window_params = [{transform_indices = @transform_0, window_bounds = array<i64: 1, 16, 128>}, {transform_indices = @transform_1, window_bounds = array<i64: 1, 1, 128>}, {transform_indices = @transform_2, window_bounds = array<i64: 128, 128>}, {transform_indices = @transform_3, window_bounds = array<i64: 1, 128>}, {transform_indices = @transform_4, window_bounds = array<i64: 1, 16, 128>}, {transform_indices = @transform_5, window_bounds = array<i64: 1, 16, 128>}]} {
    %c0_i32 = arith.constant 0 : i32
    %0 = arith.cmpi eq, %arg3, %c0_i32 : i32
    %1 = arith.extui %0 : i1 to i32
    %c0_i32_0 = arith.constant 0 : i32
    %2 = arith.cmpi ne, %1, %c0_i32_0 : i32
    scf.if %2 {
      %cst_14 = arith.constant 0.000000e+00 : f32
      %19 = vector.broadcast %cst_14 : f32 to vector<16x128xf32>
      %c0_15 = arith.constant 0 : index
      %c0_16 = arith.constant 0 : index
      %20 = vector.load %arg10[%c0_15, %c0_16] : memref<16x128xf32, #tpu.memory_space<vmem>>, vector<16x128xf32>
      tpu.vector_store %arg10[%c0_15, %c0_16], %19 {strides = array<i32>} : memref<16x128xf32, #tpu.memory_space<vmem>>, vector<16x128xf32>,
    } else {
    }
    %c0 = arith.constant 0 : index
    %c0_1 = arith.constant 0 : index
    %c0_2 = arith.constant 0 : index
    %3 = vector.load %arg4[%c0, %c0_1, %c0_2] : memref<1x16x128xbf16, #tpu.memory_space<vmem>>, vector<1x16x128xbf16>
    %4 = vector.shape_cast %3 : vector<1x16x128xbf16> to vector<16x128xbf16>
    %5 = arith.extf %4 : vector<16x128xbf16> to vector<16x128xf32>
    %c0_3 = arith.constant 0 : index
    %c0_4 = arith.constant 0 : index
    %c0_5 = arith.constant 0 : index
    %6 = vector.load %arg5[%c0_3, %c0_4, %c0_5] : memref<1x1x128xf32, #tpu.memory_space<vmem>>, vector<1x1x128xf32>
    %7 = vector.shape_cast %6 : vector<1x1x128xf32> to vector<1x128xf32>
    %8 = vector.broadcast %7 : vector<1x128xf32> to vector<16x128xf32>
    %9 = arith.mulf %5, %8 : vector<16x128xf32>
    %10 = arith.truncf %9 : vector<16x128xf32> to vector<16x128xbf16>
    %c0_6 = arith.constant 0 : index
    %c0_7 = arith.constant 0 : index
    %11 = vector.load %arg10[%c0_6, %c0_7] : memref<16x128xf32, #tpu.memory_space<vmem>>, vector<16x128xf32>
    %c0_8 = arith.constant 0 : index
    %c0_9 = arith.constant 0 : index
    %12 = vector.load %arg6[%c0_8, %c0_9] : memref<128x128xbf16, #tpu.memory_space<vmem>>, vector<128x128xbf16>
    %cst = arith.constant dense<0.000000e+00> : vector<16x128xf32>
    %13 = tpu.matmul %10, %12, %cst {dimension_numbers = #tpu.dot_dimension_numbers<[1], [0], [0], [1], [0, 0, 1, 1], [], []>} : vector<16x128xbf16>, vector<128x128xbf16>, vector<16x128xf32> -> vector<16x128xf32>
    %14 = arith.addf %11, %13 : vector<16x128xf32>
    %c0_10 = arith.constant 0 : index
    %c0_11 = arith.constant 0 : index
    %15 = vector.load %arg10[%c0_10, %c0_11] : memref<16x128xf32, #tpu.memory_space<vmem>>, vector<16x128xf32>
    tpu.vector_store %arg10[%c0_10, %c0_11], %14 {strides = array<i32>} : memref<16x128xf32, #tpu.memory_space<vmem>>, vector<16x128xf32>,
    %c0_i32_12 = arith.constant 0 : i32
    %16 = arith.cmpi eq, %arg3, %c0_i32_12 : i32
    %17 = arith.extui %16 : i1 to i32
    %c0_i32_13 = arith.constant 0 : i32
    %18 = arith.cmpi ne, %17, %c0_i32_13 : i32
    scf.if %18 {
      %c0_14 = arith.constant 0 : index
      %c0_15 = arith.constant 0 : index
      %19 = vector.load %arg10[%c0_14, %c0_15] : memref<16x128xf32, #tpu.memory_space<vmem>>, vector<16x128xf32>
      %c0_16 = arith.constant 0 : index
      %c0_17 = arith.constant 0 : index
      %20 = vector.load %arg7[%c0_16, %c0_17] : memref<1x128xf32, #tpu.memory_space<vmem>>, vector<1x128xf32>
      %21 = vector.broadcast %20 : vector<1x128xf32> to vector<16x128xf32>
      %22 = arith.addf %19, %21 : vector<16x128xf32>
      %c0_18 = arith.constant 0 : index
      %c0_19 = arith.constant 0 : index
      %c0_20 = arith.constant 0 : index
      %23 = vector.load %arg8[%c0_18, %c0_19, %c0_20] : memref<1x16x128xbf16, #tpu.memory_space<vmem>>, vector<1x16x128xbf16>
      %24 = vector.shape_cast %23 : vector<1x16x128xbf16> to vector<16x128xbf16>
      %25 = arith.extf %24 : vector<16x128xbf16> to vector<16x128xf32>
      %26 = arith.addf %22, %25 : vector<16x128xf32>
      %27 = arith.truncf %26 : vector<16x128xf32> to vector<16x128xbf16>
      %c0_21 = arith.constant 0 : index
      %c0_22 = arith.constant 0 : index
      %c0_23 = arith.constant 0 : index
      %28 = vector.load %arg9[%c0_21, %c0_22, %c0_23] : memref<1x16x128xbf16, #tpu.memory_space<vmem>>, vector<1x16x128xbf16>
      %29 = vector.shape_cast %28 : vector<1x16x128xbf16> to vector<16x128xbf16>
      %30 = vector.shape_cast %27 : vector<16x128xbf16> to vector<1x16x128xbf16>
      tpu.vector_store %arg9[%c0_21, %c0_22, %c0_23], %30 {strides = array<i32>} : memref<1x16x128xbf16, #tpu.memory_space<vmem>>, vector<1x16x128xbf16>,
    } else {
    }
    return
  }
  func.func @transform_0(%arg0: i32, %arg1: i32, %arg2: i32, %arg3: i32) -> (i32, i32, i32) {
    %c0_i32 = arith.constant 0 : i32
    return %arg0, %arg1, %arg3 : i32, i32, i32
  }
  func.func @transform_1(%arg0: i32, %arg1: i32, %arg2: i32, %arg3: i32) -> (i32, i32, i32) {
    %c0_i32 = arith.constant 0 : i32
    %c0_i32_0 = arith.constant 0 : i32
    return %arg0, %c0_i32, %arg3 : i32, i32, i32
  }
  func.func @transform_2(%arg0: i32, %arg1: i32, %arg2: i32, %arg3: i32) -> (i32, i32) {
    %c0_i32 = arith.constant 0 : i32
    return %arg3, %arg2 : i32, i32
  }
  func.func @transform_3(%arg0: i32, %arg1: i32, %arg2: i32, %arg3: i32) -> (i32, i32) {
    %c0_i32 = arith.constant 0 : i32
    %c0_i32_0 = arith.constant 0 : i32
    return %c0_i32, %arg2 : i32, i32
  }
  func.func @transform_4(%arg0: i32, %arg1: i32, %arg2: i32, %arg3: i32) -> (i32, i32, i32) {
    %c0_i32 = arith.constant 0 : i32
    return %arg0, %arg1, %arg2 : i32, i32, i32
  }
  func.func @transform_5(%arg0: i32, %arg1: i32, %arg2: i32, %arg3: i32) -> (i32, i32, i32) {
    %c0_i32 = arith.constant 0 : i32
    return %arg0, %arg1, %arg2 : i32, i32, i32
  }
}

module attributes {stable_mosaic.version = 11 : i64} {
  func.func @_pw_kernel(%arg0: i32, %arg1: i32, %arg2: i32, %arg3: i32, %arg4: memref<1x16x128xbf16, #tpu.memory_space<vmem>>, %arg5: memref<128x128xbf16, #tpu.memory_space<vmem>>, %arg6: memref<1x128xf32, #tpu.memory_space<vmem>>, %arg7: memref<1x16x128xbf16, #tpu.memory_space<vmem>>, %arg8: memref<16x128xf32, #tpu.memory_space<vmem>>) attributes {dimension_semantics = [#tpu.dimension_semantics<parallel>, #tpu.dimension_semantics<parallel>, #tpu.dimension_semantics<parallel>, #tpu.dimension_semantics<arbitrary>], iteration_bounds = array<i64: 2, 1, 1, 1>, scalar_prefetch = 0 : i64, scratch_operands = 1 : i64, tpu.core_type = #tpu.core_type<tc>, window_params = [{transform_indices = @transform_0, window_bounds = array<i64: 1, 16, 128>}, {transform_indices = @transform_1, window_bounds = array<i64: 128, 128>}, {transform_indices = @transform_2, window_bounds = array<i64: 1, 128>}, {transform_indices = @transform_3, window_bounds = array<i64: 1, 16, 128>}]} {
    %c0_i32 = arith.constant 0 : i32
    %0 = arith.cmpi eq, %arg3, %c0_i32 : i32
    %1 = arith.extui %0 : i1 to i32
    %c0_i32_0 = arith.constant 0 : i32
    %2 = arith.cmpi ne, %1, %c0_i32_0 : i32
    scf.if %2 {
      %cst_11 = arith.constant 0.000000e+00 : f32
      %13 = vector.broadcast %cst_11 : f32 to vector<16x128xf32>
      %c0_12 = arith.constant 0 : index
      %c0_13 = arith.constant 0 : index
      %14 = vector.load %arg8[%c0_12, %c0_13] : memref<16x128xf32, #tpu.memory_space<vmem>>, vector<16x128xf32>
      tpu.vector_store %arg8[%c0_12, %c0_13], %13 {strides = array<i32>} : memref<16x128xf32, #tpu.memory_space<vmem>>, vector<16x128xf32>,
    } else {
    }
    %c0 = arith.constant 0 : index
    %c0_1 = arith.constant 0 : index
    %c0_2 = arith.constant 0 : index
    %3 = vector.load %arg4[%c0, %c0_1, %c0_2] : memref<1x16x128xbf16, #tpu.memory_space<vmem>>, vector<1x16x128xbf16>
    %4 = vector.shape_cast %3 : vector<1x16x128xbf16> to vector<16x128xbf16>
    %c0_3 = arith.constant 0 : index
    %c0_4 = arith.constant 0 : index
    %5 = vector.load %arg8[%c0_3, %c0_4] : memref<16x128xf32, #tpu.memory_space<vmem>>, vector<16x128xf32>
    %c0_5 = arith.constant 0 : index
    %c0_6 = arith.constant 0 : index
    %6 = vector.load %arg5[%c0_5, %c0_6] : memref<128x128xbf16, #tpu.memory_space<vmem>>, vector<128x128xbf16>
    %cst = arith.constant dense<0.000000e+00> : vector<16x128xf32>
    %7 = tpu.matmul %4, %6, %cst {dimension_numbers = #tpu.dot_dimension_numbers<[1], [0], [0], [1], [0, 0, 1, 1], [], []>} : vector<16x128xbf16>, vector<128x128xbf16>, vector<16x128xf32> -> vector<16x128xf32>
    %8 = arith.addf %5, %7 : vector<16x128xf32>
    %c0_7 = arith.constant 0 : index
    %c0_8 = arith.constant 0 : index
    %9 = vector.load %arg8[%c0_7, %c0_8] : memref<16x128xf32, #tpu.memory_space<vmem>>, vector<16x128xf32>
    tpu.vector_store %arg8[%c0_7, %c0_8], %8 {strides = array<i32>} : memref<16x128xf32, #tpu.memory_space<vmem>>, vector<16x128xf32>,
    %c0_i32_9 = arith.constant 0 : i32
    %10 = arith.cmpi eq, %arg3, %c0_i32_9 : i32
    %11 = arith.extui %10 : i1 to i32
    %c0_i32_10 = arith.constant 0 : i32
    %12 = arith.cmpi ne, %11, %c0_i32_10 : i32
    scf.if %12 {
      %c0_11 = arith.constant 0 : index
      %c0_12 = arith.constant 0 : index
      %13 = vector.load %arg8[%c0_11, %c0_12] : memref<16x128xf32, #tpu.memory_space<vmem>>, vector<16x128xf32>
      %c0_13 = arith.constant 0 : index
      %c0_14 = arith.constant 0 : index
      %14 = vector.load %arg6[%c0_13, %c0_14] : memref<1x128xf32, #tpu.memory_space<vmem>>, vector<1x128xf32>
      %15 = vector.broadcast %14 : vector<1x128xf32> to vector<16x128xf32>
      %16 = arith.addf %13, %15 : vector<16x128xf32>
      %17 = arith.negf %16 : vector<16x128xf32>
      %18 = math.exp %17 : vector<16x128xf32>
      %cst_15 = arith.constant 1.000000e+00 : f32
      %19 = vector.broadcast %cst_15 : f32 to vector<16x128xf32>
      %20 = arith.addf %19, %18 : vector<16x128xf32>
      %21 = arith.divf %19, %20 : vector<16x128xf32>
      %22 = arith.mulf %16, %21 : vector<16x128xf32>
      %23 = arith.truncf %22 : vector<16x128xf32> to vector<16x128xbf16>
      %c0_16 = arith.constant 0 : index
      %c0_17 = arith.constant 0 : index
      %c0_18 = arith.constant 0 : index
      %24 = vector.load %arg7[%c0_16, %c0_17, %c0_18] : memref<1x16x128xbf16, #tpu.memory_space<vmem>>, vector<1x16x128xbf16>
      %25 = vector.shape_cast %24 : vector<1x16x128xbf16> to vector<16x128xbf16>
      %26 = vector.shape_cast %23 : vector<16x128xbf16> to vector<1x16x128xbf16>
      tpu.vector_store %arg7[%c0_16, %c0_17, %c0_18], %26 {strides = array<i32>} : memref<1x16x128xbf16, #tpu.memory_space<vmem>>, vector<1x16x128xbf16>,
    } else {
    }
    return
  }
  func.func @transform_0(%arg0: i32, %arg1: i32, %arg2: i32, %arg3: i32) -> (i32, i32, i32) {
    %c0_i32 = arith.constant 0 : i32
    return %arg0, %arg1, %arg3 : i32, i32, i32
  }
  func.func @transform_1(%arg0: i32, %arg1: i32, %arg2: i32, %arg3: i32) -> (i32, i32) {
    %c0_i32 = arith.constant 0 : i32
    return %arg3, %arg2 : i32, i32
  }
  func.func @transform_2(%arg0: i32, %arg1: i32, %arg2: i32, %arg3: i32) -> (i32, i32) {
    %c0_i32 = arith.constant 0 : i32
    %c0_i32_0 = arith.constant 0 : i32
    return %c0_i32, %arg2 : i32, i32
  }
  func.func @transform_3(%arg0: i32, %arg1: i32, %arg2: i32, %arg3: i32) -> (i32, i32, i32) {
    %c0_i32 = arith.constant 0 : i32
    return %arg0, %arg1, %arg2 : i32, i32, i32
  }
}

module attributes {stable_mosaic.version = 11 : i64} {
  func.func @_dw_kernel(%arg0: i32, %arg1: i32, %arg2: memref<1x6x6x128xbf16, #tpu.memory_space<vmem>>, %arg3: memref<9x1x128xbf16, #tpu.memory_space<vmem>>, %arg4: memref<1x1x128xf32, #tpu.memory_space<vmem>>, %arg5: memref<1x4x4x128xbf16, #tpu.memory_space<vmem>>) attributes {dimension_semantics = [#tpu.dimension_semantics<parallel>, #tpu.dimension_semantics<arbitrary>], iteration_bounds = array<i64: 2, 1>, scalar_prefetch = 0 : i64, scratch_operands = 0 : i64, tpu.core_type = #tpu.core_type<tc>, window_params = [{transform_indices = @transform_0, window_bounds = array<i64: 1, 6, 6, 128>}, {pipeline_mode = #tpu.pipeline_mode<synchronous>, transform_indices = @transform_1, window_bounds = array<i64: 9, 1, 128>}, {pipeline_mode = #tpu.pipeline_mode<synchronous>, transform_indices = @transform_2, window_bounds = array<i64: 1, 1, 128>}, {transform_indices = @transform_3, window_bounds = array<i64: 1, 4, 4, 128>}]} {
    %c4_i32 = arith.constant 4 : i32
    %0 = arith.muli %arg1, %c4_i32 : i32
    %cst = arith.constant 0.000000e+00 : f32
    %1 = vector.broadcast %cst : f32 to vector<4x4x128xf32>
    %c0_i32 = arith.constant 0 : i32
    %2 = arith.addi %c0_i32, %0 : i32
    %c0_i32_0 = arith.constant 0 : i32
    %3 = arith.addi %2, %c0_i32_0 : i32
    %c0 = arith.constant 0 : index
    %4 = arith.index_cast %3 : i32 to index
    %c0_1 = arith.constant 0 : index
    %c0_2 = arith.constant 0 : index
    %5 = vector.load %arg2[%c0, %4, %c0_1, %c0_2] : memref<1x6x6x128xbf16, #tpu.memory_space<vmem>>, vector<1x4x4x128xbf16>
    %6 = vector.shape_cast %5 : vector<1x4x4x128xbf16> to vector<4x4x128xbf16>
    %c0_3 = arith.constant 0 : index
    %c0_4 = arith.constant 0 : index
    %c0_5 = arith.constant 0 : index
    %7 = vector.load %arg3[%c0_3, %c0_4, %c0_5] : memref<9x1x128xbf16, #tpu.memory_space<vmem>>, vector<1x1x128xbf16>
    %8 = vector.shape_cast %7 : vector<1x1x128xbf16> to vector<1x128xbf16>
    %9 = vector.shape_cast %8 : vector<1x128xbf16> to vector<1x1x128xbf16>
    %10 = arith.extf %6 : vector<4x4x128xbf16> to vector<4x4x128xf32>
    %11 = arith.extf %9 : vector<1x1x128xbf16> to vector<1x1x128xf32>
    %12 = vector.broadcast %11 : vector<1x1x128xf32> to vector<4x4x128xf32>
    %13 = arith.mulf %10, %12 : vector<4x4x128xf32>
    %14 = arith.addf %1, %13 : vector<4x4x128xf32>
    %c0_i32_6 = arith.constant 0 : i32
    %15 = arith.addi %c0_i32_6, %0 : i32
    %c0_i32_7 = arith.constant 0 : i32
    %16 = arith.addi %15, %c0_i32_7 : i32
    %c0_8 = arith.constant 0 : index
    %17 = arith.index_cast %16 : i32 to index
    %c1 = arith.constant 1 : index
    %c0_9 = arith.constant 0 : index
    %18 = vector.load %arg2[%c0_8, %17, %c1, %c0_9] : memref<1x6x6x128xbf16, #tpu.memory_space<vmem>>, vector<1x4x4x128xbf16>
    %19 = vector.shape_cast %18 : vector<1x4x4x128xbf16> to vector<4x4x128xbf16>
    %c1_10 = arith.constant 1 : index
    %c0_11 = arith.constant 0 : index
    %c0_12 = arith.constant 0 : index
    %20 = vector.load %arg3[%c1_10, %c0_11, %c0_12] : memref<9x1x128xbf16, #tpu.memory_space<vmem>>, vector<1x1x128xbf16>
    %21 = vector.shape_cast %20 : vector<1x1x128xbf16> to vector<1x128xbf16>
    %22 = vector.shape_cast %21 : vector<1x128xbf16> to vector<1x1x128xbf16>
    %23 = arith.extf %19 : vector<4x4x128xbf16> to vector<4x4x128xf32>
    %24 = arith.extf %22 : vector<1x1x128xbf16> to vector<1x1x128xf32>
    %25 = vector.broadcast %24 : vector<1x1x128xf32> to vector<4x4x128xf32>
    %26 = arith.mulf %23, %25 : vector<4x4x128xf32>
    %27 = arith.addf %14, %26 : vector<4x4x128xf32>
    %c0_i32_13 = arith.constant 0 : i32
    %28 = arith.addi %c0_i32_13, %0 : i32
    %c0_i32_14 = arith.constant 0 : i32
    %29 = arith.addi %28, %c0_i32_14 : i32
    %c0_15 = arith.constant 0 : index
    %30 = arith.index_cast %29 : i32 to index
    %c2 = arith.constant 2 : index
    %c0_16 = arith.constant 0 : index
    %31 = vector.load %arg2[%c0_15, %30, %c2, %c0_16] : memref<1x6x6x128xbf16, #tpu.memory_space<vmem>>, vector<1x4x4x128xbf16>
    %32 = vector.shape_cast %31 : vector<1x4x4x128xbf16> to vector<4x4x128xbf16>
    %c2_17 = arith.constant 2 : index
    %c0_18 = arith.constant 0 : index
    %c0_19 = arith.constant 0 : index
    %33 = vector.load %arg3[%c2_17, %c0_18, %c0_19] : memref<9x1x128xbf16, #tpu.memory_space<vmem>>, vector<1x1x128xbf16>
    %34 = vector.shape_cast %33 : vector<1x1x128xbf16> to vector<1x128xbf16>
    %35 = vector.shape_cast %34 : vector<1x128xbf16> to vector<1x1x128xbf16>
    %36 = arith.extf %32 : vector<4x4x128xbf16> to vector<4x4x128xf32>
    %37 = arith.extf %35 : vector<1x1x128xbf16> to vector<1x1x128xf32>
    %38 = vector.broadcast %37 : vector<1x1x128xf32> to vector<4x4x128xf32>
    %39 = arith.mulf %36, %38 : vector<4x4x128xf32>
    %40 = arith.addf %27, %39 : vector<4x4x128xf32>
    %c0_i32_20 = arith.constant 0 : i32
    %41 = arith.addi %c0_i32_20, %0 : i32
    %c1_i32 = arith.constant 1 : i32
    %42 = arith.addi %41, %c1_i32 : i32
    %c0_21 = arith.constant 0 : index
    %43 = arith.index_cast %42 : i32 to index
    %c0_22 = arith.constant 0 : index
    %c0_23 = arith.constant 0 : index
    %44 = vector.load %arg2[%c0_21, %43, %c0_22, %c0_23] : memref<1x6x6x128xbf16, #tpu.memory_space<vmem>>, vector<1x4x4x128xbf16>
    %45 = vector.shape_cast %44 : vector<1x4x4x128xbf16> to vector<4x4x128xbf16>
    %c3 = arith.constant 3 : index
    %c0_24 = arith.constant 0 : index
    %c0_25 = arith.constant 0 : index
    %46 = vector.load %arg3[%c3, %c0_24, %c0_25] : memref<9x1x128xbf16, #tpu.memory_space<vmem>>, vector<1x1x128xbf16>
    %47 = vector.shape_cast %46 : vector<1x1x128xbf16> to vector<1x128xbf16>
    %48 = vector.shape_cast %47 : vector<1x128xbf16> to vector<1x1x128xbf16>
    %49 = arith.extf %45 : vector<4x4x128xbf16> to vector<4x4x128xf32>
    %50 = arith.extf %48 : vector<1x1x128xbf16> to vector<1x1x128xf32>
    %51 = vector.broadcast %50 : vector<1x1x128xf32> to vector<4x4x128xf32>
    %52 = arith.mulf %49, %51 : vector<4x4x128xf32>
    %53 = arith.addf %40, %52 : vector<4x4x128xf32>
    %c0_i32_26 = arith.constant 0 : i32
    %54 = arith.addi %c0_i32_26, %0 : i32
    %c1_i32_27 = arith.constant 1 : i32
    %55 = arith.addi %54, %c1_i32_27 : i32
    %c0_28 = arith.constant 0 : index
    %56 = arith.index_cast %55 : i32 to index
    %c1_29 = arith.constant 1 : index
    %c0_30 = arith.constant 0 : index
    %57 = vector.load %arg2[%c0_28, %56, %c1_29, %c0_30] : memref<1x6x6x128xbf16, #tpu.memory_space<vmem>>, vector<1x4x4x128xbf16>
    %58 = vector.shape_cast %57 : vector<1x4x4x128xbf16> to vector<4x4x128xbf16>
    %c4 = arith.constant 4 : index
    %c0_31 = arith.constant 0 : index
    %c0_32 = arith.constant 0 : index
    %59 = vector.load %arg3[%c4, %c0_31, %c0_32] : memref<9x1x128xbf16, #tpu.memory_space<vmem>>, vector<1x1x128xbf16>
    %60 = vector.shape_cast %59 : vector<1x1x128xbf16> to vector<1x128xbf16>
    %61 = vector.shape_cast %60 : vector<1x128xbf16> to vector<1x1x128xbf16>
    %62 = arith.extf %58 : vector<4x4x128xbf16> to vector<4x4x128xf32>
    %63 = arith.extf %61 : vector<1x1x128xbf16> to vector<1x1x128xf32>
    %64 = vector.broadcast %63 : vector<1x1x128xf32> to vector<4x4x128xf32>
    %65 = arith.mulf %62, %64 : vector<4x4x128xf32>
    %66 = arith.addf %53, %65 : vector<4x4x128xf32>
    %c0_i32_33 = arith.constant 0 : i32
    %67 = arith.addi %c0_i32_33, %0 : i32
    %c1_i32_34 = arith.constant 1 : i32
    %68 = arith.addi %67, %c1_i32_34 : i32
    %c0_35 = arith.constant 0 : index
    %69 = arith.index_cast %68 : i32 to index
    %c2_36 = arith.constant 2 : index
    %c0_37 = arith.constant 0 : index
    %70 = vector.load %arg2[%c0_35, %69, %c2_36, %c0_37] : memref<1x6x6x128xbf16, #tpu.memory_space<vmem>>, vector<1x4x4x128xbf16>
    %71 = vector.shape_cast %70 : vector<1x4x4x128xbf16> to vector<4x4x128xbf16>
    %c5 = arith.constant 5 : index
    %c0_38 = arith.constant 0 : index
    %c0_39 = arith.constant 0 : index
    %72 = vector.load %arg3[%c5, %c0_38, %c0_39] : memref<9x1x128xbf16, #tpu.memory_space<vmem>>, vector<1x1x128xbf16>
    %73 = vector.shape_cast %72 : vector<1x1x128xbf16> to vector<1x128xbf16>
    %74 = vector.shape_cast %73 : vector<1x128xbf16> to vector<1x1x128xbf16>
    %75 = arith.extf %71 : vector<4x4x128xbf16> to vector<4x4x128xf32>
    %76 = arith.extf %74 : vector<1x1x128xbf16> to vector<1x1x128xf32>
    %77 = vector.broadcast %76 : vector<1x1x128xf32> to vector<4x4x128xf32>
    %78 = arith.mulf %75, %77 : vector<4x4x128xf32>
    %79 = arith.addf %66, %78 : vector<4x4x128xf32>
    %c0_i32_40 = arith.constant 0 : i32
    %80 = arith.addi %c0_i32_40, %0 : i32
    %c2_i32 = arith.constant 2 : i32
    %81 = arith.addi %80, %c2_i32 : i32
    %c0_41 = arith.constant 0 : index
    %82 = arith.index_cast %81 : i32 to index
    %c0_42 = arith.constant 0 : index
    %c0_43 = arith.constant 0 : index
    %83 = vector.load %arg2[%c0_41, %82, %c0_42, %c0_43] : memref<1x6x6x128xbf16, #tpu.memory_space<vmem>>, vector<1x4x4x128xbf16>
    %84 = vector.shape_cast %83 : vector<1x4x4x128xbf16> to vector<4x4x128xbf16>
    %c6 = arith.constant 6 : index
    %c0_44 = arith.constant 0 : index
    %c0_45 = arith.constant 0 : index
    %85 = vector.load %arg3[%c6, %c0_44, %c0_45] : memref<9x1x128xbf16, #tpu.memory_space<vmem>>, vector<1x1x128xbf16>
    %86 = vector.shape_cast %85 : vector<1x1x128xbf16> to vector<1x128xbf16>
    %87 = vector.shape_cast %86 : vector<1x128xbf16> to vector<1x1x128xbf16>
    %88 = arith.extf %84 : vector<4x4x128xbf16> to vector<4x4x128xf32>
    %89 = arith.extf %87 : vector<1x1x128xbf16> to vector<1x1x128xf32>
    %90 = vector.broadcast %89 : vector<1x1x128xf32> to vector<4x4x128xf32>
    %91 = arith.mulf %88, %90 : vector<4x4x128xf32>
    %92 = arith.addf %79, %91 : vector<4x4x128xf32>
    %c0_i32_46 = arith.constant 0 : i32
    %93 = arith.addi %c0_i32_46, %0 : i32
    %c2_i32_47 = arith.constant 2 : i32
    %94 = arith.addi %93, %c2_i32_47 : i32
    %c0_48 = arith.constant 0 : index
    %95 = arith.index_cast %94 : i32 to index
    %c1_49 = arith.constant 1 : index
    %c0_50 = arith.constant 0 : index
    %96 = vector.load %arg2[%c0_48, %95, %c1_49, %c0_50] : memref<1x6x6x128xbf16, #tpu.memory_space<vmem>>, vector<1x4x4x128xbf16>
    %97 = vector.shape_cast %96 : vector<1x4x4x128xbf16> to vector<4x4x128xbf16>
    %c7 = arith.constant 7 : index
    %c0_51 = arith.constant 0 : index
    %c0_52 = arith.constant 0 : index
    %98 = vector.load %arg3[%c7, %c0_51, %c0_52] : memref<9x1x128xbf16, #tpu.memory_space<vmem>>, vector<1x1x128xbf16>
    %99 = vector.shape_cast %98 : vector<1x1x128xbf16> to vector<1x128xbf16>
    %100 = vector.shape_cast %99 : vector<1x128xbf16> to vector<1x1x128xbf16>
    %101 = arith.extf %97 : vector<4x4x128xbf16> to vector<4x4x128xf32>
    %102 = arith.extf %100 : vector<1x1x128xbf16> to vector<1x1x128xf32>
    %103 = vector.broadcast %102 : vector<1x1x128xf32> to vector<4x4x128xf32>
    %104 = arith.mulf %101, %103 : vector<4x4x128xf32>
    %105 = arith.addf %92, %104 : vector<4x4x128xf32>
    %c0_i32_53 = arith.constant 0 : i32
    %106 = arith.addi %c0_i32_53, %0 : i32
    %c2_i32_54 = arith.constant 2 : i32
    %107 = arith.addi %106, %c2_i32_54 : i32
    %c0_55 = arith.constant 0 : index
    %108 = arith.index_cast %107 : i32 to index
    %c2_56 = arith.constant 2 : index
    %c0_57 = arith.constant 0 : index
    %109 = vector.load %arg2[%c0_55, %108, %c2_56, %c0_57] : memref<1x6x6x128xbf16, #tpu.memory_space<vmem>>, vector<1x4x4x128xbf16>
    %110 = vector.shape_cast %109 : vector<1x4x4x128xbf16> to vector<4x4x128xbf16>
    %c8 = arith.constant 8 : index
    %c0_58 = arith.constant 0 : index
    %c0_59 = arith.constant 0 : index
    %111 = vector.load %arg3[%c8, %c0_58, %c0_59] : memref<9x1x128xbf16, #tpu.memory_space<vmem>>, vector<1x1x128xbf16>
    %112 = vector.shape_cast %111 : vector<1x1x128xbf16> to vector<1x128xbf16>
    %113 = vector.shape_cast %112 : vector<1x128xbf16> to vector<1x1x128xbf16>
    %114 = arith.extf %110 : vector<4x4x128xbf16> to vector<4x4x128xf32>
    %115 = arith.extf %113 : vector<1x1x128xbf16> to vector<1x1x128xf32>
    %116 = vector.broadcast %115 : vector<1x1x128xf32> to vector<4x4x128xf32>
    %117 = arith.mulf %114, %116 : vector<4x4x128xf32>
    %118 = arith.addf %105, %117 : vector<4x4x128xf32>
    %c0_60 = arith.constant 0 : index
    %c0_61 = arith.constant 0 : index
    %c0_62 = arith.constant 0 : index
    %119 = vector.load %arg4[%c0_60, %c0_61, %c0_62] : memref<1x1x128xf32, #tpu.memory_space<vmem>>, vector<1x1x128xf32>
    %120 = vector.broadcast %119 : vector<1x1x128xf32> to vector<4x4x128xf32>
    %121 = arith.addf %118, %120 : vector<4x4x128xf32>
    %122 = arith.negf %121 : vector<4x4x128xf32>
    %123 = math.exp %122 : vector<4x4x128xf32>
    %cst_63 = arith.constant 1.000000e+00 : f32
    %124 = vector.broadcast %cst_63 : f32 to vector<4x4x128xf32>
    %125 = arith.addf %124, %123 : vector<4x4x128xf32>
    %126 = arith.divf %124, %125 : vector<4x4x128xf32>
    %127 = arith.mulf %121, %126 : vector<4x4x128xf32>
    %128 = arith.truncf %127 : vector<4x4x128xf32> to vector<4x4x128xbf16>
    %c0_64 = arith.constant 0 : index
    %c0_65 = arith.constant 0 : index
    %c0_66 = arith.constant 0 : index
    %c0_67 = arith.constant 0 : index
    %129 = vector.load %arg5[%c0_64, %c0_65, %c0_66, %c0_67] : memref<1x4x4x128xbf16, #tpu.memory_space<vmem>>, vector<1x4x4x128xbf16>
    %130 = vector.shape_cast %129 : vector<1x4x4x128xbf16> to vector<4x4x128xbf16>
    %131 = vector.shape_cast %128 : vector<4x4x128xbf16> to vector<1x4x4x128xbf16>
    tpu.vector_store %arg5[%c0_64, %c0_65, %c0_66, %c0_67], %131 {strides = array<i32>} : memref<1x4x4x128xbf16, #tpu.memory_space<vmem>>, vector<1x4x4x128xbf16>,
    return
  }
  func.func @transform_0(%arg0: i32, %arg1: i32) -> (i32, i32, i32, i32) {
    %c0_i32 = arith.constant 0 : i32
    %c0_i32_0 = arith.constant 0 : i32
    %c0_i32_1 = arith.constant 0 : i32
    %c0_i32_2 = arith.constant 0 : i32
    return %arg0, %c0_i32, %c0_i32_0, %c0_i32_1 : i32, i32, i32, i32
  }
  func.func @transform_1(%arg0: i32, %arg1: i32) -> (i32, i32, i32) {
    %c0_i32 = arith.constant 0 : i32
    %c0_i32_0 = arith.constant 0 : i32
    %c0_i32_1 = arith.constant 0 : i32
    %c0_i32_2 = arith.constant 0 : i32
    return %c0_i32, %c0_i32_0, %c0_i32_1 : i32, i32, i32
  }
  func.func @transform_2(%arg0: i32, %arg1: i32) -> (i32, i32, i32) {
    %c0_i32 = arith.constant 0 : i32
    %c0_i32_0 = arith.constant 0 : i32
    %c0_i32_1 = arith.constant 0 : i32
    %c0_i32_2 = arith.constant 0 : i32
    return %c0_i32, %c0_i32_0, %c0_i32_1 : i32, i32, i32
  }
  func.func @transform_3(%arg0: i32, %arg1: i32) -> (i32, i32, i32, i32) {
    %c0_i32 = arith.constant 0 : i32
    %c0_i32_0 = arith.constant 0 : i32
    %c0_i32_1 = arith.constant 0 : i32
    return %arg0, %arg1, %c0_i32, %c0_i32_0 : i32, i32, i32, i32
  }
}

</mosaic_0001>

<bundles_post_ra>
// kernel: forward.17
= control target key start
LH: loop header
LB: loop body
LE: loop exit
PB: predicated region body
PF: predicated region fallthrough
CT: control target
= control target key end

     0   :  { %s963_s15 = smov 0   ;;  %s965_s16 = smov 0   ;;  %s1035_s0 = inlined_call_operand.vmem [shape: bf16[2,64,128], index: 0, kind: input, shape index: {}]   ;;  %s1036_s1 = inlined_call_operand.vmem [shape: bf16[128,128], index: 1, kind: input, shape index: {}]   ;;  %s1037_s2 = inlined_call_operand.vmem [shape: f32[1,128], index: 2, kind: input, shape index: {}]   ;;  %s1038_s3 = inlined_call_operand.vmem [shape: bf16[2,64,128], index: 3, kind: input, shape index: {}]   ;;  %s1039_s4 = inlined_call_operand.vmem [shape: bf16[2,64,128], index: 4, kind: output, shape index: {}]  }
   0x1   :  { %s967_s17 = smov 0  }
   0x2 LB: > { %s40_s18 = sadd.s32 1, %s932_s16  ;;  %p751_p0 = scmp.ge.s32.totalorder %s936_s17, 1  ;;  %s936_s17 = sphi %s967_s17, %s14_s17   ;;  %s932_s16 = sphi %s965_s16, %s1041_s16   ;;  %s928_s15 = sphi %s963_s15, %s1040_s15  }
   0x3   : > { %p42_p1 = scmp.ge.s32.totalorder %s40_s18, 2  ;;  %p250_p2 = scmp.lt.s32.totalorder %s936_s17, 3 }
   0x5   : > { %s1043_s18 = smov (%p42_p1, %s40_s18), 0  ;;  %p251_p3 = pnand %p751_p0, %p250_p2 }
   0x6   : > { %p314_p4 = scmp.lt.s32.totalorder (!%p251_p3), %s928_s15, 1 }
   0x7   : > { %254 = sbr.rel (%p251_p3) target bundleno = 193 (0xc1), region = 36 }
   0xc   : > { %v822_v0 = vld [vmem:[%s1036_s1 + $0x38] sm:$0xff]  ;;  %v821_v1 = vld [vmem:[%s1036_s1 + $0x30] sm:$0xff]  ;;  %v820_v2 = vld [vmem:[%s1036_s1 + $0x28] sm:$0xff]  ;;  %s1045_s15 = smov (!%p314_p4, %s928_s15), 1 }
   0xd   : > { %480 = vmatpush.bf16.msra.mxu0 %v822_v0  ;;  %865 = vmatpush.bf16.msra.mxu1 %v822_v0  ;;  %v819_v3 = vld [vmem:[%s1036_s1 + $0x20] sm:$0xff]  ;;  %v818_v4 = vld [vmem:[%s1036_s1 + $0x18] sm:$0xff]  ;;  %v817_v5 = vld [vmem:[%s1036_s1 + $0x10] sm:$0xff]  ;;  %s1006_s7 = sshll.u32 %s1045_s15, 5 }
   0xe   : > { %866 = vmatpush.bf16.msra.mxu2 %v822_v0  ;;  %867 = vmatpush.bf16.msra.mxu3 %v822_v0  ;;  %v816_v6 = vld [vmem:[%s1036_s1 + $0x8] sm:$0xff]  ;;  %v815_v7 = vld [vmem:[%s1036_s1] sm:$0xff]  ;;  %s324_s12 = scalar_lea.vmem %s1035_s0, %s1006_s7  ;;  %s349_s15 = scalar_lea.vmem %s1038_s3, %s1006_s7 }
   0xf   : > { %v811_v8 = vld [vmem:[%s324_s12] sm:$0xff]  ;;  %v812_v9 = vld [vmem:[%s324_s12 + $0x8] sm:$0xff]  ;;  %v813_v10 = vld [vmem:[%s324_s12 + $0x10] sm:$0xff]  ;;  %s362_s23 = scalar_lea.vmem %s1039_s4, %s1006_s7 }
  0x10   : > { %v814_v11 = vld [vmem:[%s324_s12 + $0x18] sm:$0xff]  ;;  %v913_v14 = vld [vmem:[%s1037_s2] ss:$0 sm:$0xff]  ;;  %v859_v16 = vld [vmem:[%s349_s15 + $0x8] sm:$0xff]  }
  0x11   : > { %481 = vmatpush.bf16.msra.mxu0 %v821_v1  ;;  %868 = vmatpush.bf16.msra.mxu1 %v821_v1  ;;  %v824_v15 = vld [vmem:[%s349_s15] sm:$0xff]   ;;  %v829_v18 = vunpack.c.l.bf16 %v859_v16  ;;  %v830_v24 = vunpack.c.h.bf16 %v859_v16  ;;  %v860_v29 = vld [vmem:[%s349_s15 + $0x10] sm:$0xff]   ;;  %v861_v30 = vld [vmem:[%s349_s15 + $0x18] sm:$0xff]  }
  0x12   : > { %869 = vmatpush.bf16.msra.mxu2 %v821_v1  ;;  %870 = vmatpush.bf16.msra.mxu3 %v821_v1  ;;  %v825_v17 = vunpack.c.l.bf16 %v824_v15  ;;  %v826_v23 = vunpack.c.h.bf16 %v824_v15  ;;  %v833_v35 = vunpack.c.l.bf16 %v860_v29  ;;  %v837_v36 = vunpack.c.l.bf16 %v861_v30 }
  0x13   : > { %v834_v41 = vunpack.c.h.bf16 %v860_v29  ;;  %v838_v42 = vunpack.c.h.bf16 %v861_v30 }
  0x15   : > { %482 = vmatpush.bf16.msra.mxu0 %v820_v2  ;;  %871 = vmatpush.bf16.msra.mxu1 %v820_v2 }
  0x16   : > { %872 = vmatpush.bf16.msra.mxu2 %v820_v2  ;;  %873 = vmatpush.bf16.msra.mxu3 %v820_v2 }
  0x19   : > { %483 = vmatpush.bf16.msra.mxu0 %v819_v3  ;;  %874 = vmatpush.bf16.msra.mxu1 %v819_v3 }
  0x1a   : > { %875 = vmatpush.bf16.msra.mxu2 %v819_v3  ;;  %876 = vmatpush.bf16.msra.mxu3 %v819_v3 }
  0x1d   : > { %484 = vmatpush.bf16.msra.mxu0 %v818_v4  ;;  %877 = vmatpush.bf16.msra.mxu1 %v818_v4 }
  0x1e   : > { %878 = vmatpush.bf16.msra.mxu2 %v818_v4  ;;  %879 = vmatpush.bf16.msra.mxu3 %v818_v4 }
  0x21   : > { %485 = vmatpush.bf16.msra.mxu0 %v817_v5  ;;  %880 = vmatpush.bf16.msra.mxu1 %v817_v5 }
  0x22   : > { %881 = vmatpush.bf16.msra.mxu2 %v817_v5  ;;  %882 = vmatpush.bf16.msra.mxu3 %v817_v5 }
  0x25   : > { %486 = vmatpush.bf16.msra.mxu0 %v816_v6  ;;  %883 = vmatpush.bf16.msra.mxu1 %v816_v6 }
  0x26   : > { %884 = vmatpush.bf16.msra.mxu2 %v816_v6  ;;  %885 = vmatpush.bf16.msra.mxu3 %v816_v6 }
  0x29   : > { %487 = vmatpush.bf16.msra.mxu0 %v815_v7  ;;  %886 = vmatpush.bf16.msra.mxu1 %v815_v7 }
  0x2a   : > { %887 = vmatpush.bf16.msra.mxu2 %v815_v7  ;;  %888 = vmatpush.bf16.msra.mxu3 %v815_v7 }
  0x2c   : > { %488 = vmatmul.bf16.vlgmr.msra.gmra.mxu0 %v811_v8  ;;  %493 = vmatmul.bf16.vlgmr.msra.gmra.mxu1 %v812_v9 }
  0x2d   : > { %498 = vmatmul.bf16.vlgmr.msra.gmra.mxu2 %v813_v10  ;;  %503 = vmatmul.bf16.vlgmr.msra.gmra.mxu3 %v814_v11 }
  0xa9   : > { %v489_v12 = vpop.f32.mrf.mxu0  ;;  %v494_v13 = vpop.f32.mrf.mxu1 }
  0xaa   : > { %v540_v19 = vadd.f32 %v913_v14, %v489_v12  ;;  %v542_v20 = vadd.f32 %v913_v14, %v494_v13 }
  0xac   : > { %v564_v31 = vadd.f32 %v825_v17, %v540_v19  ;;  %v566_v32 = vadd.f32 %v829_v18, %v542_v20 }
  0xb0   : > { %v499_v21 = vpop.f32.mrf.mxu2  ;;  %v504_v22 = vpop.f32.mrf.mxu3 }
  0xb1   : > { %v491_v25 = vpop.f32.mrf.mxu0  ;;  %v496_v26 = vpop.f32.mrf.mxu1  ;;  %v544_v39 = vadd.f32 %v913_v14, %v499_v21  ;;  %v546_v40 = vadd.f32 %v913_v14, %v504_v22 }
  0xb2   : > { %v541_v27 = vadd.f32 %v913_v14, %v491_v25  ;;  %v543_v28 = vadd.f32 %v913_v14, %v496_v26 }
  0xb3   : > { %v568_v47 = vadd.f32 %v833_v35, %v544_v39  ;;  %v570_v48 = vadd.f32 %v837_v36, %v546_v40 }
  0xb4   : > { %v565_v33 = vadd.f32 %v826_v23, %v541_v27  ;;  %v567_v34 = vadd.f32 %v830_v24, %v543_v28 }
  0xb6   : > { %v842_v37 = vpack.c.bf16 %v565_v33, %v564_v31  ;;  %v847_v38 = vpack.c.bf16 %v567_v34, %v566_v32 }
  0xb8   : > { %843 = vst [vmem:[%s362_s23] sm:$0xff] %v842_v37   ;;  %v501_v43 = vpop.f32.mrf.mxu2  ;;  %v506_v44 = vpop.f32.mrf.mxu3 }
  0xb9   : > { %862 = vst [vmem:[%s362_s23 + $0x8] sm:$0xff] %v847_v38   ;;  %v545_v45 = vadd.f32 %v913_v14, %v501_v43  ;;  %v547_v46 = vadd.f32 %v913_v14, %v506_v44 }
  0xbb   : > { %v569_v49 = vadd.f32 %v834_v41, %v545_v45  ;;  %v571_v50 = vadd.f32 %v838_v42, %v547_v46 }
  0xbd   : > { %v852_v51 = vpack.c.bf16 %v569_v49, %v568_v47  ;;  %v857_v52 = vpack.c.bf16 %v571_v50, %v570_v48 }
  0xbf   : > { %863 = vst [vmem:[%s362_s23 + $0x10] sm:$0xff] %v852_v51  }
  0xc0   : > { %864 = vst [vmem:[%s362_s23 + $0x18] sm:$0xff] %v857_v52  }
  0xc1 PF: > { %s14_s17 = sadd.s32 1, %s936_s17   ;;  %s1040_s15 = smov %s932_s16 }
  0xc2   : > { %p11_p5 = scmp.ge.s32.totalorder %s14_s17, 4   ;;  %s1041_s16 = smov %s1043_s18 }
  0xc4   :  { %13 = sbr.rel (!%p11_p5) target bundleno = 2 (0x2), region = 83 }

// kernel: forward.15
= control target key start
LH: loop header
LB: loop body
LE: loop exit
PB: predicated region body
PF: predicated region fallthrough
CT: control target
= control target key end

     0   :  { %s2877_s12 = smov 0   ;;  %s2879_s13 = smov 0   ;;  %s3414_s0 = inlined_call_operand.vmem [shape: bf16[2,36,9,128], index: 0, kind: input, shape index: {}]   ;;  %s3415_s1 = inlined_call_operand.vmem [shape: bf16[9,128,128], index: 1, kind: input, shape index: {}]   ;;  %s3416_s2 = inlined_call_operand.vmem [shape: f32[1,128], index: 2, kind: input, shape index: {}]   ;;  %s3417_s3 = inlined_call_operand.vmem [shape: bf16[2,8,8,128], index: 3, kind: output, shape index: {}]  }
   0x1   :  { %s2881_s14 = smov 0  }
   0x2 LB: > { %s25_s15 = sadd.s32 1, %s2851_s13  ;;  %p2041_p0 = scmp.ge.s32.totalorder %s2855_s14, 1  ;;  %s2855_s14 = sphi %s2881_s14, %s13_s14   ;;  %s2851_s13 = sphi %s2879_s13, %s3425_s13   ;;  %s2847_s12 = sphi %s2877_s12, %s3424_s12  }
   0x3   : > { %p27_p1 = scmp.ge.s32.totalorder %s25_s15, 2  ;;  %p151_p2 = scmp.lt.s32.totalorder %s2855_s14, 3 }
   0x5   : > { %s3427_s15 = smov (%p27_p1, %s25_s15), 0  ;;  %p152_p3 = pnand %p2041_p0, %p151_p2 }
   0x6   : > { %p179_p4 = scmp.lt.s32.totalorder (!%p152_p3), %s2847_s12, 1 }
   0x7   : > { %155 = sbr.rel (%p152_p3) target bundleno = 365 (0x16d), region = 32 }
   0xc   : > { %v2663_v0 = vld [vmem:[%s3415_s1 + $0x78] sm:$0xff]  ;;  %v2662_v2 = vld [vmem:[%s3415_s1 + $0x70] sm:$0xff]  ;;  %s3429_s12 = smov (!%p179_p4, %s2847_s12), 1  ;;  %v2661_v6 = vld [vmem:[%s3415_s1 + $0x68] sm:$0xff]  ;;  %vm469_vm0 = vsmask.f32 3328 }
   0xd   : > { %v2671_v1 = vld [vmem:[%s3415_s1 + $0xb8] sm:$0xff]  ;;  %2759 = vmatpush.bf16.msra.mxu1 %v2663_v0  ;;  %323 = vmatpush.bf16.msra.mxu0 %v2663_v0  ;;  %v2670_v3 = vld [vmem:[%s3415_s1 + $0xb0] sm:$0xff]  ;;  %s2775_s26 = smul.u32 288, %s3429_s12  ;;  %v2669_v7 = vld [vmem:[%s3415_s1 + $0xa8] sm:$0xff]  ;;  %vm470_vm1 = vsmask.f32 7440 }
   0xe   : > { %665 = vmatpush.bf16.msra.mxu2 %v2671_v1  ;;  %v2683_v4 = vld [vmem:[%s3415_s1 + $0xf8] sm:$0xff]  ;;  %v2682_v5 = vld [vmem:[%s3415_s1 + $0xf0] sm:$0xff]  ;;  %v2681_v8 = vld [vmem:[%s3415_s1 + $0xe8] sm:$0xff]  ;;  %s2639_s5 = sshll.u32 %s3429_s12, 5 }
   0xf   : > { %803 = vmatpush.bf16.msra.mxu3 %v2683_v4  ;;  %s2922_s6 = scalar_lea.vmem %s3414_s0, %s2775_s26  ;;  %v2660_v10 = vld [vmem:[%s3415_s1 + $0x60] sm:$0xff]  ;;  %v2659_v23 = vld [vmem:[%s3415_s1 + $0x58] sm:$0xff]  ;;  %v2658_v31 = vld [vmem:[%s3415_s1 + $0x50] sm:$0xff]  ;;  %s3350_s12 = scalar_lea.vmem %s3417_s3, %s2639_s5 }
  0x10   : > { %v453_v9 = vld [vmem:[%s2922_s6] sm:$0xf]  ;;  %v455_v11 = vld [vmem:[%s2922_s6 + $0x8] sm:$0xf]  ;;  %v454_v16 = vld [vmem:[%s2922_s6 + $0x4] sm:$0x1] }
  0x11   : > { %2760 = vmatpush.bf16.msra.mxu1 %v2662_v2  ;;  %324 = vmatpush.bf16.msra.mxu0 %v2662_v2  ;;  %v2668_v12 = vld [vmem:[%s3415_s1 + $0xa0] sm:$0xff]  ;;  %v473_v13 = vshrl.u32 %v453_v9, 16  ;;  %v476_v14 = vshll.u32 %v453_v9, 16  ;;  %v487_v15 = vshrl.u32 %v455_v11, 16  ;;  %v456_v17 = vld [vmem:[%s2922_s6 + $0xc] sm:$0x1]  ;;  %vm2959_vm2 = vmor %vm469_vm0, %vm470_vm1 }
  0x12   : > { %666 = vmatpush.bf16.msra.mxu2 %v2670_v3  ;;  %v490_v18 = vshll.u32 %v455_v11, 16  ;;  %v2680_v19 = vld [vmem:[%s3415_s1 + $0xe0] sm:$0xff]  ;;  %v2667_v25 = vld [vmem:[%s3415_s1 + $0x98] sm:$0xff]  ;;  %v482_v27 = vshll.u32 %v454_v16, 16  ;;  %v496_v28 = vshll.u32 %v456_v17, 16  ;;  %v2666_v32 = vld [vmem:[%s3415_s1 + $0x90] sm:$0xff] }
  0x13   : > { %804 = vmatpush.bf16.msra.mxu3 %v2682_v5  ;;  %v475_v20 = vrot.slane %v473_v13, 4  ;;  %v478_v21 = vrot.slane %v476_v14, 5  ;;  %v489_v22 = vrot.slane %v487_v15, 4  ;;  %v2679_v30 = vld [vmem:[%s3415_s1 + $0xd8] sm:$0xff]  ;;  %v457_v37 = vld [vmem:[%s2922_s6 + $0x10] sm:$0xf] }
  0x14   : > { %v492_v24 = vrot.slane %v490_v18, 5  ;;  %v484_v34 = vrot.slane %v482_v27, 5  ;;  %v498_v36 = vrot.slane %v496_v28, 5  ;;  %v459_v39 = vld [vmem:[%s2922_s6 + $0x18] sm:$0xf]  ;;  %v2678_v40 = vld [vmem:[%s3415_s1 + $0xd0] sm:$0xff] }
  0x15   : > { %2761 = vmatpush.bf16.msra.mxu1 %v2661_v6  ;;  %325 = vmatpush.bf16.msra.mxu0 %v2661_v6  ;;  %v479_v26 = vor.u32 %v478_v21, %v475_v20  ;;  %v2657_v41 = vld [vmem:[%s3415_s1 + $0x48] sm:$0xff]  ;;  %v501_v42 = vshrl.u32 %v457_v37, 16  ;;  %v504_v43 = vshll.u32 %v457_v37, 16  ;;  %v515_v47 = vshrl.u32 %v459_v39, 16  ;;  %v2656_v49 = vld [vmem:[%s3415_s1 + $0x40] sm:$0xff]  ;;  %v2651_v52 = vld [vmem:[%s3415_s1 + $0x38] sm:$0xff] }
  0x16   : > { %667 = vmatpush.bf16.msra.mxu2 %v2669_v7  ;;  %v493_v29 = vor.u32 %v492_v24, %v489_v22  ;;  %v2665_v44 = vld [vmem:[%s3415_s1 + $0x88] sm:$0xff]  ;;  %v518_v48 = vshll.u32 %v459_v39, 16  ;;  %v2654_v51 = vld [vmem:[%s2922_s6 + $0x6c] sm:$0xf0]  ;;  %v2664_v54 = vld [vmem:[%s3415_s1 + $0x80] sm:$0xff] }
  0x17   : > { %805 = vmatpush.bf16.msra.mxu3 %v2681_v8  ;;  %v480_v33 = vrot.slane %v479_v26, 4  ;;  %v2079_v50 = vld [vmem:[%s2922_s6 + $0x68] sm:$0xf]  ;;  %v2652_v56 = vld [vmem:[%s2922_s6 + $0x4c] sm:$0xf0]  ;;  %v503_v60 = vrot.slane %v501_v42, 4 }
  0x18   : > { %v494_v35 = vrot.slane %v493_v29, 4  ;;  %v2677_v53 = vld [vmem:[%s3415_s1 + $0xc8] sm:$0xff]  ;;  %v458_v59 = vld [vmem:[%s2922_s6 + $0x14] sm:$0x1]  ;;  %v506_v61 = vrot.slane %v504_v43, 5  ;;  %v517_v62 = vrot.slane %v515_v47, 4  ;;  %v2080_v3 = vor.u32 %v2654_v51, %v2079_v50 }
  0x19   : > { %2762 = vmatpush.bf16.msra.mxu1 %v2660_v10  ;;  %326 = vmatpush.bf16.msra.mxu0 %v2660_v10  ;;  %v485_v45 = vsel %vm2959_vm2, %v480_v33, %v484_v34  ;;  %v2071_v55 = vld [vmem:[%s2922_s6 + $0x48] sm:$0xf]  ;;  %v520_v63 = vrot.slane %v518_v48, 5  ;;  %v2695_v0 = vld [vmem:[%s3415_s1 + $0x138] sm:$0xff]  ;;  %v2676_v6 = vld [vmem:[%s3415_s1 + $0xc0] sm:$0xff]  ;;  %v510_v9 = vshll.u32 %v458_v59, 16 }
  0x1a   : > { %668 = vmatpush.bf16.msra.mxu2 %v2668_v12  ;;  %v499_v46 = vsel %vm2959_vm2, %v494_v35, %v498_v36  ;;  %v601_v57 = vunpack.c.l.b16 %v485_v45  ;;  %v2715_v1 = vld [vmem:[%s3415_s1 + $0x1b8] sm:$0xff]  ;;  %v2072_v4 = vor.u32 %v2652_v56, %v2071_v55  ;;  %v2239_v7 = vld [vmem:[%s2922_s6 + $0x90] sm:$0xf]  ;;  %v507_v11 = vor.u32 %v506_v61, %v503_v60  ;;  %v2649_v18 = vld [vmem:[%s3415_s1 + $0x28] sm:$0xff] }
  0x1b   : > { %806 = vmatpush.bf16.msra.mxu3 %v2680_v19  ;;  %v602_v58 = vunpack.c.l.b16 %v499_v46  ;;  %v460_v2 = vld [vmem:[%s2922_s6 + $0x1c] sm:$0x1]  ;;  %v2672_v8 = vld [vmem:[%s2922_s6 + $0x94] sm:$0xf0]  ;;  %v2650_v10 = vld [vmem:[%s3415_s1 + $0x30] sm:$0xff]  ;;  %v521_v12 = vor.u32 %v520_v63, %v517_v62  ;;  %v512_v19 = vrot.slane %v510_v9, 5 }
  0x1c   : > { %v524_v13 = vshll.u32 %v460_v2, 16  ;;  %v2727_v14 = vld [vmem:[%s3415_s1 + $0x1f8] sm:$0xff]  ;;  %v2694_v15 = vld [vmem:[%s3415_s1 + $0x130] sm:$0xff]  ;;  %v2240_v17 = vor.u32 %v2672_v8, %v2239_v7  ;;  %v508_v20 = vrot.slane %v507_v11, 4  ;;  %v461_v24 = vld [vmem:[%s2922_s6 + $0x20] sm:$0xf] }
  0x1d   : > { %2763 = vmatpush.bf16.msra.mxu1 %v2659_v23  ;;  %327 = vmatpush.bf16.msra.mxu0 %v2659_v23  ;;  %v609_v5 = vpack.c.b16 %v602_v58, %v601_v57  ;;  %v2714_v16 = vld [vmem:[%s3415_s1 + $0x1b0] sm:$0xff]  ;;  %v522_v21 = vrot.slane %v521_v12, 4  ;;  %v2713_v26 = vld [vmem:[%s3415_s1 + $0x1a8] sm:$0xff]  ;;  %v529_v28 = vshrl.u32 %v461_v24, 16  ;;  %v532_v29 = vshll.u32 %v461_v24, 16  ;;  %v2692_v36 = vld [vmem:[%s3415_s1 + $0x120] sm:$0xff] }
  0x1e   : > { %669 = vmatpush.bf16.msra.mxu2 %v2667_v25  ;;  %v526_v22 = vrot.slane %v524_v13, 5  ;;  %v2726_v23 = vld [vmem:[%s3415_s1 + $0x1f0] sm:$0xff]  ;;  %v2693_v25 = vld [vmem:[%s3415_s1 + $0x128] sm:$0xff]  ;;  %v2712_v37 = vld [vmem:[%s3415_s1 + $0x1a0] sm:$0xff] }
  0x1f   : > { %807 = vmatpush.bf16.msra.mxu3 %v2679_v30  ;;  %v463_v27 = vld [vmem:[%s2922_s6 + $0x28] sm:$0xf]  ;;  %v2648_v30 = vld [vmem:[%s3415_s1 + $0x20] sm:$0xff]  ;;  %v2083_v39 = vld [vmem:[%s2922_s6 + $0x78] sm:$0xf]  ;;  %v531_v45 = vrot.slane %v529_v28, 4 }
  0x20   : > { %v543_v33 = vshrl.u32 %v463_v27, 16  ;;  %v546_v34 = vshll.u32 %v463_v27, 16  ;;  %v2725_v35 = vld [vmem:[%s3415_s1 + $0x1e8] sm:$0xff]  ;;  %v2653_v42 = vld [vmem:[%s2922_s6 + $0x5c] sm:$0xf0]  ;;  %v534_v46 = vrot.slane %v532_v29, 5 }
  0x21   : > { %2764 = vmatpush.bf16.msra.mxu1 %v2658_v31  ;;  %328 = vmatpush.bf16.msra.mxu0 %v2658_v31  ;;  %v513_v31 = vsel %vm2959_vm2, %v508_v20, %v512_v19  ;;  %v2647_v47 = vld [vmem:[%s3415_s1 + $0x18] sm:$0xff]  ;;  %v462_v51 = vld [vmem:[%s2922_s6 + $0x24] sm:$0x1]  ;;  %v2243_v56 = vld [vmem:[%s2922_s6 + $0xa0] sm:$0xf] }
  0x22   : > { %670 = vmatpush.bf16.msra.mxu2 %v2666_v32  ;;  %v527_v32 = vsel %vm2959_vm2, %v522_v21, %v526_v22  ;;  %v603_v43 = vunpack.c.l.b16 %v513_v31  ;;  %v545_v48 = vrot.slane %v543_v33, 4  ;;  %v2691_v50 = vld [vmem:[%s3415_s1 + $0x118] sm:$0xff]  ;;  %v2673_v57 = vld [vmem:[%s2922_s6 + $0xa4] sm:$0xf0]  ;;  %v535_v58 = vor.u32 %v534_v46, %v531_v45  ;;  %v2646_v59 = vld [vmem:[%s3415_s1 + $0x10] sm:$0xff] }
  0x23   : > { %808 = vmatpush.bf16.msra.mxu3 %v2678_v40  ;;  %v2655_v40 = vld [vmem:[%s2922_s6 + $0x7c] sm:$0xf0]  ;;  %v538_v60 = vshll.u32 %v462_v51, 16  ;;  %v2690_v63 = vld [vmem:[%s3415_s1 + $0x110] sm:$0xff]  ;;  %v2645_v2 = vld [vmem:[%s3415_s1 + $0x8] sm:$0xff] }
  0x24   : > { %v2724_v7 = vld [vmem:[%s3415_s1 + $0x1e0] sm:$0xff]  ;;  %v465_v8 = vld [vmem:[%s2922_s6 + $0x30] sm:$0xf]  ;;  %v2689_v9 = vld [vmem:[%s3415_s1 + $0x108] sm:$0xff] }
  0x25   : > { %2765 = vmatpush.bf16.msra.mxu1 %v2657_v41  ;;  %329 = vmatpush.bf16.msra.mxu0 %v2657_v41  ;;  %v2075_v41 = vld [vmem:[%s2922_s6 + $0x58] sm:$0xf]  ;;  %v2710_v11 = vld [vmem:[%s3415_s1 + $0x190] sm:$0xff]  ;;  %v557_v12 = vshrl.u32 %v465_v8, 16  ;;  %v560_v13 = vshll.u32 %v465_v8, 16  ;;  %v2688_v21 = vld [vmem:[%s3415_s1 + $0x100] sm:$0xff] }
  0x26   : > { %671 = vmatpush.bf16.msra.mxu2 %v2665_v44  ;;  %v604_v44 = vunpack.c.l.b16 %v527_v32  ;;  %v2703_v20 = vld [vmem:[%s3415_s1 + $0x178] sm:$0xff]  ;;  %v2119_v22 = vld [vmem:[%s2922_s6] sm:$0xf]  ;;  %v2702_v33 = vld [vmem:[%s3415_s1 + $0x170] sm:$0xff] }
  0x27   : > { %809 = vmatpush.bf16.msra.mxu3 %v2677_v53  ;;  %v2084_v53 = vor.u32 %v2655_v40, %v2083_v39  ;;  %v2735_v24 = vld [vmem:[%s3415_s1 + $0x238] sm:$0xff]  ;;  %v559_v29 = vrot.slane %v557_v12, 4  ;;  %v2247_v40 = vld [vmem:[%s2922_s6 + $0xb0] sm:$0xf]  ;;  %v2697_v12 = vld [vmem:[%s3415_s1 + $0x148] sm:$0xff] }
  0x28   : > { %v610_v55 = vpack.c.b16 %v604_v44, %v603_v43  ;;  %v2734_v43 = vld [vmem:[%s3415_s1 + $0x230] sm:$0xff] }
  0x29   : > { %2766 = vmatpush.bf16.msra.mxu1 %v2656_v49  ;;  %330 = vmatpush.bf16.msra.mxu0 %v2656_v49  ;;  %v548_v49 = vrot.slane %v546_v34, 5  ;;  %v466_v34 = vld [vmem:[%s2922_s6 + $0x34] sm:$0x1] }
  0x2a   : > { %672 = vmatpush.bf16.msra.mxu2 %v2664_v54  ;;  %v2076_v54 = vor.u32 %v2653_v42, %v2075_v41  ;;  %v2674_v41 = vld [vmem:[%s2922_s6 + $0xb4] sm:$0xf0]  ;;  %v566_v44 = vshll.u32 %v466_v34, 16  ;;  %v2567_v34 = vld [vmem:[%s2922_s6 + $0x10] sm:$0xf] }
  0x2b   : > { %810 = vmatpush.bf16.msra.mxu3 %v2676_v6  ;;  %v549_v61 = vor.u32 %v548_v49, %v545_v48  ;;  %v2709_v48 = vld [vmem:[%s3415_s1 + $0x188] sm:$0xff]  ;;  %v2248_v49 = vor.u32 %v2674_v41, %v2247_v40 }
  0x2c   : > { %341 = vmatmul.bf16.vlgmr.msra.gmra.mxu1 %v2080_v3  ;;  %331 = vmatmul.bf16.vlgmr.msra.gmra.mxu0 %v2072_v4  ;;  %v536_v3 = vrot.slane %v535_v58, 4  ;;  %v540_v4 = vrot.slane %v538_v60, 5  ;;  %v568_v51 = vrot.slane %v566_v44, 5  ;;  %v2721_v58 = vld [vmem:[%s3415_s1 + $0x1c8] sm:$0xff]  ;;  %v2131_v44 = vld [vmem:[%s2922_s6 + $0x30] sm:$0xf] }
  0x2d   : > { %424 = vmatpush.bf16.msrb.mxu1 %v2651_v52  ;;  %941 = vmatpush.bf16.msrb.mxu0 %v2695_v0  ;;  %v464_v52 = vld [vmem:[%s2922_s6 + $0x2c] sm:$0x1]  ;;  %v2244_v0 = vor.u32 %v2673_v57, %v2243_v56  ;;  %v2700_v57 = vld [vmem:[%s3415_s1 + $0x160] sm:$0xff] }
  0x2e   : > { %1325 = vmatpush.bf16.msrb.mxu2 %v2715_v1  ;;  %811 = vmatmul.bf16.vlgmr.msra.gmra.mxu3 %v2240_v17  ;;  %v552_v62 = vshll.u32 %v464_v52, 16  ;;  %v2711_v1 = vld [vmem:[%s3415_s1 + $0x198] sm:$0xff]  ;;  %v2733_v56 = vld [vmem:[%s3415_s1 + $0x228] sm:$0xff] }
  0x2f   : > { %673 = vmatmul.bf16.vlgmr.msra.gmra.mxu2 %v609_v5  ;;  %1463 = vmatpush.bf16.msrb.mxu3 %v2727_v14  ;;  %v550_v5 = vrot.slane %v549_v61, 4  ;;  %v2723_v14 = vld [vmem:[%s3415_s1 + $0x1d8] sm:$0xff] }
  0x30   : > { %v554_v6 = vrot.slane %v552_v62, 5  ;;  %v2699_v62 = vld [vmem:[%s3415_s1 + $0x158] sm:$0xff] }
  0x31   : > { %425 = vmatpush.bf16.msrb.mxu1 %v2650_v10  ;;  %942 = vmatpush.bf16.msrb.mxu0 %v2694_v15  ;;  %v467_v10 = vld [vmem:[%s2922_s6 + $0x38] sm:$0xf]  ;;  %v2644_v15 = vld [vmem:[%s3415_s1] sm:$0xff] }
  0x32   : > { %1326 = vmatpush.bf16.msrb.mxu2 %v2714_v16  ;;  %v541_v16 = vsel %vm2959_vm2, %v536_v3, %v540_v4  ;;  %v555_v17 = vsel %vm2959_vm2, %v550_v5, %v554_v6  ;;  %v574_v19 = vshll.u32 %v467_v10, 16  ;;  %v2698_v5 = vld [vmem:[%s3415_s1 + $0x150] sm:$0xff] }
  0x33   : > { %1464 = vmatpush.bf16.msrb.mxu3 %v2726_v23  ;;  %v2640_v23 = vld [vmem:[%s2922_s6 + $0x4] sm:$0xf0]  ;;  %v605_v27 = vunpack.c.l.b16 %v541_v16  ;;  %v606_v28 = vunpack.c.l.b16 %v555_v17  ;;  %v2730_v16 = vld [vmem:[%s3415_s1 + $0x210] sm:$0xff]  ;;  %v2127_v17 = vld [vmem:[%s2922_s6 + $0x20] sm:$0xf] }
  0x34   : > { %v576_v32 = vrot.slane %v574_v19, 5  ;;  %v2642_v19 = vld [vmem:[%s2922_s6 + $0x24] sm:$0xf0] }
  0x35   : > { %426 = vmatpush.bf16.msrb.mxu1 %v2649_v18  ;;  %943 = vmatpush.bf16.msrb.mxu0 %v2693_v25  ;;  %v571_v18 = vshrl.u32 %v467_v10, 16  ;;  %v2311_v25 = vld [vmem:[%s2922_s6 + $0xd8] sm:$0xf]  ;;  %v611_v39 = vpack.c.b16 %v606_v28, %v605_v27  ;;  %v2675_v10 = vld [vmem:[%s2922_s6 + $0xc4] sm:$0xf0] }
  0x36   : > { %1327 = vmatpush.bf16.msrb.mxu2 %v2713_v26  ;;  %v2684_v26 = vld [vmem:[%s2922_s6 + $0xdc] sm:$0xf0]  ;;  %v2519_v27 = vld [vmem:[%s2922_s6 + $0x50] sm:$0xf]  ;;  %v2716_v28 = vld [vmem:[%s2922_s6 + $0x54] sm:$0xf0] }
  0x37   : > { %1465 = vmatpush.bf16.msrb.mxu3 %v2725_v35  ;;  %v573_v31 = vrot.slane %v571_v18, 4  ;;  %v468_v35 = vld [vmem:[%s2922_s6 + $0x3c] sm:$0x1]  ;;  %v2729_v18 = vld [vmem:[%s3415_s1 + $0x208] sm:$0xff] }
  0x38   : > { %v580_v46 = vshll.u32 %v468_v35, 16 }
  0x39   : > { %427 = vmatpush.bf16.msrb.mxu1 %v2648_v30  ;;  %944 = vmatpush.bf16.msrb.mxu0 %v2692_v36  ;;  %v562_v30 = vrot.slane %v560_v13, 5  ;;  %v2120_v36 = vor.u32 %v2640_v23, %v2119_v22  ;;  %v577_v45 = vor.u32 %v576_v32, %v573_v31  ;;  %v2720_v13 = vld [vmem:[%s3415_s1 + $0x1c0] sm:$0xff]  ;;  %v2447_v22 = vld [vmem:[%s2922_s6 + $0x8] sm:$0xf]  ;;  %v2704_v23 = vld [vmem:[%s2922_s6 + $0xc] sm:$0xf0] }
  0x3a   : > { %1328 = vmatpush.bf16.msrb.mxu2 %v2712_v37  ;;  %v2312_v37 = vor.u32 %v2684_v26, %v2311_v25  ;;  %v2448_v26 = vor.u32 %v2704_v23, %v2447_v22  ;;  %v2357_v31 = vld [vmem:[%s2922_s6 + $0x90] sm:$0xf]  ;;  %v2359_v32 = vld [vmem:[%s2922_s6 + $0x98] sm:$0xf] }
  0x3b   : > { %1466 = vmatpush.bf16.msrb.mxu3 %v2724_v7  ;;  %v563_v42 = vor.u32 %v562_v30, %v559_v29  ;;  %v578_v52 = vrot.slane %v577_v45, 4  ;;  %v2520_v29 = vor.u32 %v2716_v28, %v2519_v27  ;;  %v2728_v30 = vld [vmem:[%s3415_s1 + $0x200] sm:$0xff]  ;;  %v995_v35 = vshrl.u32 %v2357_v31, 16  ;;  %v2643_v45 = vld [vmem:[%s2922_s6 + $0x34] sm:$0xf0] }
  0x3c   : > { %346 = vmatmul.bf16.gmra.mxu1 %v2084_v53  ;;  %336 = vmatmul.bf16.gmra.mxu0 %v2076_v54  ;;  %v582_v53 = vrot.slane %v580_v46, 5  ;;  %v2708_v54 = vld [vmem:[%s3415_s1 + $0x180] sm:$0xff]  ;;  %v2323_v46 = vld [vmem:[%s2922_s6 + $0x108] sm:$0xf] }
  0x3d   : > { %428 = vmatpush.bf16.msrb.mxu1 %v2647_v47  ;;  %945 = vmatpush.bf16.msrb.mxu0 %v2691_v50  ;;  %v2701_v47 = vld [vmem:[%s3415_s1 + $0x168] sm:$0xff]  ;;  %v564_v50 = vrot.slane %v563_v42, 4  ;;  %v1531_v42 = vshrl.u32 %v2567_v34, 16 }
  0x3e   : > { %1329 = vmatpush.bf16.msrb.mxu2 %v2711_v1  ;;  %816 = vmatmul.bf16.gmra.mxu3 %v2244_v0  ;;  %v583_v61 = vsel %vm2959_vm2, %v578_v52, %v582_v53  ;;  %v2641_v0 = vld [vmem:[%s2922_s6 + $0x14] sm:$0xf0]  ;;  %v2315_v1 = vld [vmem:[%s2922_s6 + $0xe8] sm:$0xf] }
  0x3f   : > { %678 = vmatmul.bf16.gmra.mxu2 %v610_v55  ;;  %1467 = vmatpush.bf16.msrb.mxu3 %v2723_v14  ;;  %v2722_v55 = vld [vmem:[%s3415_s1 + $0x1d0] sm:$0xff]  ;;  %v569_v60 = vsel %vm2959_vm2, %v564_v50, %v568_v51  ;;  %v608_v4 = vunpack.c.l.b16 %v583_v61  ;;  %v2731_v14 = vld [vmem:[%s3415_s1 + $0x218] sm:$0xff]  ;;  %v997_v51 = vrot.slane %v995_v35, 4 }
  0x40   : > { %v607_v3 = vunpack.c.l.b16 %v569_v60  ;;  %v2360_v50 = vld [vmem:[%s2922_s6 + $0x9c] sm:$0x1]  ;;  %v2566_v60 = vld [vmem:[%s2922_s6 + $0xc] sm:$0x1]  ;;  %v2568_v61 = vld [vmem:[%s2922_s6 + $0x14] sm:$0x1] }
  0x41   : > { %429 = vmatpush.bf16.msrb.mxu1 %v2646_v59  ;;  %946 = vmatpush.bf16.msrb.mxu0 %v2690_v63  ;;  %v2732_v59 = vld [vmem:[%s3415_s1 + $0x220] sm:$0xff]  ;;  %v2123_v63 = vld [vmem:[%s2922_s6 + $0x10] sm:$0xf] }
  0x42   : > { %1330 = vmatpush.bf16.msrb.mxu2 %v2710_v11  ;;  %v2124_v6 = vor.u32 %v2641_v0, %v2123_v63  ;;  %v612_v8 = vpack.c.b16 %v608_v4, %v607_v3  ;;  %v1018_v0 = vshll.u32 %v2360_v50, 16 }
  0x43   : > { %1468 = vmatpush.bf16.msrb.mxu3 %v2722_v55  ;;  %v2705_v55 = vld [vmem:[%s2922_s6 + $0x1c] sm:$0xf0] }
  0x45   : > { %430 = vmatpush.bf16.msrb.mxu1 %v2645_v2  ;;  %947 = vmatpush.bf16.msrb.mxu0 %v2689_v9  ;;  %v2685_v2 = vld [vmem:[%s2922_s6 + $0xec] sm:$0xf0]  ;;  %v2251_v9 = vld [vmem:[%s2922_s6 + $0xc0] sm:$0xf] }
  0x46   : > { %1331 = vmatpush.bf16.msrb.mxu2 %v2709_v48  ;;  %v2316_v7 = vor.u32 %v2685_v2, %v2315_v1  ;;  %v2252_v11 = vor.u32 %v2675_v10, %v2251_v9  ;;  %v2451_v48 = vld [vmem:[%s2922_s6 + $0x18] sm:$0xf]  ;;  %v1540_v10 = vshll.u32 %v2568_v61, 16 }
  0x47   : > { %1469 = vmatpush.bf16.msrb.mxu3 %v2721_v58  ;;  %v1533_v58 = vrot.slane %v1531_v42, 4  ;;  %v2452_v2 = vor.u32 %v2705_v55, %v2451_v48  ;;  %v2364_v42 = vld [vmem:[%s2922_s6 + $0xac] sm:$0x1] }
  0x48   : > { %v1542_v23 = vrot.slane %v1540_v10, 5 }
  0x49   : > { %431 = vmatpush.bf16.msrb.mxu1 %v2644_v15  ;;  %948 = vmatpush.bf16.msrb.mxu0 %v2688_v21  ;;  %v2696_v15 = vld [vmem:[%s3415_s1 + $0x140] sm:$0xff] }
  0x4a   : > { %1332 = vmatpush.bf16.msrb.mxu2 %v2708_v54  ;;  %v2686_v21 = vld [vmem:[%s2922_s6 + $0xfc] sm:$0xf0] }
  0x4b   : > { %1470 = vmatpush.bf16.msrb.mxu3 %v2720_v13  ;;  %v2361_v13 = vld [vmem:[%s2922_s6 + $0xa0] sm:$0xf] }
  0x4c   : > { %432 = vmatmul.bf16.vlgmr.msrb.gmra.mxu1 %v2120_v36  ;;  %949 = vmatmul.bf16.vlgmr.msrb.gmra.mxu0 %v2312_v37  ;;  %v998_v36 = vshll.u32 %v2357_v31, 16  ;;  %v1009_v37 = vshrl.u32 %v2359_v32, 16 }
  0x4d   : > { %1187 = vmatpush.bf16.msra.mxu1 %v2703_v20  ;;  %1709 = vmatpush.bf16.msra.mxu0 %v2735_v24  ;;  %v2319_v20 = vld [vmem:[%s2922_s6 + $0xf8] sm:$0xf] }
  0x4e   : > { %821 = vmatmul.bf16.gmra.mxu3 %v2248_v49  ;;  %2767 = vmatpush.bf16.msra.mxu2 %v2735_v24  ;;  %v2128_v24 = vor.u32 %v2642_v19, %v2127_v17  ;;  %v2320_v25 = vor.u32 %v2686_v21, %v2319_v20  ;;  %v2358_v49 = vld [vmem:[%s2922_s6 + $0x94] sm:$0x1]  ;;  %v1000_v52 = vrot.slane %v998_v36, 5  ;;  %v1011_v53 = vrot.slane %v1009_v37, 4  ;;  %v2571_v19 = vld [vmem:[%s2922_s6 + $0x20] sm:$0xf] }
  0x4f   : > { %683 = vmatmul.bf16.gmra.mxu2 %v611_v39  ;;  %v1012_v39 = vshll.u32 %v2359_v32, 16  ;;  %v1004_v63 = vshll.u32 %v2358_v49, 16  ;;  %v1562_v31 = vshll.u32 %v2571_v19, 16  ;;  %v2362_v36 = vld [vmem:[%s2922_s6 + $0xa4] sm:$0x1] }
  0x50   : > { %v1001_v3 = vor.u32 %v1000_v52, %v997_v51  ;;  %v2570_v51 = vld [vmem:[%s2922_s6 + $0x1c] sm:$0x1]  ;;  %v2572_v52 = vld [vmem:[%s2922_s6 + $0x24] sm:$0x1] }
  0x51   : > { %1188 = vmatpush.bf16.msra.mxu1 %v2702_v33  ;;  %1710 = vmatpush.bf16.msra.mxu0 %v2734_v43  ;;  %v2565_v33 = vld [vmem:[%s2922_s6 + $0x8] sm:$0xf]  ;;  %v1014_v54 = vrot.slane %v1012_v39, 5 }
  0x52   : > { %2768 = vmatpush.bf16.msra.mxu2 %v2734_v43  ;;  %v1517_v40 = vshrl.u32 %v2565_v33, 16  ;;  %v1520_v41 = vshll.u32 %v2565_v33, 16  ;;  %v1534_v43 = vshll.u32 %v2567_v34, 16 }
  0x53   : > { %v1015_v4 = vor.u32 %v1014_v54, %v1011_v53  ;;  %v2455_v53 = vld [vmem:[%s2922_s6 + $0x28] sm:$0xf]  ;;  %v2706_v54 = vld [vmem:[%s2922_s6 + $0x2c] sm:$0xf0] }
  0x55   : > { %1189 = vmatpush.bf16.msra.mxu1 %v2701_v47  ;;  %1711 = vmatpush.bf16.msra.mxu0 %v2733_v56  ;;  %v2687_v47 = vld [vmem:[%s2922_s6 + $0x10c] sm:$0xf0] }
  0x56   : > { %2769 = vmatpush.bf16.msra.mxu2 %v2733_v56  ;;  %v1519_v56 = vrot.slane %v1517_v40, 4  ;;  %v2324_v1 = vor.u32 %v2687_v47, %v2323_v46  ;;  %v1564_v46 = vrot.slane %v1562_v31, 5 }
  0x59   : > { %1190 = vmatpush.bf16.msra.mxu1 %v2700_v57  ;;  %1712 = vmatpush.bf16.msra.mxu0 %v2732_v59  ;;  %v1522_v57 = vrot.slane %v1520_v41, 5 }
  0x5a   : > { %2770 = vmatpush.bf16.msra.mxu2 %v2732_v59  ;;  %v1536_v59 = vrot.slane %v1534_v43, 5 }
  0x5c   : > { %437 = vmatmul.bf16.gmra.mxu1 %v2124_v6  ;;  %954 = vmatmul.bf16.gmra.mxu0 %v2316_v7  ;;  %v2717_v6 = vld [vmem:[%s2922_s6 + $0x64] sm:$0xf0]  ;;  %v1523_v7 = vor.u32 %v1522_v57, %v1519_v56  ;;  %v1537_v9 = vor.u32 %v1536_v59, %v1533_v58  ;;  %v1032_v56 = vshll.u32 %v2362_v36, 16  ;;  %v1046_v58 = vshll.u32 %v2364_v42, 16  ;;  %v2366_v42 = vld [vmem:[%s2922_s6 + $0xb4] sm:$0x1] }
  0x5d   : > { %1191 = vmatpush.bf16.msra.mxu1 %v2699_v62  ;;  %1713 = vmatpush.bf16.msra.mxu0 %v2731_v14  ;;  %v2132_v62 = vor.u32 %v2643_v45, %v2131_v44 }
  0x5e   : > { %826 = vmatmul.bf16.gmra.mxu3 %v2252_v11  ;;  %2771 = vmatpush.bf16.msra.mxu2 %v2731_v14  ;;  %v1006_v11 = vrot.slane %v1004_v63, 5  ;;  %v2363_v14 = vld [vmem:[%s2922_s6 + $0xa8] sm:$0xf]  ;;  %v1524_v20 = vrot.slane %v1523_v7, 4  ;;  %v1538_v22 = vrot.slane %v1537_v9, 4  ;;  %v1048_v7 = vrot.slane %v1046_v58, 5 }
  0x5f   : > { %688 = vmatmul.bf16.gmra.mxu2 %v612_v8  ;;  %v1526_v8 = vshll.u32 %v2566_v60, 16  ;;  %v1040_v27 = vshll.u32 %v2363_v14, 16  ;;  %v1554_v60 = vshll.u32 %v2570_v51, 16  ;;  %v2459_v51 = vld [vmem:[%s2922_s6 + $0x38] sm:$0xf] }
  0x60   : > { %v1543_v35 = vsel %vm2959_vm2, %v1538_v22, %v1542_v23  ;;  %v2578_v58 = vld [vmem:[%s2922_s6 + $0x3c] sm:$0x1] }
  0x61   : > { %1192 = vmatpush.bf16.msra.mxu1 %v2698_v5  ;;  %1714 = vmatpush.bf16.msra.mxu0 %v2730_v16  ;;  %v2523_v5 = vld [vmem:[%s2922_s6 + $0x60] sm:$0xf]  ;;  %v1528_v21 = vrot.slane %v1526_v8, 5  ;;  %v1042_v41 = vrot.slane %v1040_v27, 5  ;;  %v1646_v50 = vunpack.c.l.b16 %v1543_v35  ;;  %v1556_v9 = vrot.slane %v1554_v60, 5 }
  0x62   : > { %2772 = vmatpush.bf16.msra.mxu2 %v2730_v16  ;;  %v1016_v16 = vrot.slane %v1015_v4, 4  ;;  %v2524_v17 = vor.u32 %v2717_v6, %v2523_v5  ;;  %v1034_v5 = vrot.slane %v1032_v56, 5  ;;  %v2707_v56 = vld [vmem:[%s2922_s6 + $0x3c] sm:$0xf0] }
  0x63   : > { %v1529_v34 = vsel %vm2959_vm2, %v1524_v20, %v1528_v21  ;;  %v2577_v21 = vld [vmem:[%s2922_s6 + $0x38] sm:$0xf] }
  0x64   : > { %v1645_v49 = vunpack.c.l.b16 %v1529_v34  ;;  %v1604_v34 = vshll.u32 %v2577_v21, 16 }
  0x65   : > { %1193 = vmatpush.bf16.msra.mxu1 %v2697_v12  ;;  %1715 = vmatpush.bf16.msra.mxu0 %v2729_v18  ;;  %v1020_v12 = vrot.slane %v1018_v0, 5 }
  0x66   : > { %2773 = vmatpush.bf16.msra.mxu2 %v2729_v18  ;;  %v2569_v18 = vld [vmem:[%s2922_s6 + $0x18] sm:$0xf]  ;;  %v1653_v0 = vpack.c.b16 %v1646_v50, %v1645_v49 }
  0x67   : > { %v1545_v28 = vshrl.u32 %v2569_v18, 16  ;;  %v1021_v33 = vsel %vm2959_vm2, %v1016_v16, %v1020_v12  ;;  %v2365_v12 = vld [vmem:[%s2922_s6 + $0xb0] sm:$0xf] }
  0x68   : > { %v1124_v48 = vunpack.c.l.b16 %v1021_v33  ;;  %v2575_v16 = vld [vmem:[%s2922_s6 + $0x30] sm:$0xf]  ;;  %v1054_v20 = vshll.u32 %v2365_v12, 16  ;;  %v1601_v33 = vshrl.u32 %v2577_v21, 16 }
  0x69   : > { %1194 = vmatpush.bf16.msra.mxu1 %v2696_v15  ;;  %1716 = vmatpush.bf16.msra.mxu0 %v2728_v30  ;;  %v1002_v15 = vrot.slane %v1001_v3, 4  ;;  %v1547_v43 = vrot.slane %v1545_v28, 4  ;;  %v2718_v3 = vld [vmem:[%s2922_s6 + $0x74] sm:$0xf0] }
  0x6a   : > { %2774 = vmatpush.bf16.msra.mxu2 %v2728_v30  ;;  %v1559_v30 = vshrl.u32 %v2571_v19, 16  ;;  %v1051_v19 = vshrl.u32 %v2365_v12, 16  ;;  %v1056_v36 = vrot.slane %v1054_v20, 5 }
  0x6b   : > { %v1007_v32 = vsel %vm2959_vm2, %v1002_v15, %v1006_v11  ;;  %v2573_v15 = vld [vmem:[%s2922_s6 + $0x28] sm:$0xf] }
  0x6c   : > { %442 = vmatmul.bf16.gmra.mxu1 %v2128_v24  ;;  %959 = vmatmul.bf16.gmra.mxu0 %v2320_v25  ;;  %v1023_v24 = vshrl.u32 %v2361_v13, 16  ;;  %v1026_v25 = vshll.u32 %v2361_v13, 16  ;;  %v1561_v45 = vrot.slane %v1559_v30, 4  ;;  %v1123_v47 = vunpack.c.l.b16 %v1007_v32 }
  0x6d   : > { %v1573_v27 = vshrl.u32 %v2573_v15, 16  ;;  %v1576_v28 = vshll.u32 %v2573_v15, 16  ;;  %v1590_v30 = vshll.u32 %v2575_v16, 16  ;;  %v1053_v35 = vrot.slane %v1051_v19, 4 }
  0x6e   : > { %1471 = vmatmul.bf16.vlgmr.msrb.gmra.mxu3 %v2520_v29  ;;  %v1548_v29 = vshll.u32 %v2569_v18, 16  ;;  %v1025_v37 = vrot.slane %v1023_v24, 4  ;;  %v1028_v39 = vrot.slane %v1026_v25, 5  ;;  %v1565_v61 = vor.u32 %v1564_v46, %v1561_v45  ;;  %v2574_v46 = vld [vmem:[%s2922_s6 + $0x2c] sm:$0x1] }
  0x6f   : > { %1333 = vmatmul.bf16.vlgmr.msrb.gmra.mxu2 %v2448_v26  ;;  %v1037_v26 = vshrl.u32 %v2363_v14, 16  ;;  %v1131_v63 = vpack.c.b16 %v1124_v48, %v1123_v47  ;;  %v2367_v14 = vld [vmem:[%s2922_s6 + $0xb8] sm:$0xf]  ;;  %v1575_v47 = vrot.slane %v1573_v27, 4  ;;  %v1578_v48 = vrot.slane %v1576_v28, 5 }
  0x70   : > { %v1550_v44 = vrot.slane %v1548_v29, 5  ;;  %v1029_v55 = vor.u32 %v1028_v39, %v1025_v37  ;;  %v1566_v10 = vrot.slane %v1565_v61, 4  ;;  %v1065_v24 = vshrl.u32 %v2367_v14, 16  ;;  %v2371_v27 = vld [vmem:[%s2922_s6 + $0xc8] sm:$0xf] }
  0x71   : > { %v1039_v40 = vrot.slane %v1037_v26, 4  ;;  %v1068_v25 = vshll.u32 %v2367_v14, 16  ;;  %v2579_v26 = vld [vmem:[%s2922_s6 + $0x40] sm:$0xf]  ;;  %v1587_v29 = vshrl.u32 %v2575_v16, 16  ;;  %v1592_v50 = vrot.slane %v1590_v30, 5 }
  0x72   : > { %v1551_v59 = vor.u32 %v1550_v44, %v1547_v43  ;;  %v1030_v4 = vrot.slane %v1029_v55, 4  ;;  %v1615_v37 = vshrl.u32 %v2579_v26, 16  ;;  %v1618_v39 = vshll.u32 %v2579_v26, 16  ;;  %v2368_v43 = vld [vmem:[%s2922_s6 + $0xbc] sm:$0x1] }
  0x73   : > { %v1043_v57 = vor.u32 %v1042_v41, %v1039_v40  ;;  %v1067_v44 = vrot.slane %v1065_v24, 4  ;;  %v1070_v45 = vrot.slane %v1068_v25, 5  ;;  %v1589_v49 = vrot.slane %v1587_v29, 4  ;;  %v2369_v24 = vld [vmem:[%s2922_s6 + $0xc0] sm:$0xf] }
  0x74   : > { %v1552_v8 = vrot.slane %v1551_v59, 4  ;;  %v1617_v59 = vrot.slane %v1615_v37, 4  ;;  %v1620_v60 = vrot.slane %v1618_v39, 5  ;;  %v1060_v61 = vshll.u32 %v2366_v42, 16 }
  0x75   : > { %v1044_v6 = vrot.slane %v1043_v57, 4  ;;  %v1057_v57 = vor.u32 %v1056_v36, %v1053_v35  ;;  %v1093_v35 = vshrl.u32 %v2371_v27, 16  ;;  %v1096_v36 = vshll.u32 %v2371_v27, 16 }
  0x76   : > { %v1557_v22 = vsel %vm2959_vm2, %v1552_v8, %v1556_v9  ;;  %v2719_v8 = vld [vmem:[%s2922_s6 + $0x84] sm:$0xf0]  ;;  %v1621_v12 = vor.u32 %v1620_v60, %v1617_v59  ;;  %v1062_v14 = vrot.slane %v1060_v61, 5 }
  0x77   : > { %v1049_v18 = vsel %vm2959_vm2, %v1044_v6, %v1048_v7  ;;  %v1647_v40 = vunpack.c.l.b16 %v1557_v22  ;;  %v2460_v6 = vor.u32 %v2707_v56, %v2459_v51  ;;  %v2531_v7 = vld [vmem:[%s2922_s6 + $0x80] sm:$0xf] }
  0x78   : > { %v1126_v32 = vunpack.c.l.b16 %v1049_v18  ;;  %v2532_v18 = vor.u32 %v2719_v8, %v2531_v7  ;;  %v1622_v25 = vrot.slane %v1621_v12, 4 }
  0x7c   : > { %447 = vmatmul.bf16.gmra.mxu1 %v2132_v62  ;;  %964 = vmatmul.bf16.gmra.mxu0 %v2324_v1  ;;  %v1568_v62 = vshll.u32 %v2572_v52, 16  ;;  %v2456_v1 = vor.u32 %v2706_v54, %v2455_v53  ;;  %v2576_v52 = vld [vmem:[%s2922_s6 + $0x34] sm:$0x1]  ;;  %v1603_v53 = vrot.slane %v1601_v33, 4  ;;  %v1606_v54 = vrot.slane %v1604_v34, 5 }
  0x7d   : > { %v1082_v34 = vshll.u32 %v2369_v24, 16 }
  0x7e   : > { %1476 = vmatmul.bf16.gmra.mxu3 %v2524_v17  ;;  %v1570_v11 = vrot.slane %v1568_v62, 5  ;;  %v1035_v17 = vsel %vm2959_vm2, %v1030_v4, %v1034_v5  ;;  %v1071_v62 = vor.u32 %v1070_v45, %v1067_v44  ;;  %v1593_v4 = vor.u32 %v1592_v50, %v1589_v49  ;;  %v2372_v50 = vld [vmem:[%s2922_s6 + $0xcc] sm:$0x1] }
  0x7f   : > { %1338 = vmatmul.bf16.gmra.mxu2 %v2452_v2  ;;  %v2527_v2 = vld [vmem:[%s2922_s6 + $0x70] sm:$0xf]  ;;  %v1125_v31 = vunpack.c.l.b16 %v1035_v17  ;;  %v1596_v5 = vshll.u32 %v2576_v52, 16  ;;  %v1607_v9 = vor.u32 %v1606_v54, %v1603_v53  ;;  %v1098_v49 = vrot.slane %v1096_v36, 5 }
  0x80   : > { %v2528_v13 = vor.u32 %v2718_v3, %v2527_v2  ;;  %v1571_v23 = vsel %vm2959_vm2, %v1566_v10, %v1570_v11  ;;  %v1579_v3 = vor.u32 %v1578_v48, %v1575_v47  ;;  %v1610_v10 = vshll.u32 %v2578_v58, 16 }
  0x81   : > { %v1648_v41 = vunpack.c.l.b16 %v1571_v23  ;;  %v1132_v55 = vpack.c.b16 %v1126_v32, %v1125_v31  ;;  %v1058_v11 = vrot.slane %v1057_v57, 4  ;;  %v1072_v15 = vrot.slane %v1071_v62, 4 }
  0x82   : > { %v1580_v19 = vrot.slane %v1579_v3, 4  ;;  %v1594_v20 = vrot.slane %v1593_v4, 4  ;;  %v1598_v21 = vrot.slane %v1596_v5, 5  ;;  %v1608_v22 = vrot.slane %v1607_v9, 4 }
  0x83   : > { %v1654_v2 = vpack.c.b16 %v1648_v41, %v1647_v40  ;;  %v1612_v23 = vrot.slane %v1610_v10, 5  ;;  %v1063_v28 = vsel %vm2959_vm2, %v1058_v11, %v1062_v14  ;;  %v1079_v32 = vshrl.u32 %v2369_v24, 16 }
  0x84   : > { %v1599_v31 = vsel %vm2959_vm2, %v1594_v20, %v1598_v21  ;;  %v1127_v39 = vunpack.c.l.b16 %v1063_v28  ;;  %v1084_v47 = vrot.slane %v1082_v34, 5  ;;  %v1095_v48 = vrot.slane %v1093_v35, 4 }
  0x85   : > { %v1613_v33 = vsel %vm2959_vm2, %v1608_v22, %v1612_v23  ;;  %v1650_v42 = vunpack.c.l.b16 %v1599_v31  ;;  %v1081_v44 = vrot.slane %v1079_v32, 4  ;;  %v1102_v59 = vshll.u32 %v2372_v50, 16 }
  0x86   : > { %v1099_v58 = vor.u32 %v1098_v49, %v1095_v48 }
  0x87   : > { %v1085_v57 = vor.u32 %v1084_v47, %v1081_v44 }
  0x88   : > { %v1100_v62 = vrot.slane %v1099_v58, 4 }
  0x89   : > { %v1086_v60 = vrot.slane %v1085_v57, 4 }
  0x8c   : > { %1195 = vmatmul.bf16.vlgmr.msra.gmra.mxu1 %v1131_v63  ;;  %1717 = vmatmul.bf16.vlgmr.msra.gmra.mxu0 %v1653_v0  ;;  %v1074_v63 = vshll.u32 %v2368_v43, 16  ;;  %v1582_v0 = vshll.u32 %v2574_v46, 16  ;;  %v1651_v43 = vunpack.c.l.b16 %v1613_v33  ;;  %v2370_v46 = vld [vmem:[%s2922_s6 + $0xc4] sm:$0x1] }
  0x8d   : > { %v1088_v53 = vshll.u32 %v2370_v46, 16 }
  0x8e   : > { %1481 = vmatmul.bf16.gmra.mxu3 %v2528_v13  ;;  %v1076_v16 = vrot.slane %v1074_v63, 5  ;;  %v1584_v17 = vrot.slane %v1582_v0, 5  ;;  %v1104_v63 = vrot.slane %v1102_v59, 5 }
  0x8f   : > { %1343 = vmatmul.bf16.gmra.mxu2 %v2456_v1  ;;  %v2580_v1 = vld [vmem:[%s2922_s6 + $0x44] sm:$0x1]  ;;  %v1090_v61 = vrot.slane %v1088_v53, 5 }
  0x90   : > { %v1624_v13 = vshll.u32 %v2580_v1, 16  ;;  %v1077_v29 = vsel %vm2959_vm2, %v1072_v15, %v1076_v16  ;;  %v1585_v30 = vsel %vm2959_vm2, %v1580_v19, %v1584_v17  ;;  %v1105_v4 = vsel %vm2959_vm2, %v1100_v62, %v1104_v63 }
  0x91   : > { %v1128_v40 = vunpack.c.l.b16 %v1077_v29  ;;  %v1649_v41 = vunpack.c.l.b16 %v1585_v30  ;;  %v1091_v3 = vsel %vm2959_vm2, %v1086_v60, %v1090_v61  ;;  %v1130_v7 = vunpack.c.l.b16 %v1105_v4 }
  0x92   : > { %v1626_v26 = vrot.slane %v1624_v13, 5 }
  0x93   : > { %v1133_v51 = vpack.c.b16 %v1128_v40, %v1127_v39  ;;  %v1655_v52 = vpack.c.b16 %v1650_v42, %v1649_v41 }
  0x94   : > { %v1627_v37 = vsel %vm2959_vm2, %v1622_v25, %v1626_v26 }
  0x95   : > { %v1652_v45 = vunpack.c.l.b16 %v1627_v37 }
  0x97   : > { %v1656_v56 = vpack.c.b16 %v1652_v45, %v1651_v43 }
  0x9c   : > { %1200 = vmatmul.bf16.gmra.mxu1 %v1132_v55  ;;  %1722 = vmatmul.bf16.gmra.mxu0 %v1654_v2 }
  0x9e   : > { %1486 = vmatmul.bf16.gmra.mxu3 %v2532_v18 }
  0x9f   : > { %1348 = vmatmul.bf16.gmra.mxu2 %v2460_v6  ;;  %v1129_v6 = vunpack.c.l.b16 %v1091_v3 }
  0xa1   : > { %v1134_v8 = vpack.c.b16 %v1130_v7, %v1129_v6 }
  0xa9   : > { %v342_v54 = vpop.f32.mrf.mxu1  ;;  %v332_v55 = vpop.f32.mrf.mxu0 }
  0xac   : > { %1205 = vmatmul.bf16.gmra.mxu1 %v1133_v51  ;;  %1727 = vmatmul.bf16.gmra.mxu0 %v1655_v52 }
  0xaf   : > { %1732 = vmatmul.bf16.vlgmr.msra.gmra.mxu2 %v1656_v56 }
  0xb1   : > { %v344_v1 = vpop.f32.mrf.mxu1  ;;  %v334_v2 = vpop.f32.mrf.mxu0 }
  0xb2   : > { %v674_v0 = vpop.f32.mrf.mxu2  ;;  %v812_v5 = vpop.f32.mrf.mxu3 }
  0xb9   : > { %v347_v10 = vpop.f32.mrf.mxu1  ;;  %v337_v11 = vpop.f32.mrf.mxu0 }
  0xba   : > { %v676_v9 = vpop.f32.mrf.mxu2  ;;  %v3267_v12 = vpop.f32.mrf.mxu3 }
  0xbc   : > { %1210 = vmatmul.bf16.gmra.mxu1 %v1134_v8 }
  0xc1   : > { %v349_v14 = vpop.f32.mrf.mxu1  ;;  %v339_v15 = vpop.f32.mrf.mxu0 }
  0xc2   : > { %v679_v13 = vpop.f32.mrf.mxu2  ;;  %v817_v16 = vpop.f32.mrf.mxu3 }
  0xc9   : > { %v433_v18 = vpop.f32.mrf.mxu1  ;;  %v950_v19 = vpop.f32.mrf.mxu0 }
  0xca   : > { %v681_v17 = vpop.f32.mrf.mxu2  ;;  %v434_v20 = vadd.f32 %v433_v18, %v332_v55  ;;  %v3269_v21 = vpop.f32.mrf.mxu3 }
  0xcc   : > { %v694_v38 = vadd.f32 %v674_v0, %v434_v20 }
  0xce   : > { %v832_v22 = vadd.f32 %v812_v5, %v694_v38 }
  0xd0   : > { %v970_v23 = vadd.f32 %v950_v19, %v832_v22 }
  0xd1   : > { %v435_v25 = vpop.f32.mrf.mxu1  ;;  %v952_v26 = vpop.f32.mrf.mxu0 }
  0xd2   : > { %v684_v24 = vpop.f32.mrf.mxu2  ;;  %v436_v27 = vadd.f32 %v435_v25, %v334_v2  ;;  %v822_v29 = vpop.f32.mrf.mxu3 }
  0xd4   : > { %v695_v28 = vadd.f32 %v676_v9, %v436_v27 }
  0xd9   : > { %v438_v31 = vpop.f32.mrf.mxu1  ;;  %v955_v32 = vpop.f32.mrf.mxu0 }
  0xda   : > { %v686_v30 = vpop.f32.mrf.mxu2  ;;  %v439_v33 = vadd.f32 %v438_v31, %v337_v11  ;;  %v3271_v39 = vpop.f32.mrf.mxu3 }
  0xdc   : > { %v696_v34 = vadd.f32 %v679_v13, %v439_v33 }
  0xde   : > { %v834_v35 = vadd.f32 %v817_v16, %v696_v34 }
  0xe0   : > { %v972_v36 = vadd.f32 %v955_v32, %v834_v35 }
  0xe1   : > { %v440_v40 = vpop.f32.mrf.mxu1  ;;  %v3273_v41 = vpop.f32.mrf.mxu0 }
  0xe2   : > { %v689_v37 = vpop.f32.mrf.mxu2  ;;  %v441_v42 = vadd.f32 %v440_v40, %v339_v15  ;;  %v827_v48 = vpop.f32.mrf.mxu3  ;;  %v833_v15 = vadd.f32 %v3267_v12, %v695_v28 }
  0xe4   : > { %v697_v43 = vadd.f32 %v681_v17, %v441_v42  ;;  %v3293_v17 = vld [vmem:[%s3416_s2] ss:$0 sm:$0xff]  ;;  %v971_v18 = vadd.f32 %v952_v26, %v833_v15 }
  0xe6   : > { %v835_v33 = vadd.f32 %v3269_v21, %v697_v43 }
  0xe9   : > { %v443_v45 = vpop.f32.mrf.mxu1  ;;  %v960_v46 = vpop.f32.mrf.mxu0 }
  0xea   : > { %v691_v44 = vpop.f32.mrf.mxu2  ;;  %v444_v47 = vadd.f32 %v443_v45, %v342_v54  ;;  %v3281_v58 = vpop.f32.mrf.mxu3  ;;  %v973_v45 = vadd.f32 %v3273_v41, %v835_v33 }
  0xec   : > { %v698_v49 = vadd.f32 %v684_v24, %v444_v47 }
  0xee   : > { %v836_v50 = vadd.f32 %v822_v29, %v698_v49 }
  0xf0   : > { %v3275_v51 = vadd.f32 %v960_v46, %v836_v50 }
  0xf1   : > { %v445_v53 = vpop.f32.mrf.mxu1  ;;  %v3277_v55 = vpop.f32.mrf.mxu0 }
  0xf2   : > { %v1334_v52 = vpop.f32.mrf.mxu2  ;;  %v446_v56 = vadd.f32 %v445_v53, %v344_v1  ;;  %v1472_v0 = vpop.f32.mrf.mxu3 }
  0xf4   : > { %v3279_v57 = vadd.f32 %v686_v30, %v446_v56 }
  0xf9   : > { %v448_v60 = vpop.f32.mrf.mxu1  ;;  %v965_v61 = vpop.f32.mrf.mxu0 }
  0xfa   : > { %v1336_v59 = vpop.f32.mrf.mxu2  ;;  %v449_v62 = vadd.f32 %v448_v60, %v347_v10  ;;  %v1474_v1 = vpop.f32.mrf.mxu3 }
  0xfc   : > { %v700_v63 = vadd.f32 %v689_v37, %v449_v62 }
  0xfe   : > { %v838_v54 = vadd.f32 %v827_v48, %v700_v63 }
 0x100   : > { %v3283_v2 = vadd.f32 %v965_v61, %v838_v54 }
 0x101   : > { %v450_v4 = vpop.f32.mrf.mxu1  ;;  %v3285_v5 = vpop.f32.mrf.mxu0 }
 0x102   : > { %v1339_v3 = vpop.f32.mrf.mxu2  ;;  %v451_v6 = vadd.f32 %v450_v4, %v349_v14  ;;  %v1477_v24 = vpop.f32.mrf.mxu3 }
 0x104   : > { %v3287_v7 = vadd.f32 %v691_v44, %v451_v6  ;;  %v837_v6 = vadd.f32 %v3271_v39, %v3279_v57 }
 0x109   : > { %v1196_v8 = vpop.f32.mrf.mxu1  ;;  %v1718_v9 = vpop.f32.mrf.mxu0 }
 0x10a   : > { %v1216_v11 = vadd.f32 %v1196_v8, %v970_v23  ;;  %v1341_v13 = vpop.f32.mrf.mxu2  ;;  %v1479_v40 = vpop.f32.mrf.mxu3 }
 0x10c   : > { %v1354_v10 = vadd.f32 %v1334_v52, %v1216_v11 }
 0x10e   : > { %v1492_v16 = vadd.f32 %v1472_v0, %v1354_v10 }
 0x110   : > { %v1738_v19 = vadd.f32 %v1718_v9, %v1492_v16 }
 0x111   : > { %v1198_v20 = vpop.f32.mrf.mxu1  ;;  %v1720_v14 = vpop.f32.mrf.mxu0 }
 0x112   : > { %v3296_v38 = vadd.f32 %v3293_v17, %v1738_v19  ;;  %v1217_v22 = vadd.f32 %v1198_v20, %v971_v18  ;;  %v1344_v12 = vpop.f32.mrf.mxu2  ;;  %v1482_v60 = vpop.f32.mrf.mxu3 }
 0x114   : > { %v2629_v23 = vmul.f32 -1.442695, %v3296_v38  ;;  %v1355_v25 = vadd.f32 %v1336_v59, %v1217_v22 }
 0x116   : > { %2801 = vpow2.f32 %v2629_v23  ;;  %v1493_v27 = vadd.f32 %v1474_v1, %v1355_v25 }
 0x118   : > { %v1739_v28 = vadd.f32 %v1720_v14, %v1493_v27 }
 0x119   : > { %v1201_v29 = vpop.f32.mrf.mxu1  ;;  %v1723_v31 = vpop.f32.mrf.mxu0 }
 0x11a   : > { %v3300_v30 = vadd.f32 %v3293_v17, %v1739_v28  ;;  %v1218_v26 = vadd.f32 %v1201_v29, %v972_v36  ;;  %v3304_v44 = vpop.f32.mrf.mxu2 }
 0x11c   : > { %v2802_v32 = vpop.eup %2801  ;;  %v2630_v34 = vmul.f32 -1.442695, %v3300_v30  ;;  %v1356_v35 = vadd.f32 %v1339_v3, %v1218_v26 }
 0x11d   : > { %v1782_v37 = vadd.f32 1.0, %v2802_v32 }
 0x11e   : > { %2803 = vpow2.f32 %v2630_v34  ;;  %v1494_v42 = vadd.f32 %v1477_v24, %v1356_v35  ;;  %v1484_v24 = vpop.f32.mrf.mxu3 }
 0x11f   : > { %2805 = vrcp.f32 %v1782_v37  ;;  %vm1795_vm4 = vweird.f32 %v1782_v37  ;;  %v1801_v16 = vand.u32 2147483648, %v1782_v37  ;;  %v1799_v39 = vand.u32 2147483647, %v1782_v37 }
 0x120   : > { %v1740_v46 = vadd.f32 %v1723_v31, %v1494_v42 }
 0x121   : > { %v1203_v47 = vpop.f32.mrf.mxu1  ;;  %v1725_v50 = vpop.f32.mrf.mxu0  ;;  %vm1800_vm7 = vcmp.eq.f32.partialorder %v1799_v39, 8.507059e+37 }
 0x122   : > { %v3308_v36 = vadd.f32 %v3293_v17, %v1740_v46  ;;  %v1219_v48 = vadd.f32 %v1203_v47, %v973_v45  ;;  %v3311_v62 = vpop.f32.mrf.mxu2 }
 0x124   : > { %v2804_v49 = vpop.eup %2803  ;;  %v2631_v21 = vmul.f32 -1.442695, %v3308_v36  ;;  %v1357_v43 = vadd.f32 %v1341_v13, %v1219_v48 }
 0x125   : > { %v2806_v52 = vpop.eup %2805  ;;  %v1783_v53 = vadd.f32 1.0, %v2804_v49 }
 0x126   : > { %v1791_v56 = vmul.f32 %v2806_v52, %v1782_v37  ;;  %2807 = vpow2.f32 %v2631_v21  ;;  %v1495_v59 = vadd.f32 %v1479_v40, %v1357_v43  ;;  %vm1796_vm3 = vweird.f32 %v2806_v52 }
 0x127   : > { %2809 = vrcp.f32 %v1783_v53  ;;  %vm3324_vm5 = vmor %vm1795_vm4, %vm1796_vm3  ;;  %v1814_v14 = vand.u32 2147483647, %v1783_v53  ;;  %v1816_v22 = vand.u32 2147483648, %v1783_v53  ;;  %vm1810_vm8 = vweird.f32 %v1783_v53 }
 0x128   : > { %v1792_v61 = vsub.f32 1.0, %v1791_v56  ;;  %v1741_v41 = vadd.f32 %v1725_v50, %v1495_v59  ;;  %v1487_v56 = vpop.f32.mrf.mxu3 }
 0x129   : > { %v1206_v63 = vpop.f32.mrf.mxu1  ;;  %v1728_v10 = vpop.f32.mrf.mxu0  ;;  %v1817_v34 = vor.u32 1.1754944e-38, %v1816_v22  ;;  %vm1815_vm10 = vcmp.eq.f32.partialorder %v1814_v14, 8.507059e+37 }
 0x12a   : > { %v1793_v54 = vmul.f32 %v2806_v52, %v1792_v61  ;;  %v3314_v0 = vadd.f32 %v3293_v17, %v1741_v41  ;;  %v1220_v3 = vadd.f32 %v1206_v63, %v3275_v51  ;;  %v975_v51 = vadd.f32 %v3277_v55, %v837_v6  ;;  %v3330_v28 = vpop.f32.mrf.mxu2 }
 0x12b   : > { %v1802_v55 = vor.u32 1.1754944e-38, %v1801_v16 }
 0x12c   : > { %v2808_v4 = vpop.eup %2807  ;;  %v2632_v1 = vmul.f32 -1.442695, %v3314_v0  ;;  %v1358_v8 = vadd.f32 %v1344_v12, %v1220_v3  ;;  %v1794_v11 = vadd.f32 %v2806_v52, %v1793_v54 }
 0x12d   : > { %v2810_v9 = vpop.eup %2809  ;;  %v3320_v13 = vadd.f32 1.0, %v2808_v4 }
 0x12e   : > { %v1806_v15 = vmul.f32 %v2810_v9, %v1783_v53  ;;  %2811 = vpow2.f32 %v2632_v1  ;;  %v1496_v19 = vadd.f32 %v1482_v60, %v1358_v8  ;;  %v1798_v20 = vsel %vm3324_vm5, %v2806_v52, %v1794_v11 }
 0x12f   : > { %2813 = vrcp.f32 %v3320_v13  ;;  %vm1811_vm6 = vweird.f32 %v2810_v9  ;;  %v1803_v33 = vsel %vm1800_vm7, %v1802_v55, %v1798_v20  ;;  %vm1825_vm12 = vweird.f32 %v3320_v13 }
 0x130   : > { %v1807_v57 = vsub.f32 1.0, %v1806_v15  ;;  %v1742_v12 = vadd.f32 %v1728_v10, %v1496_v19  ;;  %vm1812_vm9 = vmor %vm1810_vm8, %vm1811_vm6  ;;  %v1910_v47 = vmul.f32 %v1803_v33, %v3296_v38  ;;  %v1489_v22 = vpop.f32.mrf.mxu3 }
 0x131   : > { %v1208_v23 = vpop.f32.mrf.mxu1  ;;  %v1730_v21 = vpop.f32.mrf.mxu0 }
 0x132   : > { %v1808_v25 = vmul.f32 %v2810_v9, %v1807_v57  ;;  %v1221_v27 = vadd.f32 %v1208_v23, %v975_v51  ;;  %v3333_v31 = vadd.f32 %v3293_v17, %v1742_v12  ;;  %v1733_v63 = vpop.f32.mrf.mxu2 }
 0x134   : > { %v2812_v29 = vpop.eup %2811  ;;  %v1809_v26 = vadd.f32 %v2810_v9, %v1808_v25  ;;  %v1359_v37 = vadd.f32 %v3304_v44, %v1221_v27  ;;  %v2633_v45 = vmul.f32 -1.442695, %v3333_v31 }
 0x135   : > { %v3335_v32 = vpop.eup %2813  ;;  %v3337_v35 = vadd.f32 1.0, %v2812_v29 }
 0x136   : > { %v1813_v40 = vsel %vm1812_vm9, %v2810_v9, %v1809_v26  ;;  %v1821_v42 = vmul.f32 %v3335_v32, %v3320_v13  ;;  %v1497_v44 = vadd.f32 %v1484_v24, %v1359_v37  ;;  %vm1826_vm11 = vweird.f32 %v3335_v32 }
 0x137   : > { %v1818_v46 = vsel %vm1815_vm10, %v1817_v34, %v1813_v40  ;;  %2815 = vrcp.f32 %v3337_v35  ;;  %vm3371_vm13 = vmor %vm1825_vm12, %vm1826_vm11  ;;  %v1844_v9 = vand.u32 2147483647, %v3337_v35  ;;  %vm1840_vm0 = vweird.f32 %v3337_v35 }
 0x138   : > { %v1911_v48 = vmul.f32 %v1818_v46, %v3300_v30  ;;  %v1822_v49 = vsub.f32 1.0, %v1821_v42  ;;  %2817 = vpow2.f32 %v2633_v45  ;;  %v1743_v38 = vadd.f32 %v1730_v21, %v1497_v44 }
 0x139   : > { %v1211_v43 = vpop.f32.mrf.mxu1  ;;  %v839_v30 = vadd.f32 %v3281_v58, %v3287_v7  ;;  %v1829_v58 = vand.u32 2147483647, %v3320_v13  ;;  %v1831_v7 = vand.u32 2147483648, %v3320_v13  ;;  %v1846_v13 = vand.u32 2147483648, %v3337_v35 }
 0x13a   : > { %v2739_v50 = vpack.c.bf16 %v1911_v48, %v1910_v47  ;;  %v1823_v52 = vmul.f32 %v3335_v32, %v1822_v49  ;;  %v1222_v53 = vadd.f32 %v1211_v43, %v3283_v2  ;;  %v3361_v41 = vadd.f32 %v3293_v17, %v1743_v38  ;;  %v1735_v27 = vpop.f32.mrf.mxu2 }
 0x13b   : > { %v977_v6 = vadd.f32 %v3285_v5, %v839_v30  ;;  %vm1830_vm15 = vcmp.eq.f32.partialorder %v1829_v58, 8.507059e+37  ;;  %v1832_v18 = vor.u32 1.1754944e-38, %v1831_v7  ;;  %v1847_v14 = vor.u32 1.1754944e-38, %v1846_v13 }
 0x13c   : > { %2740 = vst [vmem:[%s3350_s12] sm:$0xff] %v2739_v50   ;;  %v1360_v59 = vadd.f32 %v3311_v62, %v1222_v53  ;;  %v1824_v61 = vadd.f32 %v3335_v32, %v1823_v52  ;;  %v2634_v4 = vmul.f32 -1.442695, %v3361_v41  ;;  %vm1845_vm2 = vcmp.eq.f32.partialorder %v1844_v9, 8.507059e+37 }
 0x13d   : > { %v2816_v60 = vpop.eup %2815 }
 0x13e   : > { %v2818_v54 = vpop.eup %2817  ;;  %v1836_v2 = vmul.f32 %v2816_v60, %v3337_v35  ;;  %v1498_v3 = vadd.f32 %v1487_v56, %v1360_v59  ;;  %v1828_v15 = vsel %vm3371_vm13, %v3335_v32, %v1824_v61  ;;  %vm1841_vm14 = vweird.f32 %v2816_v60 }
 0x13f   : > { %v3367_v62 = vadd.f32 1.0, %v2818_v54  ;;  %v1833_v20 = vsel %vm1830_vm15, %v1832_v18, %v1828_v15  ;;  %vm1842_vm1 = vmor %vm1840_vm0, %vm1841_vm14 }
 0x140   : > { %v1837_v8 = vsub.f32 1.0, %v1836_v2  ;;  %v1744_v11 = vadd.f32 %v1733_v63, %v1498_v3  ;;  %v1912_v29 = vmul.f32 %v1833_v20, %v3308_v36 }
 0x141   : > { %2819 = vrcp.f32 %v3367_v62  ;;  %v1213_v10 = vpop.f32.mrf.mxu1  ;;  %v1861_v48 = vand.u32 2147483648, %v3367_v62  ;;  %vm1855_vm4 = vweird.f32 %v3367_v62 }
 0x142   : > { %v1838_v16 = vmul.f32 %v2816_v60, %v1837_v8  ;;  %2821 = vpow2.f32 %v2634_v4  ;;  %v3382_v5 = vadd.f32 %v3293_v17, %v1744_v11  ;;  %v1223_v51 = vadd.f32 %v1213_v10, %v977_v6 }
 0x143   : > { %v1862_v30 = vor.u32 1.1754944e-38, %v1861_v48 }
 0x144   : > { %v1839_v39 = vadd.f32 %v2816_v60, %v1838_v16  ;;  %v2635_v57 = vmul.f32 -1.442695, %v3382_v5  ;;  %v1361_v19 = vadd.f32 %v3330_v28, %v1223_v51 }
 0x146   : > { %v1843_v24 = vsel %vm1842_vm1, %v2816_v60, %v1839_v39  ;;  %2823 = vpow2.f32 %v2635_v57  ;;  %v1499_v23 = vadd.f32 %v1489_v22, %v1361_v19 }
 0x147   : > { %v2820_v25 = vpop.eup %2819  ;;  %v1848_v12 = vsel %vm1845_vm2, %v1847_v14, %v1843_v24 }
 0x148   : > { %v2822_v55 = vpop.eup %2821  ;;  %v1913_v26 = vmul.f32 %v1848_v12, %v3314_v0  ;;  %v1851_v28 = vmul.f32 %v2820_v25, %v3367_v62  ;;  %v1745_v32 = vadd.f32 %v1735_v27, %v1499_v23  ;;  %vm1856_vm3 = vweird.f32 %v2820_v25 }
 0x149   : > { %v1787_v33 = vadd.f32 1.0, %v2822_v55  ;;  %vm1857_vm5 = vmor %vm1855_vm4, %vm1856_vm3 }
 0x14a   : > { %v2744_v34 = vpack.c.bf16 %v1913_v26, %v1912_v29  ;;  %v1852_v35 = vsub.f32 1.0, %v1851_v28  ;;  %v3392_v37 = vadd.f32 %v3293_v17, %v1745_v32  ;;  %v1859_v17 = vand.u32 2147483647, %v3367_v62 }
 0x14b   : > { %2825 = vrcp.f32 %v1787_v33  ;;  %v1874_v43 = vand.u32 2147483647, %v1787_v33  ;;  %v1876_v50 = vand.u32 2147483648, %v1787_v33  ;;  %vm1870_vm8 = vweird.f32 %v1787_v33 }
 0x14c   : > { %v2824_v40 = vpop.eup %2823  ;;  %2756 = vst [vmem:[%s3350_s12 + $0x8] sm:$0xff] %v2744_v34   ;;  %v2636_v42 = vmul.f32 -1.442695, %v3392_v37  ;;  %v1853_v46 = vmul.f32 %v2820_v25, %v1852_v35  ;;  %vm1860_vm7 = vcmp.eq.f32.partialorder %v1859_v17, 8.507059e+37 }
 0x14d   : > { %v1788_v45 = vadd.f32 1.0, %v2824_v40  ;;  %v1877_v63 = vor.u32 1.1754944e-38, %v1876_v50  ;;  %vm1875_vm10 = vcmp.eq.f32.partialorder %v1874_v43, 8.507059e+37 }
 0x14e   : > { %2827 = vpow2.f32 %v2636_v42  ;;  %v1854_v0 = vadd.f32 %v2820_v25, %v1853_v46 }
 0x14f   : > { %2829 = vrcp.f32 %v1788_v45  ;;  %v1891_v8 = vand.u32 2147483648, %v1788_v45  ;;  %vm1885_vm12 = vweird.f32 %v1788_v45  ;;  %v1889_v9 = vand.u32 2147483647, %v1788_v45 }
 0x150   : > { %v1858_v53 = vsel %vm1857_vm5, %v2820_v25, %v1854_v0 }
 0x151   : > { %v2826_v36 = vpop.eup %2825  ;;  %v1863_v61 = vsel %vm1860_vm7, %v1862_v30, %v1858_v53  ;;  %vm1890_vm15 = vcmp.eq.f32.partialorder %v1889_v9, 8.507059e+37 }
 0x152   : > { %v1866_v47 = vmul.f32 %v2826_v36, %v1787_v33  ;;  %vm1871_vm6 = vweird.f32 %v2826_v36  ;;  %v1914_v58 = vmul.f32 %v1863_v61, %v3333_v31  ;;  %v1892_v31 = vor.u32 1.1754944e-38, %v1891_v8 }
 0x153   : > { %vm1872_vm9 = vmor %vm1870_vm8, %vm1871_vm6 }
 0x154   : > { %v2828_v49 = vpop.eup %2827  ;;  %v1867_v21 = vsub.f32 1.0, %v1866_v47 }
 0x155   : > { %v2830_v44 = vpop.eup %2829  ;;  %v1789_v52 = vadd.f32 1.0, %v2828_v49 }
 0x156   : > { %v1868_v56 = vmul.f32 %v2826_v36, %v1867_v21  ;;  %v1881_v38 = vmul.f32 %v2830_v44, %v1788_v45  ;;  %vm1886_vm11 = vweird.f32 %v2830_v44 }
 0x157   : > { %2831 = vrcp.f32 %v1789_v52  ;;  %vm1887_vm13 = vmor %vm1885_vm12, %vm1886_vm11  ;;  %v1906_v15 = vand.u32 2147483648, %v1789_v52  ;;  %v1904_v16 = vand.u32 2147483647, %v1789_v52  ;;  %vm1900_vm0 = vweird.f32 %v1789_v52 }
 0x158   : > { %v1869_v59 = vadd.f32 %v2826_v36, %v1868_v56  ;;  %v1882_v60 = vsub.f32 1.0, %v1881_v38 }
 0x159   : > { %v1907_v18 = vor.u32 1.1754944e-38, %v1906_v15  ;;  %vm1905_vm2 = vcmp.eq.f32.partialorder %v1904_v16, 8.507059e+37 }
 0x15a   : > { %v1873_v54 = vsel %vm1872_vm9, %v2826_v36, %v1869_v59  ;;  %v1883_v2 = vmul.f32 %v2830_v44, %v1882_v60 }
 0x15b   : > { %v1878_v3 = vsel %vm1875_vm10, %v1877_v63, %v1873_v54 }
 0x15c   : > { %v1915_v7 = vmul.f32 %v1878_v3, %v3361_v41  ;;  %v1884_v6 = vadd.f32 %v2830_v44, %v1883_v2 }
 0x15d   : > { %v2832_v62 = vpop.eup %2831 }
 0x15e   : > { %v2749_v4 = vpack.c.bf16 %v1915_v7, %v1914_v58  ;;  %v1896_v1 = vmul.f32 %v2832_v62, %v1789_v52  ;;  %v1888_v13 = vsel %vm1887_vm13, %v2830_v44, %v1884_v6  ;;  %vm1901_vm14 = vweird.f32 %v2832_v62 }
 0x15f   : > { %v1893_v51 = vsel %vm1890_vm15, %v1892_v31, %v1888_v13  ;;  %vm1902_vm1 = vmor %vm1900_vm0, %vm1901_vm14 }
 0x160   : > { %2757 = vst [vmem:[%s3350_s12 + $0x10] sm:$0xff] %v2749_v4   ;;  %v1897_v11 = vsub.f32 1.0, %v1896_v1  ;;  %v1916_v19 = vmul.f32 %v1893_v51, %v3382_v5 }
 0x162   : > { %v1898_v10 = vmul.f32 %v2832_v62, %v1897_v11 }
 0x164   : > { %v1899_v41 = vadd.f32 %v2832_v62, %v1898_v10 }
 0x166   : > { %v1903_v39 = vsel %vm1902_vm1, %v2832_v62, %v1899_v41 }
 0x167   : > { %v1908_v57 = vsel %vm1905_vm2, %v1907_v18, %v1903_v39 }
 0x168   : > { %v1917_v20 = vmul.f32 %v1908_v57, %v3392_v37 }
 0x16a   : > { %v2754_v14 = vpack.c.bf16 %v1917_v20, %v1916_v19 }
 0x16c   : > { %2758 = vst [vmem:[%s3350_s12 + $0x18] sm:$0xff] %v2754_v14  }
 0x16d PF: > { %s13_s14 = sadd.s32 1, %s2855_s14   ;;  %s3424_s12 = smov %s2851_s13 }
 0x16e   : > { %p10_p5 = scmp.ge.s32.totalorder %s13_s14, 4   ;;  %s3425_s13 = smov %s3427_s15 }
 0x170   :  { %12 = sbr.rel (!%p10_p5) target bundleno = 2 (0x2), region = 76 }

// kernel: forward.16
= control target key start
LH: loop header
LB: loop body
LE: loop exit
PB: predicated region body
PF: predicated region fallthrough
CT: control target
= control target key end

     0   :  { %s2924_s12 = smov 0   ;;  %s2926_s13 = smov 0   ;;  %s3637_s0 = inlined_call_operand.vmem [shape: bf16[2,10,10,128], index: 0, kind: input, shape index: {}]   ;;  %s3638_s1 = inlined_call_operand.vmem [shape: bf16[9,128,128], index: 1, kind: input, shape index: {}]   ;;  %s3639_s2 = inlined_call_operand.vmem [shape: f32[1,128], index: 2, kind: input, shape index: {}]   ;;  %s3640_s3 = inlined_call_operand.vmem [shape: bf16[2,8,8,128], index: 3, kind: output, shape index: {}]  }
   0x1   :  { %s2928_s14 = smov 0  }
   0x2 LB: > { %s25_s15 = sadd.s32 1, %s2898_s13  ;;  %p2132_p0 = scmp.ge.s32.totalorder %s2902_s14, 1  ;;  %s2902_s14 = sphi %s2928_s14, %s13_s14   ;;  %s2898_s13 = sphi %s2926_s13, %s3650_s13   ;;  %s2894_s12 = sphi %s2924_s12, %s3649_s12  }
   0x3   : > { %p27_p1 = scmp.ge.s32.totalorder %s25_s15, 2  ;;  %p151_p2 = scmp.lt.s32.totalorder %s2902_s14, 3 }
   0x5   : > { %s3652_s15 = smov (%p27_p1, %s25_s15), 0  ;;  %p152_p3 = pnand %p2132_p0, %p151_p2 }
   0x6   : > { %p179_p4 = scmp.lt.s32.totalorder (!%p152_p3), %s2894_s12, 1 }
   0x7   : > { %155 = sbr.rel (%p152_p3) target bundleno = 365 (0x16d), region = 32 }
   0xc   : > { %v2718_v0 = vld [vmem:[%s3638_s1 + $0x78] sm:$0xff]  ;;  %v2717_v2 = vld [vmem:[%s3638_s1 + $0x70] sm:$0xff]  ;;  %s3654_s12 = smov (!%p179_p4, %s2894_s12), 1  ;;  %v2716_v6 = vld [vmem:[%s3638_s1 + $0x68] sm:$0xff]  ;;  %vm230_vm0 = vsmask.f32 3328 }
   0xd   : > { %v2726_v1 = vld [vmem:[%s3638_s1 + $0xb8] sm:$0xff]  ;;  %2806 = vmatpush.bf16.msra.mxu1 %v2718_v0  ;;  %426 = vmatpush.bf16.msra.mxu0 %v2718_v0  ;;  %v2725_v3 = vld [vmem:[%s3638_s1 + $0xb0] sm:$0xff]  ;;  %s2822_s26 = smul.u32 80, %s3654_s12  ;;  %v2724_v7 = vld [vmem:[%s3638_s1 + $0xa8] sm:$0xff]  ;;  %vm231_vm1 = vsmask.f32 7440 }
   0xe   : > { %696 = vmatpush.bf16.msra.mxu2 %v2726_v1  ;;  %v2738_v4 = vld [vmem:[%s3638_s1 + $0xf8] sm:$0xff]  ;;  %v2737_v5 = vld [vmem:[%s3638_s1 + $0xf0] sm:$0xff]  ;;  %v2715_v11 = vld [vmem:[%s3638_s1 + $0x60] sm:$0xff]  ;;  %vm580_vm2 = vcmask 1042432   ;;  %vm581_vm3 = vcmask 1046532   ;;  %s2698_s5 = sshll.u32 %s3654_s12, 5 }
   0xf   : > { %834 = vmatpush.bf16.msra.mxu3 %v2738_v4  ;;  %s2972_s8 = scalar_lea.vmem %s3637_s0, %s2822_s26  ;;  %v2723_v16 = vld [vmem:[%s3638_s1 + $0xa0] sm:$0xff]  ;;  %v2736_v17 = vld [vmem:[%s3638_s1 + $0xe8] sm:$0xff]  ;;  %v2714_v29 = vld [vmem:[%s3638_s1 + $0x58] sm:$0xff]  ;;  %s3573_s12 = scalar_lea.vmem %s3640_s3, %s2698_s5 }
  0x10   : > { %v202_v8 = vld [vmem:[%s2972_s8 + $0x20] sm:$0xf]  ;;  %v203_v9 = vld [vmem:[%s2972_s8 + $0x28] sm:$0xf]  ;;  %v2977_v10 = vld [vmem:[%s2972_s8 + $0x24] sm:$0x1] }
  0x11   : > { %2807 = vmatpush.bf16.msra.mxu1 %v2717_v2  ;;  %427 = vmatpush.bf16.msra.mxu0 %v2717_v2  ;;  %v2983_v12 = vld [vmem:[%s2972_s8 + $0x2c] sm:$0x1]  ;;  %v290_v13 = vshrl.u32 %v202_v8, 16  ;;  %v293_v14 = vshll.u32 %v202_v8, 16  ;;  %v304_v15 = vshrl.u32 %v203_v9, 16  ;;  %v307_v18 = vshll.u32 %v203_v9, 16  ;;  %vm3010_vm4 = vmor %vm230_vm0, %vm231_vm1 }
  0x12   : > { %697 = vmatpush.bf16.msra.mxu2 %v2725_v3  ;;  %v198_v19 = vld [vmem:[%s2972_s8] sm:$0xf]  ;;  %v299_v22 = vshll.u32 %v2977_v10, 16  ;;  %v199_v24 = vld [vmem:[%s2972_s8 + $0x8] sm:$0xf]  ;;  %v313_v26 = vshll.u32 %v2983_v12, 16  ;;  %vm3019_vm5 = vmor %vm580_vm2, %vm581_vm3 }
  0x13   : > { %835 = vmatpush.bf16.msra.mxu3 %v2737_v5  ;;  %v292_v20 = vrot.slane %v290_v13, 4  ;;  %v295_v21 = vrot.slane %v293_v14, 5  ;;  %v306_v23 = vrot.slane %v304_v15, 4  ;;  %v309_v25 = vrot.slane %v307_v18, 5  ;;  %v222_v27 = vld [vmem:[%s2972_s8 + $0x4] sm:$0x1] }
  0x14   : > { %v223_v28 = vld [vmem:[%s2972_s8 + $0xc] sm:$0x1]  ;;  %v234_v31 = vshrl.u32 %v198_v19, 16  ;;  %v237_v32 = vshll.u32 %v198_v19, 16  ;;  %v2735_v34 = vld [vmem:[%s3638_s1 + $0xe0] sm:$0xff]  ;;  %v243_v35 = vshll.u32 %v222_v27, 16 }
  0x15   : > { %2808 = vmatpush.bf16.msra.mxu1 %v2716_v6  ;;  %428 = vmatpush.bf16.msra.mxu0 %v2716_v6  ;;  %v296_v30 = vor.u32 %v295_v21, %v292_v20  ;;  %v310_v33 = vor.u32 %v309_v25, %v306_v23  ;;  %v248_v36 = vshrl.u32 %v199_v24, 16  ;;  %v251_v37 = vshll.u32 %v199_v24, 16  ;;  %v556_v38 = vld [vmem:[%s2972_s8] sm:$0xe]  ;;  %v557_v43 = vld [vmem:[%s2972_s8 + $0x8] sm:$0xe] }
  0x16   : > { %698 = vmatpush.bf16.msra.mxu2 %v2724_v7  ;;  %v301_v39 = vrot.slane %v299_v22, 5  ;;  %v236_v40 = vrot.slane %v234_v31, 4  ;;  %v239_v41 = vrot.slane %v237_v32, 5  ;;  %v257_v42 = vshll.u32 %v223_v28, 16  ;;  %v2722_v44 = vld [vmem:[%s3638_s1 + $0x98] sm:$0xff]  ;;  %v2713_v60 = vld [vmem:[%s3638_s1 + $0x50] sm:$0xff] }
  0x17   : > { %836 = vmatpush.bf16.msra.mxu3 %v2736_v17  ;;  %v297_v45 = vrot.slane %v296_v30, 4  ;;  %v315_v46 = vrot.slane %v313_v26, 5  ;;  %v250_v47 = vrot.slane %v248_v36, 4  ;;  %v253_v48 = vrot.slane %v251_v37, 5  ;;  %v2734_v56 = vld [vmem:[%s3638_s1 + $0xd8] sm:$0xff]  ;;  %v2721_v0 = vld [vmem:[%s3638_s1 + $0x90] sm:$0xff] }
  0x18   : > { %v311_v50 = vrot.slane %v310_v33, 4  ;;  %v240_v51 = vor.u32 %v239_v41, %v236_v40  ;;  %v2232_v52 = vrot.slane %v556_v38, 9  ;;  %v585_v53 = vrot.slane %v222_v27, 5  ;;  %v204_v59 = vld [vmem:[%s2972_s8 + $0x30] sm:$0xf]  ;;  %v2712_v14 = vld [vmem:[%s3638_s1 + $0x48] sm:$0xff] }
  0x19   : > { %2809 = vmatpush.bf16.msra.mxu1 %v2715_v11  ;;  %429 = vmatpush.bf16.msra.mxu0 %v2715_v11  ;;  %v245_v54 = vrot.slane %v243_v35, 5  ;;  %v254_v55 = vor.u32 %v253_v48, %v250_v47  ;;  %v2233_v58 = vrot.slane %v557_v43, 9  ;;  %v259_v62 = vrot.slane %v257_v42, 5  ;;  %v205_v3 = vld [vmem:[%s2972_s8 + $0x38] sm:$0xf]  ;;  %v2733_v11 = vld [vmem:[%s3638_s1 + $0xd0] sm:$0xff] }
  0x1a   : > { %699 = vmatpush.bf16.msra.mxu2 %v2723_v16  ;;  %v241_v61 = vrot.slane %v240_v51, 4  ;;  %v589_v63 = vrot.slane %v223_v28, 5  ;;  %v302_v1 = vsel %vm3010_vm4, %v297_v45, %v301_v39  ;;  %v316_v4 = vsel %vm3010_vm4, %v311_v50, %v315_v46  ;;  %v200_v7 = vld [vmem:[%s2972_s8 + $0x10] sm:$0xf]  ;;  %v2720_v19 = vld [vmem:[%s3638_s1 + $0x88] sm:$0xff]  ;;  %v2711_v24 = vld [vmem:[%s3638_s1 + $0x40] sm:$0xff] }
  0x1b   : > { %837 = vmatpush.bf16.msra.mxu3 %v2735_v34  ;;  %v255_v2 = vrot.slane %v254_v55, 4  ;;  %v586_v5 = vsel %vm3019_vm5, %v2232_v52, %v585_v53  ;;  %v318_v6 = vshrl.u32 %v204_v59, 16  ;;  %v321_v13 = vshll.u32 %v204_v59, 16  ;;  %v201_v22 = vld [vmem:[%s2972_s8 + $0x18] sm:$0xf]  ;;  %v2732_v31 = vld [vmem:[%s3638_s1 + $0xc8] sm:$0xff] }
  0x1c   : > { %v246_v8 = vsel %vm3010_vm4, %v241_v61, %v245_v54  ;;  %v590_v9 = vsel %vm3019_vm5, %v2233_v58, %v589_v63  ;;  %v3048_v15 = vunpack.c.l.b16 %v302_v1  ;;  %v332_v17 = vshrl.u32 %v205_v3, 16  ;;  %v3066_v32 = vld [vmem:[%s2972_s8 + $0x34] sm:$0x1]  ;;  %v3069_v36 = vld [vmem:[%s2972_s8 + $0x3c] sm:$0x1]  ;;  %v2719_v42 = vld [vmem:[%s3638_s1 + $0x80] sm:$0xff] }
  0x1d   : > { %2810 = vmatpush.bf16.msra.mxu1 %v2714_v29  ;;  %430 = vmatpush.bf16.msra.mxu0 %v2714_v29  ;;  %v260_v16 = vsel %vm3010_vm4, %v255_v2, %v259_v62  ;;  %v367_v18 = vunpack.c.l.b16 %v316_v4  ;;  %v632_v20 = vunpack.c.l.b16 %v586_v5  ;;  %v335_v21 = vshll.u32 %v205_v3, 16  ;;  %v2710_v29 = vld [vmem:[%s3638_s1 + $0x38] sm:$0xff]  ;;  %v3076_v43 = vld [vmem:[%s2972_s8 + $0x14] sm:$0x1]  ;;  %v2731_v58 = vld [vmem:[%s3638_s1 + $0xc0] sm:$0xff] }
  0x1e   : > { %700 = vmatpush.bf16.msra.mxu2 %v2722_v44  ;;  %v262_v23 = vshrl.u32 %v200_v7, 16  ;;  %v362_v25 = vunpack.c.l.b16 %v246_v8  ;;  %v633_v26 = vunpack.c.l.b16 %v590_v9  ;;  %v320_v27 = vrot.slane %v318_v6, 4  ;;  %v3079_v44 = vld [vmem:[%s2972_s8 + $0x1c] sm:$0x1]  ;;  %v2709_v52 = vld [vmem:[%s3638_s1 + $0x30] sm:$0xff] }
  0x1f   : > { %838 = vmatpush.bf16.msra.mxu3 %v2734_v56  ;;  %v265_v28 = vshll.u32 %v200_v7, 16  ;;  %v363_v30 = vunpack.c.l.b16 %v260_v16  ;;  %v323_v33 = vrot.slane %v321_v13, 5  ;;  %v334_v34 = vrot.slane %v332_v17, 4  ;;  %v2746_v45 = vld [vmem:[%s3638_s1 + $0x138] sm:$0xff]  ;;  %v2314_v63 = vld [vmem:[%s2972_s8 + $0x8] sm:$0xf] }
  0x20   : > { %v337_v35 = vrot.slane %v335_v21, 5  ;;  %v264_v37 = vrot.slane %v262_v23, 4  ;;  %v276_v39 = vshrl.u32 %v201_v22, 16  ;;  %v279_v40 = vshll.u32 %v201_v22, 16  ;;  %v2766_v48 = vld [vmem:[%s3638_s1 + $0x1b8] sm:$0xff]  ;;  %v2745_v1 = vld [vmem:[%s3638_s1 + $0x130] sm:$0xff] }
  0x21   : > { %2811 = vmatpush.bf16.msra.mxu1 %v2713_v60  ;;  %431 = vmatpush.bf16.msra.mxu0 %v2713_v60  ;;  %v267_v38 = vrot.slane %v265_v28, 5  ;;  %v372_v41 = vpack.c.b16 %v367_v18, %v3048_v15  ;;  %v640_v46 = vpack.c.b16 %v633_v26, %v632_v20  ;;  %v327_v47 = vshll.u32 %v3066_v32, 16  ;;  %v2774_v2 = vld [vmem:[%s3638_s1 + $0x1f8] sm:$0xff]  ;;  %v558_v4 = vld [vmem:[%s2972_s8 + $0x10] sm:$0xe]  ;;  %v2764_v26 = vld [vmem:[%s3638_s1 + $0x1a8] sm:$0xff] }
  0x22   : > { %701 = vmatpush.bf16.msra.mxu2 %v2721_v0  ;;  %v278_v50 = vrot.slane %v276_v39, 4  ;;  %v281_v51 = vrot.slane %v279_v40, 5  ;;  %v370_v53 = vpack.c.b16 %v363_v30, %v362_v25  ;;  %v324_v54 = vor.u32 %v323_v33, %v320_v27  ;;  %v2727_v0 = vld [vmem:[%s2972_s8 + $0xc] sm:$0xf0]  ;;  %v559_v5 = vld [vmem:[%s2972_s8 + $0x18] sm:$0xe] }
  0x23   : > { %839 = vmatpush.bf16.msra.mxu3 %v2733_v11  ;;  %v338_v55 = vor.u32 %v337_v35, %v334_v34  ;;  %v341_v56 = vshll.u32 %v3069_v36, 16  ;;  %v268_v59 = vor.u32 %v267_v38, %v264_v37  ;;  %v271_v60 = vshll.u32 %v3076_v43, 16  ;;  %v2765_v6 = vld [vmem:[%s3638_s1 + $0x1b0] sm:$0xff]  ;;  %v2360_v13 = vld [vmem:[%s2972_s8 + $0x8] sm:$0xf]  ;;  %v2707_v37 = vld [vmem:[%s3638_s1 + $0x20] sm:$0xff] }
  0x24   : > { %v282_v61 = vor.u32 %v281_v51, %v278_v50  ;;  %v285_v62 = vshll.u32 %v3079_v44, 16  ;;  %v329_v3 = vrot.slane %v327_v47, 5  ;;  %v325_v7 = vrot.slane %v324_v54, 4  ;;  %v2362_v18 = vld [vmem:[%s2972_s8 + $0x10] sm:$0xf]  ;;  %v2744_v25 = vld [vmem:[%s3638_s1 + $0x128] sm:$0xff] }
  0x25   : > { %2812 = vmatpush.bf16.msra.mxu1 %v2712_v14  ;;  %432 = vmatpush.bf16.msra.mxu0 %v2712_v14  ;;  %v339_v8 = vrot.slane %v338_v55, 4  ;;  %v343_v9 = vrot.slane %v341_v56, 5  ;;  %v2315_v11 = vor.u32 %v2727_v0, %v2314_v63  ;;  %v269_v14 = vrot.slane %v268_v59, 4  ;;  %v2772_v40 = vld [vmem:[%s3638_s1 + $0x1e8] sm:$0xff]  ;;  %v2706_v55 = vld [vmem:[%s3638_s1 + $0x18] sm:$0xff] }
  0x26   : > { %702 = vmatpush.bf16.msra.mxu2 %v2720_v19  ;;  %v273_v15 = vrot.slane %v271_v60, 5  ;;  %v283_v16 = vrot.slane %v282_v61, 4  ;;  %v287_v17 = vrot.slane %v285_v62, 5  ;;  %v2708_v19 = vld [vmem:[%s3638_s1 + $0x28] sm:$0xff]  ;;  %v2234_v20 = vrot.slane %v558_v4, 9 }
  0x27   : > { %840 = vmatpush.bf16.msra.mxu3 %v2732_v31  ;;  %v593_v21 = vrot.slane %v3076_v43, 5  ;;  %v2235_v22 = vrot.slane %v559_v5, 9  ;;  %v597_v23 = vrot.slane %v3079_v44, 5  ;;  %v330_v27 = vsel %vm3010_vm4, %v325_v7, %v329_v3  ;;  %v2743_v43 = vld [vmem:[%s3638_s1 + $0x120] sm:$0xff]  ;;  %v3151_v47 = vld [vmem:[%s2972_s8 + $0xc] sm:$0x1] }
  0x28   : > { %v344_v28 = vsel %vm3010_vm4, %v339_v8, %v343_v9  ;;  %v891_v30 = vshll.u32 %v2360_v13, 16  ;;  %v274_v31 = vsel %vm3010_vm4, %v269_v14, %v273_v15  ;;  %v288_v33 = vsel %vm3010_vm4, %v283_v16, %v287_v17  ;;  %v2763_v44 = vld [vmem:[%s3638_s1 + $0x1a0] sm:$0xff]  ;;  %v3157_v56 = vld [vmem:[%s2972_s8 + $0x14] sm:$0x1]  ;;  %v2318_v62 = vld [vmem:[%s2972_s8 + $0x18] sm:$0xf] }
  0x29   : > { %2813 = vmatpush.bf16.msra.mxu1 %v2711_v24  ;;  %433 = vmatpush.bf16.msra.mxu0 %v2711_v24  ;;  %v2773_v24 = vld [vmem:[%s3638_s1 + $0x1f0] sm:$0xff]  ;;  %v902_v34 = vshrl.u32 %v2362_v18, 16  ;;  %v905_v35 = vshll.u32 %v2362_v18, 16  ;;  %v594_v38 = vsel %vm3019_vm5, %v2234_v20, %v593_v21  ;;  %v598_v39 = vsel %vm3019_vm5, %v2235_v22, %v597_v23  ;;  %v2728_v63 = vld [vmem:[%s2972_s8 + $0x1c] sm:$0xf0]  ;;  %v2762_v17 = vld [vmem:[%s3638_s1 + $0x198] sm:$0xff] }
  0x2a   : > { %703 = vmatpush.bf16.msra.mxu2 %v2719_v42  ;;  %v369_v42 = vunpack.c.l.b16 %v344_v28  ;;  %v893_v50 = vrot.slane %v891_v30, 5  ;;  %v634_v51 = vunpack.c.l.b16 %v594_v38  ;;  %v897_v59 = vshll.u32 %v3151_v47, 16  ;;  %v561_v5 = vld [vmem:[%s2972_s8 + $0x28] sm:$0xe]  ;;  %v2741_v7 = vld [vmem:[%s3638_s1 + $0x110] sm:$0xff]  ;;  %v2771_v21 = vld [vmem:[%s3638_s1 + $0x1e0] sm:$0xff] }
  0x2b   : > { %841 = vmatpush.bf16.msra.mxu3 %v2731_v58  ;;  %v907_v54 = vrot.slane %v905_v35, 5  ;;  %v2742_v58 = vld [vmem:[%s3638_s1 + $0x118] sm:$0xff]  ;;  %v911_v4 = vshll.u32 %v3157_v56, 16  ;;  %v2319_v8 = vor.u32 %v2728_v63, %v2318_v62  ;;  %v601_v14 = vrot.slane %v2977_v10, 5  ;;  %v2704_v10 = vld [vmem:[%s3638_s1 + $0x8] sm:$0xff]  ;;  %v2761_v23 = vld [vmem:[%s3638_s1 + $0x190] sm:$0xff] }
  0x2c   : > { %444 = vmatmul.bf16.vlgmr.msra.gmra.mxu1 %v372_v41  ;;  %434 = vmatmul.bf16.vlgmr.msra.gmra.mxu0 %v370_v53  ;;  %v368_v41 = vunpack.c.l.b16 %v330_v27  ;;  %v904_v53 = vrot.slane %v902_v34, 4  ;;  %v899_v9 = vrot.slane %v897_v59, 5  ;;  %v2237_v15 = vrot.slane %v561_v5, 9  ;;  %v2364_v20 = vld [vmem:[%s2972_s8 + $0x18] sm:$0xf]  ;;  %v2703_v34 = vld [vmem:[%s3638_s1] sm:$0xff] }
  0x2d   : > { %527 = vmatpush.bf16.msrb.mxu1 %v2710_v29  ;;  %1080 = vmatpush.bf16.msrb.mxu0 %v2746_v45  ;;  %v888_v29 = vshrl.u32 %v2360_v13, 16  ;;  %v364_v45 = vunpack.c.l.b16 %v274_v31  ;;  %v605_v16 = vrot.slane %v2983_v12, 5  ;;  %v2366_v22 = vld [vmem:[%s2972_s8 + $0x20] sm:$0xf]  ;;  %v2740_v12 = vld [vmem:[%s3638_s1 + $0x108] sm:$0xff]  ;;  %v916_v28 = vshrl.u32 %v2364_v20, 16 }
  0x2e   : > { %1392 = vmatpush.bf16.msrb.mxu2 %v2766_v48  ;;  %842 = vmatmul.bf16.vlgmr.msra.gmra.mxu3 %v2315_v11  ;;  %v373_v60 = vpack.c.b16 %v369_v42, %v368_v41  ;;  %v908_v3 = vor.u32 %v907_v54, %v904_v53  ;;  %v919_v30 = vshll.u32 %v2364_v20, 16  ;;  %v930_v31 = vshrl.u32 %v2366_v22, 16  ;;  %v2186_v35 = vld [vmem:[%s2972_s8] sm:$0xf]  ;;  %v2753_v53 = vld [vmem:[%s3638_s1 + $0x170] sm:$0xff] }
  0x2f   : > { %704 = vmatmul.bf16.vlgmr.msra.gmra.mxu2 %v640_v46  ;;  %1638 = vmatpush.bf16.msrb.mxu3 %v2774_v2  ;;  %v365_v46 = vunpack.c.l.b16 %v288_v33  ;;  %v890_v48 = vrot.slane %v888_v29, 4  ;;  %v606_v27 = vsel %vm3019_vm5, %v2237_v15, %v605_v16  ;;  %v933_v33 = vshll.u32 %v2366_v22, 16  ;;  %v2739_v38 = vld [vmem:[%s3638_s1 + $0x100] sm:$0xff]  ;;  %v2729_v62 = vld [vmem:[%s2972_s8 + $0x2c] sm:$0xf0] }
  0x30   : > { %v909_v18 = vrot.slane %v908_v3, 4  ;;  %v2368_v3 = vld [vmem:[%s2972_s8 + $0x28] sm:$0xf]  ;;  %v563_v5 = vld [vmem:[%s2972_s8 + $0x38] sm:$0xe]  ;;  %v609_v20 = vrot.slane %v3066_v32, 5 }
  0x31   : > { %528 = vmatpush.bf16.msrb.mxu1 %v2709_v52  ;;  %1081 = vmatpush.bf16.msrb.mxu0 %v2745_v1  ;;  %v635_v52 = vunpack.c.l.b16 %v598_v39  ;;  %v371_v61 = vpack.c.b16 %v365_v46, %v364_v45  ;;  %v894_v0 = vor.u32 %v893_v50, %v890_v48  ;;  %v560_v1 = vld [vmem:[%s2972_s8 + $0x20] sm:$0xe]  ;;  %v2699_v39 = vld [vmem:[%s2972_s8 + $0x4] sm:$0xf0]  ;;  %v3221_v45 = vld [vmem:[%s3638_s1 + $0x238] sm:$0xff]  ;;  %v918_v48 = vrot.slane %v916_v28, 4 }
  0x32   : > { %1393 = vmatpush.bf16.msrb.mxu2 %v2765_v6  ;;  %v2705_v6 = vld [vmem:[%s3638_s1 + $0x10] sm:$0xff]  ;;  %v2236_v11 = vrot.slane %v560_v1, 9  ;;  %v3224_v46 = vld [vmem:[%s2972_s8 + $0x24] sm:$0x1]  ;;  %v921_v50 = vrot.slane %v919_v30, 5  ;;  %v2187_v54 = vor.u32 %v2699_v39, %v2186_v35  ;;  %v944_v15 = vshrl.u32 %v2368_v3, 16 }
  0x33   : > { %1639 = vmatpush.bf16.msrb.mxu3 %v2773_v24  ;;  %v641_v2 = vpack.c.b16 %v635_v52, %v634_v51  ;;  %v895_v13 = vrot.slane %v894_v0, 4  ;;  %v2770_v24 = vld [vmem:[%s3638_s1 + $0x1d8] sm:$0xff]  ;;  %v932_v51 = vrot.slane %v930_v31, 4  ;;  %v935_v52 = vrot.slane %v933_v33, 5  ;;  %v3237_v1 = vld [vmem:[%s3638_s1 + $0x230] sm:$0xff]  ;;  %v2759_v22 = vld [vmem:[%s3638_s1 + $0x180] sm:$0xff] }
  0x34   : > { %v939_v59 = vshll.u32 %v3224_v46, 16  ;;  %v922_v63 = vor.u32 %v921_v50, %v918_v48  ;;  %v947_v16 = vshll.u32 %v2368_v3, 16  ;;  %v2768_v32 = vld [vmem:[%s3638_s1 + $0x1c8] sm:$0xff]  ;;  %v3277_v28 = vld [vmem:[%s3638_s1 + $0x220] sm:$0xff]  ;;  %v2750_v31 = vld [vmem:[%s3638_s1 + $0x158] sm:$0xff] }
  0x35   : > { %529 = vmatpush.bf16.msrb.mxu1 %v2708_v19  ;;  %1082 = vmatpush.bf16.msrb.mxu0 %v2744_v25  ;;  %v913_v19 = vrot.slane %v911_v4, 5  ;;  %v900_v25 = vsel %vm3010_vm4, %v895_v13, %v899_v9  ;;  %v936_v0 = vor.u32 %v935_v52, %v932_v51  ;;  %v562_v4 = vld [vmem:[%s2972_s8 + $0x30] sm:$0xe]  ;;  %v3287_v33 = vld [vmem:[%s2972_s8 + $0x2c] sm:$0x1] }
  0x36   : > { %1394 = vmatpush.bf16.msrb.mxu2 %v2764_v26  ;;  %v602_v26 = vsel %vm3019_vm5, %v2236_v11, %v601_v14  ;;  %v941_v9 = vrot.slane %v939_v59, 5  ;;  %v2370_v11 = vld [vmem:[%s2972_s8 + $0x30] sm:$0xf]  ;;  %v923_v13 = vrot.slane %v922_v63, 4  ;;  %v3290_v39 = vld [vmem:[%s2972_s8 + $0x34] sm:$0x1] }
  0x37   : > { %1640 = vmatpush.bf16.msrb.mxu3 %v2772_v40  ;;  %v914_v29 = vsel %vm3010_vm4, %v909_v18, %v913_v19  ;;  %v1016_v40 = vunpack.c.l.b16 %v900_v25  ;;  %v636_v42 = vunpack.c.l.b16 %v602_v26  ;;  %v937_v14 = vrot.slane %v936_v0, 4  ;;  %v3256_v18 = vld [vmem:[%s3638_s1 + $0x228] sm:$0xff]  ;;  %v2562_v51 = vld [vmem:[%s2972_s8 + $0x18] sm:$0xf]  ;;  %v2730_v63 = vld [vmem:[%s2972_s8 + $0x3c] sm:$0xf0] }
  0x38   : > { %v1017_v41 = vunpack.c.l.b16 %v914_v29  ;;  %v2238_v19 = vrot.slane %v562_v4, 9  ;;  %v946_v26 = vrot.slane %v944_v15, 4  ;;  %v953_v52 = vshll.u32 %v3287_v33, 16  ;;  %v2372_v0 = vld [vmem:[%s2972_s8 + $0x38] sm:$0xf] }
  0x39   : > { %530 = vmatpush.bf16.msrb.mxu1 %v2707_v37  ;;  %1083 = vmatpush.bf16.msrb.mxu0 %v2743_v43  ;;  %v2754_v37 = vld [vmem:[%s3638_s1 + $0x178] sm:$0xff]  ;;  %v637_v43 = vunpack.c.l.b16 %v606_v27  ;;  %v942_v25 = vsel %vm3010_vm4, %v937_v14, %v941_v9  ;;  %v949_v27 = vrot.slane %v947_v16, 5  ;;  %v967_v59 = vshll.u32 %v3290_v39, 16  ;;  %v2374_v16 = vld [vmem:[%s2972_s8 + $0x40] sm:$0xf] }
  0x3a   : > { %1395 = vmatpush.bf16.msrb.mxu2 %v2763_v44  ;;  %v3216_v44 = vld [vmem:[%s2972_s8 + $0x1c] sm:$0x1]  ;;  %v610_v29 = vsel %vm3019_vm5, %v2238_v19, %v609_v20  ;;  %v2767_v19 = vld [vmem:[%s3638_s1 + $0x1c0] sm:$0xff]  ;;  %v975_v20 = vshll.u32 %v2372_v0, 16 }
  0x3b   : > { %1641 = vmatpush.bf16.msrb.mxu3 %v2771_v21  ;;  %v2239_v21 = vrot.slane %v563_v5, 9  ;;  %v950_v50 = vor.u32 %v949_v27, %v946_v26  ;;  %v3308_v5 = vld [vmem:[%s2972_s8 + $0x14] sm:$0x1]  ;;  %v969_v15 = vrot.slane %v967_v59, 5 }
  0x3c   : > { %449 = vmatmul.bf16.gmra.mxu1 %v373_v60  ;;  %439 = vmatmul.bf16.gmra.mxu0 %v371_v61  ;;  %v642_v60 = vpack.c.b16 %v637_v43, %v636_v42  ;;  %v2322_v61 = vld [vmem:[%s2972_s8 + $0x28] sm:$0xf]  ;;  %v2700_v42 = vld [vmem:[%s2972_s8 + $0x14] sm:$0xf0]  ;;  %v638_v43 = vunpack.c.l.b16 %v610_v29  ;;  %v3330_v27 = vld [vmem:[%s3638_s1 + $0x210] sm:$0xff] }
  0x3d   : > { %531 = vmatpush.bf16.msrb.mxu1 %v2706_v55  ;;  %1084 = vmatpush.bf16.msrb.mxu0 %v2742_v58  ;;  %v1024_v55 = vpack.c.b16 %v1017_v41, %v1016_v40  ;;  %v925_v58 = vshll.u32 %v3216_v44, 16  ;;  %v2560_v40 = vld [vmem:[%s2972_s8 + $0x10] sm:$0xf]  ;;  %v951_v4 = vrot.slane %v950_v50, 4  ;;  %v2424_v29 = vld [vmem:[%s2972_s8 + $0x8] sm:$0xe] }
  0x3e   : > { %1396 = vmatpush.bf16.msrb.mxu2 %v2762_v17  ;;  %847 = vmatmul.bf16.gmra.mxu3 %v2319_v8  ;;  %v2769_v17 = vld [vmem:[%s3638_s1 + $0x1d0] sm:$0xff] }
  0x3f   : > { %709 = vmatmul.bf16.gmra.mxu2 %v641_v2  ;;  %1642 = vmatpush.bf16.msrb.mxu3 %v2770_v24  ;;  %v2752_v2 = vld [vmem:[%s3638_s1 + $0x168] sm:$0xff]  ;;  %v927_v8 = vrot.slane %v925_v58, 5  ;;  %v961_v24 = vshll.u32 %v2370_v11, 16  ;;  %v2190_v41 = vld [vmem:[%s2972_s8 + $0x10] sm:$0xf] }
  0x41   : > { %532 = vmatpush.bf16.msrb.mxu1 %v2705_v6  ;;  %1085 = vmatpush.bf16.msrb.mxu0 %v2741_v7  ;;  %v2760_v6 = vld [vmem:[%s3638_s1 + $0x188] sm:$0xff]  ;;  %v2323_v7 = vor.u32 %v2729_v62, %v2322_v61  ;;  %v963_v35 = vrot.slane %v961_v24, 5  ;;  %v2191_v61 = vor.u32 %v2700_v42, %v2190_v41  ;;  %v3343_v42 = vld [vmem:[%s2972_s8 + $0x3c] sm:$0x1] }
  0x42   : > { %1397 = vmatpush.bf16.msrb.mxu2 %v2761_v23  ;;  %v958_v23 = vshrl.u32 %v2370_v11, 16 }
  0x43   : > { %1643 = vmatpush.bf16.msrb.mxu3 %v2769_v17  ;;  %v972_v17 = vshrl.u32 %v2372_v0, 16 }
  0x45   : > { %533 = vmatpush.bf16.msrb.mxu1 %v2704_v10  ;;  %1086 = vmatpush.bf16.msrb.mxu0 %v2740_v12  ;;  %v613_v10 = vrot.slane %v3069_v36, 5  ;;  %v2751_v12 = vld [vmem:[%s3638_s1 + $0x160] sm:$0xff]  ;;  %v928_v36 = vsel %vm3010_vm4, %v923_v13, %v927_v8 }
  0x46   : > { %1398 = vmatpush.bf16.msrb.mxu2 %v2760_v6  ;;  %v955_v6 = vrot.slane %v953_v52, 5 }
  0x47   : > { %v614_v30 = vsel %vm3019_vm5, %v2239_v21, %v613_v10  ;;  %1644 = vmatpush.bf16.msrb.mxu3 %v2768_v32  ;;  %v1455_v10 = vshll.u32 %v3308_v5, 16  ;;  %v1147_v32 = vrot.slane %v3157_v56, 5  ;;  %v974_v56 = vrot.slane %v972_v17, 4 }
  0x48   : > { %v639_v48 = vunpack.c.l.b16 %v614_v30 }
  0x49   : > { %534 = vmatpush.bf16.msrb.mxu1 %v2703_v34  ;;  %1087 = vmatpush.bf16.msrb.mxu0 %v2739_v38  ;;  %v960_v34 = vrot.slane %v958_v23, 4  ;;  %v1019_v38 = vunpack.c.l.b16 %v942_v25  ;;  %v1143_v23 = vrot.slane %v3151_v47, 5  ;;  %v989_v25 = vshll.u32 %v2374_v16, 16 }
  0x4a   : > { %1399 = vmatpush.bf16.msrb.mxu2 %v2759_v22  ;;  %v643_v3 = vpack.c.b16 %v639_v48, %v638_v43  ;;  %v956_v47 = vsel %vm3010_vm4, %v951_v4, %v955_v6  ;;  %v2514_v4 = vld [vmem:[%s2972_s8 + $0x10] sm:$0xf] }
  0x4b   : > { %v964_v58 = vor.u32 %v963_v35, %v960_v34  ;;  %1645 = vmatpush.bf16.msrb.mxu3 %v2767_v19  ;;  %v2425_v34 = vld [vmem:[%s2972_s8 + $0x10] sm:$0xe]  ;;  %v2432_v35 = vrot.slane %v2424_v29, 9  ;;  %v991_v52 = vrot.slane %v989_v25, 5 }
  0x4c   : > { %535 = vmatmul.bf16.vlgmr.msrb.gmra.mxu1 %v2187_v54  ;;  %1088 = vmatmul.bf16.vlgmr.msrb.gmra.mxu0 %v1024_v55  ;;  %v1449_v54 = vshll.u32 %v2560_v40, 16  ;;  %v1460_v55 = vshrl.u32 %v2562_v51, 16  ;;  %v2433_v41 = vrot.slane %v2425_v34, 9  ;;  %v2775_v34 = vld [vmem:[%s3638_s1 + $0x200] sm:$0xff] }
  0x4d   : > { %1254 = vmatpush.bf16.msra.mxu1 %v2754_v37  ;;  %1812 = vmatpush.bf16.msra.mxu0 %v3221_v45  ;;  %v1018_v37 = vunpack.c.l.b16 %v928_v36  ;;  %v965_v14 = vrot.slane %v964_v58, 4  ;;  %v986_v36 = vshrl.u32 %v2374_v16, 16  ;;  %v1144_v50 = vsel %vm3019_vm5, %v2432_v35, %v1143_v23  ;;  %v3375_v23 = vld [vmem:[%s2972_s8 + $0x2c] sm:$0x1] }
  0x4e   : > { %852 = vmatmul.bf16.gmra.mxu3 %v2323_v7  ;;  %2814 = vmatpush.bf16.msra.mxu2 %v3221_v45  ;;  %v2326_v45 = vld [vmem:[%s2972_s8 + $0x38] sm:$0xf]  ;;  %v3311_v7 = vld [vmem:[%s2972_s8 + $0x1c] sm:$0x1]  ;;  %v1451_v9 = vrot.slane %v1449_v54, 5  ;;  %v1462_v11 = vrot.slane %v1460_v55, 4  ;;  %v1190_v54 = vunpack.c.l.b16 %v1144_v50  ;;  %v1020_v58 = vunpack.c.l.b16 %v956_v47 }
  0x4f   : > { %714 = vmatmul.bf16.gmra.mxu2 %v642_v60  ;;  %v2749_v60 = vld [vmem:[%s3638_s1 + $0x150] sm:$0xff]  ;;  %v1025_v62 = vpack.c.b16 %v1019_v38, %v1018_v37  ;;  %v2327_v13 = vor.u32 %v2730_v63, %v2326_v45  ;;  %v1469_v24 = vshll.u32 %v3311_v7, 16  ;;  %v970_v30 = vsel %vm3010_vm4, %v965_v14, %v969_v15  ;;  %v2194_v55 = vld [vmem:[%s2972_s8 + $0x20] sm:$0xf]  ;;  %v2701_v45 = vld [vmem:[%s2972_s8 + $0x24] sm:$0xf0] }
  0x50   : > { %v977_v37 = vrot.slane %v975_v20, 5  ;;  %v1021_v59 = vunpack.c.l.b16 %v970_v30  ;;  %v981_v63 = vshll.u32 %v3343_v42, 16  ;;  %v2195_v17 = vor.u32 %v2701_v45, %v2194_v55  ;;  %v2198_v55 = vld [vmem:[%s2972_s8 + $0x30] sm:$0xf] }
  0x51   : > { %1255 = vmatpush.bf16.msra.mxu1 %v2753_v53  ;;  %1813 = vmatpush.bf16.msra.mxu0 %v3237_v1  ;;  %v1446_v53 = vshrl.u32 %v2560_v40, 16  ;;  %v1457_v40 = vrot.slane %v1455_v10, 5  ;;  %v1471_v48 = vrot.slane %v1469_v24, 5 }
  0x52   : > { %2815 = vmatpush.bf16.msra.mxu2 %v3237_v1  ;;  %v2748_v1 = vld [vmem:[%s3638_s1 + $0x148] sm:$0xff] }
  0x53   : > { %v1448_v8 = vrot.slane %v1446_v53, 4  ;;  %v1148_v53 = vsel %vm3019_vm5, %v2433_v41, %v1147_v32 }
  0x55   : > { %1256 = vmatpush.bf16.msra.mxu1 %v2752_v2  ;;  %1814 = vmatpush.bf16.msra.mxu0 %v3256_v18  ;;  %v1463_v2 = vshll.u32 %v2562_v51, 16  ;;  %v1452_v21 = vor.u32 %v1451_v9, %v1448_v8  ;;  %v988_v51 = vrot.slane %v986_v36, 4 }
  0x56   : > { %2816 = vmatpush.bf16.msra.mxu2 %v3256_v18  ;;  %v2776_v18 = vld [vmem:[%s3638_s1 + $0x208] sm:$0xff] }
  0x57   : > { %v1465_v22 = vrot.slane %v1463_v2, 5  ;;  %v1453_v38 = vrot.slane %v1452_v21, 4  ;;  %v2564_v2 = vld [vmem:[%s2972_s8 + $0x20] sm:$0xf] }
  0x58   : > { %v1474_v9 = vshrl.u32 %v2564_v2, 16 }
  0x59   : > { %1257 = vmatpush.bf16.msra.mxu1 %v2751_v12  ;;  %1815 = vmatpush.bf16.msra.mxu0 %v3277_v28  ;;  %v2778_v12 = vld [vmem:[%s3638_s1 + $0x218] sm:$0xff]  ;;  %v1466_v26 = vor.u32 %v1465_v22, %v1462_v11  ;;  %v1458_v0 = vsel %vm3010_vm4, %v1453_v38, %v1457_v40  ;;  %v1477_v11 = vshll.u32 %v2564_v2, 16  ;;  %v3372_v22 = vld [vmem:[%s2972_s8 + $0x24] sm:$0x1]  ;;  %v2427_v38 = vld [vmem:[%s2972_s8 + $0x20] sm:$0xe] }
  0x5a   : > { %2817 = vmatpush.bf16.msra.mxu2 %v3277_v28  ;;  %v992_v28 = vor.u32 %v991_v52, %v988_v51  ;;  %v1476_v19 = vrot.slane %v1474_v9, 4  ;;  %v1574_v21 = vunpack.c.l.b16 %v1458_v0  ;;  %v1151_v52 = vrot.slane %v3216_v44, 5 }
  0x5b   : > { %v1467_v43 = vrot.slane %v1466_v26, 4  ;;  %v1479_v20 = vrot.slane %v1477_v11, 5  ;;  %v983_v26 = vrot.slane %v981_v63, 5  ;;  %v2624_v63 = vld [vmem:[%s2972_s8 + $0x10] sm:$0xe] }
  0x5c   : > { %540 = vmatmul.bf16.gmra.mxu1 %v2191_v61  ;;  %1093 = vmatmul.bf16.gmra.mxu0 %v1025_v62  ;;  %v1191_v61 = vunpack.c.l.b16 %v1148_v53  ;;  %v978_v62 = vor.u32 %v977_v37, %v974_v56  ;;  %v993_v29 = vrot.slane %v992_v28, 4  ;;  %v1483_v56 = vshll.u32 %v3372_v22, 16  ;;  %v2426_v37 = vld [vmem:[%s2972_s8 + $0x18] sm:$0xe] }
  0x5d   : > { %1258 = vmatpush.bf16.msra.mxu1 %v2750_v31  ;;  %1816 = vmatpush.bf16.msra.mxu0 %v2778_v12  ;;  %v2747_v31 = vld [vmem:[%s3638_s1 + $0x140] sm:$0xff]  ;;  %v1472_v6 = vsel %vm3010_vm4, %v1467_v43, %v1471_v48  ;;  %v1480_v30 = vor.u32 %v1479_v20, %v1476_v19  ;;  %v2434_v50 = vrot.slane %v2426_v37, 9  ;;  %v2435_v53 = vrot.slane %v2427_v38, 9 }
  0x5e   : > { %857 = vmatmul.bf16.gmra.mxu3 %v2327_v13  ;;  %v3367_v8 = vpack.c.b16 %v1191_v61, %v1190_v54  ;;  %v2755_v13 = vld [vmem:[%s2972_s8 + $0x14] sm:$0xf0]  ;;  %2818 = vmatpush.bf16.msra.mxu2 %v2778_v12  ;;  %v1575_v10 = vunpack.c.l.b16 %v1472_v6  ;;  %v979_v25 = vrot.slane %v978_v62, 4  ;;  %v1497_v12 = vshll.u32 %v3375_v23, 16 }
  0x5f   : > { %719 = vmatmul.bf16.gmra.mxu2 %v643_v3  ;;  %v2566_v3 = vld [vmem:[%s2972_s8 + $0x28] sm:$0xf]  ;;  %v2515_v36 = vor.u32 %v2755_v13, %v2514_v4  ;;  %v1485_v43 = vrot.slane %v1483_v56, 5  ;;  %v1155_v54 = vrot.slane %v3224_v46, 5  ;;  %v1701_v62 = vrot.slane %v3308_v5, 5 }
  0x60   : > { %v1488_v15 = vshrl.u32 %v2566_v3, 16  ;;  %v1491_v16 = vshll.u32 %v2566_v3, 16  ;;  %v984_v40 = vsel %vm3010_vm4, %v979_v25, %v983_v26  ;;  %v1499_v48 = vrot.slane %v1497_v12, 5  ;;  %v2625_v3 = vld [vmem:[%s2972_s8 + $0x18] sm:$0xe] }
  0x61   : > { %1259 = vmatpush.bf16.msra.mxu1 %v2749_v60  ;;  %1817 = vmatpush.bf16.msra.mxu0 %v3330_v27  ;;  %v3356_v60 = vld [vmem:[%s2972_s8 + $0x44] sm:$0x1]  ;;  %v1022_v45 = vunpack.c.l.b16 %v984_v40  ;;  %v1156_v61 = vsel %vm3019_vm5, %v2435_v53, %v1155_v54  ;;  %v2568_v4 = vld [vmem:[%s2972_s8 + $0x30] sm:$0xf]  ;;  %v2570_v6 = vld [vmem:[%s2972_s8 + $0x38] sm:$0xf] }
  0x62   : > { %v995_v14 = vshll.u32 %v3356_v60, 16  ;;  %v1490_v24 = vrot.slane %v1488_v15, 4  ;;  %v1493_v32 = vrot.slane %v1491_v16, 5  ;;  %2819 = vmatpush.bf16.msra.mxu2 %v3330_v27  ;;  %v1481_v27 = vrot.slane %v1480_v30, 4  ;;  %v2518_v16 = vld [vmem:[%s2972_s8 + $0x20] sm:$0xf] }
  0x63   : > { %v1193_v0 = vunpack.c.l.b16 %v1156_v61  ;;  %v1502_v11 = vshrl.u32 %v2568_v4, 16  ;;  %v1505_v13 = vshll.u32 %v2568_v4, 16  ;;  %v1516_v5 = vshrl.u32 %v2570_v6, 16  ;;  %v2428_v53 = vld [vmem:[%s2972_s8 + $0x28] sm:$0xe] }
  0x64   : > { %v997_v47 = vrot.slane %v995_v14, 5  ;;  %v1494_v35 = vor.u32 %v1493_v32, %v1490_v24  ;;  %v1486_v46 = vsel %vm3010_vm4, %v1481_v27, %v1485_v43  ;;  %v1705_v15 = vrot.slane %v3311_v7, 5  ;;  %v2429_v54 = vld [vmem:[%s2972_s8 + $0x30] sm:$0xe]  ;;  %v2626_v4 = vld [vmem:[%s2972_s8 + $0x20] sm:$0xe] }
  0x65   : > { %1260 = vmatpush.bf16.msra.mxu1 %v2748_v1  ;;  %1818 = vmatpush.bf16.msra.mxu0 %v2776_v18  ;;  %v1026_v1 = vpack.c.b16 %v1021_v59, %v1020_v58  ;;  %v1152_v59 = vsel %vm3019_vm5, %v2434_v50, %v1151_v52  ;;  %v1576_v19 = vunpack.c.l.b16 %v1486_v46  ;;  %v1504_v24 = vrot.slane %v1502_v11, 4  ;;  %v2522_v50 = vld [vmem:[%s2972_s8 + $0x30] sm:$0xf]  ;;  %v2627_v11 = vld [vmem:[%s2972_s8 + $0x28] sm:$0xe] }
  0x66   : > { %v998_v41 = vsel %vm3010_vm4, %v993_v29, %v997_v47  ;;  %2820 = vmatpush.bf16.msra.mxu2 %v2776_v18  ;;  %v1495_v51 = vrot.slane %v1494_v35, 4  ;;  %v2702_v18 = vld [vmem:[%s2972_s8 + $0x34] sm:$0xf0]  ;;  %v1192_v44 = vunpack.c.l.b16 %v1152_v59  ;;  %v1507_v32 = vrot.slane %v1505_v13, 5  ;;  %v3412_v29 = vld [vmem:[%s2972_s8 + $0x34] sm:$0x1] }
  0x67   : > { %v1023_v58 = vunpack.c.l.b16 %v998_v41  ;;  %v2199_v28 = vor.u32 %v2702_v18, %v2198_v55  ;;  %v3415_v47 = vld [vmem:[%s2972_s8 + $0x3c] sm:$0x1]  ;;  %v2572_v55 = vld [vmem:[%s2972_s8 + $0x40] sm:$0xf]  ;;  %v2437_v59 = vrot.slane %v2429_v54, 9  ;;  %v1163_v61 = vrot.slane %v3290_v39, 5 }
  0x68   : > { %v1500_v2 = vsel %vm3010_vm4, %v1495_v51, %v1499_v48  ;;  %v3406_v9 = vpack.c.b16 %v1193_v0, %v1192_v44  ;;  %v1508_v12 = vor.u32 %v1507_v32, %v1504_v24  ;;  %v1525_v35 = vshll.u32 %v3415_v47, 16  ;;  %v2574_v18 = vld [vmem:[%s2972_s8 + $0x48] sm:$0xf] }
  0x69   : > { %1261 = vmatpush.bf16.msra.mxu1 %v2747_v31  ;;  %v1582_v31 = vpack.c.b16 %v1575_v10, %v1574_v21  ;;  %1819 = vmatpush.bf16.msra.mxu0 %v2775_v34  ;;  %v1027_v14 = vpack.c.b16 %v1023_v58, %v1022_v45  ;;  %v1577_v20 = vunpack.c.l.b16 %v1500_v2  ;;  %v2632_v21 = vrot.slane %v2624_v63, 9 }
  0x6a   : > { %2821 = vmatpush.bf16.msra.mxu2 %v2775_v34  ;;  %v2633_v10 = vrot.slane %v2625_v3, 9  ;;  %v1509_v40 = vrot.slane %v1508_v12, 4  ;;  %v1527_v43 = vrot.slane %v1525_v35, 5  ;;  %v2436_v45 = vrot.slane %v2428_v53, 9 }
  0x6b   : > { %v1583_v30 = vpack.c.b16 %v1577_v20, %v1576_v19  ;;  %v1702_v7 = vsel %vm3019_vm5, %v2632_v21, %v1701_v62  ;;  %v1159_v58 = vrot.slane %v3287_v33, 5  ;;  %v2757_v62 = vld [vmem:[%s2972_s8 + $0x34] sm:$0xf0]  ;;  %v1530_v63 = vshrl.u32 %v2572_v55, 16 }
  0x6c   : > { %545 = vmatmul.bf16.gmra.mxu1 %v2195_v17  ;;  %1098 = vmatmul.bf16.gmra.mxu0 %v1026_v1  ;;  %v2756_v17 = vld [vmem:[%s2972_s8 + $0x24] sm:$0xf0]  ;;  %v1519_v1 = vshll.u32 %v2570_v6, 16  ;;  %v1706_v56 = vsel %vm3019_vm5, %v2633_v10, %v1705_v15  ;;  %v1748_v37 = vunpack.c.l.b16 %v1702_v7  ;;  %v1533_v44 = vshll.u32 %v2572_v55, 16  ;;  %v3442_v15 = vld [vmem:[%s2972_s8 + $0x44] sm:$0x1] }
  0x6d   : > { %v2519_v26 = vor.u32 %v2756_v17, %v2518_v16  ;;  %v1749_v38 = vunpack.c.l.b16 %v1706_v56  ;;  %v1544_v0 = vshrl.u32 %v2574_v18, 16  ;;  %v1547_v46 = vshll.u32 %v2574_v18, 16  ;;  %v3445_v16 = vld [vmem:[%s2972_s8 + $0x4c] sm:$0x1] }
  0x6e   : > { %1646 = vmatmul.bf16.vlgmr.msrb.gmra.mxu3 %v1582_v31  ;;  %v1521_v25 = vrot.slane %v1519_v1, 5  ;;  %v1511_v31 = vshll.u32 %v3412_v29, 16  ;;  %v1160_v6 = vsel %vm3019_vm5, %v2436_v45, %v1159_v58  ;;  %v1164_v33 = vsel %vm3019_vm5, %v2437_v59, %v1163_v61  ;;  %v2629_v61 = vld [vmem:[%s2972_s8 + $0x38] sm:$0xe] }
  0x6f   : > { %1400 = vmatmul.bf16.vlgmr.msrb.gmra.mxu2 %v2515_v36  ;;  %v1518_v36 = vrot.slane %v1516_v5, 4  ;;  %v1756_v48 = vpack.c.b16 %v1749_v38, %v1748_v37  ;;  %v1194_v13 = vunpack.c.l.b16 %v1160_v6  ;;  %v1195_v39 = vunpack.c.l.b16 %v1164_v33  ;;  %v2430_v38 = vld [vmem:[%s2972_s8 + $0x38] sm:$0xe] }
  0x70   : > { %v1513_v41 = vrot.slane %v1511_v31, 5  ;;  %v1532_v5 = vrot.slane %v1530_v63, 4  ;;  %v1546_v17 = vrot.slane %v1544_v0, 4  ;;  %v1549_v1 = vrot.slane %v1547_v46, 5  ;;  %v2631_v63 = vld [vmem:[%s2972_s8 + $0x48] sm:$0xe] }
  0x71   : > { %v1522_v34 = vor.u32 %v1521_v25, %v1518_v36  ;;  %v2634_v19 = vrot.slane %v2626_v4, 9  ;;  %v3447_v20 = vpack.c.b16 %v1195_v39, %v1194_v13  ;;  %v1709_v10 = vrot.slane %v3372_v22, 5 }
  0x72   : > { %v1514_v51 = vsel %vm3010_vm4, %v1509_v40, %v1513_v41  ;;  %v2635_v24 = vrot.slane %v2627_v11, 9  ;;  %v1713_v32 = vrot.slane %v3375_v23, 5  ;;  %v1539_v25 = vshll.u32 %v3442_v15, 16  ;;  %v2431_v40 = vld [vmem:[%s2972_s8 + $0x40] sm:$0xe] }
  0x73   : > { %v1523_v27 = vrot.slane %v1522_v34, 4  ;;  %v1578_v2 = vunpack.c.l.b16 %v1514_v51  ;;  %v1710_v7 = vsel %vm3019_vm5, %v2634_v19, %v1709_v10  ;;  %v2438_v41 = vrot.slane %v2430_v38, 9  ;;  %v2758_v51 = vld [vmem:[%s2972_s8 + $0x44] sm:$0xf0] }
  0x74   : > { %v1714_v22 = vsel %vm3019_vm5, %v2635_v24, %v1713_v32  ;;  %v1541_v23 = vrot.slane %v1539_v25, 5  ;;  %v1750_v31 = vunpack.c.l.b16 %v1710_v7  ;;  %v1717_v0 = vrot.slane %v3412_v29, 5 }
  0x75   : > { %v1528_v52 = vsel %vm3010_vm4, %v1523_v27, %v1527_v43  ;;  %v1751_v34 = vunpack.c.l.b16 %v1714_v22  ;;  %v1167_v27 = vrot.slane %v3343_v42, 5  ;;  %v2439_v43 = vrot.slane %v2431_v40, 9  ;;  %v2628_v42 = vld [vmem:[%s2972_s8 + $0x30] sm:$0xe] }
  0x76   : > { %v1579_v3 = vunpack.c.l.b16 %v1528_v52  ;;  %v2637_v46 = vrot.slane %v2629_v61, 9  ;;  %v1729_v4 = vrot.slane %v3445_v16, 5  ;;  %v2639_v33 = vrot.slane %v2631_v63, 9 }
  0x77   : > { %v1757_v52 = vpack.c.b16 %v1751_v34, %v1750_v31  ;;  %v1168_v53 = vsel %vm3019_vm5, %v2438_v41, %v1167_v27 }
  0x78   : > { %v1584_v21 = vpack.c.b16 %v1579_v3, %v1578_v2  ;;  %v1196_v45 = vunpack.c.l.b16 %v1168_v53  ;;  %v1721_v2 = vrot.slane %v3415_v47, 5  ;;  %v1725_v3 = vrot.slane %v3442_v15, 5 }
  0x79   : > { %v1730_v29 = vsel %vm3019_vm5, %v2639_v33, %v1729_v4 }
  0x7c   : > { %550 = vmatmul.bf16.gmra.mxu1 %v2199_v28  ;;  %1103 = vmatmul.bf16.gmra.mxu0 %v1027_v14  ;;  %v1535_v28 = vrot.slane %v1533_v44, 5  ;;  %v2523_v14 = vor.u32 %v2757_v62, %v2522_v50  ;;  %v2526_v50 = vld [vmem:[%s2972_s8 + $0x40] sm:$0xf]  ;;  %v2636_v44 = vrot.slane %v2628_v42, 9 }
  0x7d   : > { %v2527_v59 = vor.u32 %v2758_v51, %v2526_v50  ;;  %v2630_v62 = vld [vmem:[%s2972_s8 + $0x40] sm:$0xe] }
  0x7e   : > { %1651 = vmatmul.bf16.gmra.mxu3 %v1583_v30  ;;  %v1536_v36 = vor.u32 %v1535_v28, %v1532_v5  ;;  %v1553_v30 = vshll.u32 %v3445_v16, 16  ;;  %v2638_v6 = vrot.slane %v2630_v62, 9  ;;  %v1718_v11 = vsel %vm3019_vm5, %v2636_v44, %v1717_v0 }
  0x7f   : > { %1405 = vmatmul.bf16.gmra.mxu2 %v2519_v26  ;;  %v1550_v26 = vor.u32 %v1549_v1, %v1546_v17  ;;  %v1752_v47 = vunpack.c.l.b16 %v1718_v11  ;;  %v1755_v28 = vunpack.c.l.b16 %v1730_v29 }
  0x80   : > { %v1555_v12 = vrot.slane %v1553_v30, 5  ;;  %v1726_v13 = vsel %vm3019_vm5, %v2638_v6, %v1725_v3 }
  0x81   : > { %v1551_v56 = vrot.slane %v1550_v26, 4  ;;  %v1754_v5 = vunpack.c.l.b16 %v1726_v13 }
  0x83   : > { %v1556_v37 = vsel %vm3010_vm4, %v1551_v56, %v1555_v12  ;;  %v1759_v17 = vpack.c.b16 %v1755_v28, %v1754_v5 }
  0x84   : > { %v1581_v55 = vunpack.c.l.b16 %v1556_v37 }
  0x8c   : > { %1262 = vmatmul.bf16.vlgmr.msra.gmra.mxu1 %v3367_v8  ;;  %1820 = vmatmul.bf16.vlgmr.msra.gmra.mxu0 %v1756_v48  ;;  %v1537_v8 = vrot.slane %v1536_v36, 4  ;;  %v1171_v48 = vrot.slane %v3356_v60, 5 }
  0x8e   : > { %1656 = vmatmul.bf16.gmra.mxu3 %v1584_v21  ;;  %v1542_v35 = vsel %vm3010_vm4, %v1537_v8, %v1541_v23  ;;  %v1172_v49 = vsel %vm3019_vm5, %v2439_v43, %v1171_v48 }
  0x8f   : > { %1410 = vmatmul.bf16.gmra.mxu2 %v2523_v14  ;;  %v1580_v54 = vunpack.c.l.b16 %v1542_v35  ;;  %v1197_v58 = vunpack.c.l.b16 %v1172_v49 }
  0x91   : > { %v1201_v18 = vpack.c.b16 %v1197_v58, %v1196_v45  ;;  %v1585_v60 = vpack.c.b16 %v1581_v55, %v1580_v54 }
  0x9c   : > { %1267 = vmatmul.bf16.gmra.mxu1 %v3406_v9  ;;  %1825 = vmatmul.bf16.gmra.mxu0 %v1757_v52  ;;  %v1722_v9 = vsel %vm3019_vm5, %v2637_v46, %v1721_v2 }
  0x9d   : > { %v1753_v39 = vunpack.c.l.b16 %v1722_v9 }
  0x9e   : > { %1661 = vmatmul.bf16.gmra.mxu3 %v1585_v60 }
  0x9f   : > { %1415 = vmatmul.bf16.gmra.mxu2 %v2527_v59  ;;  %v1758_v14 = vpack.c.b16 %v1753_v39, %v1752_v47 }
  0xa9   : > { %v445_v15 = vpop.f32.mrf.mxu1  ;;  %v435_v16 = vpop.f32.mrf.mxu0 }
  0xac   : > { %1272 = vmatmul.bf16.gmra.mxu1 %v3447_v20  ;;  %1830 = vmatmul.bf16.gmra.mxu0 %v1758_v14 }
  0xaf   : > { %1835 = vmatmul.bf16.vlgmr.msra.gmra.mxu2 %v1759_v17 }
  0xb1   : > { %v447_v19 = vpop.f32.mrf.mxu1  ;;  %v437_v21 = vpop.f32.mrf.mxu0 }
  0xb2   : > { %v705_v1 = vpop.f32.mrf.mxu2  ;;  %v843_v10 = vpop.f32.mrf.mxu3 }
  0xb9   : > { %v450_v32 = vpop.f32.mrf.mxu1  ;;  %v440_v57 = vpop.f32.mrf.mxu0 }
  0xba   : > { %v707_v24 = vpop.f32.mrf.mxu2  ;;  %v3490_v36 = vpop.f32.mrf.mxu3 }
  0xbc   : > { %1277 = vmatmul.bf16.gmra.mxu1 %v1201_v18 }
  0xc1   : > { %v452_v26 = vpop.f32.mrf.mxu1  ;;  %v442_v30 = vpop.f32.mrf.mxu0 }
  0xc2   : > { %v710_v25 = vpop.f32.mrf.mxu2  ;;  %v848_v7 = vpop.f32.mrf.mxu3 }
  0xc9   : > { %v536_v8 = vpop.f32.mrf.mxu1  ;;  %v1089_v23 = vpop.f32.mrf.mxu0 }
  0xca   : > { %v712_v22 = vpop.f32.mrf.mxu2  ;;  %v537_v20 = vadd.f32 %v536_v8, %v435_v16  ;;  %v3492_v12 = vpop.f32.mrf.mxu3 }
  0xcc   : > { %v725_v56 = vadd.f32 %v705_v1, %v537_v20 }
  0xce   : > { %v863_v31 = vadd.f32 %v843_v10, %v725_v56 }
  0xd0   : > { %v1109_v34 = vadd.f32 %v1089_v23, %v863_v31 }
  0xd1   : > { %v538_v37 = vpop.f32.mrf.mxu1  ;;  %v1091_v38 = vpop.f32.mrf.mxu0 }
  0xd2   : > { %v715_v35 = vpop.f32.mrf.mxu2  ;;  %v539_v40 = vadd.f32 %v538_v37, %v437_v21  ;;  %v853_v27 = vpop.f32.mrf.mxu3 }
  0xd4   : > { %v726_v41 = vadd.f32 %v707_v24, %v539_v40 }
  0xd9   : > { %v541_v48 = vpop.f32.mrf.mxu1  ;;  %v1094_v50 = vpop.f32.mrf.mxu0 }
  0xda   : > { %v717_v43 = vpop.f32.mrf.mxu2  ;;  %v542_v51 = vadd.f32 %v541_v48, %v440_v57  ;;  %v3494_v55 = vpop.f32.mrf.mxu3 }
  0xdc   : > { %v727_v52 = vadd.f32 %v710_v25, %v542_v51 }
  0xde   : > { %v865_v53 = vadd.f32 %v848_v7, %v727_v52 }
  0xe0   : > { %v1111_v49 = vadd.f32 %v1094_v50, %v865_v53 }
  0xe1   : > { %v543_v45 = vpop.f32.mrf.mxu1  ;;  %v3496_v58 = vpop.f32.mrf.mxu0 }
  0xe2   : > { %v720_v54 = vpop.f32.mrf.mxu2  ;;  %v544_v59 = vadd.f32 %v543_v45, %v442_v30  ;;  %v858_v60 = vpop.f32.mrf.mxu3  ;;  %v864_v30 = vadd.f32 %v3490_v36, %v726_v41 }
  0xe4   : > { %v728_v42 = vadd.f32 %v712_v22, %v544_v59  ;;  %v3516_v22 = vld [vmem:[%s3639_s2] ss:$0 sm:$0xff]  ;;  %v1110_v8 = vadd.f32 %v1091_v38, %v864_v30 }
  0xe6   : > { %v866_v51 = vadd.f32 %v3492_v12, %v728_v42 }
  0xe9   : > { %v546_v18 = vpop.f32.mrf.mxu1  ;;  %v1099_v62 = vpop.f32.mrf.mxu0 }
  0xea   : > { %v722_v61 = vpop.f32.mrf.mxu2  ;;  %v547_v63 = vadd.f32 %v546_v18, %v445_v15  ;;  %v3504_v11 = vpop.f32.mrf.mxu3  ;;  %v1112_v18 = vadd.f32 %v3496_v58, %v866_v51 }
  0xec   : > { %v729_v44 = vadd.f32 %v715_v35, %v547_v63 }
  0xee   : > { %v867_v0 = vadd.f32 %v853_v27, %v729_v44 }
  0xf0   : > { %v3498_v46 = vadd.f32 %v1099_v62, %v867_v0 }
  0xf1   : > { %v548_v3 = vpop.f32.mrf.mxu1  ;;  %v3500_v4 = vpop.f32.mrf.mxu0 }
  0xf2   : > { %v1401_v2 = vpop.f32.mrf.mxu2  ;;  %v549_v6 = vadd.f32 %v548_v3, %v447_v19  ;;  %v1647_v28 = vpop.f32.mrf.mxu3 }
  0xf4   : > { %v3502_v33 = vadd.f32 %v717_v43, %v549_v6 }
  0xf9   : > { %v551_v13 = vpop.f32.mrf.mxu1  ;;  %v1104_v29 = vpop.f32.mrf.mxu0 }
  0xfa   : > { %v1403_v9 = vpop.f32.mrf.mxu2  ;;  %v552_v47 = vadd.f32 %v551_v13, %v450_v32  ;;  %v1649_v19 = vpop.f32.mrf.mxu3 }
  0xfc   : > { %v731_v39 = vadd.f32 %v720_v54, %v552_v47 }
  0xfe   : > { %v869_v5 = vadd.f32 %v858_v60, %v731_v39 }
 0x100   : > { %v3506_v14 = vadd.f32 %v1104_v29, %v869_v5 }
 0x101   : > { %v553_v16 = vpop.f32.mrf.mxu1  ;;  %v3508_v17 = vpop.f32.mrf.mxu0 }
 0x102   : > { %v1406_v15 = vpop.f32.mrf.mxu2  ;;  %v554_v1 = vadd.f32 %v553_v16, %v452_v26  ;;  %v1652_v35 = vpop.f32.mrf.mxu3 }
 0x104   : > { %v3510_v21 = vadd.f32 %v722_v61, %v554_v1  ;;  %v868_v1 = vadd.f32 %v3494_v55, %v3502_v33 }
 0x109   : > { %v1263_v10 = vpop.f32.mrf.mxu1  ;;  %v1821_v24 = vpop.f32.mrf.mxu0 }
 0x10a   : > { %v1283_v57 = vadd.f32 %v1263_v10, %v1109_v34  ;;  %v1408_v25 = vpop.f32.mrf.mxu2  ;;  %v1654_v45 = vpop.f32.mrf.mxu3 }
 0x10c   : > { %v1421_v32 = vadd.f32 %v1401_v2, %v1283_v57 }
 0x10e   : > { %v1667_v7 = vadd.f32 %v1647_v28, %v1421_v32 }
 0x110   : > { %v1841_v23 = vadd.f32 %v1821_v24, %v1667_v7 }
 0x111   : > { %v1265_v20 = vpop.f32.mrf.mxu1  ;;  %v1823_v26 = vpop.f32.mrf.mxu0 }
 0x112   : > { %v3519_v56 = vadd.f32 %v3516_v22, %v1841_v23  ;;  %v1284_v31 = vadd.f32 %v1265_v20, %v1110_v8  ;;  %v1411_v36 = vpop.f32.mrf.mxu2  ;;  %v1657_v13 = vpop.f32.mrf.mxu3 }
 0x114   : > { %v2688_v34 = vmul.f32 -1.442695, %v3519_v56  ;;  %v1422_v37 = vadd.f32 %v1403_v9, %v1284_v31 }
 0x116   : > { %2848 = vpow2.f32 %v2688_v34  ;;  %v1668_v40 = vadd.f32 %v1649_v19, %v1422_v37 }
 0x118   : > { %v1842_v41 = vadd.f32 %v1823_v26, %v1668_v40 }
 0x119   : > { %v1268_v27 = vpop.f32.mrf.mxu1  ;;  %v1826_v48 = vpop.f32.mrf.mxu0 }
 0x11a   : > { %v3523_v43 = vadd.f32 %v3516_v22, %v1842_v41  ;;  %v1285_v38 = vadd.f32 %v1268_v27, %v1111_v49  ;;  %v3527_v61 = vpop.f32.mrf.mxu2 }
 0x11c   : > { %v2849_v50 = vpop.eup %2848  ;;  %v2689_v52 = vmul.f32 -1.442695, %v3523_v43  ;;  %v1423_v53 = vadd.f32 %v1406_v15, %v1285_v38 }
 0x11d   : > { %v1885_v54 = vadd.f32 1.0, %v2849_v50 }
 0x11e   : > { %2850 = vpow2.f32 %v2689_v52  ;;  %v1669_v59 = vadd.f32 %v1652_v35, %v1423_v53  ;;  %v1659_v35 = vpop.f32.mrf.mxu3 }
 0x11f   : > { %2852 = vrcp.f32 %v1885_v54  ;;  %vm1898_vm7 = vweird.f32 %v1885_v54  ;;  %v1904_v7 = vand.u32 2147483648, %v1885_v54  ;;  %v1902_v55 = vand.u32 2147483647, %v1885_v54 }
 0x120   : > { %v1843_v62 = vadd.f32 %v1826_v48, %v1669_v59 }
 0x121   : > { %v1270_v63 = vpop.f32.mrf.mxu1  ;;  %v1828_v0 = vpop.f32.mrf.mxu0  ;;  %vm1903_vm10 = vcmp.eq.f32.partialorder %v1902_v55, 8.507059e+37 }
 0x122   : > { %v3531_v49 = vadd.f32 %v3516_v22, %v1843_v62  ;;  %v1286_v60 = vadd.f32 %v1270_v63, %v1112_v18  ;;  %v3534_v47 = vpop.f32.mrf.mxu2 }
 0x124   : > { %v2851_v44 = vpop.eup %2850  ;;  %v2690_v12 = vmul.f32 -1.442695, %v3531_v49  ;;  %v1424_v42 = vadd.f32 %v1408_v25, %v1286_v60 }
 0x125   : > { %v2853_v2 = vpop.eup %2852  ;;  %v1886_v3 = vadd.f32 1.0, %v2851_v44 }
 0x126   : > { %v1894_v6 = vmul.f32 %v2853_v2, %v1885_v54  ;;  %2854 = vpow2.f32 %v2690_v12  ;;  %v1670_v9 = vadd.f32 %v1654_v45, %v1424_v42  ;;  %vm1899_vm6 = vweird.f32 %v2853_v2 }
 0x127   : > { %2856 = vrcp.f32 %v1886_v3  ;;  %vm3547_vm8 = vmor %vm1898_vm7, %vm1899_vm6  ;;  %v1917_v26 = vand.u32 2147483647, %v1886_v3  ;;  %v1919_v31 = vand.u32 2147483648, %v1886_v3  ;;  %vm1913_vm11 = vweird.f32 %v1886_v3 }
 0x128   : > { %v1895_v29 = vsub.f32 1.0, %v1894_v6  ;;  %v1844_v58 = vadd.f32 %v1828_v0, %v1670_v9  ;;  %v1662_v6 = vpop.f32.mrf.mxu3 }
 0x129   : > { %v1273_v39 = vpop.f32.mrf.mxu1  ;;  %v1831_v32 = vpop.f32.mrf.mxu0  ;;  %v1920_v52 = vor.u32 1.1754944e-38, %v1919_v31  ;;  %vm1918_vm13 = vcmp.eq.f32.partialorder %v1917_v26, 8.507059e+37 }
 0x12a   : > { %v1896_v5 = vmul.f32 %v2853_v2, %v1895_v29  ;;  %v3537_v28 = vadd.f32 %v3516_v22, %v1844_v58  ;;  %v1287_v15 = vadd.f32 %v1273_v39, %v3498_v46  ;;  %v1114_v46 = vadd.f32 %v3500_v4, %v868_v1  ;;  %v3553_v41 = vpop.f32.mrf.mxu2 }
 0x12b   : > { %v1905_v4 = vor.u32 1.1754944e-38, %v1904_v7 }
 0x12c   : > { %v2855_v16 = vpop.eup %2854  ;;  %v2691_v19 = vmul.f32 -1.442695, %v3537_v28  ;;  %v1425_v10 = vadd.f32 %v1411_v36, %v1287_v15  ;;  %v1897_v57 = vadd.f32 %v2853_v2, %v1896_v5 }
 0x12d   : > { %v2857_v24 = vpop.eup %2856  ;;  %v3543_v25 = vadd.f32 1.0, %v2855_v16 }
 0x12e   : > { %v1909_v30 = vmul.f32 %v2857_v24, %v1886_v3  ;;  %2858 = vpow2.f32 %v2691_v19  ;;  %v1671_v23 = vadd.f32 %v1657_v13, %v1425_v10  ;;  %v1901_v20 = vsel %vm3547_vm8, %v2853_v2, %v1897_v57 }
 0x12f   : > { %2860 = vrcp.f32 %v3543_v25  ;;  %vm1914_vm9 = vweird.f32 %v2857_v24  ;;  %v1906_v51 = vsel %vm1903_vm10, %v1905_v4, %v1901_v20  ;;  %vm1928_vm15 = vweird.f32 %v3543_v25 }
 0x130   : > { %v1910_v33 = vsub.f32 1.0, %v1909_v30  ;;  %v1845_v36 = vadd.f32 %v1831_v32, %v1671_v23  ;;  %vm1915_vm12 = vmor %vm1913_vm11, %vm1914_vm9  ;;  %v2013_v63 = vmul.f32 %v1906_v51, %v3519_v56  ;;  %v1664_v31 = vpop.f32.mrf.mxu3 }
 0x131   : > { %v1275_v34 = vpop.f32.mrf.mxu1  ;;  %v1833_v12 = vpop.f32.mrf.mxu0 }
 0x132   : > { %v1911_v37 = vmul.f32 %v2857_v24, %v1910_v33  ;;  %v1288_v40 = vadd.f32 %v1275_v34, %v1114_v46  ;;  %v3556_v48 = vadd.f32 %v3516_v22, %v1845_v36  ;;  %v1836_v39 = vpop.f32.mrf.mxu2 }
 0x134   : > { %v2859_v27 = vpop.eup %2858  ;;  %v1912_v38 = vadd.f32 %v2857_v24, %v1911_v37  ;;  %v1426_v54 = vadd.f32 %v3527_v61, %v1288_v40  ;;  %v2692_v18 = vmul.f32 -1.442695, %v3556_v48 }
 0x135   : > { %v3558_v50 = vpop.eup %2860  ;;  %v3560_v53 = vadd.f32 1.0, %v2859_v27 }
 0x136   : > { %v1916_v45 = vsel %vm1915_vm12, %v2857_v24, %v1912_v38  ;;  %v1924_v59 = vmul.f32 %v3558_v50, %v3543_v25  ;;  %v1672_v61 = vadd.f32 %v1659_v35, %v1426_v54  ;;  %vm1929_vm14 = vweird.f32 %v3558_v50 }
 0x137   : > { %v1921_v62 = vsel %vm1918_vm13, %v1920_v52, %v1916_v45  ;;  %2862 = vrcp.f32 %v3560_v53  ;;  %vm3594_vm0 = vmor %vm1928_vm15, %vm1929_vm14  ;;  %v1947_v24 = vand.u32 2147483647, %v3560_v53  ;;  %vm1943_vm3 = vweird.f32 %v3560_v53 }
 0x138   : > { %v2014_v60 = vmul.f32 %v1921_v62, %v3523_v43  ;;  %v1925_v44 = vsub.f32 1.0, %v1924_v59  ;;  %2864 = vpow2.f32 %v2692_v18  ;;  %v1846_v56 = vadd.f32 %v1833_v12, %v1672_v61 }
 0x139   : > { %v1278_v42 = vpop.f32.mrf.mxu1  ;;  %v870_v43 = vadd.f32 %v3504_v11, %v3510_v21  ;;  %v1932_v11 = vand.u32 2147483647, %v3543_v25  ;;  %v1934_v21 = vand.u32 2147483648, %v3543_v25  ;;  %v1949_v25 = vand.u32 2147483648, %v3560_v53 }
 0x13a   : > { %v2786_v0 = vpack.c.bf16 %v2014_v60, %v2013_v63  ;;  %v1926_v2 = vmul.f32 %v3558_v50, %v1925_v44  ;;  %v1289_v3 = vadd.f32 %v1278_v42, %v3506_v14  ;;  %v3584_v58 = vadd.f32 %v3516_v22, %v1846_v56  ;;  %v1838_v40 = vpop.f32.mrf.mxu2 }
 0x13b   : > { %v1116_v1 = vadd.f32 %v3508_v17, %v870_v43  ;;  %vm1933_vm2 = vcmp.eq.f32.partialorder %v1932_v11, 8.507059e+37  ;;  %v1935_v8 = vor.u32 1.1754944e-38, %v1934_v21  ;;  %v1950_v26 = vor.u32 1.1754944e-38, %v1949_v25 }
 0x13c   : > { %2787 = vst [vmem:[%s3573_s12] sm:$0xff] %v2786_v0   ;;  %v1427_v9 = vadd.f32 %v3534_v47, %v1289_v3  ;;  %v1927_v29 = vadd.f32 %v3558_v50, %v1926_v2  ;;  %v2693_v16 = vmul.f32 -1.442695, %v3584_v58  ;;  %vm1948_vm5 = vcmp.eq.f32.partialorder %v1947_v24, 8.507059e+37 }
 0x13d   : > { %v2863_v13 = vpop.eup %2862 }
 0x13e   : > { %v2865_v5 = vpop.eup %2864  ;;  %v1939_v14 = vmul.f32 %v2863_v13, %v3560_v53  ;;  %v1673_v15 = vadd.f32 %v1662_v6, %v1427_v9  ;;  %v1931_v30 = vsel %vm3594_vm0, %v3558_v50, %v1927_v29  ;;  %vm1944_vm1 = vweird.f32 %v2863_v13 }
 0x13f   : > { %v3590_v47 = vadd.f32 1.0, %v2865_v5  ;;  %v1936_v20 = vsel %vm1933_vm2, %v1935_v8, %v1931_v30  ;;  %vm1945_vm4 = vmor %vm1943_vm3, %vm1944_vm1 }
 0x140   : > { %v1940_v10 = vsub.f32 1.0, %v1939_v14  ;;  %v1847_v57 = vadd.f32 %v1836_v39, %v1673_v15  ;;  %v2015_v27 = vmul.f32 %v1936_v20, %v3531_v49 }
 0x141   : > { %2866 = vrcp.f32 %v3590_v47  ;;  %v1280_v32 = vpop.f32.mrf.mxu1  ;;  %v1964_v60 = vand.u32 2147483648, %v3590_v47  ;;  %vm1958_vm7 = vweird.f32 %v3590_v47 }
 0x142   : > { %v1941_v7 = vmul.f32 %v2863_v13, %v1940_v10  ;;  %2868 = vpow2.f32 %v2693_v16  ;;  %v3605_v17 = vadd.f32 %v3516_v22, %v1847_v57  ;;  %v1290_v46 = vadd.f32 %v1280_v32, %v1116_v1 }
 0x143   : > { %v1965_v43 = vor.u32 1.1754944e-38, %v1964_v60 }
 0x144   : > { %v1942_v55 = vadd.f32 %v2863_v13, %v1941_v7  ;;  %v2694_v33 = vmul.f32 -1.442695, %v3605_v17  ;;  %v1428_v23 = vadd.f32 %v3553_v41, %v1290_v46 }
 0x146   : > { %v1946_v35 = vsel %vm1945_vm4, %v2863_v13, %v1942_v55  ;;  %2870 = vpow2.f32 %v2694_v33  ;;  %v1674_v34 = vadd.f32 %v1664_v31, %v1428_v23 }
 0x147   : > { %v2867_v37 = vpop.eup %2866  ;;  %v1951_v36 = vsel %vm1948_vm5, %v1950_v26, %v1946_v35 }
 0x148   : > { %v2869_v4 = vpop.eup %2868  ;;  %v2016_v38 = vmul.f32 %v1951_v36, %v3537_v28  ;;  %v1954_v41 = vmul.f32 %v2867_v37, %v3590_v47  ;;  %v1848_v50 = vadd.f32 %v1838_v40, %v1674_v34  ;;  %vm1959_vm6 = vweird.f32 %v2867_v37 }
 0x149   : > { %v1890_v51 = vadd.f32 1.0, %v2869_v4  ;;  %vm1960_vm8 = vmor %vm1958_vm7, %vm1959_vm6 }
 0x14a   : > { %v2791_v52 = vpack.c.bf16 %v2016_v38, %v2015_v27  ;;  %v1955_v53 = vsub.f32 1.0, %v1954_v41  ;;  %v3615_v54 = vadd.f32 %v3516_v22, %v1848_v50  ;;  %v1962_v22 = vand.u32 2147483647, %v3590_v47 }
 0x14b   : > { %2872 = vrcp.f32 %v1890_v51  ;;  %v1977_v42 = vand.u32 2147483647, %v1890_v51  ;;  %v1979_v0 = vand.u32 2147483648, %v1890_v51  ;;  %vm1973_vm11 = vweird.f32 %v1890_v51 }
 0x14c   : > { %v2871_v45 = vpop.eup %2870  ;;  %2803 = vst [vmem:[%s3573_s12 + $0x8] sm:$0xff] %v2791_v52   ;;  %v2695_v59 = vmul.f32 -1.442695, %v3615_v54  ;;  %v1956_v62 = vmul.f32 %v2867_v37, %v1955_v53  ;;  %vm1963_vm10 = vcmp.eq.f32.partialorder %v1962_v22, 8.507059e+37 }
 0x14d   : > { %v1891_v18 = vadd.f32 1.0, %v2871_v45  ;;  %v1980_v39 = vor.u32 1.1754944e-38, %v1979_v0  ;;  %vm1978_vm13 = vcmp.eq.f32.partialorder %v1977_v42, 8.507059e+37 }
 0x14e   : > { %2874 = vpow2.f32 %v2695_v59  ;;  %v1957_v28 = vadd.f32 %v2867_v37, %v1956_v62 }
 0x14f   : > { %2876 = vrcp.f32 %v1891_v18  ;;  %v1994_v10 = vand.u32 2147483648, %v1891_v18  ;;  %vm1988_vm15 = vweird.f32 %v1891_v18  ;;  %v1992_v24 = vand.u32 2147483647, %v1891_v18 }
 0x150   : > { %v1961_v3 = vsel %vm1960_vm8, %v2867_v37, %v1957_v28 }
 0x151   : > { %v2873_v49 = vpop.eup %2872  ;;  %v1966_v29 = vsel %vm1963_vm10, %v1965_v43, %v1961_v3  ;;  %vm1993_vm2 = vcmp.eq.f32.partialorder %v1992_v24, 8.507059e+37 }
 0x152   : > { %v1969_v63 = vmul.f32 %v2873_v49, %v1890_v51  ;;  %vm1974_vm9 = vweird.f32 %v2873_v49  ;;  %v2017_v11 = vmul.f32 %v1966_v29, %v3556_v48  ;;  %v1995_v48 = vor.u32 1.1754944e-38, %v1994_v10 }
 0x153   : > { %vm1975_vm12 = vmor %vm1973_vm11, %vm1974_vm9 }
 0x154   : > { %v2875_v44 = vpop.eup %2874  ;;  %v1970_v12 = vsub.f32 1.0, %v1969_v63 }
 0x155   : > { %v2877_v61 = vpop.eup %2876  ;;  %v1892_v2 = vadd.f32 1.0, %v2875_v44 }
 0x156   : > { %v1971_v6 = vmul.f32 %v2873_v49, %v1970_v12  ;;  %v1984_v56 = vmul.f32 %v2877_v61, %v1891_v18  ;;  %vm1989_vm14 = vweird.f32 %v2877_v61 }
 0x157   : > { %2878 = vrcp.f32 %v1892_v2  ;;  %vm1990_vm0 = vmor %vm1988_vm15, %vm1989_vm14  ;;  %v2009_v30 = vand.u32 2147483648, %v1892_v2  ;;  %v2007_v7 = vand.u32 2147483647, %v1892_v2  ;;  %vm2003_vm3 = vweird.f32 %v1892_v2 }
 0x158   : > { %v1972_v9 = vadd.f32 %v2873_v49, %v1971_v6  ;;  %v1985_v13 = vsub.f32 1.0, %v1984_v56 }
 0x159   : > { %v2010_v8 = vor.u32 1.1754944e-38, %v2009_v30  ;;  %vm2008_vm5 = vcmp.eq.f32.partialorder %v2007_v7, 8.507059e+37 }
 0x15a   : > { %v1976_v5 = vsel %vm1975_vm12, %v2873_v49, %v1972_v9  ;;  %v1986_v14 = vmul.f32 %v2877_v61, %v1985_v13 }
 0x15b   : > { %v1981_v15 = vsel %vm1978_vm13, %v1980_v39, %v1976_v5 }
 0x15c   : > { %v2018_v21 = vmul.f32 %v1981_v15, %v3584_v58  ;;  %v1987_v1 = vadd.f32 %v2877_v61, %v1986_v14 }
 0x15d   : > { %v2879_v47 = vpop.eup %2878 }
 0x15e   : > { %v2796_v16 = vpack.c.bf16 %v2018_v21, %v2017_v11  ;;  %v1999_v19 = vmul.f32 %v2879_v47, %v1892_v2  ;;  %v1991_v25 = vsel %vm1990_vm0, %v2877_v61, %v1987_v1  ;;  %vm2004_vm1 = vweird.f32 %v2879_v47 }
 0x15f   : > { %v1996_v46 = vsel %vm1993_vm2, %v1995_v48, %v1991_v25  ;;  %vm2005_vm4 = vmor %vm2003_vm3, %vm2004_vm1 }
 0x160   : > { %2804 = vst [vmem:[%s3573_s12 + $0x10] sm:$0xff] %v2796_v16   ;;  %v2000_v57 = vsub.f32 1.0, %v1999_v19  ;;  %v2019_v23 = vmul.f32 %v1996_v46, %v3605_v17 }
 0x162   : > { %v2001_v32 = vmul.f32 %v2879_v47, %v2000_v57 }
 0x164   : > { %v2002_v58 = vadd.f32 %v2879_v47, %v2001_v32 }
 0x166   : > { %v2006_v55 = vsel %vm2005_vm4, %v2879_v47, %v2002_v58 }
 0x167   : > { %v2011_v33 = vsel %vm2008_vm5, %v2010_v8, %v2006_v55 }
 0x168   : > { %v2020_v20 = vmul.f32 %v2011_v33, %v3615_v54 }
 0x16a   : > { %v2801_v26 = vpack.c.bf16 %v2020_v20, %v2019_v23 }
 0x16c   : > { %2805 = vst [vmem:[%s3573_s12 + $0x18] sm:$0xff] %v2801_v26  }
 0x16d PF: > { %s13_s14 = sadd.s32 1, %s2902_s14   ;;  %s3649_s12 = smov %s2898_s13 }
 0x16e   : > { %p10_p5 = scmp.ge.s32.totalorder %s13_s14, 4   ;;  %s3650_s13 = smov %s3652_s15 }
 0x170   :  { %12 = sbr.rel (!%p10_p5) target bundleno = 2 (0x2), region = 73 }

// kernel: forward.19
= control target key start
LH: loop header
LB: loop body
LE: loop exit
PB: predicated region body
PF: predicated region fallthrough
CT: control target
= control target key end

     0   :  { %v59_v0 = vmov 0.0   ;;  %vm40_vm0 = vcmask 1041409   ;;  %s85_s1 = inlined_call_operand.vmem [shape: f32[2,128], index: 1, kind: output, shape index: {}]   ;;  %s86_s0 = inlined_call_operand.vmem [shape: bf16[2,16,128], index: 0, kind: input, shape index: {}]  }
   0x1   :  { %12 = vst [vmem:[%s85_s1] sm:$0x3] %v59_v0  ;;  %v50_v1 = vld [vmem:[%s86_s0] sm:$0xff]   ;;  %v57_v2 = vld [vmem:[%s86_s0 + $0x8] sm:$0xff]  }
   0x2   :  { %v51_v3 = vunpack.c.l.bf16 %v50_v1  ;;  %v52_v4 = vunpack.c.h.bf16 %v50_v1  ;;  %v55_v5 = vunpack.c.l.bf16 %v57_v2  ;;  %v56_v6 = vunpack.c.h.bf16 %v57_v2 }
   0x4   :  { %v22_v7 = vadd.f32 %v52_v4, %v51_v3  ;;  %v29_v8 = vadd.f32 %v56_v6, %v55_v5 }
   0x6   :  { %v23_v9 = vrot.slane %v22_v7, 4  ;;  %v30_v10 = vrot.slane %v29_v8, 4 }
   0x8   :  { %v24_v11 = vadd.f32 %v23_v9, %v22_v7  ;;  %v31_v12 = vadd.f32 %v30_v10, %v29_v8  ;;  %v13_v21 = vld [vmem:[%s85_s1] sm:$0x3] }
   0xa   :  { %v25_v13 = vrot.slane %v24_v11, 2  ;;  %v32_v14 = vrot.slane %v31_v12, 2 }
   0xc   :  { %v26_v15 = vadd.f32 %v25_v13, %v24_v11  ;;  %v33_v16 = vadd.f32 %v32_v14, %v31_v12 }
   0xe   :  { %v27_v17 = vrot.slane %v26_v15, 1  ;;  %v34_v18 = vrot.slane %v33_v16, 1 }
  0x10   :  { %v28_v19 = vadd.f32 %v27_v17, %v26_v15  ;;  %v35_v20 = vadd.f32 %v34_v18, %v33_v16 }
  0x12   :  { %v36_v22 = vmul.f32 0.0625, %v28_v19  ;;  %v37_v23 = vmul.f32 0.0625, %v35_v20 }
  0x14   :  { %v41_v24 = vsel %vm40_vm0, %v37_v23, %v36_v22 }
  0x15   :  { %v43_v25 = vadd.f32 %v41_v24, %v13_v21 }
  0x17   :  { %44 = vst [vmem:[%s85_s1] sm:$0x3] %v43_v25 }

// kernel: forward.20
= control target key start
LH: loop header
LB: loop body
LE: loop exit
PB: predicated region body
PF: predicated region fallthrough
CT: control target
= control target key end

     0   :  { %s745_s15 = smov 0   ;;  %s747_s16 = smov 0   ;;  %s812_s0 = inlined_call_operand.vmem [shape: bf16[2,16,128], index: 0, kind: input, shape index: {}]   ;;  %s813_s1 = inlined_call_operand.vmem [shape: f32[2,1,128], index: 1, kind: input, shape index: {}]   ;;  %s814_s2 = inlined_call_operand.vmem [shape: bf16[128,128], index: 2, kind: input, shape index: {}]   ;;  %s815_s3 = inlined_call_operand.vmem [shape: f32[1,128], index: 3, kind: input, shape index: {}]   ;;  %s816_s4 = inlined_call_operand.vmem [shape: bf16[2,16,128], index: 4, kind: output, shape index: {}]  }
   0x1   :  { %s749_s17 = smov 0  }
   0x2 LB: > { %s40_s18 = sadd.s32 1, %s714_s16  ;;  %p612_p0 = scmp.ge.s32.totalorder %s718_s17, 1  ;;  %s718_s17 = sphi %s749_s17, %s14_s17   ;;  %s714_s16 = sphi %s747_s16, %s818_s16   ;;  %s710_s15 = sphi %s745_s15, %s817_s15  }
   0x3   : > { %p42_p1 = scmp.ge.s32.totalorder %s40_s18, 2  ;;  %p241_p2 = scmp.lt.s32.totalorder %s718_s17, 3 }
   0x5   : > { %s820_s18 = smov (%p42_p1, %s40_s18), 0  ;;  %p242_p3 = pnand %p612_p0, %p241_p2 }
   0x6   : > { %p299_p4 = scmp.lt.s32.totalorder (!%p242_p3), %s710_s15, 1 }
   0x7   : > { %245 = sbr.rel (%p242_p3) target bundleno = 183 (0xb7), region = 36 }
   0xc   : > { %v660_v0 = vld [vmem:[%s814_s2 + $0x38] sm:$0xff]  ;;  %v659_v1 = vld [vmem:[%s814_s2 + $0x30] sm:$0xff]  ;;  %s822_s15 = smov (!%p299_p4, %s710_s15), 1  ;;  %v658_v2 = vld [vmem:[%s814_s2 + $0x28] sm:$0xff] }
   0xd   : > { %425 = vmatpush.bf16.msra.mxu0 %v660_v0  ;;  %s316_s25 = scalar_lea.vmem %s813_s1, %s822_s15  ;;  %v657_v3 = vld [vmem:[%s814_s2 + $0x20] sm:$0xff]  ;;  %s651_s30 = sshll.u32 %s822_s15, 3  ;;  %v656_v4 = vld [vmem:[%s814_s2 + $0x18] sm:$0xff]  ;;  %v655_v5 = vld [vmem:[%s814_s2 + $0x10] sm:$0xff] }
   0xe   : > { %s309_s9 = scalar_lea.vmem %s812_s0, %s651_s30  ;;  %v694_v9 = vld [vmem:[%s316_s25] ss:$0 sm:$0xff]  ;;  %v654_v10 = vld [vmem:[%s814_s2 + $0x8] sm:$0xff]  ;;  %s340_s23 = scalar_lea.vmem %s816_s4, %s651_s30 }
   0xf   : > { %v662_v6 = vld [vmem:[%s309_s9] sm:$0xff]  }
  0x10   : > { %v663_v7 = vunpack.c.l.bf16 %v662_v6  ;;  %v664_v8 = vunpack.c.h.bf16 %v662_v6  ;;  %v653_v13 = vld [vmem:[%s814_s2] sm:$0xff] }
  0x11   : > { %426 = vmatpush.bf16.msra.mxu0 %v659_v1  ;;  %v695_v16 = vld [vmem:[%s815_s3] ss:$0 sm:$0xff] }
  0x12   : > { %v356_v11 = vmul.f32 %v694_v9, %v663_v7  ;;  %v357_v12 = vmul.f32 %v694_v9, %v664_v8 }
  0x14   : > { %v358_v14 = vpack.c.bf16 %v357_v12, %v356_v11 }
  0x15   : > { %427 = vmatpush.bf16.msra.mxu0 %v658_v2 }
  0x19   : > { %428 = vmatpush.bf16.msra.mxu0 %v657_v3 }
  0x1d   : > { %429 = vmatpush.bf16.msra.mxu0 %v656_v4 }
  0x21   : > { %430 = vmatpush.bf16.msra.mxu0 %v655_v5 }
  0x25   : > { %431 = vmatpush.bf16.msra.mxu0 %v654_v10 }
  0x29   : > { %432 = vmatpush.bf16.msra.mxu0 %v653_v13 }
  0x2c   : > { %433 = vmatmul.bf16.vlgmr.msra.gmra.mxu0 %v358_v14 }
  0xa9   : > { %v434_v15 = vpop.f32.mrf.mxu0 }
  0xaa   : > { %v452_v18 = vadd.f32 %v695_v16, %v434_v15 }
  0xb1   : > { %v436_v17 = vpop.f32.mrf.mxu0 }
  0xb2   : > { %v453_v19 = vadd.f32 %v695_v16, %v436_v17 }
  0xb4   : > { %v668_v20 = vpack.c.bf16 %v453_v19, %v452_v18 }
  0xb6   : > { %669 = vst [vmem:[%s340_s23] sm:$0xff] %v668_v20  }
  0xb7 PF: > { %s14_s17 = sadd.s32 1, %s718_s17   ;;  %s817_s15 = smov %s714_s16 }
  0xb8   : > { %p11_p5 = scmp.ge.s32.totalorder %s14_s17, 4   ;;  %s818_s16 = smov %s820_s18 }
  0xba   :  { %13 = sbr.rel (!%p11_p5) target bundleno = 2 (0x2), region = 83 }

// kernel: forward.18
= control target key start
LH: loop header
LB: loop body
LE: loop exit
PB: predicated region body
PF: predicated region fallthrough
CT: control target
= control target key end

     0   :  { %s2120_s12 = smov 0   ;;  %s2122_s13 = smov 0   ;;  %s2482_s0 = inlined_call_operand.vmem [shape: bf16[2,20,5,128], index: 0, kind: input, shape index: {}]   ;;  %s2483_s1 = inlined_call_operand.vmem [shape: bf16[9,128,128], index: 1, kind: input, shape index: {}]   ;;  %s2484_s2 = inlined_call_operand.vmem [shape: f32[1,128], index: 2, kind: input, shape index: {}]   ;;  %s2485_s3 = inlined_call_operand.vmem [shape: bf16[2,4,4,128], index: 3, kind: output, shape index: {}]  }
   0x1   :  { %s2124_s14 = smov 0  }
   0x2 LB: > { %s25_s15 = sadd.s32 1, %s2094_s13  ;;  %p1517_p0 = scmp.ge.s32.totalorder %s2098_s14, 1  ;;  %s2098_s14 = sphi %s2124_s14, %s13_s14   ;;  %s2094_s13 = sphi %s2122_s13, %s2493_s13   ;;  %s2090_s12 = sphi %s2120_s12, %s2492_s12  }
   0x3   : > { %p27_p1 = scmp.ge.s32.totalorder %s25_s15, 2  ;;  %p151_p2 = scmp.lt.s32.totalorder %s2098_s14, 3 }
   0x5   : > { %s2495_s15 = smov (%p27_p1, %s25_s15), 0  ;;  %p152_p3 = pnand %p1517_p0, %p151_p2 }
   0x6   : > { %p179_p4 = scmp.lt.s32.totalorder (!%p152_p3), %s2090_s12, 1 }
   0x7   : > { %155 = sbr.rel (%p152_p3) target bundleno = 292 (0x124), region = 32 }
   0xc   : > { %v1985_v0 = vld [vmem:[%s2483_s1 + $0x78] sm:$0xff]  ;;  %v1984_v3 = vld [vmem:[%s2483_s1 + $0x70] sm:$0xff]  ;;  %s2497_s12 = smov (!%p179_p4, %s2090_s12), 1  ;;  %v1983_v8 = vld [vmem:[%s2483_s1 + $0x68] sm:$0xff]  ;;  %vm403_vm0 = vcmask 1041408   ;;  %vm407_vm2 = vcmask 1043458  }
   0xd   : > { %v1993_v1 = vld [vmem:[%s2483_s1 + $0xb8] sm:$0xff]  ;;  %302 = vmatpush.bf16.msra.mxu0 %v1985_v0  ;;  %v1992_v4 = vld [vmem:[%s2483_s1 + $0xb0] sm:$0xff]  ;;  %v1991_v9 = vld [vmem:[%s2483_s1 + $0xa8] sm:$0xff]  ;;  %s2042_s17 = smul.u32 80, %s2497_s12  ;;  %vm429_vm1 = vsmask.f32 1280 }
   0xe   : > { %v1977_v2 = vld [vmem:[%s2483_s1 + $0x38] sm:$0xff]  ;;  %566 = vmatpush.bf16.msra.mxu2 %v1993_v1  ;;  %v1976_v6 = vld [vmem:[%s2483_s1 + $0x30] sm:$0xff]  ;;  %v1975_v10 = vld [vmem:[%s2483_s1 + $0x28] sm:$0xff]  ;;  %vm430_vm3 = vsmask.f32 3336  ;;  %s1969_s5 = sshll.u32 %s2497_s12, 3 }
   0xf   : > { %v2001_v5 = vld [vmem:[%s2483_s1 + $0xf8] sm:$0xff]  ;;  %377 = vmatpush.bf16.msra.mxu1 %v1977_v2  ;;  %v2000_v7 = vld [vmem:[%s2483_s1 + $0xf0] sm:$0xff]  ;;  %v1999_v11 = vld [vmem:[%s2483_s1 + $0xe8] sm:$0xff]  ;;  %s2192_s28 = scalar_lea.vmem %s2482_s0, %s2042_s17  ;;  %vm432_vm4 = vsmask.f32 5392  ;;  %s192_s8 = scalar_lea.vmem %s2485_s3, %s1969_s5 }
  0x10   : > { %667 = vmatpush.bf16.msra.mxu3 %v2001_v5  ;;  %v1982_v12 = vld [vmem:[%s2483_s1 + $0x60] sm:$0xff]  ;;  %v1981_v16 = vld [vmem:[%s2483_s1 + $0x58] sm:$0xff]  ;;  %v1521_v20 = vld [vmem:[%s2192_s28 + $0x14] sm:$0x3]  ;;  %vm434_vm5 = vsmask.f32 7448 }
  0x11   : > { %303 = vmatpush.bf16.msra.mxu0 %v1984_v3  ;;  %v1990_v13 = vld [vmem:[%s2483_s1 + $0xa0] sm:$0xff]  ;;  %v1989_v17 = vld [vmem:[%s2483_s1 + $0x98] sm:$0xff]  ;;  %242 = vst [vmem:[#allocation1] ss:$4 sm:$0xff] %v1521_v20  ;;  %v1980_v24 = vld [vmem:[%s2483_s1 + $0x50] sm:$0xff] }
  0x12   : > { %567 = vmatpush.bf16.msra.mxu2 %v1992_v4  ;;  %v1974_v14 = vld [vmem:[%s2483_s1 + $0x20] sm:$0xff]  ;;  %v1973_v18 = vld [vmem:[%s2483_s1 + $0x18] sm:$0xff]  ;;  %v1988_v25 = vld [vmem:[%s2483_s1 + $0x90] sm:$0xff] }
  0x13   : > { %378 = vmatpush.bf16.msra.mxu1 %v1976_v6  ;;  %v1998_v15 = vld [vmem:[%s2483_s1 + $0xe0] sm:$0xff]  ;;  %v1997_v19 = vld [vmem:[%s2483_s1 + $0xd8] sm:$0xff]  ;;  %v1972_v26 = vld [vmem:[%s2483_s1 + $0x10] sm:$0xff] }
  0x14   : > { %668 = vmatpush.bf16.msra.mxu3 %v2000_v7  ;;  %v1522_v21 = vld [vmem:[%s2192_s28 + $0x18] sm:$0x3]  ;;  %v1523_v22 = vld [vmem:[%s2192_s28 + $0x1c] sm:$0x3]  ;;  %v1524_v23 = vld [vmem:[%s2192_s28 + $0x20] sm:$0x3] }
  0x15   : > { %304 = vmatpush.bf16.msra.mxu0 %v1983_v8  ;;  %245 = vst [vmem:[#allocation1 + $0x1] ss:$4 sm:$0xff] %v1522_v21  ;;  %v1996_v27 = vld [vmem:[%s2483_s1 + $0xd0] sm:$0xff]  ;;  %v391_v28 = vld [vmem:[%s2192_s28] sm:$0x7]  ;;  %v1979_v35 = vld [vmem:[%s2483_s1 + $0x48] sm:$0xff] }
  0x16   : > { %568 = vmatpush.bf16.msra.mxu2 %v1991_v9  ;;  %248 = vst [vmem:[#allocation1 + $0x2] ss:$4 sm:$0xff] %v1523_v22  ;;  %v392_v29 = vld [vmem:[%s2192_s28 + $0x4] sm:$0x7]  ;;  %v393_v30 = vld [vmem:[%s2192_s28 + $0x8] sm:$0x7]  ;;  %vm2270_vm6 = vmor %vm429_vm1, %vm430_vm3 }
  0x17   : > { %379 = vmatpush.bf16.msra.mxu1 %v1975_v10  ;;  %251 = vst [vmem:[#allocation1 + $0x3] ss:$4 sm:$0xff] %v1524_v23  ;;  %v394_v31 = vld [vmem:[%s2192_s28 + $0xc] sm:$0x7]  ;;  %v399_v32 = vrot.slane %v391_v28, 2  ;;  %v400_v33 = vrot.slane %v392_v29, 2  ;;  %vm2280_vm7 = vmor %vm2270_vm6, %vm432_vm4 }
  0x18   : > { %669 = vmatpush.bf16.msra.mxu3 %v1999_v11  ;;  %v401_v34 = vrot.slane %v393_v30, 2  ;;  %v1987_v36 = vld [vmem:[%s2483_s1 + $0x88] sm:$0xff]  ;;  %v402_v37 = vrot.slane %v394_v31, 2  ;;  %v197_v41 = vld [vmem:[%s2192_s28] sm:$0x3]  ;;  %v2009_v54 = vld [vmem:[%s2483_s1 + $0x138] sm:$0xff] }
  0x19   : > { %305 = vmatpush.bf16.msra.mxu0 %v1982_v12  ;;  %v406_v38 = vsel %vm403_vm0, %v391_v28, %v399_v32  ;;  %v408_v39 = vsel %vm407_vm2, %v391_v28, %v399_v32  ;;  %v1971_v40 = vld [vmem:[%s2483_s1 + $0x8] sm:$0xff]  ;;  %v413_v43 = vsel %vm403_vm0, %v392_v29, %v400_v33  ;;  %v414_v44 = vsel %vm407_vm2, %v392_v29, %v400_v33  ;;  %v1978_v46 = vld [vmem:[%s2483_s1 + $0x40] sm:$0xff]  ;;  %v2025_v60 = vld [vmem:[%s2483_s1 + $0x1b8] sm:$0xff] }
  0x1a   : > { %569 = vmatpush.bf16.msra.mxu2 %v1990_v13  ;;  %v410_v42 = vrot.slane %v408_v39, 2  ;;  %v420_v45 = vsel %vm407_vm2, %v393_v30, %v401_v34  ;;  %v1986_v47 = vld [vmem:[%s2483_s1 + $0x80] sm:$0xff]  ;;  %v1995_v48 = vld [vmem:[%s2483_s1 + $0xc8] sm:$0xff]  ;;  %v416_v51 = vrot.slane %v414_v44, 2  ;;  %v419_v52 = vsel %vm403_vm0, %v393_v30, %v401_v34  ;;  %v2017_v61 = vld [vmem:[%s2483_s1 + $0x178] sm:$0xff] }
  0x1b   : > { %380 = vmatpush.bf16.msra.mxu1 %v1974_v14  ;;  %v198_v49 = vld [vmem:[%s2192_s28 + $0x4] sm:$0x3]  ;;  %v199_v50 = vld [vmem:[%s2192_s28 + $0x8] sm:$0x3]  ;;  %v426_v53 = vsel %vm407_vm2, %v394_v31, %v402_v37  ;;  %v200_v56 = vld [vmem:[%s2192_s28 + $0xc] sm:$0x3]  ;;  %v425_v63 = vsel %vm403_vm0, %v394_v31, %v402_v37 }
  0x1c   : > { %670 = vmatpush.bf16.msra.mxu3 %v1998_v15  ;;  %v1970_v55 = vld [vmem:[%s2483_s1] sm:$0xff]  ;;  %v422_v57 = vrot.slane %v420_v45, 2  ;;  %v436_v58 = vshrl.u32 %v406_v38, 16  ;;  %v439_v59 = vshll.u32 %v406_v38, 16  ;;  %v428_v0 = vrot.slane %v426_v53, 2  ;;  %v2008_v23 = vld [vmem:[%s2483_s1 + $0x130] sm:$0xff]  ;;  %vm2299_vm8 = vmor %vm2280_vm7, %vm434_vm5 }
  0x1d   : > { %306 = vmatpush.bf16.msra.mxu0 %v1981_v16  ;;  %v449_v2 = vshrl.u32 %v413_v43, 16  ;;  %v452_v3 = vshll.u32 %v413_v43, 16  ;;  %v445_v6 = vshll.u32 %v410_v42, 16  ;;  %v462_v7 = vshrl.u32 %v419_v52, 16  ;;  %v1994_v12 = vld [vmem:[%s2483_s1 + $0xc0] sm:$0xff]  ;;  %v2016_v28 = vld [vmem:[%s2483_s1 + $0x170] sm:$0xff] }
  0x1e   : > { %570 = vmatpush.bf16.msra.mxu2 %v1989_v17  ;;  %v252_v62 = vld.sshfl [vmem:[#allocation1] sm:$0xff pattern:$0x73625140]  ;;  %v438_v4 = vrot.slane %v436_v58, 6  ;;  %v441_v5 = vrot.slane %v439_v59, 7  ;;  %v458_v10 = vshll.u32 %v416_v51, 16 }
  0x1f   : > { %381 = vmatpush.bf16.msra.mxu1 %v1973_v18  ;;  %317 = vst [vmem:[#allocation1] ss:$4 sm:$0xff] %v197_v41  ;;  %v451_v8 = vrot.slane %v449_v2, 6  ;;  %v454_v9 = vrot.slane %v452_v3, 7  ;;  %v465_v11 = vshll.u32 %v419_v52, 16  ;;  %v464_v15 = vrot.slane %v462_v7, 6 }
  0x20   : > { %671 = vmatpush.bf16.msra.mxu3 %v1997_v19  ;;  %320 = vst [vmem:[#allocation1 + $0x1] ss:$4 sm:$0xff] %v198_v49  ;;  %v442_v14 = vor.u32 %v441_v5, %v438_v4  ;;  %v471_v16 = vshll.u32 %v422_v57, 16  ;;  %v475_v17 = vshrl.u32 %v425_v63, 16  ;;  %v2033_v18 = vld [vmem:[%s2483_s1 + $0x1f8] sm:$0xff]  ;;  %v478_v21 = vshll.u32 %v425_v63, 16 }
  0x21   : > { %307 = vmatpush.bf16.msra.mxu0 %v1980_v24  ;;  %323 = vst [vmem:[#allocation1 + $0x2] ss:$4 sm:$0xff] %v199_v50  ;;  %v455_v19 = vor.u32 %v454_v9, %v451_v8  ;;  %v467_v20 = vrot.slane %v465_v11, 7  ;;  %v484_v22 = vshll.u32 %v428_v0, 16  ;;  %v460_v31 = vrot.slane %v458_v10, 7  ;;  %v2007_v39 = vld [vmem:[%s2483_s1 + $0x128] sm:$0xff] }
  0x22   : > { %571 = vmatpush.bf16.msra.mxu2 %v1988_v25  ;;  %326 = vst [vmem:[#allocation1 + $0x3] ss:$4 sm:$0xff] %v200_v56  ;;  %v443_v24 = vrot.slane %v442_v14, 2  ;;  %v447_v25 = vrot.slane %v445_v6, 7  ;;  %v480_v33 = vrot.slane %v478_v21, 7  ;;  %v473_v34 = vrot.slane %v471_v16, 7 }
  0x23   : > { %382 = vmatpush.bf16.msra.mxu1 %v1972_v26  ;;  %v477_v26 = vrot.slane %v475_v17, 6  ;;  %v456_v30 = vrot.slane %v455_v19, 2  ;;  %v468_v32 = vor.u32 %v467_v20, %v464_v15  ;;  %v486_v38 = vrot.slane %v484_v22, 7  ;;  %v2023_v41 = vld [vmem:[%s2483_s1 + $0x1a8] sm:$0xff]  ;;  %v2006_v49 = vld [vmem:[%s2483_s1 + $0x120] sm:$0xff]  ;;  %v2021_v56 = vld [vmem:[%s2483_s1 + $0x198] sm:$0xff] }
  0x24   : > { %672 = vmatpush.bf16.msra.mxu3 %v1996_v27  ;;  %v2024_v27 = vld [vmem:[%s2483_s1 + $0x1b0] sm:$0xff]  ;;  %v2015_v42 = vld [vmem:[%s2483_s1 + $0x168] sm:$0xff]  ;;  %v2022_v50 = vld [vmem:[%s2483_s1 + $0x1a0] sm:$0xff] }
  0x25   : > { %308 = vmatpush.bf16.msra.mxu0 %v1979_v35  ;;  %v2032_v35 = vld [vmem:[%s2483_s1 + $0x1f0] sm:$0xff]  ;;  %v481_v37 = vor.u32 %v480_v33, %v477_v26  ;;  %v461_v43 = vsel %vm2299_vm8, %v456_v30, %v460_v31  ;;  %v2014_v51 = vld [vmem:[%s2483_s1 + $0x160] sm:$0xff]  ;;  %v1757_v53 = vld [vmem:[%s2192_s28 + $0x28] sm:$0x7] }
  0x26   : > { %572 = vmatpush.bf16.msra.mxu2 %v1987_v36  ;;  %v469_v36 = vrot.slane %v468_v32, 2  ;;  %v2030_v52 = vld [vmem:[%s2483_s1 + $0x1e0] sm:$0xff]  ;;  %v2013_v57 = vld [vmem:[%s2483_s1 + $0x158] sm:$0xff]  ;;  %v1759_v58 = vld [vmem:[%s2192_s28 + $0x30] sm:$0x7] }
  0x27   : > { %383 = vmatpush.bf16.msra.mxu1 %v1971_v40  ;;  %v448_v40 = vsel %vm2299_vm8, %v443_v24, %v447_v25  ;;  %v482_v44 = vrot.slane %v481_v37, 2  ;;  %v1760_v59 = vld [vmem:[%s2192_s28 + $0x34] sm:$0x7]  ;;  %v1654_v0 = vld [vmem:[%s2192_s28 + $0x2c] sm:$0x3]  ;;  %v794_v3 = vrot.slane %v1759_v58, 2 }
  0x28   : > { %673 = vmatpush.bf16.msra.mxu3 %v1995_v48  ;;  %v2031_v48 = vld [vmem:[%s2483_s1 + $0x1e8] sm:$0xff]  ;;  %v1655_v1 = vld [vmem:[%s2192_s28 + $0x30] sm:$0x3]  ;;  %v795_v7 = vrot.slane %v1760_v59, 2  ;;  %v1656_v8 = vld [vmem:[%s2192_s28 + $0x34] sm:$0x3] }
  0x29   : > { %309 = vmatpush.bf16.msra.mxu0 %v1978_v46  ;;  %v327_v45 = vld.sshfl [vmem:[#allocation1] sm:$0xff pattern:$0x73625140]  ;;  %v474_v46 = vsel %vm2299_vm8, %v469_v36, %v473_v34  ;;  %v2004_v2 = vld [vmem:[%s2483_s1 + $0x110] sm:$0xff]  ;;  %v810_v13 = vsel %vm403_vm0, %v1759_v58, %v794_v3  ;;  %v2019_v14 = vld [vmem:[%s2483_s1 + $0x188] sm:$0xff] }
  0x2a   : > { %573 = vmatpush.bf16.msra.mxu2 %v1986_v47  ;;  %v487_v47 = vsel %vm2299_vm8, %v482_v44, %v486_v38  ;;  %506 = vst [vmem:[#allocation1] ss:$4 sm:$0xff] %v448_v40  ;;  %v2020_v5 = vld [vmem:[%s2483_s1 + $0x190] sm:$0xff]  ;;  %v2011_v15 = vld [vmem:[%s2483_s1 + $0x148] sm:$0xff]  ;;  %v816_v16 = vsel %vm403_vm0, %v1760_v59, %v795_v7  ;;  %v849_v24 = vshll.u32 %v810_v13, 16  ;;  %v2002_v25 = vld [vmem:[%s2483_s1 + $0x100] sm:$0xff]  ;;  %v817_v34 = vsel %vm407_vm2, %v1760_v59, %v795_v7 }
  0x2b   : > { %384 = vmatpush.bf16.msra.mxu1 %v1970_v55  ;;  %509 = vst [vmem:[#allocation1 + $0x1] ss:$4 sm:$0xff] %v461_v43  ;;  %v1758_v55 = vld [vmem:[%s2192_s28 + $0x2c] sm:$0x7]  ;;  %v2012_v6 = vld [vmem:[%s2483_s1 + $0x150] sm:$0xff]  ;;  %v2018_v26 = vld [vmem:[%s2483_s1 + $0x180] sm:$0xff] }
  0x2c   : > { %674 = vmatpush.bf16.msra.mxu3 %v1994_v12  ;;  %310 = vmatmul.bf16.vlgmr.msra.gmra.mxu0 %v252_v62  ;;  %512 = vst [vmem:[#allocation1 + $0x2] ss:$4 sm:$0xff] %v474_v46  ;;  %v2029_v62 = vld [vmem:[%s2483_s1 + $0x1d8] sm:$0xff]  ;;  %v793_v63 = vrot.slane %v1758_v55, 2  ;;  %v2028_v10 = vld [vmem:[%s2483_s1 + $0x1d0] sm:$0xff]  ;;  %v2003_v12 = vld [vmem:[%s2483_s1 + $0x108] sm:$0xff] }
  0x2d   : > { %768 = vmatpush.bf16.msrb.mxu0 %v2009_v54  ;;  %515 = vst [vmem:[#allocation1 + $0x3] ss:$4 sm:$0xff] %v487_v47  ;;  %v2005_v54 = vld [vmem:[%s2483_s1 + $0x118] sm:$0xff]  ;;  %v862_v30 = vshll.u32 %v816_v16, 16  ;;  %v2010_v37 = vld [vmem:[%s2483_s1 + $0x140] sm:$0xff]  ;;  %v819_v47 = vrot.slane %v817_v34, 2 }
  0x2e   : > { %1051 = vmatpush.bf16.msrb.mxu2 %v2025_v60  ;;  %385 = vmatmul.bf16.vlgmr.msra.gmra.mxu1 %v327_v45  ;;  %v792_v60 = vrot.slane %v1757_v53, 2  ;;  %v804_v11 = vsel %vm403_vm0, %v1758_v55, %v793_v63  ;;  %v805_v22 = vsel %vm407_vm2, %v1758_v55, %v793_v63  ;;  %v2041_v31 = vld [vmem:[%s2483_s1 + $0x238] sm:$0xff]  ;;  %v1706_v38 = vld [vmem:[%s2192_s28 + $0x40] sm:$0x3]  ;;  %v851_v45 = vrot.slane %v849_v24, 7 }
  0x2f   : > { %950 = vmatpush.bf16.msrb.mxu1 %v2017_v61  ;;  %v1653_v61 = vld [vmem:[%s2192_s28 + $0x28] sm:$0x3]  ;;  %v833_v20 = vshrl.u32 %v804_v11, 16  ;;  %v836_v21 = vshll.u32 %v804_v11, 16  ;;  %v1705_v32 = vld [vmem:[%s2192_s28 + $0x3c] sm:$0x3] }
  0x30   : > { %1152 = vmatpush.bf16.msrb.mxu3 %v2033_v18  ;;  %v798_v9 = vsel %vm403_vm0, %v1757_v53, %v792_v60  ;;  %v799_v19 = vsel %vm407_vm2, %v1757_v53, %v792_v60  ;;  %v2027_v53 = vld [vmem:[%s2483_s1 + $0x1c8] sm:$0xff]  ;;  %v2026_v59 = vld [vmem:[%s2483_s1 + $0x1c0] sm:$0xff] }
  0x31   : > { %769 = vmatpush.bf16.msrb.mxu0 %v2008_v23  ;;  %v820_v17 = vshrl.u32 %v798_v9, 16  ;;  %v823_v18 = vshll.u32 %v798_v9, 16  ;;  %v846_v23 = vshrl.u32 %v810_v13, 16  ;;  %v801_v33 = vrot.slane %v799_v19, 2  ;;  %v1913_v11 = vld [vmem:[%s2192_s28 + $0x4] sm:$0x7] }
  0x32   : > { %1052 = vmatpush.bf16.msrb.mxu2 %v2024_v27  ;;  %v811_v27 = vsel %vm407_vm2, %v1759_v58, %v794_v3  ;;  %v835_v40 = vrot.slane %v833_v20, 6 }
  0x33   : > { %951 = vmatpush.bf16.msrb.mxu1 %v2016_v28  ;;  %v859_v28 = vshrl.u32 %v816_v16, 16  ;;  %v825_v36 = vrot.slane %v823_v18, 7  ;;  %v813_v43 = vrot.slane %v811_v27, 2  ;;  %v848_v44 = vrot.slane %v846_v23, 6  ;;  %v1916_v16 = vld [vmem:[%s2192_s28 + $0x10] sm:$0x7] }
  0x34   : > { %1153 = vmatpush.bf16.msrb.mxu3 %v2032_v35  ;;  %v516_v4 = vld.sshfl [vmem:[#allocation1] sm:$0xff pattern:$0x73625140]  ;;  %v822_v35 = vrot.slane %v820_v17, 6  ;;  %v1176_v17 = vrot.slane %v1913_v11, 2  ;;  %v1179_v20 = vrot.slane %v1916_v16, 2 }
  0x35   : > { %770 = vmatpush.bf16.msrb.mxu0 %v2007_v39  ;;  %574 = vmatmul.bf16.vlgmr.msra.gmra.mxu2 %v516_v4  ;;  %607 = vst [vmem:[#allocation1] ss:$4 sm:$0xff] %v1653_v61  ;;  %v807_v39 = vrot.slane %v805_v22, 2  ;;  %v855_v58 = vshll.u32 %v813_v43, 16  ;;  %v868_v61 = vshll.u32 %v819_v47, 16 }
  0x36   : > { %1053 = vmatpush.bf16.msrb.mxu2 %v2023_v41  ;;  %610 = vst [vmem:[#allocation1 + $0x1] ss:$4 sm:$0xff] %v1654_v0  ;;  %v838_v41 = vrot.slane %v836_v21, 7  ;;  %v1182_v21 = vsel %vm403_vm0, %v1913_v11, %v1176_v17  ;;  %v1183_v22 = vsel %vm407_vm2, %v1913_v11, %v1176_v17 }
  0x37   : > { %952 = vmatpush.bf16.msrb.mxu1 %v2015_v42  ;;  %613 = vst [vmem:[#allocation1 + $0x2] ss:$4 sm:$0xff] %v1655_v1  ;;  %v1707_v42 = vld [vmem:[%s2192_s28 + $0x44] sm:$0x3]  ;;  %v842_v55 = vshll.u32 %v807_v39, 16  ;;  %v857_v4 = vrot.slane %v855_v58, 7 }
  0x38   : > { %1154 = vmatpush.bf16.msrb.mxu3 %v2031_v48  ;;  %616 = vst [vmem:[#allocation1 + $0x3] ss:$4 sm:$0xff] %v1656_v8  ;;  %v861_v48 = vrot.slane %v859_v28, 6  ;;  %v1204_v34 = vshrl.u32 %v1182_v21, 16 }
  0x39   : > { %771 = vmatpush.bf16.msrb.mxu0 %v2006_v49  ;;  %v864_v49 = vrot.slane %v862_v30, 7  ;;  %v844_v1 = vrot.slane %v842_v55, 7  ;;  %v2035_v55 = vld [vmem:[%s2483_s1 + $0x208] sm:$0xff] }
  0x3a   : > { %1054 = vmatpush.bf16.msrb.mxu2 %v2022_v50  ;;  %v1708_v50 = vld [vmem:[%s2192_s28 + $0x48] sm:$0x3] }
  0x3b   : > { %953 = vmatpush.bf16.msrb.mxu1 %v2014_v51  ;;  %v826_v51 = vor.u32 %v825_v36, %v822_v35  ;;  %v865_v60 = vor.u32 %v864_v49, %v861_v48  ;;  %v1809_v35 = vld [vmem:[%s2192_s28 + $0x4] sm:$0x3] }
  0x3c   : > { %1155 = vmatpush.bf16.msrb.mxu3 %v2030_v52  ;;  %v829_v52 = vshll.u32 %v801_v33, 16  ;;  %v1201_v33 = vsel %vm407_vm2, %v1916_v16, %v1179_v20 }
  0x3d   : > { %772 = vmatpush.bf16.msrb.mxu0 %v2005_v54  ;;  %v839_v54 = vor.u32 %v838_v41, %v835_v40  ;;  %v1203_v36 = vrot.slane %v1201_v33, 2  ;;  %v2036_v40 = vld [vmem:[%s2483_s1 + $0x210] sm:$0xff]  ;;  %v1810_v41 = vld [vmem:[%s2192_s28 + $0x8] sm:$0x3] }
  0x3e   : > { %1055 = vmatpush.bf16.msrb.mxu2 %v2021_v56  ;;  %v2040_v56 = vld [vmem:[%s2483_s1 + $0x230] sm:$0xff]  ;;  %v831_v63 = vrot.slane %v829_v52, 7 }
  0x3f   : > { %954 = vmatpush.bf16.msrb.mxu1 %v2013_v57  ;;  %v617_v46 = vld.sshfl [vmem:[#allocation1] sm:$0xff pattern:$0x73625140]  ;;  %v852_v57 = vor.u32 %v851_v45, %v848_v44  ;;  %v840_v0 = vrot.slane %v839_v54, 2 }
  0x40   : > { %1156 = vmatpush.bf16.msrb.mxu3 %v2029_v62  ;;  %708 = vst [vmem:[#allocation1] ss:$4 sm:$0xff] %v1705_v32  ;;  %v827_v62 = vrot.slane %v826_v51, 2  ;;  %v1200_v32 = vsel %vm403_vm0, %v1916_v16, %v1179_v20  ;;  %v1862_v16 = vld [vmem:[%s2192_s28 + $0x1c] sm:$0x3] }
  0x41   : > { %773 = vmatpush.bf16.msrb.mxu0 %v2004_v2  ;;  %675 = vmatmul.bf16.vlgmr.msra.gmra.mxu3 %v617_v46  ;;  %711 = vst [vmem:[#allocation1 + $0x1] ss:$4 sm:$0xff] %v1706_v38  ;;  %v2039_v2 = vld [vmem:[%s2483_s1 + $0x228] sm:$0xff]  ;;  %v853_v3 = vrot.slane %v852_v57, 2  ;;  %v845_v8 = vsel %vm2299_vm8, %v840_v0, %v844_v1  ;;  %v1252_v0 = vshll.u32 %v1203_v36, 16 }
  0x42   : > { %1056 = vmatpush.bf16.msrb.mxu2 %v2020_v5  ;;  %714 = vst [vmem:[#allocation1 + $0x2] ss:$4 sm:$0xff] %v1707_v42  ;;  %v866_v5 = vrot.slane %v865_v60, 2  ;;  %v832_v7 = vsel %vm2299_vm8, %v827_v62, %v831_v63  ;;  %v1206_v42 = vrot.slane %v1204_v34, 6  ;;  %v1811_v46 = vld [vmem:[%s2192_s28 + $0xc] sm:$0x3] }
  0x43   : > { %955 = vmatpush.bf16.msrb.mxu1 %v2012_v6  ;;  %717 = vst [vmem:[#allocation1 + $0x3] ss:$4 sm:$0xff] %v1708_v50  ;;  %v870_v6 = vrot.slane %v868_v61, 7  ;;  %v1812_v50 = vld [vmem:[%s2192_s28 + $0x10] sm:$0x3]  ;;  %v1246_v60 = vshll.u32 %v1200_v32, 16 }
  0x44   : > { %1157 = vmatpush.bf16.msrb.mxu3 %v2028_v10  ;;  %v858_v10 = vsel %vm2299_vm8, %v853_v3, %v857_v4 }
  0x45   : > { %774 = vmatpush.bf16.msrb.mxu0 %v2003_v12  ;;  %v2038_v12 = vld [vmem:[%s2483_s1 + $0x220] sm:$0xff]  ;;  %v871_v13 = vsel %vm2299_vm8, %v866_v5, %v870_v6  ;;  %v1248_v4 = vrot.slane %v1246_v60, 7 }
  0x46   : > { %1057 = vmatpush.bf16.msrb.mxu2 %v2019_v14  ;;  %v1914_v14 = vld [vmem:[%s2192_s28 + $0x8] sm:$0x7] }
  0x47   : > { %956 = vmatpush.bf16.msrb.mxu1 %v2011_v15  ;;  %v1915_v15 = vld [vmem:[%s2192_s28 + $0xc] sm:$0x7]  ;;  %v1177_v18 = vrot.slane %v1914_v14, 2 }
  0x48   : > { %1158 = vmatpush.bf16.msrb.mxu3 %v2027_v53  ;;  %v1178_v19 = vrot.slane %v1915_v15, 2 }
  0x49   : > { %775 = vmatpush.bf16.msrb.mxu0 %v2002_v25  ;;  %v1188_v23 = vsel %vm403_vm0, %v1914_v14, %v1177_v18  ;;  %v1189_v24 = vsel %vm407_vm2, %v1914_v14, %v1177_v18  ;;  %v2037_v25 = vld [vmem:[%s2483_s1 + $0x218] sm:$0xff]  ;;  %v1863_v18 = vld [vmem:[%s2192_s28 + $0x20] sm:$0x3] }
  0x4a   : > { %1058 = vmatpush.bf16.msrb.mxu2 %v2018_v26  ;;  %v718_v9 = vld.sshfl [vmem:[#allocation1] sm:$0xff pattern:$0x73625140]  ;;  %v1185_v26 = vrot.slane %v1183_v22, 2  ;;  %v1191_v27 = vrot.slane %v1189_v24, 2  ;;  %v1194_v28 = vsel %vm403_vm0, %v1915_v15, %v1178_v19  ;;  %v1195_v30 = vsel %vm407_vm2, %v1915_v15, %v1178_v19 }
  0x4b   : > { %957 = vmatpush.bf16.msrb.mxu1 %v2010_v37  ;;  %890 = vst [vmem:[#allocation1] ss:$4 sm:$0xff] %v832_v7  ;;  %v1207_v37 = vshll.u32 %v1182_v21, 16  ;;  %v1217_v39 = vshrl.u32 %v1188_v23, 16  ;;  %v1220_v43 = vshll.u32 %v1188_v23, 16  ;;  %v1230_v45 = vshrl.u32 %v1194_v28, 16 }
  0x4c   : > { %1159 = vmatpush.bf16.msrb.mxu3 %v2026_v59  ;;  %776 = vmatmul.bf16.vlgmr.msrb.gmra.mxu0 %v718_v9  ;;  %893 = vst [vmem:[#allocation1 + $0x1] ss:$4 sm:$0xff] %v845_v8  ;;  %v1213_v38 = vshll.u32 %v1185_v26, 16  ;;  %v1226_v44 = vshll.u32 %v1191_v27, 16  ;;  %v1233_v49 = vshll.u32 %v1194_v28, 16  ;;  %v1243_v59 = vshrl.u32 %v1200_v32, 16 }
  0x4d   : > { %1334 = vmatpush.bf16.msra.mxu0 %v2041_v31  ;;  %896 = vst [vmem:[#allocation1 + $0x2] ss:$4 sm:$0xff] %v858_v10  ;;  %v1197_v31 = vrot.slane %v1195_v30, 2  ;;  %v1209_v47 = vrot.slane %v1207_v37, 7  ;;  %v1219_v48 = vrot.slane %v1217_v39, 6  ;;  %v1222_v52 = vrot.slane %v1220_v43, 7 }
  0x4e   : > { %899 = vst [vmem:[#allocation1 + $0x3] ss:$4 sm:$0xff] %v871_v13  ;;  %v1215_v51 = vrot.slane %v1213_v38, 7  ;;  %v1232_v53 = vrot.slane %v1230_v45, 6  ;;  %v1235_v58 = vrot.slane %v1233_v49, 7  ;;  %v1228_v62 = vrot.slane %v1226_v44, 7 }
  0x4f   : > { %v1239_v54 = vshll.u32 %v1197_v31, 16  ;;  %v1210_v57 = vor.u32 %v1209_v47, %v1206_v42  ;;  %v1223_v61 = vor.u32 %v1222_v52, %v1219_v48  ;;  %v1245_v3 = vrot.slane %v1243_v59, 6  ;;  %v2034_v10 = vld [vmem:[%s2483_s1 + $0x200] sm:$0xff]  ;;  %v1861_v15 = vld [vmem:[%s2192_s28 + $0x18] sm:$0x3] }
  0x50   : > { %v1254_v9 = vrot.slane %v1252_v0, 7  ;;  %v1864_v19 = vld [vmem:[%s2192_s28 + $0x24] sm:$0x3] }
  0x51   : > { %1335 = vmatpush.bf16.msra.mxu0 %v2040_v56  ;;  %v1241_v63 = vrot.slane %v1239_v54, 7  ;;  %v1211_v1 = vrot.slane %v1210_v57, 2  ;;  %v1224_v5 = vrot.slane %v1223_v61, 2  ;;  %v1249_v8 = vor.u32 %v1248_v4, %v1245_v3 }
  0x53   : > { %v1216_v6 = vsel %vm2299_vm8, %v1211_v1, %v1215_v51  ;;  %v1229_v11 = vsel %vm2299_vm8, %v1224_v5, %v1228_v62  ;;  %v1250_v13 = vrot.slane %v1249_v8, 2 }
  0x55   : > { %1336 = vmatpush.bf16.msra.mxu0 %v2039_v2  ;;  %v900_v56 = vld.sshfl [vmem:[#allocation1] sm:$0xff pattern:$0x73625140]  ;;  %v1236_v2 = vor.u32 %v1235_v58, %v1232_v53  ;;  %v1255_v14 = vsel %vm2299_vm8, %v1250_v13, %v1254_v9 }
  0x56   : > { %991 = vst [vmem:[#allocation1] ss:$4 sm:$0xff] %v1809_v35  ;;  %958 = vmatmul.bf16.vlgmr.msrb.gmra.mxu1 %v900_v56 }
  0x57   : > { %994 = vst [vmem:[#allocation1 + $0x1] ss:$4 sm:$0xff] %v1810_v41  ;;  %v1237_v7 = vrot.slane %v1236_v2, 2 }
  0x58   : > { %997 = vst [vmem:[#allocation1 + $0x2] ss:$4 sm:$0xff] %v1811_v46  ;;  %v2067_v46 = vld [vmem:[%s2484_s2] ss:$0 sm:$0xff] }
  0x59   : > { %1337 = vmatpush.bf16.msra.mxu0 %v2038_v12  ;;  %1000 = vst [vmem:[#allocation1 + $0x3] ss:$4 sm:$0xff] %v1812_v50  ;;  %v1242_v12 = vsel %vm2299_vm8, %v1237_v7, %v1241_v63 }
  0x5d   : > { %1338 = vmatpush.bf16.msra.mxu0 %v2037_v25 }
  0x60   : > { %v1001_v17 = vld.sshfl [vmem:[#allocation1] sm:$0xff pattern:$0x73625140] }
  0x61   : > { %1339 = vmatpush.bf16.msra.mxu0 %v2036_v40  ;;  %1059 = vmatmul.bf16.vlgmr.msrb.gmra.mxu2 %v1001_v17  ;;  %1092 = vst [vmem:[#allocation1] ss:$4 sm:$0xff] %v1861_v15 }
  0x62   : > { %1095 = vst [vmem:[#allocation1 + $0x1] ss:$4 sm:$0xff] %v1862_v16 }
  0x63   : > { %1098 = vst [vmem:[#allocation1 + $0x2] ss:$4 sm:$0xff] %v1863_v18 }
  0x64   : > { %1101 = vst [vmem:[#allocation1 + $0x3] ss:$4 sm:$0xff] %v1864_v19 }
  0x65   : > { %1340 = vmatpush.bf16.msra.mxu0 %v2035_v55 }
  0x69   : > { %1341 = vmatpush.bf16.msra.mxu0 %v2034_v10 }
  0x6b   : > { %v1102_v20 = vld.sshfl [vmem:[#allocation1] sm:$0xff pattern:$0x73625140] }
  0x6c   : > { %1160 = vmatmul.bf16.vlgmr.msrb.gmra.mxu3 %v1102_v20  ;;  %1274 = vst [vmem:[#allocation1] ss:$4 sm:$0xff] %v1216_v6 }
  0x6d   : > { %1277 = vst [vmem:[#allocation1 + $0x1] ss:$4 sm:$0xff] %v1229_v11 }
  0x6e   : > { %1280 = vst [vmem:[#allocation1 + $0x2] ss:$4 sm:$0xff] %v1242_v12 }
  0x6f   : > { %1283 = vst [vmem:[#allocation1 + $0x3] ss:$4 sm:$0xff] %v1255_v14 }
  0x76   : > { %v1284_v21 = vld.sshfl [vmem:[#allocation1] sm:$0xff pattern:$0x73625140] }
  0x77   : > { %1342 = vmatmul.bf16.vlgmr.msra.gmra.mxu0 %v1284_v21 }
  0xa9   : > { %v311_v29 = vpop.f32.mrf.mxu0 }
  0xab   : > { %v386_v22 = vpop.f32.mrf.mxu1 }
  0xac   : > { %v387_v25 = vadd.f32 %v386_v22, %v311_v29 }
  0xb1   : > { %v313_v24 = vpop.f32.mrf.mxu0 }
  0xb3   : > { %v388_v27 = vpop.f32.mrf.mxu1 }
  0xb4   : > { %v389_v34 = vadd.f32 %v388_v27, %v313_v24 }
  0xb8   : > { %v575_v23 = vpop.f32.mrf.mxu2 }
  0xb9   : > { %v580_v28 = vadd.f32 %v575_v23, %v387_v25 }
  0xc0   : > { %v577_v30 = vpop.f32.mrf.mxu2 }
  0xc1   : > { %v581_v39 = vadd.f32 %v577_v30, %v389_v34 }
  0xc4   : > { %v676_v26 = vpop.f32.mrf.mxu3 }
  0xc5   : > { %v681_v32 = vadd.f32 %v676_v26, %v580_v28 }
  0xc9   : > { %v777_v31 = vpop.f32.mrf.mxu0 }
  0xca   : > { %v782_v35 = vadd.f32 %v777_v31, %v681_v32 }
  0xcc   : > { %v678_v33 = vpop.f32.mrf.mxu3 }
  0xcd   : > { %v682_v42 = vadd.f32 %v678_v33, %v581_v39 }
  0xd1   : > { %v779_v38 = vpop.f32.mrf.mxu0 }
  0xd2   : > { %v783_v44 = vadd.f32 %v779_v38, %v682_v42 }
  0xd3   : > { %v959_v36 = vpop.f32.mrf.mxu1 }
  0xd4   : > { %v964_v40 = vadd.f32 %v959_v36, %v782_v35 }
  0xdb   : > { %v961_v47 = vpop.f32.mrf.mxu1 }
  0xdc   : > { %v965_v51 = vadd.f32 %v961_v47, %v783_v44 }
  0xe4   : > { %v1060_v37 = vpop.f32.mrf.mxu2 }
  0xe5   : > { %v1065_v43 = vadd.f32 %v1060_v37, %v964_v40 }
  0xec   : > { %v1062_v50 = vpop.f32.mrf.mxu2 }
  0xed   : > { %v1066_v54 = vadd.f32 %v1062_v50, %v965_v51 }
  0xef   : > { %v1161_v41 = vpop.f32.mrf.mxu3 }
  0xf0   : > { %v1166_v45 = vadd.f32 %v1161_v41, %v1065_v43 }
  0xf4   : > { %v1343_v48 = vpop.f32.mrf.mxu0 }
  0xf5   : > { %v1348_v49 = vadd.f32 %v1343_v48, %v1166_v45 }
  0xf7   : > { %v1354_v52 = vadd.f32 %v2067_v46, %v1348_v49  ;;  %v1163_v53 = vpop.f32.mrf.mxu3 }
  0xf8   : > { %v1167_v56 = vadd.f32 %v1163_v53, %v1066_v54 }
  0xf9   : > { %v1965_v55 = vmul.f32 -1.442695, %v1354_v52 }
  0xfb   : > { %2068 = vpow2.f32 %v1965_v55 }
  0xfc   : > { %v1345_v57 = vpop.f32.mrf.mxu0 }
  0xfd   : > { %v1349_v58 = vadd.f32 %v1345_v57, %v1167_v56 }
  0xff   : > { %v1355_v59 = vadd.f32 %v2067_v46, %v1349_v58 }
 0x101   : > { %v2069_v60 = vpop.eup %2068  ;;  %v1966_v61 = vmul.f32 -1.442695, %v1355_v59 }
 0x102   : > { %v1362_v62 = vadd.f32 1.0, %v2069_v60 }
 0x103   : > { %2070 = vpow2.f32 %v1966_v61 }
 0x104   : > { %2072 = vrcp.f32 %v1362_v62  ;;  %v1375_v4 = vand.u32 2147483648, %v1362_v62  ;;  %v1373_v6 = vand.u32 2147483647, %v1362_v62  ;;  %vm1369_vm10 = vweird.f32 %v1362_v62 }
 0x106   : > { %v1376_v9 = vor.u32 1.1754944e-38, %v1375_v4  ;;  %vm1374_vm12 = vcmp.eq.f32.partialorder %v1373_v6, 8.507059e+37 }
 0x109   : > { %v2071_v63 = vpop.eup %2070 }
 0x10a   : > { %v2073_v0 = vpop.eup %2072  ;;  %v1363_v1 = vadd.f32 1.0, %v2071_v63 }
 0x10b   : > { %v1365_v2 = vmul.f32 %v2073_v0, %v1362_v62  ;;  %vm1370_vm9 = vweird.f32 %v2073_v0 }
 0x10c   : > { %2074 = vrcp.f32 %v1363_v1  ;;  %vm1371_vm11 = vmor %vm1369_vm10, %vm1370_vm9  ;;  %v1388_v15 = vand.u32 2147483647, %v1363_v1  ;;  %v1390_v16 = vand.u32 2147483648, %v1363_v1  ;;  %vm1384_vm14 = vweird.f32 %v1363_v1 }
 0x10d   : > { %v1366_v3 = vsub.f32 1.0, %v1365_v2 }
 0x10e   : > { %v1391_v29 = vor.u32 1.1754944e-38, %v1390_v16  ;;  %vm1389_vm0 = vcmp.eq.f32.partialorder %v1388_v15, 8.507059e+37 }
 0x10f   : > { %v1367_v5 = vmul.f32 %v2073_v0, %v1366_v3 }
 0x111   : > { %v1368_v7 = vadd.f32 %v2073_v0, %v1367_v5 }
 0x112   : > { %v2075_v8 = vpop.eup %2074 }
 0x113   : > { %v1372_v10 = vsel %vm1371_vm11, %v2073_v0, %v1368_v7  ;;  %v1380_v11 = vmul.f32 %v2075_v8, %v1363_v1  ;;  %vm1385_vm13 = vweird.f32 %v2075_v8 }
 0x114   : > { %v1377_v12 = vsel %vm1374_vm12, %v1376_v9, %v1372_v10  ;;  %vm1386_vm15 = vmor %vm1384_vm14, %vm1385_vm13 }
 0x115   : > { %v1394_v13 = vmul.f32 %v1377_v12, %v1354_v52  ;;  %v1381_v14 = vsub.f32 1.0, %v1380_v11 }
 0x117   : > { %v1398_v17 = vrot.slane %v1394_v13, 4  ;;  %v1402_v18 = vpack.c.bf16 %v1394_v13, %v1394_v13  ;;  %v1382_v19 = vmul.f32 %v2075_v8, %v1381_v14 }
 0x119   : > { %v1403_v20 = vpack.c.bf16 %v1398_v17, %v1398_v17  ;;  %1406 = vst [vmem:[%s192_s8] sm:$0x3] %v1402_v18  ;;  %v1383_v21 = vadd.f32 %v2075_v8, %v1382_v19 }
 0x11b   : > { %1407 = vst [vmem:[%s192_s8 + $0x2] sm:$0x3] %v1403_v20  ;;  %v1387_v22 = vsel %vm1386_vm15, %v2075_v8, %v1383_v21 }
 0x11c   : > { %v1392_v23 = vsel %vm1389_vm0, %v1391_v29, %v1387_v22 }
 0x11d   : > { %v1395_v24 = vmul.f32 %v1392_v23, %v1355_v59 }
 0x11f   : > { %v1399_v25 = vrot.slane %v1395_v24, 4  ;;  %v1404_v26 = vpack.c.bf16 %v1395_v24, %v1395_v24 }
 0x121   : > { %v1405_v27 = vpack.c.bf16 %v1399_v25, %v1399_v25  ;;  %1408 = vst [vmem:[%s192_s8 + $0x4] sm:$0x3] %v1404_v26 }
 0x123   : > { %1409 = vst [vmem:[%s192_s8 + $0x6] sm:$0x3] %v1405_v27 }
 0x124 PF: > { %s13_s14 = sadd.s32 1, %s2098_s14   ;;  %s2492_s12 = smov %s2094_s13 }
 0x125   : > { %p10_p5 = scmp.ge.s32.totalorder %s13_s14, 4   ;;  %s2493_s13 = smov %s2495_s15 }
 0x127   :  { %12 = sbr.rel (!%p10_p5) target bundleno = 2 (0x2), region = 103 }

// kernel: forward.23
= control target key start
LH: loop header
LB: loop body
LE: loop exit
PB: predicated region body
PF: predicated region fallthrough
CT: control target
= control target key end

     0   :  { %s858_s18 = smov 0   ;;  %s860_s19 = smov 0   ;;  %s929_s0 = inlined_call_operand.vmem [shape: bf16[2,16,128], index: 0, kind: input, shape index: {}]   ;;  %s930_s1 = inlined_call_operand.vmem [shape: f32[2,1,128], index: 1, kind: input, shape index: {}]   ;;  %s931_s2 = inlined_call_operand.vmem [shape: bf16[128,128], index: 2, kind: input, shape index: {}]   ;;  %s932_s3 = inlined_call_operand.vmem [shape: f32[1,128], index: 3, kind: input, shape index: {}]   ;;  %s933_s4 = inlined_call_operand.vmem [shape: bf16[2,16,128], index: 4, kind: input, shape index: {}]   ;;  %s934_s5 = inlined_call_operand.vmem [shape: bf16[2,16,128], index: 5, kind: output, shape index: {}]  }
   0x1   :  { %s862_s20 = smov 0  }
   0x2 LB: > { %s41_s21 = sadd.s32 1, %s822_s19  ;;  %p713_p0 = scmp.ge.s32.totalorder %s826_s20, 1  ;;  %s826_s20 = sphi %s862_s20, %s15_s20   ;;  %s822_s19 = sphi %s860_s19, %s936_s19   ;;  %s818_s18 = sphi %s858_s18, %s935_s18  }
   0x3   : > { %p43_p1 = scmp.ge.s32.totalorder %s41_s21, 2  ;;  %p288_p2 = scmp.lt.s32.totalorder %s826_s20, 3 }
   0x5   : > { %s938_s21 = smov (%p43_p1, %s41_s21), 0  ;;  %p289_p3 = pnand %p713_p0, %p288_p2 }
   0x6   : > { %p360_p4 = scmp.lt.s32.totalorder (!%p289_p3), %s818_s18, 1 }
   0x7   : > { %292 = sbr.rel (%p289_p3) target bundleno = 185 (0xb9), region = 40 }
   0xc   : > { %v764_v0 = vld [vmem:[%s931_s2 + $0x38] sm:$0xff]  ;;  %v763_v1 = vld [vmem:[%s931_s2 + $0x30] sm:$0xff]  ;;  %s940_s18 = smov (!%p360_p4, %s818_s18), 1  ;;  %v762_v2 = vld [vmem:[%s931_s2 + $0x28] sm:$0xff] }
   0xd   : > { %499 = vmatpush.bf16.msra.mxu0 %v764_v0  ;;  %s377_s28 = scalar_lea.vmem %s930_s1, %s940_s18  ;;  %v761_v3 = vld [vmem:[%s931_s2 + $0x20] sm:$0xff]  ;;  %s891_s8 = sshll.u32 %s940_s18, 3  ;;  %v760_v4 = vld [vmem:[%s931_s2 + $0x18] sm:$0xff]  ;;  %v759_v5 = vld [vmem:[%s931_s2 + $0x10] sm:$0xff] }
   0xe   : > { %s370_s13 = scalar_lea.vmem %s929_s0, %s891_s8  ;;  %v802_v9 = vld [vmem:[%s377_s28] ss:$0 sm:$0xff]  ;;  %v758_v10 = vld [vmem:[%s931_s2 + $0x8] sm:$0xff]  ;;  %s401_s25 = scalar_lea.vmem %s933_s4, %s891_s8 }
   0xf   : > { %v766_v6 = vld [vmem:[%s370_s13] sm:$0xff]   ;;  %s414_s30 = scalar_lea.vmem %s934_s5, %s891_s8 }
  0x10   : > { %v767_v7 = vunpack.c.l.bf16 %v766_v6  ;;  %v768_v8 = vunpack.c.h.bf16 %v766_v6  ;;  %v757_v13 = vld [vmem:[%s931_s2] sm:$0xff] }
  0x11   : > { %500 = vmatpush.bf16.msra.mxu0 %v763_v1  ;;  %v803_v16 = vld [vmem:[%s932_s3] ss:$0 sm:$0xff] }
  0x12   : > { %v430_v11 = vmul.f32 %v802_v9, %v767_v7  ;;  %v431_v12 = vmul.f32 %v802_v9, %v768_v8  ;;  %v770_v17 = vld [vmem:[%s401_s25] sm:$0xff]  }
  0x13   : > { %v771_v19 = vunpack.c.l.bf16 %v770_v17  ;;  %v772_v20 = vunpack.c.h.bf16 %v770_v17 }
  0x14   : > { %v432_v14 = vpack.c.bf16 %v431_v12, %v430_v11 }
  0x15   : > { %501 = vmatpush.bf16.msra.mxu0 %v762_v2 }
  0x19   : > { %502 = vmatpush.bf16.msra.mxu0 %v761_v3 }
  0x1d   : > { %503 = vmatpush.bf16.msra.mxu0 %v760_v4 }
  0x21   : > { %504 = vmatpush.bf16.msra.mxu0 %v759_v5 }
  0x25   : > { %505 = vmatpush.bf16.msra.mxu0 %v758_v10 }
  0x29   : > { %506 = vmatpush.bf16.msra.mxu0 %v757_v13 }
  0x2c   : > { %507 = vmatmul.bf16.vlgmr.msra.gmra.mxu0 %v432_v14 }
  0xa9   : > { %v508_v15 = vpop.f32.mrf.mxu0 }
  0xaa   : > { %v526_v18 = vadd.f32 %v803_v16, %v508_v15 }
  0xac   : > { %v532_v23 = vadd.f32 %v771_v19, %v526_v18 }
  0xb1   : > { %v510_v21 = vpop.f32.mrf.mxu0 }
  0xb2   : > { %v527_v22 = vadd.f32 %v803_v16, %v510_v21 }
  0xb4   : > { %v533_v24 = vadd.f32 %v772_v20, %v527_v22 }
  0xb6   : > { %v776_v25 = vpack.c.bf16 %v533_v24, %v532_v23 }
  0xb8   : > { %777 = vst [vmem:[%s414_s30] sm:$0xff] %v776_v25  }
  0xb9 PF: > { %s15_s20 = sadd.s32 1, %s826_s20   ;;  %s935_s18 = smov %s822_s19 }
  0xba   : > { %p12_p5 = scmp.ge.s32.totalorder %s15_s20, 4   ;;  %s936_s19 = smov %s938_s21 }
  0xbc   :  { %14 = sbr.rel (!%p12_p5) target bundleno = 2 (0x2), region = 90 }

// kernel: forward.24
= control target key start
LH: loop header
LB: loop body
LE: loop exit
PB: predicated region body
PF: predicated region fallthrough
CT: control target
= control target key end

     0   :  { %s723_s12 = smov 0   ;;  %s725_s13 = smov 0   ;;  %s790_s0 = inlined_call_operand.vmem [shape: bf16[2,16,128], index: 0, kind: input, shape index: {}]   ;;  %s791_s1 = inlined_call_operand.vmem [shape: bf16[128,128], index: 1, kind: input, shape index: {}]   ;;  %s792_s2 = inlined_call_operand.vmem [shape: f32[1,128], index: 2, kind: input, shape index: {}]   ;;  %s793_s3 = inlined_call_operand.vmem [shape: bf16[2,16,128], index: 3, kind: output, shape index: {}]  }
   0x1   :  { %s727_s14 = smov 0  }
   0x2 LB: > { %s39_s15 = sadd.s32 1, %s697_s13  ;;  %p585_p0 = scmp.ge.s32.totalorder %s701_s14, 1  ;;  %s701_s14 = sphi %s727_s14, %s13_s14   ;;  %s697_s13 = sphi %s725_s13, %s795_s13   ;;  %s693_s12 = sphi %s723_s12, %s794_s12  }
   0x3   : > { %p41_p1 = scmp.ge.s32.totalorder %s39_s15, 2  ;;  %p203_p2 = scmp.lt.s32.totalorder %s701_s14, 3 }
   0x5   : > { %s797_s15 = smov (%p41_p1, %s39_s15), 0  ;;  %p204_p3 = pnand %p585_p0, %p203_p2 }
   0x6   : > { %p253_p4 = scmp.lt.s32.totalorder (!%p204_p3), %s693_s12, 1 }
   0x7   : > { %207 = sbr.rel (%p204_p3) target bundleno = 213 (0xd5), region = 32 }
   0xc   : > { %v640_v0 = vld [vmem:[%s791_s1 + $0x38] sm:$0xff]  ;;  %v639_v1 = vld [vmem:[%s791_s1 + $0x30] sm:$0xff]  ;;  %v638_v2 = vld [vmem:[%s791_s1 + $0x28] sm:$0xff]  ;;  %s799_s12 = smov (!%p253_p4, %s693_s12), 1 }
   0xd   : > { %370 = vmatpush.bf16.msra.mxu0 %v640_v0  ;;  %v637_v3 = vld [vmem:[%s791_s1 + $0x20] sm:$0xff]  ;;  %v636_v4 = vld [vmem:[%s791_s1 + $0x18] sm:$0xff]  ;;  %v635_v5 = vld [vmem:[%s791_s1 + $0x10] sm:$0xff]  ;;  %s630_s30 = sshll.u32 %s799_s12, 3 }
   0xe   : > { %v634_v6 = vld [vmem:[%s791_s1 + $0x8] sm:$0xff]  ;;  %v633_v7 = vld [vmem:[%s791_s1] sm:$0xff]  ;;  %s263_s8 = scalar_lea.vmem %s790_s0, %s630_s30  ;;  %s288_s17 = scalar_lea.vmem %s793_s3, %s630_s30 }
   0xf   : > { %v632_v8 = vld [vmem:[%s263_s8] sm:$0xff] }
  0x10   : > { %v670_v9 = vld [vmem:[%s792_s2] ss:$0 sm:$0xff] }
  0x11   : > { %371 = vmatpush.bf16.msra.mxu0 %v639_v1 }
  0x15   : > { %372 = vmatpush.bf16.msra.mxu0 %v638_v2 }
  0x19   : > { %373 = vmatpush.bf16.msra.mxu0 %v637_v3 }
  0x1d   : > { %374 = vmatpush.bf16.msra.mxu0 %v636_v4 }
  0x21   : > { %375 = vmatpush.bf16.msra.mxu0 %v635_v5 }
  0x25   : > { %376 = vmatpush.bf16.msra.mxu0 %v634_v6 }
  0x29   : > { %377 = vmatpush.bf16.msra.mxu0 %v633_v7 }
  0x2c   : > { %378 = vmatmul.bf16.vlgmr.msra.gmra.mxu0 %v632_v8 }
  0xa9   : > { %v379_v10 = vpop.f32.mrf.mxu0 }
  0xaa   : > { %v397_v11 = vadd.f32 %v670_v9, %v379_v10 }
  0xac   : > { %v626_v12 = vmul.f32 -1.442695, %v397_v11 }
  0xae   : > { %671 = vpow2.f32 %v626_v12 }
  0xb1   : > { %v381_v13 = vpop.f32.mrf.mxu0 }
  0xb2   : > { %v398_v14 = vadd.f32 %v670_v9, %v381_v13 }
  0xb4   : > { %v672_v15 = vpop.eup %671  ;;  %v627_v16 = vmul.f32 -1.442695, %v398_v14 }
  0xb5   : > { %v405_v17 = vadd.f32 1.0, %v672_v15 }
  0xb6   : > { %673 = vpow2.f32 %v627_v16 }
  0xb7   : > { %675 = vrcp.f32 %v405_v17  ;;  %v418_v27 = vand.u32 2147483648, %v405_v17  ;;  %vm412_vm1 = vweird.f32 %v405_v17  ;;  %v416_v28 = vand.u32 2147483647, %v405_v17 }
  0xb9   : > { %v419_v34 = vor.u32 1.1754944e-38, %v418_v27  ;;  %vm417_vm4 = vcmp.eq.f32.partialorder %v416_v28, 8.507059e+37 }
  0xbc   : > { %v674_v18 = vpop.eup %673 }
  0xbd   : > { %v676_v19 = vpop.eup %675  ;;  %v406_v20 = vadd.f32 1.0, %v674_v18 }
  0xbe   : > { %v408_v21 = vmul.f32 %v676_v19, %v405_v17  ;;  %vm413_vm0 = vweird.f32 %v676_v19 }
  0xbf   : > { %677 = vrcp.f32 %v406_v20  ;;  %vm414_vm2 = vmor %vm412_vm1, %vm413_vm0  ;;  %v433_v30 = vand.u32 2147483648, %v406_v20  ;;  %v431_v33 = vand.u32 2147483647, %v406_v20  ;;  %vm427_vm5 = vweird.f32 %v406_v20 }
  0xc0   : > { %v409_v22 = vsub.f32 1.0, %v408_v21 }
  0xc1   : > { %v434_v37 = vor.u32 1.1754944e-38, %v433_v30  ;;  %vm432_vm7 = vcmp.eq.f32.partialorder %v431_v33, 8.507059e+37 }
  0xc2   : > { %v410_v23 = vmul.f32 %v676_v19, %v409_v22 }
  0xc4   : > { %v411_v25 = vadd.f32 %v676_v19, %v410_v23 }
  0xc5   : > { %v678_v24 = vpop.eup %677 }
  0xc6   : > { %v423_v26 = vmul.f32 %v678_v24, %v406_v20  ;;  %v415_v31 = vsel %vm414_vm2, %v676_v19, %v411_v25  ;;  %vm428_vm3 = vweird.f32 %v678_v24 }
  0xc7   : > { %v420_v36 = vsel %vm417_vm4, %v419_v34, %v415_v31  ;;  %vm429_vm6 = vmor %vm427_vm5, %vm428_vm3 }
  0xc8   : > { %v424_v29 = vsub.f32 1.0, %v423_v26  ;;  %v437_v40 = vmul.f32 %v420_v36, %v397_v11 }
  0xca   : > { %v425_v32 = vmul.f32 %v678_v24, %v424_v29 }
  0xcc   : > { %v426_v35 = vadd.f32 %v678_v24, %v425_v32 }
  0xce   : > { %v430_v38 = vsel %vm429_vm6, %v678_v24, %v426_v35 }
  0xcf   : > { %v435_v39 = vsel %vm432_vm7, %v434_v37, %v430_v38 }
  0xd0   : > { %v438_v41 = vmul.f32 %v435_v39, %v398_v14 }
  0xd2   : > { %v644_v42 = vpack.c.bf16 %v438_v41, %v437_v40 }
  0xd4   : > { %645 = vst [vmem:[%s288_s17] sm:$0xff] %v644_v42  }
  0xd5 PF: > { %s13_s14 = sadd.s32 1, %s701_s14   ;;  %s794_s12 = smov %s697_s13 }
  0xd6   : > { %p10_p5 = scmp.ge.s32.totalorder %s13_s14, 4   ;;  %s795_s13 = smov %s797_s15 }
  0xd8   :  { %12 = sbr.rel (!%p10_p5) target bundleno = 2 (0x2), region = 76 }

// kernel: forward.21
= control target key start
LH: loop header
LB: loop body
LE: loop exit
PB: predicated region body
PF: predicated region fallthrough
CT: control target
= control target key end

     0   :  { %s2282_s12 = smov 0   ;;  %s2284_s13 = smov 0   ;;  %s2697_s0 = inlined_call_operand.vmem [shape: bf16[2,6,6,128], index: 0, kind: input, shape index: {}]   ;;  %s2698_s1 = inlined_call_operand.vmem [shape: bf16[9,128,128], index: 1, kind: input, shape index: {}]   ;;  %s2699_s2 = inlined_call_operand.vmem [shape: f32[1,128], index: 2, kind: input, shape index: {}]   ;;  %s2700_s3 = inlined_call_operand.vmem [shape: bf16[2,4,4,128], index: 3, kind: output, shape index: {}]  }
   0x1   :  { %s2286_s14 = smov 0  }
   0x2 LB: > { %s25_s15 = sadd.s32 1, %s2256_s13  ;;  %p1659_p0 = scmp.ge.s32.totalorder %s2260_s14, 1  ;;  %s2260_s14 = sphi %s2286_s14, %s13_s14   ;;  %s2256_s13 = sphi %s2284_s13, %s2710_s13   ;;  %s2252_s12 = sphi %s2282_s12, %s2709_s12  }
   0x3   : > { %p27_p1 = scmp.ge.s32.totalorder %s25_s15, 2  ;;  %p151_p2 = scmp.lt.s32.totalorder %s2260_s14, 3 }
   0x5   : > { %s2712_s15 = smov (%p27_p1, %s25_s15), 0  ;;  %p152_p3 = pnand %p1659_p0, %p151_p2 }
   0x6   : > { %p179_p4 = scmp.lt.s32.totalorder (!%p152_p3), %s2252_s12, 1 }
   0x7   : > { %155 = sbr.rel (%p152_p3) target bundleno = 305 (0x131), region = 32 }
   0xc   : > { %v2147_v0 = vld [vmem:[%s2698_s1 + $0x78] sm:$0xff]  ;;  %v2146_v2 = vld [vmem:[%s2698_s1 + $0x70] sm:$0xff]  ;;  %s2714_s12 = smov (!%p179_p4, %s2252_s12), 1  ;;  %v2145_v8 = vld [vmem:[%s2698_s1 + $0x68] sm:$0xff]  ;;  %vm229_vm0 = vcmask 1041408   ;;  %vm233_vm1 = vcmask 1043458  }
   0xd   : > { %v2139_v1 = vld [vmem:[%s2698_s1 + $0x38] sm:$0xff]  ;;  %392 = vmatpush.bf16.msra.mxu0 %v2147_v0  ;;  %v2138_v3 = vld [vmem:[%s2698_s1 + $0x30] sm:$0xff]  ;;  %v2137_v9 = vld [vmem:[%s2698_s1 + $0x28] sm:$0xff]  ;;  %s2204_s9 = smul.u32 24, %s2714_s12  ;;  %vm255_vm2 = vsmask.f32 1280 }
   0xe   : > { %467 = vmatpush.bf16.msra.mxu1 %v2139_v1  ;;  %v2155_v4 = vld [vmem:[%s2698_s1 + $0xb8] sm:$0xff]  ;;  %v2154_v6 = vld [vmem:[%s2698_s1 + $0xb0] sm:$0xff]  ;;  %v2153_v10 = vld [vmem:[%s2698_s1 + $0xa8] sm:$0xff]  ;;  %vm256_vm3 = vsmask.f32 3336  ;;  %vm521_vm9 = vcmask 1040384  }
   0xf   : > { %v2163_v5 = vld [vmem:[%s2698_s1 + $0xf8] sm:$0xff]  ;;  %622 = vmatpush.bf16.msra.mxu2 %v2155_v4  ;;  %v2162_v7 = vld [vmem:[%s2698_s1 + $0xf0] sm:$0xff]  ;;  %v2161_v11 = vld [vmem:[%s2698_s1 + $0xe8] sm:$0xff]  ;;  %s2348_s24 = scalar_lea.vmem %s2697_s0, %s2204_s9  ;;  %vm258_vm4 = vsmask.f32 5392  ;;  %vm522_vm10 = vcmask 1042434  }
  0x10   : > { %723 = vmatpush.bf16.msra.mxu3 %v2163_v5  ;;  %v2144_v12 = vld [vmem:[%s2698_s1 + $0x60] sm:$0xff]  ;;  %v2143_v14 = vld [vmem:[%s2698_s1 + $0x58] sm:$0xff]  ;;  %v219_v19 = vld [vmem:[%s2348_s24 + $0x8] sm:$0x7]  ;;  %vm260_vm7 = vsmask.f32 7448 }
  0x11   : > { %393 = vmatpush.bf16.msra.mxu0 %v2146_v2  ;;  %v2136_v13 = vld [vmem:[%s2698_s1 + $0x20] sm:$0xff]  ;;  %v2135_v20 = vld [vmem:[%s2698_s1 + $0x18] sm:$0xff]  ;;  %v220_v21 = vld [vmem:[%s2348_s24 + $0xc] sm:$0x7]  ;;  %v227_v24 = vrot.slane %v219_v19, 2  ;;  %vm524_vm12 = vcmask 1044484  }
  0x12   : > { %468 = vmatpush.bf16.msra.mxu1 %v2138_v3  ;;  %v2152_v15 = vld [vmem:[%s2698_s1 + $0xa0] sm:$0xff]  ;;  %v228_v25 = vrot.slane %v220_v21, 2  ;;  %v2151_v26 = vld [vmem:[%s2698_s1 + $0x98] sm:$0xff]  ;;  %v2142_v36 = vld [vmem:[%s2698_s1 + $0x50] sm:$0xff]  ;;  %vm526_vm14 = vcmask 1046534   ;;  %s2131_s5 = sshll.u32 %s2714_s12, 3 }
  0x13   : > { %623 = vmatpush.bf16.msra.mxu2 %v2154_v6  ;;  %v2160_v16 = vld [vmem:[%s2698_s1 + $0xe0] sm:$0xff]  ;;  %v2159_v31 = vld [vmem:[%s2698_s1 + $0xd8] sm:$0xff]  ;;  %v245_v34 = vsel %vm229_vm0, %v219_v19, %v227_v24  ;;  %v246_v35 = vsel %vm233_vm1, %v219_v19, %v227_v24  ;;  %v2134_v37 = vld [vmem:[%s2698_s1 + $0x10] sm:$0xff]  ;;  %s192_s8 = scalar_lea.vmem %s2700_s3, %s2131_s5 }
  0x14   : > { %724 = vmatpush.bf16.msra.mxu3 %v2162_v7  ;;  %v217_v17 = vld [vmem:[%s2348_s24] sm:$0x7]  ;;  %v218_v18 = vld [vmem:[%s2348_s24 + $0x4] sm:$0x7]  ;;  %v248_v38 = vrot.slane %v246_v35, 2  ;;  %v251_v39 = vsel %vm229_vm0, %v220_v21, %v228_v25  ;;  %v252_v40 = vsel %vm233_vm1, %v220_v21, %v228_v25  ;;  %vm257_vm5 = vmor %vm255_vm2, %vm256_vm3  ;;  %v288_v50 = vshrl.u32 %v245_v34, 16 }
  0x15   : > { %394 = vmatpush.bf16.msra.mxu0 %v2145_v8  ;;  %v225_v22 = vrot.slane %v217_v17, 2  ;;  %v226_v23 = vrot.slane %v218_v18, 2  ;;  %v254_v42 = vrot.slane %v252_v40, 2  ;;  %v2150_v46 = vld [vmem:[%s2698_s1 + $0x90] sm:$0xff]  ;;  %vm2395_vm6 = vmor %vm257_vm5, %vm258_vm4  ;;  %v291_v55 = vshll.u32 %v245_v34, 16  ;;  %v2141_v56 = vld [vmem:[%s2698_s1 + $0x48] sm:$0xff] }
  0x16   : > { %469 = vmatpush.bf16.msra.mxu1 %v2137_v9  ;;  %v2158_v51 = vld [vmem:[%s2698_s1 + $0xd0] sm:$0xff]  ;;  %v2133_v57 = vld [vmem:[%s2698_s1 + $0x8] sm:$0xff]  ;;  %v290_v60 = vrot.slane %v288_v50, 6  ;;  %v297_v61 = vshll.u32 %v248_v38, 16  ;;  %v301_v0 = vshrl.u32 %v251_v39, 16  ;;  %v304_v1 = vshll.u32 %v251_v39, 16  ;;  %vm2411_vm8 = vmor %vm2395_vm6, %vm260_vm7 }
  0x17   : > { %624 = vmatpush.bf16.msra.mxu2 %v2153_v10  ;;  %v232_v27 = vsel %vm229_vm0, %v217_v17, %v225_v22  ;;  %v234_v28 = vsel %vm233_vm1, %v217_v17, %v225_v22  ;;  %v239_v29 = vsel %vm229_vm0, %v218_v18, %v226_v23  ;;  %v240_v30 = vsel %vm233_vm1, %v218_v18, %v226_v23  ;;  %v2149_v2 = vld [vmem:[%s2698_s1 + $0x88] sm:$0xff]  ;;  %v2179_v17 = vld [vmem:[%s2698_s1 + $0x178] sm:$0xff]  ;;  %v2148_v22 = vld [vmem:[%s2698_s1 + $0x80] sm:$0xff] }
  0x18   : > { %725 = vmatpush.bf16.msra.mxu3 %v2161_v11  ;;  %v236_v32 = vrot.slane %v234_v28, 2  ;;  %v242_v33 = vrot.slane %v240_v30, 2  ;;  %v262_v41 = vshrl.u32 %v232_v27, 16  ;;  %v265_v43 = vshll.u32 %v232_v27, 16  ;;  %v2157_v8 = vld [vmem:[%s2698_s1 + $0xc8] sm:$0xff]  ;;  %v2187_v24 = vld [vmem:[%s2698_s1 + $0x1b8] sm:$0xff]  ;;  %vm523_vm11 = vmor %vm521_vm9, %vm522_vm10 }
  0x19   : > { %395 = vmatpush.bf16.msra.mxu0 %v2144_v12  ;;  %v275_v45 = vshrl.u32 %v239_v29, 16  ;;  %v278_v48 = vshll.u32 %v239_v29, 16  ;;  %v293_v63 = vrot.slane %v291_v55, 7  ;;  %v299_v6 = vrot.slane %v297_v61, 7  ;;  %v2156_v27 = vld [vmem:[%s2698_s1 + $0xc0] sm:$0xff]  ;;  %v2170_v28 = vld [vmem:[%s2698_s1 + $0x130] sm:$0xff]  ;;  %vm2486_vm13 = vmor %vm523_vm11, %vm524_vm12 }
  0x1a   : > { %470 = vmatpush.bf16.msra.mxu1 %v2136_v13  ;;  %v271_v44 = vshll.u32 %v236_v32, 16  ;;  %v264_v47 = vrot.slane %v262_v41, 6  ;;  %v284_v49 = vshll.u32 %v242_v33, 16  ;;  %v267_v53 = vrot.slane %v265_v43, 7  ;;  %v2140_v13 = vld [vmem:[%s2698_s1 + $0x40] sm:$0xff]  ;;  %v2178_v29 = vld [vmem:[%s2698_s1 + $0x170] sm:$0xff]  ;;  %vm2510_vm15 = vmor %vm2486_vm13, %vm526_vm14 }
  0x1b   : > { %625 = vmatpush.bf16.msra.mxu2 %v2152_v15  ;;  %v277_v54 = vrot.slane %v275_v45, 6  ;;  %v280_v59 = vrot.slane %v278_v48, 7  ;;  %v310_v7 = vshll.u32 %v254_v42, 16  ;;  %v294_v10 = vor.u32 %v293_v63, %v290_v60  ;;  %v481_v32 = vld [vmem:[%s2348_s24] sm:$0x6]  ;;  %v2169_v33 = vld [vmem:[%s2698_s1 + $0x128] sm:$0xff] }
  0x1c   : > { %726 = vmatpush.bf16.msra.mxu3 %v2160_v16  ;;  %v273_v58 = vrot.slane %v271_v44, 7  ;;  %v268_v62 = vor.u32 %v267_v53, %v264_v47  ;;  %v286_v5 = vrot.slane %v284_v49, 7  ;;  %v303_v11 = vrot.slane %v301_v0, 6  ;;  %v2171_v16 = vld [vmem:[%s2698_s1 + $0x138] sm:$0xff]  ;;  %v2177_v34 = vld [vmem:[%s2698_s1 + $0x168] sm:$0xff]  ;;  %v2168_v41 = vld [vmem:[%s2698_s1 + $0x120] sm:$0xff] }
  0x1d   : > { %396 = vmatpush.bf16.msra.mxu0 %v2143_v14  ;;  %v281_v4 = vor.u32 %v280_v59, %v277_v54  ;;  %v306_v12 = vrot.slane %v304_v1, 7  ;;  %v2132_v14 = vld [vmem:[%s2698_s1] sm:$0xff]  ;;  %v295_v19 = vrot.slane %v294_v10, 2  ;;  %v312_v21 = vrot.slane %v310_v7, 7  ;;  %v484_v39 = vld [vmem:[%s2348_s24 + $0xc] sm:$0x6] }
  0x1e   : > { %471 = vmatpush.bf16.msra.mxu1 %v2135_v20  ;;  %v269_v9 = vrot.slane %v268_v62, 2  ;;  %v482_v35 = vld [vmem:[%s2348_s24 + $0x4] sm:$0x6]  ;;  %v489_v40 = vrot.slane %v481_v32, 2  ;;  %v199_v42 = vld [vmem:[%s2348_s24 + $0x8] sm:$0x3] }
  0x1f   : > { %626 = vmatpush.bf16.msra.mxu2 %v2151_v26  ;;  %v282_v15 = vrot.slane %v281_v4, 2  ;;  %v307_v20 = vor.u32 %v306_v12, %v303_v11  ;;  %v300_v25 = vsel %vm2411_vm8, %v295_v19, %v299_v6  ;;  %v198_v38 = vld [vmem:[%s2348_s24 + $0x4] sm:$0x3]  ;;  %v200_v43 = vld [vmem:[%s2348_s24 + $0xc] sm:$0x3]  ;;  %v490_v44 = vrot.slane %v482_v35, 2 }
  0x20   : > { %727 = vmatpush.bf16.msra.mxu3 %v2159_v31  ;;  %v274_v18 = vsel %vm2411_vm8, %v269_v9, %v273_v58  ;;  %338 = vst [vmem:[#allocation1 + $0x2] ss:$4 sm:$0xff] %v300_v25  ;;  %v2186_v31 = vld [vmem:[%s2698_s1 + $0x1b0] sm:$0xff]  ;;  %v2176_v47 = vld [vmem:[%s2698_s1 + $0x160] sm:$0xff]  ;;  %v492_v48 = vrot.slane %v484_v39, 2  ;;  %v2185_v49 = vld [vmem:[%s2698_s1 + $0x1a8] sm:$0xff]  ;;  %v497_v52 = vsel %vm233_vm1, %v481_v32, %v489_v40 }
  0x21   : > { %397 = vmatpush.bf16.msra.mxu0 %v2142_v36  ;;  %v287_v23 = vsel %vm2411_vm8, %v282_v15, %v286_v5  ;;  %332 = vst [vmem:[#allocation1] ss:$4 sm:$0xff] %v274_v18  ;;  %v308_v26 = vrot.slane %v307_v20, 2  ;;  %v197_v36 = vld [vmem:[%s2348_s24] sm:$0x3]  ;;  %v2195_v50 = vld [vmem:[%s2698_s1 + $0x1f8] sm:$0xff]  ;;  %v502_v53 = vsel %vm229_vm0, %v482_v35, %v490_v44  ;;  %v504_v54 = vsel %vm233_vm1, %v482_v35, %v490_v44 }
  0x22   : > { %472 = vmatpush.bf16.msra.mxu1 %v2134_v37  ;;  %335 = vst [vmem:[#allocation1 + $0x1] ss:$4 sm:$0xff] %v287_v23  ;;  %v483_v37 = vld [vmem:[%s2348_s24 + $0x8] sm:$0x6]  ;;  %v2167_v60 = vld [vmem:[%s2698_s1 + $0x118] sm:$0xff]  ;;  %v516_v62 = vsel %vm229_vm0, %v484_v39, %v492_v48  ;;  %v518_v63 = vsel %vm233_vm1, %v484_v39, %v492_v48  ;;  %v1744_v1 = vrot.slane %v497_v52, 9 }
  0x23   : > { %627 = vmatpush.bf16.msra.mxu2 %v2150_v46  ;;  %v313_v30 = vsel %vm2411_vm8, %v308_v26, %v312_v21  ;;  %v491_v46 = vrot.slane %v483_v37, 2  ;;  %v2175_v61 = vld [vmem:[%s2698_s1 + $0x158] sm:$0xff]  ;;  %v1745_v5 = vrot.slane %v502_v53, 9  ;;  %v1746_v6 = vrot.slane %v504_v54, 9  ;;  %v1852_v7 = vld [vmem:[%s2348_s24 + $0x8] sm:$0x7] }
  0x24   : > { %728 = vmatpush.bf16.msra.mxu3 %v2158_v51  ;;  %341 = vst [vmem:[#allocation1 + $0x3] ss:$4 sm:$0xff] %v313_v30  ;;  %v495_v51 = vsel %vm229_vm0, %v481_v32, %v489_v40  ;;  %v2183_v10 = vld [vmem:[%s2698_s1 + $0x198] sm:$0xff]  ;;  %v2193_v11 = vld [vmem:[%s2698_s1 + $0x1e8] sm:$0xff]  ;;  %v2166_v15 = vld [vmem:[%s2698_s1 + $0x110] sm:$0xff]  ;;  %v748_v20 = vrot.slane %v1852_v7, 2 }
  0x25   : > { %398 = vmatpush.bf16.msra.mxu0 %v2141_v56  ;;  %v2184_v56 = vld [vmem:[%s2698_s1 + $0x1a0] sm:$0xff]  ;;  %v509_v58 = vsel %vm229_vm0, %v483_v37, %v491_v46  ;;  %v511_v59 = vsel %vm233_vm1, %v483_v37, %v491_v46  ;;  %v1743_v0 = vrot.slane %v495_v51, 9  ;;  %v1853_v12 = vld [vmem:[%s2348_s24 + $0xc] sm:$0x7]  ;;  %v2174_v19 = vld [vmem:[%s2698_s1 + $0x150] sm:$0xff]  ;;  %v535_v21 = vsel %vm2510_vm15, %v1745_v5, %v1746_v6 }
  0x26   : > { %473 = vmatpush.bf16.msra.mxu1 %v2133_v57  ;;  %v2194_v57 = vld [vmem:[%s2698_s1 + $0x1f0] sm:$0xff]  ;;  %v1748_v9 = vrot.slane %v511_v59, 9  ;;  %v759_v30 = vsel %vm229_vm0, %v1852_v7, %v748_v20  ;;  %v2192_v32 = vld [vmem:[%s2698_s1 + $0x1e0] sm:$0xff]  ;;  %v1801_v55 = vld [vmem:[%s2348_s24 + $0xc] sm:$0x3] }
  0x27   : > { %628 = vmatpush.bf16.msra.mxu2 %v2149_v2  ;;  %v1851_v2 = vld [vmem:[%s2348_s24 + $0x4] sm:$0x7]  ;;  %v531_v18 = vsel %vm2510_vm15, %v1743_v0, %v1744_v1  ;;  %v788_v39 = vshrl.u32 %v759_v30, 16  ;;  %v791_v40 = vshll.u32 %v759_v30, 16  ;;  %v1802_v59 = vld [vmem:[%s2348_s24 + $0x10] sm:$0x3] }
  0x28   : > { %729 = vmatpush.bf16.msra.mxu3 %v2157_v8  ;;  %v1747_v8 = vrot.slane %v509_v58, 9  ;;  %v2164_v37 = vld [vmem:[%s2698_s1 + $0x100] sm:$0xff]  ;;  %v1905_v30 = vld [vmem:[%s2348_s24 + $0xc] sm:$0x6] }
  0x29   : > { %399 = vmatpush.bf16.msra.mxu0 %v2140_v13  ;;  %v1749_v13 = vrot.slane %v516_v62, 9  ;;  %v1799_v46 = vld [vmem:[%s2348_s24 + $0x4] sm:$0x3]  ;;  %v793_v58 = vrot.slane %v791_v40, 7 }
  0x2a   : > { %474 = vmatpush.bf16.msra.mxu1 %v2132_v14  ;;  %v1750_v14 = vrot.slane %v518_v63, 9  ;;  %v2202_v63 = vld [vmem:[%s2698_s1 + $0x230] sm:$0xff] }
  0x2b   : > { %629 = vmatpush.bf16.msra.mxu2 %v2148_v22  ;;  %v342_v45 = vld.sshfl [vmem:[#allocation1] sm:$0xff pattern:$0x73625140]  ;;  %v749_v22 = vrot.slane %v1853_v12, 2 }
  0x2c   : > { %730 = vmatpush.bf16.msra.mxu3 %v2156_v27  ;;  %400 = vmatmul.bf16.vlgmr.msra.gmra.mxu0 %v342_v45  ;;  %407 = vst [vmem:[#allocation1] ss:$4 sm:$0xff] %v197_v36  ;;  %v543_v26 = vsel %vm2510_vm15, %v1749_v13, %v1750_v14  ;;  %v2165_v27 = vld [vmem:[%s2698_s1 + $0x108] sm:$0xff]  ;;  %v2172_v45 = vld [vmem:[%s2698_s1 + $0x140] sm:$0xff] }
  0x2d   : > { %905 = vmatpush.bf16.msrb.mxu0 %v2171_v16  ;;  %410 = vst [vmem:[#allocation1 + $0x1] ss:$4 sm:$0xff] %v198_v38  ;;  %v1854_v16 = vld [vmem:[%s2348_s24 + $0x10] sm:$0x7]  ;;  %v2201_v14 = vld [vmem:[%s2698_s1 + $0x228] sm:$0xff] }
  0x2e   : > { %1055 = vmatpush.bf16.msrb.mxu1 %v2179_v17  ;;  %413 = vst [vmem:[#allocation1 + $0x2] ss:$4 sm:$0xff] %v199_v42  ;;  %v747_v17 = vrot.slane %v1851_v2, 2  ;;  %v750_v25 = vrot.slane %v1854_v16, 2  ;;  %v760_v42 = vsel %vm233_vm1, %v1852_v7, %v748_v20 }
  0x2f   : > { %1156 = vmatpush.bf16.msrb.mxu2 %v2187_v24  ;;  %416 = vst [vmem:[#allocation1 + $0x3] ss:$4 sm:$0xff] %v200_v43  ;;  %v539_v24 = vsel %vm2510_vm15, %v1747_v8, %v1748_v9  ;;  %v2181_v8 = vld [vmem:[%s2698_s1 + $0x188] sm:$0xff]  ;;  %v2191_v9 = vld [vmem:[%s2698_s1 + $0x1d8] sm:$0xff] }
  0x30   : > { %1338 = vmatpush.bf16.msrb.mxu3 %v2195_v50  ;;  %v754_v38 = vsel %vm233_vm1, %v1851_v2, %v747_v17  ;;  %v1800_v50 = vld [vmem:[%s2348_s24 + $0x8] sm:$0x3]  ;;  %v772_v52 = vsel %vm233_vm1, %v1854_v16, %v750_v25 }
  0x31   : > { %906 = vmatpush.bf16.msrb.mxu0 %v2170_v28  ;;  %v753_v28 = vsel %vm229_vm0, %v1851_v2, %v747_v17  ;;  %v756_v51 = vrot.slane %v754_v38, 2  ;;  %v774_v1 = vrot.slane %v772_v52, 2  ;;  %v931_v38 = vrot.slane %v1905_v30, 2 }
  0x32   : > { %1056 = vmatpush.bf16.msrb.mxu1 %v2178_v29  ;;  %v2173_v29 = vld [vmem:[%s2698_s1 + $0x148] sm:$0xff]  ;;  %v775_v35 = vshrl.u32 %v753_v28, 16  ;;  %v778_v36 = vshll.u32 %v753_v28, 16 }
  0x33   : > { %1157 = vmatpush.bf16.msrb.mxu2 %v2186_v31  ;;  %v2182_v31 = vld [vmem:[%s2698_s1 + $0x190] sm:$0xff]  ;;  %v784_v7 = vshll.u32 %v756_v51, 16  ;;  %v823_v17 = vshll.u32 %v774_v1, 16 }
  0x34   : > { %1339 = vmatpush.bf16.msrb.mxu3 %v2194_v57  ;;  %v777_v53 = vrot.slane %v775_v35, 6  ;;  %v780_v54 = vrot.slane %v778_v36, 7  ;;  %v790_v57 = vrot.slane %v788_v39, 6 }
  0x35   : > { %907 = vmatpush.bf16.msrb.mxu0 %v2169_v33  ;;  %v765_v33 = vsel %vm229_vm0, %v1853_v12, %v749_v22  ;;  %v786_v20 = vrot.slane %v784_v7, 7 }
  0x36   : > { %1057 = vmatpush.bf16.msrb.mxu1 %v2177_v34  ;;  %v417_v23 = vld.sshfl [vmem:[#allocation1] sm:$0xff pattern:$0x73625140]  ;;  %v771_v34 = vsel %vm229_vm0, %v1854_v16, %v750_v25  ;;  %v801_v43 = vshrl.u32 %v765_v33, 16  ;;  %v804_v44 = vshll.u32 %v765_v33, 16  ;;  %v781_v6 = vor.u32 %v780_v54, %v777_v53 }
  0x37   : > { %1158 = vmatpush.bf16.msrb.mxu2 %v2185_v49  ;;  %562 = vst [vmem:[#allocation1] ss:$4 sm:$0xff] %v531_v18  ;;  %475 = vmatmul.bf16.vlgmr.msra.gmra.mxu1 %v417_v23  ;;  %v814_v48 = vshrl.u32 %v771_v34, 16  ;;  %v817_v49 = vshll.u32 %v771_v34, 16  ;;  %v2190_v18 = vld [vmem:[%s2698_s1 + $0x1d0] sm:$0xff] }
  0x38   : > { %1340 = vmatpush.bf16.msrb.mxu3 %v2193_v11  ;;  %565 = vst [vmem:[#allocation1 + $0x1] ss:$4 sm:$0xff] %v535_v21  ;;  %v806_v62 = vrot.slane %v804_v44, 7  ;;  %v1903_v23 = vld [vmem:[%s2348_s24 + $0x4] sm:$0x6] }
  0x39   : > { %908 = vmatpush.bf16.msrb.mxu0 %v2168_v41  ;;  %568 = vst [vmem:[#allocation1 + $0x2] ss:$4 sm:$0xff] %v539_v24  ;;  %v2203_v41 = vld [vmem:[%s2698_s1 + $0x238] sm:$0xff]  ;;  %v816_v2 = vrot.slane %v814_v48, 6  ;;  %v819_v5 = vrot.slane %v817_v49, 7  ;;  %v929_v33 = vrot.slane %v1903_v23, 2  ;;  %v949_v48 = vsel %vm229_vm0, %v1905_v30, %v931_v38 }
  0x3a   : > { %1058 = vmatpush.bf16.msrb.mxu1 %v2176_v47  ;;  %571 = vst [vmem:[#allocation1 + $0x3] ss:$4 sm:$0xff] %v543_v26  ;;  %v766_v47 = vsel %vm233_vm1, %v1853_v12, %v749_v22  ;;  %v1904_v26 = vld [vmem:[%s2348_s24 + $0x8] sm:$0x6]  ;;  %v951_v49 = vsel %vm233_vm1, %v1905_v30, %v931_v38  ;;  %v1965_v38 = vld [vmem:[%s2348_s24 + $0x10] sm:$0x3] }
  0x3b   : > { %1159 = vmatpush.bf16.msrb.mxu2 %v2184_v56  ;;  %v762_v56 = vrot.slane %v760_v42, 2  ;;  %v820_v16 = vor.u32 %v819_v5, %v816_v2  ;;  %v930_v35 = vrot.slane %v1904_v26, 2  ;;  %v2199_v42 = vld [vmem:[%s2698_s1 + $0x218] sm:$0xff]  ;;  %v937_v44 = vsel %vm233_vm1, %v1903_v23, %v929_v33 }
  0x3c   : > { %1341 = vmatpush.bf16.msrb.mxu3 %v2192_v32  ;;  %v1906_v32 = vld [vmem:[%s2348_s24 + $0x10] sm:$0x6]  ;;  %v1908_v54 = vrot.slane %v937_v44, 9 }
  0x3d   : > { %909 = vmatpush.bf16.msrb.mxu0 %v2167_v60  ;;  %v768_v60 = vrot.slane %v766_v47, 2  ;;  %v797_v11 = vshll.u32 %v762_v56, 16  ;;  %v821_v28 = vrot.slane %v820_v16, 2  ;;  %v932_v40 = vrot.slane %v1906_v32, 2  ;;  %v2188_v47 = vld [vmem:[%s2698_s1 + $0x1c0] sm:$0xff] }
  0x3e   : > { %1059 = vmatpush.bf16.msrb.mxu1 %v2175_v61  ;;  %v803_v61 = vrot.slane %v801_v43, 6  ;;  %v935_v43 = vsel %vm229_vm0, %v1903_v23, %v929_v33 }
  0x3f   : > { %1160 = vmatpush.bf16.msrb.mxu2 %v2183_v10  ;;  %v794_v10 = vor.u32 %v793_v58, %v790_v57  ;;  %v810_v13 = vshll.u32 %v768_v60, 16  ;;  %v799_v22 = vrot.slane %v797_v11, 7  ;;  %v956_v51 = vsel %vm229_vm0, %v1906_v32, %v932_v40  ;;  %v2016_v58 = vld [vmem:[%s2348_s24 + $0xc] sm:$0x7] }
  0x40   : > { %v807_v12 = vor.u32 %v806_v62, %v803_v61  ;;  %1342 = vmatpush.bf16.msrb.mxu3 %v2191_v9  ;;  %v958_v52 = vsel %vm233_vm1, %v1906_v32, %v932_v40  ;;  %v1907_v53 = vrot.slane %v935_v43, 9  ;;  %v1912_v60 = vrot.slane %v951_v49, 9  ;;  %v2017_v61 = vld [vmem:[%s2348_s24 + $0x10] sm:$0x7] }
  0x41   : > { %910 = vmatpush.bf16.msrb.mxu0 %v2166_v15  ;;  %v572_v0 = vld.sshfl [vmem:[#allocation1] sm:$0xff pattern:$0x73625140]  ;;  %v795_v21 = vrot.slane %v794_v10, 2  ;;  %v812_v25 = vrot.slane %v810_v13, 7  ;;  %v1913_v62 = vrot.slane %v956_v51, 9 }
  0x42   : > { %1060 = vmatpush.bf16.msrb.mxu1 %v2174_v19  ;;  %630 = vmatmul.bf16.vlgmr.msra.gmra.mxu2 %v572_v0  ;;  %663 = vst [vmem:[#allocation1] ss:$4 sm:$0xff] %v1799_v46  ;;  %v2180_v15 = vld [vmem:[%s2698_s1 + $0x180] sm:$0xff]  ;;  %v782_v19 = vrot.slane %v781_v6, 2  ;;  %v808_v24 = vrot.slane %v807_v12, 2  ;;  %v944_v46 = vsel %vm233_vm1, %v1904_v26, %v930_v35  ;;  %v964_v2 = vsel %vm2510_vm15, %v1907_v53, %v1908_v54 }
  0x43   : > { %1161 = vmatpush.bf16.msrb.mxu2 %v2182_v31  ;;  %666 = vst [vmem:[#allocation1 + $0x1] ss:$4 sm:$0xff] %v1800_v50  ;;  %v800_v34 = vsel %vm2411_vm8, %v795_v21, %v799_v22  ;;  %v2198_v50 = vld [vmem:[%s2698_s1 + $0x210] sm:$0xff]  ;;  %v1910_v57 = vrot.slane %v944_v46, 9  ;;  %v1181_v5 = vrot.slane %v2016_v58, 2  ;;  %v1182_v7 = vrot.slane %v2017_v61, 2 }
  0x44   : > { %669 = vst [vmem:[#allocation1 + $0x2] ss:$4 sm:$0xff] %v1801_v55  ;;  %1343 = vmatpush.bf16.msrb.mxu3 %v2190_v18  ;;  %v787_v31 = vsel %vm2411_vm8, %v782_v19, %v786_v20  ;;  %v2015_v55 = vld [vmem:[%s2348_s24 + $0x8] sm:$0x7]  ;;  %v2018_v0 = vld [vmem:[%s2348_s24 + $0x14] sm:$0x7] }
  0x45   : > { %911 = vmatpush.bf16.msrb.mxu0 %v2165_v27  ;;  %672 = vst [vmem:[#allocation1 + $0x3] ss:$4 sm:$0xff] %v1802_v59  ;;  %v2200_v27 = vld [vmem:[%s2698_s1 + $0x220] sm:$0xff]  ;;  %v1911_v59 = vrot.slane %v949_v48, 9  ;;  %v1180_v1 = vrot.slane %v2015_v55, 2  ;;  %v1183_v10 = vrot.slane %v2018_v0, 2  ;;  %v1192_v13 = vsel %vm229_vm0, %v2016_v58, %v1181_v5 }
  0x46   : > { %1061 = vmatpush.bf16.msrb.mxu1 %v2173_v29  ;;  %v825_v29 = vrot.slane %v823_v17, 7  ;;  %v2197_v18 = vld [vmem:[%s2698_s1 + $0x208] sm:$0xff]  ;;  %v1221_v20 = vshrl.u32 %v1192_v13, 16  ;;  %v1224_v21 = vshll.u32 %v1192_v13, 16  ;;  %v1193_v22 = vsel %vm233_vm1, %v2016_v58, %v1181_v5  ;;  %v1966_v46 = vld [vmem:[%s2348_s24 + $0x14] sm:$0x3] }
  0x47   : > { %1162 = vmatpush.bf16.msrb.mxu2 %v2181_v8  ;;  %v972_v9 = vsel %vm2510_vm15, %v1911_v59, %v1912_v60  ;;  %v1186_v12 = vsel %vm229_vm0, %v2015_v55, %v1180_v1  ;;  %v1187_v19 = vsel %vm233_vm1, %v2015_v55, %v1180_v1  ;;  %v2067_v59 = vld [vmem:[%s2348_s24 + $0x8] sm:$0x6]  ;;  %v2069_v1 = vld [vmem:[%s2348_s24 + $0x10] sm:$0x6]  ;;  %v2070_v5 = vld [vmem:[%s2348_s24 + $0x14] sm:$0x6] }
  0x48   : > { %v826_v39 = vsel %vm2411_vm8, %v821_v28, %v825_v29  ;;  %v1208_v16 = vshrl.u32 %v1186_v12, 16  ;;  %v1211_v17 = vshll.u32 %v1186_v12, 16  ;;  %v1963_v29 = vld [vmem:[%s2348_s24 + $0x8] sm:$0x3]  ;;  %v1189_v30 = vrot.slane %v1187_v19, 2 }
  0x49   : > { %912 = vmatpush.bf16.msrb.mxu0 %v2164_v37  ;;  %v813_v37 = vsel %vm2411_vm8, %v808_v24, %v812_v25  ;;  %v2196_v25 = vld [vmem:[%s2698_s1 + $0x200] sm:$0xff]  ;;  %v1365_v13 = vrot.slane %v2070_v5, 2 }
  0x4a   : > { %1062 = vmatpush.bf16.msrb.mxu1 %v2172_v45  ;;  %v942_v45 = vsel %vm229_vm0, %v1904_v26, %v930_v35  ;;  %v1199_v26 = vsel %vm233_vm1, %v2017_v61, %v1182_v7  ;;  %v1210_v32 = vrot.slane %v1208_v16, 6  ;;  %v1213_v33 = vrot.slane %v1211_v17, 7 }
  0x4b   : > { %1163 = vmatpush.bf16.msrb.mxu2 %v2180_v15  ;;  %v1909_v56 = vrot.slane %v942_v45, 9  ;;  %v1204_v15 = vsel %vm229_vm0, %v2018_v0, %v1183_v10  ;;  %v1195_v35 = vrot.slane %v1193_v22, 2  ;;  %v1217_v48 = vshll.u32 %v1189_v30, 16 }
  0x4c   : > { %v673_v36 = vld.sshfl [vmem:[#allocation1] sm:$0xff pattern:$0x73625140]  ;;  %v1250_v28 = vshll.u32 %v1204_v15, 16  ;;  %v1389_v3 = vsel %vm229_vm0, %v2070_v5, %v1365_v13 }
  0x4d   : > { %1488 = vmatpush.bf16.msra.mxu0 %v2203_v41  ;;  %731 = vmatmul.bf16.vlgmr.msra.gmra.mxu3 %v673_v36  ;;  %845 = vst [vmem:[#allocation1] ss:$4 sm:$0xff] %v787_v31  ;;  %v2189_v41 = vld [vmem:[%s2698_s1 + $0x1c8] sm:$0xff]  ;;  %v968_v6 = vsel %vm2510_vm15, %v1909_v56, %v1910_v57  ;;  %v1205_v31 = vsel %vm233_vm1, %v2018_v0, %v1183_v10  ;;  %v1223_v36 = vrot.slane %v1221_v20, 6  ;;  %v1219_v56 = vrot.slane %v1217_v48, 7 }
  0x4e   : > { %848 = vst [vmem:[#allocation1 + $0x1] ss:$4 sm:$0xff] %v800_v34  ;;  %1344 = vmatpush.bf16.msrb.mxu3 %v2189_v41  ;;  %v1964_v34 = vld [vmem:[%s2348_s24 + $0xc] sm:$0x3]  ;;  %v1207_v43 = vrot.slane %v1205_v31, 2  ;;  %v1252_v45 = vrot.slane %v1250_v28, 7  ;;  %v1391_v20 = vsel %vm233_vm1, %v2070_v5, %v1365_v13 }
  0x4f   : > { %851 = vst [vmem:[#allocation1 + $0x2] ss:$4 sm:$0xff] %v813_v37  ;;  %v1226_v37 = vrot.slane %v1224_v21, 7  ;;  %v2078_v28 = vrot.slane %v1391_v20, 9 }
  0x50   : > { %854 = vst [vmem:[#allocation1 + $0x3] ss:$4 sm:$0xff] %v826_v39  ;;  %v1201_v39 = vrot.slane %v1199_v26, 2  ;;  %v1256_v54 = vshll.u32 %v1207_v43, 16 }
  0x51   : > { %1489 = vmatpush.bf16.msra.mxu0 %v2202_v63  ;;  %v1914_v63 = vrot.slane %v958_v52, 9  ;;  %v1227_v49 = vor.u32 %v1226_v37, %v1223_v36 }
  0x52   : > { %1345 = vmatpush.bf16.msrb.mxu3 %v2188_v47  ;;  %v1214_v47 = vor.u32 %v1213_v33, %v1210_v32  ;;  %v1243_v52 = vshll.u32 %v1201_v39, 16  ;;  %v1258_v0 = vrot.slane %v1256_v54, 7 }
  0x53   : > { %v976_v11 = vsel %vm2510_vm15, %v1913_v62, %v1914_v63  ;;  %v1228_v57 = vrot.slane %v1227_v49, 2  ;;  %v2068_v62 = vld [vmem:[%s2348_s24 + $0xc] sm:$0x6] }
  0x54   : > { %v1215_v55 = vrot.slane %v1214_v47, 2 }
  0x55   : > { %1490 = vmatpush.bf16.msra.mxu0 %v2201_v14  ;;  %v1198_v14 = vsel %vm229_vm0, %v2017_v61, %v1182_v7  ;;  %v1245_v61 = vrot.slane %v1243_v52, 7 }
  0x56   : > { %v1234_v23 = vshrl.u32 %v1198_v14, 16  ;;  %v1237_v24 = vshll.u32 %v1198_v14, 16 }
  0x57   : > { %v855_v8 = vld.sshfl [vmem:[#allocation1] sm:$0xff pattern:$0x73625140] }
  0x58   : > { %913 = vmatmul.bf16.vlgmr.msrb.gmra.mxu0 %v855_v8  ;;  %995 = vst [vmem:[#allocation1] ss:$4 sm:$0xff] %v964_v2  ;;  %v1236_v40 = vrot.slane %v1234_v23, 6  ;;  %v1239_v41 = vrot.slane %v1237_v24, 7  ;;  %v1220_v2 = vsel %vm2411_vm8, %v1215_v55, %v1219_v56  ;;  %v1363_v8 = vrot.slane %v2068_v62, 2 }
  0x59   : > { %1491 = vmatpush.bf16.msra.mxu0 %v2200_v27  ;;  %998 = vst [vmem:[#allocation1 + $0x1] ss:$4 sm:$0xff] %v968_v6  ;;  %v1247_v27 = vshrl.u32 %v1204_v15, 16  ;;  %v1362_v6 = vrot.slane %v2067_v59, 2 }
  0x5a   : > { %1001 = vst [vmem:[#allocation1 + $0x2] ss:$4 sm:$0xff] %v972_v9  ;;  %v1240_v51 = vor.u32 %v1239_v41, %v1236_v40  ;;  %v1375_v16 = vsel %vm229_vm0, %v2068_v62, %v1363_v8  ;;  %v1377_v17 = vsel %vm233_vm1, %v2068_v62, %v1363_v8 }
  0x5b   : > { %1004 = vst [vmem:[#allocation1 + $0x3] ss:$4 sm:$0xff] %v976_v11  ;;  %v1249_v44 = vrot.slane %v1247_v27, 6  ;;  %v1364_v11 = vrot.slane %v2069_v1, 2  ;;  %v1368_v14 = vsel %vm229_vm0, %v2067_v59, %v1362_v6  ;;  %v1370_v15 = vsel %vm233_vm1, %v2067_v59, %v1362_v6  ;;  %v2229_v59 = vld [vmem:[%s2699_s2] ss:$0 sm:$0xff] }
  0x5c   : > { %v1241_v60 = vrot.slane %v1240_v51, 2  ;;  %v2071_v21 = vrot.slane %v1368_v14, 9  ;;  %v2072_v22 = vrot.slane %v1370_v15, 9  ;;  %v2073_v23 = vrot.slane %v1375_v16, 9 }
  0x5d   : > { %1492 = vmatpush.bf16.msra.mxu0 %v2199_v42  ;;  %v1253_v53 = vor.u32 %v1252_v45, %v1249_v44  ;;  %v1384_v19 = vsel %vm233_vm1, %v2069_v1, %v1364_v11  ;;  %v2074_v24 = vrot.slane %v1377_v17, 9  ;;  %v2077_v27 = vrot.slane %v1389_v3, 9 }
  0x5e   : > { %v1246_v10 = vsel %vm2411_vm8, %v1241_v60, %v1245_v61  ;;  %v2076_v26 = vrot.slane %v1384_v19, 9 }
  0x5f   : > { %v1254_v63 = vrot.slane %v1253_v53, 2  ;;  %v1401_v30 = vsel %vm2510_vm15, %v2073_v23, %v2074_v24  ;;  %v1409_v33 = vsel %vm2510_vm15, %v2077_v27, %v2078_v28 }
  0x61   : > { %1493 = vmatpush.bf16.msra.mxu0 %v2198_v50  ;;  %v1230_v50 = vshll.u32 %v1195_v35, 16  ;;  %v1259_v12 = vsel %vm2411_vm8, %v1254_v63, %v1258_v0 }
  0x62   : > { %v1005_v42 = vld.sshfl [vmem:[#allocation1] sm:$0xff pattern:$0x73625140] }
  0x63   : > { %1063 = vmatmul.bf16.vlgmr.msrb.gmra.mxu1 %v1005_v42  ;;  %1096 = vst [vmem:[#allocation1] ss:$4 sm:$0xff] %v1963_v29  ;;  %v1232_v58 = vrot.slane %v1230_v50, 7  ;;  %v1397_v29 = vsel %vm2510_vm15, %v2071_v21, %v2072_v22 }
  0x64   : > { %1099 = vst [vmem:[#allocation1 + $0x1] ss:$4 sm:$0xff] %v1964_v34 }
  0x65   : > { %1494 = vmatpush.bf16.msra.mxu0 %v2197_v18  ;;  %1102 = vst [vmem:[#allocation1 + $0x2] ss:$4 sm:$0xff] %v1965_v38  ;;  %v1233_v7 = vsel %vm2411_vm8, %v1228_v57, %v1232_v58  ;;  %v1382_v18 = vsel %vm229_vm0, %v2069_v1, %v1364_v11 }
  0x66   : > { %1105 = vst [vmem:[#allocation1 + $0x3] ss:$4 sm:$0xff] %v1966_v46 }
  0x69   : > { %1495 = vmatpush.bf16.msra.mxu0 %v2196_v25  ;;  %v2075_v25 = vrot.slane %v1382_v18, 9 }
  0x6b   : > { %v1405_v32 = vsel %vm2510_vm15, %v2075_v25, %v2076_v26 }
  0x6d   : > { %v1106_v9 = vld.sshfl [vmem:[#allocation1] sm:$0xff pattern:$0x73625140] }
  0x6e   : > { %1164 = vmatmul.bf16.vlgmr.msrb.gmra.mxu2 %v1106_v9  ;;  %1278 = vst [vmem:[#allocation1] ss:$4 sm:$0xff] %v1220_v2 }
  0x6f   : > { %1281 = vst [vmem:[#allocation1 + $0x1] ss:$4 sm:$0xff] %v1233_v7 }
  0x70   : > { %1284 = vst [vmem:[#allocation1 + $0x2] ss:$4 sm:$0xff] %v1246_v10 }
  0x71   : > { %1287 = vst [vmem:[#allocation1 + $0x3] ss:$4 sm:$0xff] %v1259_v12 }
  0x78   : > { %v1288_v31 = vld.sshfl [vmem:[#allocation1] sm:$0xff pattern:$0x73625140] }
  0x79   : > { %1346 = vmatmul.bf16.vlgmr.msrb.gmra.mxu3 %v1288_v31  ;;  %1428 = vst [vmem:[#allocation1] ss:$4 sm:$0xff] %v1397_v29 }
  0x7a   : > { %1431 = vst [vmem:[#allocation1 + $0x1] ss:$4 sm:$0xff] %v1401_v30 }
  0x7b   : > { %1434 = vst [vmem:[#allocation1 + $0x2] ss:$4 sm:$0xff] %v1405_v32 }
  0x7c   : > { %1437 = vst [vmem:[#allocation1 + $0x3] ss:$4 sm:$0xff] %v1409_v33 }
  0x83   : > { %v1438_v34 = vld.sshfl [vmem:[#allocation1] sm:$0xff pattern:$0x73625140] }
  0x84   : > { %1496 = vmatmul.bf16.vlgmr.msra.gmra.mxu0 %v1438_v34 }
  0xa9   : > { %v401_v35 = vpop.f32.mrf.mxu0 }
  0xb1   : > { %v403_v38 = vpop.f32.mrf.mxu0 }
  0xb4   : > { %v476_v36 = vpop.f32.mrf.mxu1 }
  0xb5   : > { %v477_v39 = vadd.f32 %v476_v36, %v401_v35 }
  0xbc   : > { %v478_v41 = vpop.f32.mrf.mxu1 }
  0xbd   : > { %v479_v49 = vadd.f32 %v478_v41, %v403_v38 }
  0xc5   : > { %v631_v37 = vpop.f32.mrf.mxu2 }
  0xc6   : > { %v636_v42 = vadd.f32 %v631_v37, %v477_v39 }
  0xcd   : > { %v633_v43 = vpop.f32.mrf.mxu2 }
  0xce   : > { %v637_v52 = vadd.f32 %v633_v43, %v479_v49 }
  0xd0   : > { %v732_v40 = vpop.f32.mrf.mxu3 }
  0xd1   : > { %v737_v45 = vadd.f32 %v732_v40, %v636_v42 }
  0xd5   : > { %v914_v44 = vpop.f32.mrf.mxu0 }
  0xd6   : > { %v919_v47 = vadd.f32 %v914_v44, %v737_v45 }
  0xd8   : > { %v734_v46 = vpop.f32.mrf.mxu3 }
  0xd9   : > { %v738_v55 = vadd.f32 %v734_v46, %v637_v52 }
  0xdd   : > { %v916_v50 = vpop.f32.mrf.mxu0 }
  0xde   : > { %v920_v58 = vadd.f32 %v916_v50, %v738_v55 }
  0xe0   : > { %v1064_v4 = vpop.f32.mrf.mxu1 }
  0xe1   : > { %v1069_v51 = vadd.f32 %v1064_v4, %v919_v47 }
  0xe8   : > { %v1066_v57 = vpop.f32.mrf.mxu1 }
  0xe9   : > { %v1070_v62 = vadd.f32 %v1066_v57, %v920_v58 }
  0xf1   : > { %v1165_v48 = vpop.f32.mrf.mxu2 }
  0xf2   : > { %v1170_v53 = vadd.f32 %v1165_v48, %v1069_v51 }
  0xf9   : > { %v1167_v60 = vpop.f32.mrf.mxu2 }
  0xfa   : > { %v1171_v0 = vadd.f32 %v1167_v60, %v1070_v62 }
  0xfc   : > { %v1347_v54 = vpop.f32.mrf.mxu3 }
  0xfd   : > { %v1352_v56 = vadd.f32 %v1347_v54, %v1170_v53 }
 0x101   : > { %v1497_v61 = vpop.f32.mrf.mxu0 }
 0x102   : > { %v1502_v63 = vadd.f32 %v1497_v61, %v1352_v56 }
 0x104   : > { %v1508_v1 = vadd.f32 %v2229_v59, %v1502_v63  ;;  %v1349_v2 = vpop.f32.mrf.mxu3 }
 0x105   : > { %v1353_v6 = vadd.f32 %v1349_v2, %v1171_v0 }
 0x106   : > { %v2127_v5 = vmul.f32 -1.442695, %v1508_v1 }
 0x108   : > { %2230 = vpow2.f32 %v2127_v5 }
 0x109   : > { %v1499_v7 = vpop.f32.mrf.mxu0 }
 0x10a   : > { %v1503_v8 = vadd.f32 %v1499_v7, %v1353_v6 }
 0x10c   : > { %v1509_v9 = vadd.f32 %v2229_v59, %v1503_v8 }
 0x10e   : > { %v2231_v10 = vpop.eup %2230  ;;  %v2128_v11 = vmul.f32 -1.442695, %v1509_v9 }
 0x10f   : > { %v1516_v12 = vadd.f32 1.0, %v2231_v10 }
 0x110   : > { %2232 = vpow2.f32 %v2128_v11 }
 0x111   : > { %2234 = vrcp.f32 %v1516_v12  ;;  %v1529_v18 = vand.u32 2147483648, %v1516_v12  ;;  %v1527_v3 = vand.u32 2147483647, %v1516_v12  ;;  %vm1523_vm1 = vweird.f32 %v1516_v12 }
 0x113   : > { %v1530_v22 = vor.u32 1.1754944e-38, %v1529_v18  ;;  %vm1528_vm3 = vcmp.eq.f32.partialorder %v1527_v3, 8.507059e+37 }
 0x116   : > { %v2233_v13 = vpop.eup %2232 }
 0x117   : > { %v2235_v14 = vpop.eup %2234  ;;  %v1517_v15 = vadd.f32 1.0, %v2233_v13 }
 0x118   : > { %v1519_v16 = vmul.f32 %v2235_v14, %v1516_v12  ;;  %vm1524_vm0 = vweird.f32 %v2235_v14 }
 0x119   : > { %2236 = vrcp.f32 %v1517_v15  ;;  %vm1525_vm2 = vmor %vm1523_vm1, %vm1524_vm0  ;;  %v1542_v28 = vand.u32 2147483647, %v1517_v15  ;;  %v1544_v29 = vand.u32 2147483648, %v1517_v15  ;;  %vm1538_vm5 = vweird.f32 %v1517_v15 }
 0x11a   : > { %v1520_v17 = vsub.f32 1.0, %v1519_v16 }
 0x11b   : > { %v1545_v35 = vor.u32 1.1754944e-38, %v1544_v29  ;;  %vm1543_vm7 = vcmp.eq.f32.partialorder %v1542_v28, 8.507059e+37 }
 0x11c   : > { %v1521_v19 = vmul.f32 %v2235_v14, %v1520_v17 }
 0x11e   : > { %v1522_v20 = vadd.f32 %v2235_v14, %v1521_v19 }
 0x11f   : > { %v2237_v21 = vpop.eup %2236 }
 0x120   : > { %v1526_v23 = vsel %vm1525_vm2, %v2235_v14, %v1522_v20  ;;  %v1534_v24 = vmul.f32 %v2237_v21, %v1517_v15  ;;  %vm1539_vm4 = vweird.f32 %v2237_v21 }
 0x121   : > { %v1531_v25 = vsel %vm1528_vm3, %v1530_v22, %v1526_v23  ;;  %vm1540_vm6 = vmor %vm1538_vm5, %vm1539_vm4 }
 0x122   : > { %v1548_v26 = vmul.f32 %v1531_v25, %v1508_v1  ;;  %v1535_v27 = vsub.f32 1.0, %v1534_v24 }
 0x124   : > { %v1552_v30 = vrot.slane %v1548_v26, 4  ;;  %v1556_v31 = vpack.c.bf16 %v1548_v26, %v1548_v26  ;;  %v1536_v32 = vmul.f32 %v2237_v21, %v1535_v27 }
 0x126   : > { %v1557_v33 = vpack.c.bf16 %v1552_v30, %v1552_v30  ;;  %1560 = vst [vmem:[%s192_s8] sm:$0x3] %v1556_v31  ;;  %v1537_v34 = vadd.f32 %v2237_v21, %v1536_v32 }
 0x128   : > { %1561 = vst [vmem:[%s192_s8 + $0x2] sm:$0x3] %v1557_v33  ;;  %v1541_v36 = vsel %vm1540_vm6, %v2237_v21, %v1537_v34 }
 0x129   : > { %v1546_v37 = vsel %vm1543_vm7, %v1545_v35, %v1541_v36 }
 0x12a   : > { %v1549_v38 = vmul.f32 %v1546_v37, %v1509_v9 }
 0x12c   : > { %v1553_v39 = vrot.slane %v1549_v38, 4  ;;  %v1558_v40 = vpack.c.bf16 %v1549_v38, %v1549_v38 }
 0x12e   : > { %v1559_v41 = vpack.c.bf16 %v1553_v39, %v1553_v39  ;;  %1562 = vst [vmem:[%s192_s8 + $0x4] sm:$0x3] %v1558_v40 }
 0x130   : > { %1563 = vst [vmem:[%s192_s8 + $0x6] sm:$0x3] %v1559_v41 }
 0x131 PF: > { %s13_s14 = sadd.s32 1, %s2260_s14   ;;  %s2709_s12 = smov %s2256_s13 }
 0x132   : > { %p10_p5 = scmp.ge.s32.totalorder %s13_s14, 4   ;;  %s2710_s13 = smov %s2712_s15 }
 0x134   :  { %12 = sbr.rel (!%p10_p5) target bundleno = 2 (0x2), region = 100 }

// kernel: forward.25
= control target key start
LH: loop header
LB: loop body
LE: loop exit
PB: predicated region body
PF: predicated region fallthrough
CT: control target
= control target key end

     0   :  { %s774_s12 = smov 0   ;;  %s776_s13 = smov 0   ;;  %s958_s0 = inlined_call_operand.vmem [shape: bf16[2,6,6,128], index: 0, kind: input, shape index: {}]   ;;  %s959_s1 = inlined_call_operand.vmem [shape: bf16[9,1,128], index: 1, kind: input, shape index: {}]   ;;  %s960_s2 = inlined_call_operand.vmem [shape: f32[1,1,128], index: 2, kind: input, shape index: {}]   ;;  %s961_s3 = inlined_call_operand.vmem [shape: bf16[2,4,4,128], index: 3, kind: output, shape index: {}]  }
   0x1   :  { %s778_s14 = smov 0  }
   0x2 LB: > { %s25_s15 = sadd.s32 1, %s748_s13  ;;  %p645_p0 = scmp.ge.s32.totalorder %s752_s14, 1  ;;  %s752_s14 = sphi %s778_s14, %s13_s14   ;;  %s748_s13 = sphi %s776_s13, %s971_s13   ;;  %s744_s12 = sphi %s774_s12, %s970_s12  }
   0x3   : > { %p27_p1 = scmp.ge.s32.totalorder %s25_s15, 2  ;;  %p151_p2 = scmp.lt.s32.totalorder %s752_s14, 3 }
   0x5   : > { %s973_s15 = smov (%p27_p1, %s25_s15), 0  ;;  %p152_p3 = pnand %p645_p0, %p151_p2 }
   0x6   : > { %p179_p4 = scmp.lt.s32.totalorder (!%p152_p3), %s744_s12, 1 }
   0x7   : > { %155 = sbr.rel (%p152_p3) target bundleno = 93 (0x5d), region = 32 }
   0xc   : > { %v201_v0 = vld [vmem:[%s959_s1] sm:$0x1]  ;;  %v649_v1 = vld [vmem:[%s959_s1 + $0x1] sm:$0x1]  ;;  %v650_v4 = vld [vmem:[%s959_s1 + $0x2] sm:$0x1] }
   0xd   : > { %v206_v2 = vunpack.c.l.bf16 %v201_v0  ;;  %v226_v3 = vunpack.c.l.bf16 %v649_v1  ;;  %v655_v5 = vld [vmem:[%s959_s1 + $0x3] sm:$0x1]  ;;  %v660_v6 = vld [vmem:[%s959_s1 + $0x4] sm:$0x1]  ;;  %s975_s12 = smov (!%p179_p4, %s744_s12), 1  ;;  %v258_v7 = vunpack.c.l.bf16 %v650_v4 }
   0xe   : > { %v293_v8 = vunpack.c.l.bf16 %v655_v5  ;;  %v313_v9 = vunpack.c.l.bf16 %v660_v6  ;;  %v665_v10 = vld [vmem:[%s959_s1 + $0x5] sm:$0x1]  ;;  %v670_v11 = vld [vmem:[%s959_s1 + $0x6] sm:$0x1]  ;;  %v675_v14 = vld [vmem:[%s959_s1 + $0x7] sm:$0x1] }
   0xf   : > { %v345_v12 = vunpack.c.l.bf16 %v665_v10  ;;  %v380_v13 = vunpack.c.l.bf16 %v670_v11  ;;  %s688_s5 = smul.u32 24, %s975_s12  ;;  %v400_v15 = vunpack.c.l.bf16 %v675_v14  ;;  %v207_v16 = vperm.slane %v206_v2, 0  ;;  %v837_v24 = vld [vmem:[%s959_s1 + $0x8] sm:$0x1]  ;;  %s687_s17 = sshll.u32 %s975_s12, 3 }
  0x10   : > { %v227_v17 = vperm.slane %v226_v3, 0  ;;  %v259_v18 = vperm.slane %v258_v7, 0  ;;  %v819_v19 = vperm.slane %v293_v8, 0  ;;  %v826_v20 = vperm.slane %v313_v9, 0  ;;  %s192_s19 = scalar_lea.vmem %s961_s3, %s687_s17 }
  0x11   : > { %s824_s8 = scalar_lea.vmem %s958_s0, %s688_s5  ;;  %v828_v21 = vperm.slane %v345_v12, 0  ;;  %v830_v22 = vperm.slane %v380_v13, 0  ;;  %v832_v23 = vperm.slane %v400_v15, 0  ;;  %v432_v40 = vunpack.c.l.bf16 %v837_v24 }
  0x12   : > { %v197_v25 = vld [vmem:[%s824_s8] sm:$0x3]  ;;  %v198_v26 = vld [vmem:[%s824_s8 + $0x4] sm:$0x3]  ;;  %v199_v27 = vld [vmem:[%s824_s8 + $0x8] sm:$0x3] }
  0x13   : > { %v200_v28 = vld [vmem:[%s824_s8 + $0xc] sm:$0x3]  ;;  %v202_v29 = vunpack.c.l.bf16 %v197_v25  ;;  %v203_v30 = vunpack.c.l.bf16 %v198_v26  ;;  %v204_v31 = vunpack.c.l.bf16 %v199_v27  ;;  %v216_v32 = vld [vmem:[%s824_s8] sm:$0x7]  ;;  %v217_v33 = vld [vmem:[%s824_s8 + $0x4] sm:$0x7] }
  0x14   : > { %v205_v34 = vunpack.c.l.bf16 %v200_v28  ;;  %v218_v35 = vld [vmem:[%s824_s8 + $0x8] sm:$0x7]  ;;  %v219_v36 = vld [vmem:[%s824_s8 + $0xc] sm:$0x7]  ;;  %v222_v37 = vunpack.c.l.bf16 %v216_v32  ;;  %v223_v38 = vunpack.c.l.bf16 %v217_v33  ;;  %v248_v39 = vld [vmem:[%s824_s8] sm:$0x6] }
  0x15   : > { %v208_v41 = vmul.f32 %v207_v16, %v202_v29  ;;  %v209_v42 = vmul.f32 %v207_v16, %v203_v30  ;;  %v210_v43 = vmul.f32 %v207_v16, %v204_v31  ;;  %v224_v44 = vunpack.c.l.bf16 %v218_v35  ;;  %v249_v45 = vld [vmem:[%s824_s8 + $0x4] sm:$0x6]  ;;  %v250_v46 = vld [vmem:[%s824_s8 + $0x8] sm:$0x6]  ;;  %v251_v47 = vld [vmem:[%s824_s8 + $0xc] sm:$0x6] }
  0x16   : > { %v211_v48 = vmul.f32 %v207_v16, %v205_v34  ;;  %v225_v49 = vunpack.c.l.bf16 %v219_v36  ;;  %v228_v50 = vmul.f32 %v227_v17, %v222_v37  ;;  %v229_v51 = vmul.f32 %v227_v17, %v223_v38  ;;  %v651_v0 = vld [vmem:[%s824_s8 + $0x4] sm:$0x3]  ;;  %v652_v1 = vld [vmem:[%s824_s8 + $0x8] sm:$0x3]  ;;  %v653_v6 = vld [vmem:[%s824_s8 + $0xc] sm:$0x3] }
  0x17   : > { %v230_v52 = vmul.f32 %v227_v17, %v224_v44  ;;  %v254_v53 = vunpack.c.l.bf16 %v248_v39  ;;  %v255_v54 = vunpack.c.l.bf16 %v249_v45  ;;  %v256_v55 = vunpack.c.l.bf16 %v250_v46  ;;  %v654_v7 = vld [vmem:[%s824_s8 + $0x10] sm:$0x3]  ;;  %v656_v12 = vld [vmem:[%s824_s8 + $0x4] sm:$0x7]  ;;  %v658_v25 = vld [vmem:[%s824_s8 + $0xc] sm:$0x7] }
  0x18   : > { %v231_v56 = vmul.f32 %v227_v17, %v225_v49  ;;  %v236_v57 = vrot.slane %v228_v50, 1  ;;  %v237_v58 = vrot.slane %v229_v51, 1  ;;  %v257_v59 = vunpack.c.l.bf16 %v251_v47  ;;  %v657_v17 = vld [vmem:[%s824_s8 + $0x8] sm:$0x7]  ;;  %v659_v29 = vld [vmem:[%s824_s8 + $0x10] sm:$0x7] }
  0x19   : > { %v238_v60 = vrot.slane %v230_v52, 1  ;;  %v260_v61 = vmul.f32 %v259_v18, %v254_v53  ;;  %v261_v62 = vmul.f32 %v259_v18, %v255_v54  ;;  %v262_v63 = vmul.f32 %v259_v18, %v256_v55  ;;  %v661_v38 = vld [vmem:[%s824_s8 + $0x4] sm:$0x6]  ;;  %v662_v39 = vld [vmem:[%s824_s8 + $0x8] sm:$0x6] }
  0x1a   : > { %v239_v2 = vrot.slane %v231_v56, 1  ;;  %v244_v3 = vadd.f32 %v236_v57, %v208_v41  ;;  %v245_v4 = vadd.f32 %v237_v58, %v209_v42  ;;  %v263_v5 = vmul.f32 %v259_v18, %v257_v59  ;;  %v663_v45 = vld [vmem:[%s824_s8 + $0xc] sm:$0x6]  ;;  %v664_v50 = vld [vmem:[%s824_s8 + $0x10] sm:$0x6] }
  0x1b   : > { %v246_v8 = vadd.f32 %v238_v60, %v210_v43  ;;  %v268_v9 = vrot.slane %v260_v61, 2  ;;  %v269_v10 = vrot.slane %v261_v62, 2  ;;  %v270_v11 = vrot.slane %v262_v63, 2  ;;  %v666_v58 = vld [vmem:[%s824_s8 + $0x8] sm:$0x3] }
  0x1c   : > { %v247_v13 = vadd.f32 %v239_v2, %v211_v48  ;;  %v271_v14 = vrot.slane %v263_v5, 2  ;;  %v289_v15 = vunpack.c.l.bf16 %v651_v0  ;;  %v290_v16 = vunpack.c.l.bf16 %v652_v1  ;;  %v667_v63 = vld [vmem:[%s824_s8 + $0xc] sm:$0x3]  ;;  %v668_v0 = vld [vmem:[%s824_s8 + $0x10] sm:$0x3] }
  0x1d   : > { %v276_v26 = vadd.f32 %v268_v9, %v244_v3  ;;  %v277_v27 = vadd.f32 %v269_v10, %v245_v4  ;;  %v278_v28 = vadd.f32 %v270_v11, %v246_v8  ;;  %v291_v18 = vunpack.c.l.bf16 %v653_v6  ;;  %v669_v4 = vld [vmem:[%s824_s8 + $0x14] sm:$0x3] }
  0x1e   : > { %v279_v30 = vadd.f32 %v271_v14, %v247_v13  ;;  %v292_v31 = vunpack.c.l.bf16 %v654_v7  ;;  %v295_v32 = vmul.f32 %v819_v19, %v289_v15  ;;  %v296_v33 = vmul.f32 %v819_v19, %v290_v16  ;;  %v671_v13 = vld [vmem:[%s824_s8 + $0x8] sm:$0x7]  ;;  %v672_v14 = vld [vmem:[%s824_s8 + $0xc] sm:$0x7] }
  0x1f   : > { %v297_v34 = vmul.f32 %v819_v19, %v291_v18  ;;  %v309_v35 = vunpack.c.l.bf16 %v656_v12  ;;  %v310_v36 = vunpack.c.l.bf16 %v657_v17  ;;  %v311_v37 = vunpack.c.l.bf16 %v658_v25 }
  0x20   : > { %v298_v41 = vmul.f32 %v819_v19, %v292_v31  ;;  %v299_v42 = vadd.f32 %v295_v32, %v276_v26  ;;  %v300_v43 = vadd.f32 %v296_v33, %v277_v27  ;;  %v312_v44 = vunpack.c.l.bf16 %v659_v29  ;;  %v673_v26 = vld [vmem:[%s824_s8 + $0x10] sm:$0x7]  ;;  %v674_v29 = vld [vmem:[%s824_s8 + $0x14] sm:$0x7] }
  0x21   : > { %v301_v46 = vadd.f32 %v297_v34, %v278_v28  ;;  %v315_v47 = vmul.f32 %v826_v20, %v309_v35  ;;  %v316_v48 = vmul.f32 %v826_v20, %v310_v36  ;;  %v317_v49 = vmul.f32 %v826_v20, %v311_v37  ;;  %v676_v34 = vld [vmem:[%s824_s8 + $0x8] sm:$0x6]  ;;  %v677_v35 = vld [vmem:[%s824_s8 + $0xc] sm:$0x6]  ;;  %v678_v36 = vld [vmem:[%s824_s8 + $0x10] sm:$0x6] }
  0x22   : > { %v302_v51 = vadd.f32 %v298_v41, %v279_v30  ;;  %v318_v52 = vmul.f32 %v826_v20, %v312_v44  ;;  %v341_v53 = vunpack.c.l.bf16 %v661_v38  ;;  %v342_v19 = vunpack.c.l.bf16 %v662_v39 }
  0x23   : > { %v323_v54 = vrot.slane %v315_v47, 1  ;;  %v324_v55 = vrot.slane %v316_v48, 1  ;;  %v325_v56 = vrot.slane %v317_v49, 1  ;;  %v343_v57 = vunpack.c.l.bf16 %v663_v45 }
  0x24   : > { %v326_v59 = vrot.slane %v318_v52, 1  ;;  %v344_v60 = vunpack.c.l.bf16 %v664_v50  ;;  %v347_v61 = vmul.f32 %v828_v21, %v341_v53  ;;  %v348_v62 = vmul.f32 %v828_v21, %v342_v19 }
  0x25   : > { %v331_v1 = vadd.f32 %v323_v54, %v299_v42  ;;  %v332_v20 = vadd.f32 %v324_v55, %v300_v43  ;;  %v333_v2 = vadd.f32 %v325_v56, %v301_v46  ;;  %v349_v3 = vmul.f32 %v828_v21, %v343_v57  ;;  %v679_v42 = vld [vmem:[%s824_s8 + $0x14] sm:$0x6] }
  0x26   : > { %v334_v5 = vadd.f32 %v326_v59, %v302_v51  ;;  %v350_v6 = vmul.f32 %v828_v21, %v344_v60  ;;  %v355_v7 = vrot.slane %v347_v61, 2  ;;  %v356_v8 = vrot.slane %v348_v62, 2 }
  0x27   : > { %v357_v9 = vrot.slane %v349_v3, 2  ;;  %v376_v10 = vunpack.c.l.bf16 %v666_v58  ;;  %v377_v11 = vunpack.c.l.bf16 %v667_v63  ;;  %v378_v12 = vunpack.c.l.bf16 %v668_v0 }
  0x28   : > { %v358_v15 = vrot.slane %v350_v6, 2  ;;  %v363_v16 = vadd.f32 %v355_v7, %v331_v1  ;;  %v364_v17 = vadd.f32 %v356_v8, %v332_v20  ;;  %v379_v25 = vunpack.c.l.bf16 %v669_v4 }
  0x29   : > { %v365_v27 = vadd.f32 %v357_v9, %v333_v2  ;;  %v382_v21 = vmul.f32 %v830_v22, %v376_v10  ;;  %v383_v28 = vmul.f32 %v830_v22, %v377_v11  ;;  %v384_v18 = vmul.f32 %v830_v22, %v378_v12 }
  0x2a   : > { %v366_v30 = vadd.f32 %v358_v15, %v334_v5  ;;  %v385_v31 = vmul.f32 %v830_v22, %v379_v25  ;;  %v396_v32 = vunpack.c.l.bf16 %v671_v13  ;;  %v397_v33 = vunpack.c.l.bf16 %v672_v14 }
  0x2b   : > { %v386_v37 = vadd.f32 %v382_v21, %v363_v16  ;;  %v387_v38 = vadd.f32 %v383_v28, %v364_v17  ;;  %v388_v39 = vadd.f32 %v384_v18, %v365_v27  ;;  %v398_v41 = vunpack.c.l.bf16 %v673_v26 }
  0x2c   : > { %v389_v43 = vadd.f32 %v385_v31, %v366_v30  ;;  %v399_v44 = vunpack.c.l.bf16 %v674_v29  ;;  %v402_v45 = vmul.f32 %v832_v23, %v396_v32  ;;  %v403_v46 = vmul.f32 %v832_v23, %v397_v33 }
  0x2d   : > { %v404_v47 = vmul.f32 %v832_v23, %v398_v41  ;;  %v428_v48 = vunpack.c.l.bf16 %v676_v34  ;;  %v429_v22 = vunpack.c.l.bf16 %v677_v35  ;;  %v430_v49 = vunpack.c.l.bf16 %v678_v36 }
  0x2e   : > { %v405_v50 = vmul.f32 %v832_v23, %v399_v44  ;;  %v410_v51 = vrot.slane %v402_v45, 1  ;;  %v411_v52 = vrot.slane %v403_v46, 1  ;;  %v431_v53 = vunpack.c.l.bf16 %v679_v42  ;;  %v713_v23 = vld [vmem:[%s960_s2] ss:$0 sm:$0xff] }
  0x2f   : > { %v412_v19 = vrot.slane %v404_v47, 1  ;;  %v433_v54 = vperm.slane %v432_v40, 0 }
  0x30   : > { %v413_v55 = vrot.slane %v405_v50, 1  ;;  %v418_v56 = vadd.f32 %v410_v51, %v386_v37  ;;  %v419_v57 = vadd.f32 %v411_v52, %v387_v38 }
  0x31   : > { %v420_v58 = vadd.f32 %v412_v19, %v388_v39  ;;  %v434_v59 = vmul.f32 %v433_v54, %v428_v48  ;;  %v435_v60 = vmul.f32 %v433_v54, %v429_v22  ;;  %v436_v61 = vmul.f32 %v433_v54, %v430_v49 }
  0x32   : > { %v421_v62 = vadd.f32 %v413_v55, %v389_v43  ;;  %v437_v63 = vmul.f32 %v433_v54, %v431_v53 }
  0x33   : > { %v442_v0 = vrot.slane %v434_v59, 2  ;;  %v443_v1 = vrot.slane %v435_v60, 2  ;;  %v444_v20 = vrot.slane %v436_v61, 2 }
  0x34   : > { %v445_v2 = vrot.slane %v437_v63, 2 }
  0x35   : > { %v450_v3 = vadd.f32 %v442_v0, %v418_v56  ;;  %v451_v24 = vadd.f32 %v443_v1, %v419_v57  ;;  %v452_v40 = vadd.f32 %v444_v20, %v420_v58 }
  0x36   : > { %v453_v4 = vadd.f32 %v445_v2, %v421_v62 }
  0x37   : > { %v901_v5 = vadd.f32 %v713_v23, %v450_v3  ;;  %v903_v6 = vadd.f32 %v713_v23, %v451_v24  ;;  %v905_v7 = vadd.f32 %v713_v23, %v452_v40 }
  0x38   : > { %v907_v8 = vadd.f32 %v713_v23, %v453_v4 }
  0x39   : > { %v681_v9 = vmul.f32 -1.442695, %v901_v5  ;;  %v682_v10 = vmul.f32 -1.442695, %v903_v6  ;;  %v683_v11 = vmul.f32 -1.442695, %v905_v7 }
  0x3a   : > { %v684_v12 = vmul.f32 -1.442695, %v907_v8 }
  0x3b   : > { %714 = vpow2.f32 %v681_v9 }
  0x3c   : > { %716 = vpow2.f32 %v682_v10 }
  0x3d   : > { %718 = vpow2.f32 %v683_v11 }
  0x3e   : > { %720 = vpow2.f32 %v684_v12 }
  0x41   : > { %v715_v13 = vpop.eup %714 }
  0x42   : > { %v717_v14 = vpop.eup %716  ;;  %v474_v15 = vadd.f32 1.0, %v715_v13 }
  0x43   : > { %v719_v16 = vpop.eup %718  ;;  %v475_v17 = vadd.f32 1.0, %v717_v14 }
  0x44   : > { %v721_v25 = vpop.eup %720  ;;  %v476_v26 = vadd.f32 1.0, %v719_v16  ;;  %722 = vrcp.f32 %v474_v15  ;;  %v487_v21 = vand.u32 2147483647, %v474_v15  ;;  %v489_v28 = vand.u32 2147483648, %v474_v15 }
  0x45   : > { %v477_v27 = vadd.f32 1.0, %v721_v25  ;;  %724 = vrcp.f32 %v475_v17  ;;  %v504_v29 = vand.u32 2147483648, %v475_v17  ;;  %vm483_vm0 = vweird.f32 %v474_v15 }
  0x46   : > { %726 = vrcp.f32 %v476_v26  ;;  %vm913_vm1 = vcmp.eq.f32.partialorder %v487_v21, 8.507059e+37  ;;  %vm498_vm2 = vweird.f32 %v475_v17  ;;  %v490_v34 = vor.u32 1.1754944e-38, %v489_v28 }
  0x47   : > { %728 = vrcp.f32 %v477_v27  ;;  %v502_v36 = vand.u32 2147483647, %v475_v17  ;;  %vm513_vm3 = vweird.f32 %v476_v26  ;;  %v517_v39 = vand.u32 2147483647, %v476_v26 }
  0x48   : > { %v505_v43 = vor.u32 1.1754944e-38, %v504_v29  ;;  %v519_v44 = vand.u32 2147483648, %v476_v26  ;;  %vm528_vm8 = vweird.f32 %v477_v27  ;;  %v532_v49 = vand.u32 2147483647, %v477_v27 }
  0x49   : > { %v534_v50 = vand.u32 2147483648, %v477_v27  ;;  %vm503_vm11 = vcmp.eq.f32.partialorder %v502_v36, 8.507059e+37  ;;  %vm518_vm13 = vcmp.eq.f32.partialorder %v517_v39, 8.507059e+37 }
  0x4a   : > { %v723_v18 = vpop.eup %722  ;;  %v520_v56 = vor.u32 1.1754944e-38, %v519_v44  ;;  %vm533_vm15 = vcmp.eq.f32.partialorder %v532_v49, 8.507059e+37 }
  0x4b   : > { %v725_v30 = vpop.eup %724  ;;  %v479_v31 = vmul.f32 %v723_v18, %v474_v15  ;;  %vm484_vm4 = vweird.f32 %v723_v18  ;;  %v535_v62 = vor.u32 1.1754944e-38, %v534_v50 }
  0x4c   : > { %v727_v33 = vpop.eup %726  ;;  %v494_v35 = vmul.f32 %v725_v30, %v475_v17  ;;  %vm499_vm5 = vweird.f32 %v725_v30  ;;  %vm918_vm7 = vmor %vm483_vm0, %vm484_vm4 }
  0x4d   : > { %v480_v37 = vsub.f32 1.0, %v479_v31  ;;  %v509_v38 = vmul.f32 %v727_v33, %v476_v26  ;;  %v729_v41 = vpop.eup %728  ;;  %vm514_vm6 = vweird.f32 %v727_v33  ;;  %vm923_vm9 = vmor %vm498_vm2, %vm499_vm5 }
  0x4e   : > { %v495_v42 = vsub.f32 1.0, %v494_v35  ;;  %v524_v47 = vmul.f32 %v729_v41, %v477_v27  ;;  %vm529_vm10 = vweird.f32 %v729_v41  ;;  %vm928_vm12 = vmor %vm513_vm3, %vm514_vm6 }
  0x4f   : > { %v481_v45 = vmul.f32 %v723_v18, %v480_v37  ;;  %v510_v46 = vsub.f32 1.0, %v509_v38  ;;  %vm530_vm14 = vmor %vm528_vm8, %vm529_vm10 }
  0x50   : > { %v496_v22 = vmul.f32 %v725_v30, %v495_v42  ;;  %v525_v19 = vsub.f32 1.0, %v524_v47 }
  0x51   : > { %v482_v51 = vadd.f32 %v723_v18, %v481_v45  ;;  %v511_v53 = vmul.f32 %v727_v33, %v510_v46 }
  0x52   : > { %v497_v54 = vadd.f32 %v725_v30, %v496_v22  ;;  %v526_v59 = vmul.f32 %v729_v41, %v525_v19 }
  0x53   : > { %v486_v57 = vsel %vm918_vm7, %v723_v18, %v482_v51  ;;  %v512_v58 = vadd.f32 %v727_v33, %v511_v53 }
  0x54   : > { %v491_v60 = vsel %vm913_vm1, %v490_v34, %v486_v57  ;;  %v501_v61 = vsel %vm923_vm9, %v725_v30, %v497_v54  ;;  %v527_v1 = vadd.f32 %v729_v41, %v526_v59 }
  0x55   : > { %v506_v63 = vsel %vm503_vm11, %v505_v43, %v501_v61  ;;  %v516_v0 = vsel %vm928_vm12, %v727_v33, %v512_v58  ;;  %v538_v20 = vmul.f32 %v491_v60, %v901_v5 }
  0x56   : > { %v521_v23 = vsel %vm518_vm13, %v520_v56, %v516_v0  ;;  %v539_v2 = vmul.f32 %v506_v63, %v903_v6  ;;  %v531_v3 = vsel %vm530_vm14, %v729_v41, %v527_v1 }
  0x57   : > { %v540_v24 = vmul.f32 %v521_v23, %v905_v7  ;;  %v542_v40 = vpack.c.bf16 %v538_v20, %v538_v20  ;;  %v536_v4 = vsel %vm533_vm15, %v535_v62, %v531_v3 }
  0x58   : > { %v543_v9 = vpack.c.bf16 %v539_v2, %v539_v2  ;;  %v541_v10 = vmul.f32 %v536_v4, %v907_v8 }
  0x59   : > { %v544_v11 = vpack.c.bf16 %v540_v24, %v540_v24  ;;  %546 = vst [vmem:[%s192_s19] sm:$0x3] %v542_v40 }
  0x5a   : > { %547 = vst [vmem:[%s192_s19 + $0x2] sm:$0x3] %v543_v9  ;;  %v545_v12 = vpack.c.bf16 %v541_v10, %v541_v10 }
  0x5b   : > { %548 = vst [vmem:[%s192_s19 + $0x4] sm:$0x3] %v544_v11 }
  0x5c   : > { %549 = vst [vmem:[%s192_s19 + $0x6] sm:$0x3] %v545_v12 }
  0x5d PF: > { %s13_s14 = sadd.s32 1, %s752_s14   ;;  %s970_s12 = smov %s748_s13 }
  0x5e   : > { %p10_p5 = scmp.ge.s32.totalorder %s13_s14, 4   ;;  %s971_s13 = smov %s973_s15 }
  0x60   :  { %12 = sbr.rel (!%p10_p5) target bundleno = 2 (0x2), region = 73 }

</bundles_post_ra>
